<compile_context>
chip_gen: v7x
topology: tpu7x:2x2x1
jax: 0.10.0
libtpu: 0.0.40
codegen_flags: <defaults>
</compile_context>

<pallas_src>
import jax
import jax.numpy as jnp
from jax import lax
from jax.experimental import pallas as pl
from jax.experimental.pallas import tpu as pltpu


# ----------------------------- Pallas kernel --------------------------------

def _shift_cols(v, d):
    """Static left-rotate along the last axis: out[..., m] = v[..., m + d] (wrapped)."""
    if d == 0:
        return v
    return jnp.concatenate([v[..., d:], v[..., :d]], axis=-1)


def _fused_net_kernel(alpha_ref,                       # SMEM (1, 1)  mixedPool alpha
                      x_ref,                           # (1, 1, 784)  one sample, flat 28x28
                      w1_ref, b1_ref,                  # (10, 25) f32, (10, 1) f32
                      wm_ref,                          # (4, 10, 10) bf16  gate conv, per 2x2 tap
                      w2_ref, b2_ref,                  # (25, 20, 10) bf16 per 5x5 tap, (20, 1) f32
                      fc1w_ref, fc1b_ref,              # (320, 50) bf16, (1, 50) f32
                      fc2w_ref, fc2b_ref,              # (50, 10) bf16, (1, 10) f32
                      out_ref):                        # (1, 1, 10)
    f32 = jnp.float32
    bf16 = jnp.bfloat16

    # ---- conv1: 1 -> 10 channels, 5x5, stride 1 (shifted multiply-accumulate) ----
    x = x_ref[0]                                       # (1, 784) f32
    w1 = w1_ref[...]                                   # (10, 25) f32
    acc1 = jnp.zeros((10, 28 * 28), f32)
    for i in range(5):
        for j in range(5):
            k = i * 5 + j
            acc1 = acc1 + w1[:, k:k + 1] * _shift_cols(x, 28 * i + j)
    # drop the right/bottom apron: flat 28x28 grid -> dense flat 24x24 grid
    c1 = jnp.concatenate([acc1[:, r * 28:r * 28 + 24] for r in range(24)], axis=-1)
    c1 = c1 + b1_ref[...]                              # (10, 576), fully valid

    # ---- gatedPool_c: sigmoid(2x2/stride-2 conv) gates max/avg 2x2 pool, then ReLU ----
    t00 = c1
    t01 = _shift_cols(c1, 1)
    t10 = _shift_cols(c1, 24)
    t11 = _shift_cols(c1, 25)
    mx = jnp.maximum(jnp.maximum(t00, t01), jnp.maximum(t10, t11))
    av = (t00 + t01 + t10 + t11) * 0.25
    gate = jnp.dot(wm_ref[0], t00.astype(bf16), preferred_element_type=f32)
    gate = gate + jnp.dot(wm_ref[1], t01.astype(bf16), preferred_element_type=f32)
    gate = gate + jnp.dot(wm_ref[2], t10.astype(bf16), preferred_element_type=f32)
    gate = gate + jnp.dot(wm_ref[3], t11.astype(bf16), preferred_element_type=f32)
    a1 = jax.nn.sigmoid(gate)
    x1 = jnp.maximum(a1 * mx + (1.0 - a1) * av, 0.0)   # (10, 576); valid cols = 48*y + 2*x

    # ---- conv2: 10 -> 20 channels, 5x5, stride 1 (25 shifted bf16 matmuls) ----
    x1b = x1.astype(bf16)
    acc2 = jnp.zeros((20, 576), f32)
    for i in range(5):
        for j in range(5):
            tap = _shift_cols(x1b, 48 * i + 2 * j)     # (10, 576)
            acc2 = acc2 + jnp.dot(w2_ref[i * 5 + j], tap, preferred_element_type=f32)
    c2 = acc2 + b2_ref[...]                            # (20, 576); valid cols = 48*yo + 2*xo
    # TODO(synk): nn.Dropout2d after conv2 is identity in eval mode; training-mode
    # stochastic channel dropout is not implemented.

    # ---- mixedPool (learnable scalar alpha) + ReLU ----
    am = alpha_ref[0, 0]
    u00 = c2
    u01 = _shift_cols(c2, 2)
    u10 = _shift_cols(c2, 48)
    u11 = _shift_cols(c2, 50)
    mx2 = jnp.maximum(jnp.maximum(u00, u01), jnp.maximum(u10, u11))
    av2 = (u00 + u01 + u10 + u11) * 0.25
    p2 = jnp.maximum(am * mx2 + (1.0 - am) * av2, 0.0)  # (20, 576); valid cols = 96*y3 + 4*x3

    # ---- gather the 4x4 valid grid and flatten to (1, 320) in (c, y3, x3) order ----
    x2 = jnp.concatenate(
        [p2[:, (96 * y3 + 4 * x3):(96 * y3 + 4 * x3 + 1)]
         for y3 in range(4) for x3 in range(4)],
        axis=-1)                                       # (20, 16)
    flat = jnp.concatenate([x2[c:c + 1, :] for c in range(20)], axis=-1)   # (1, 320)

    # ---- fc1 + ReLU, fc2 + log_softmax ----
    h = jnp.dot(flat.astype(bf16), fc1w_ref[...], preferred_element_type=f32) + fc1b_ref[...]
    h = jnp.maximum(h, 0.0)                            # (1, 50)
    # TODO(synk): F.dropout after fc1 is identity in eval mode (training mode not implemented).
    logits = jnp.dot(h.astype(bf16), fc2w_ref[...], preferred_element_type=f32) + fc2b_ref[...]
    m = jnp.max(logits, axis=-1, keepdims=True)
    lse = m + jnp.log(jnp.sum(jnp.exp(logits - m), axis=-1, keepdims=True))
    out_ref[0] = (logits - lse).astype(out_ref.dtype)


# ------------------------------ wrapper --------------------------------------

def net_forward(params, x):
    """x: (B, 1, 28, 28) NCHW float32 -> (B, 10) log-probabilities."""
    B = x.shape[0]
    xf = x.astype(jnp.float32).reshape(B, 1, 28 * 28)                  # flat per-sample grid

    w1m = params["conv1_w"].reshape(10, 25)                            # (o, i*5+j)
    b1 = params["conv1_b"].reshape(10, 1)
    wmm = params["mask_w"].transpose(2, 3, 0, 1).reshape(4, 10, 10).astype(jnp.bfloat16)
    w2m = params["conv2_w"].transpose(2, 3, 0, 1).reshape(25, 20, 10).astype(jnp.bfloat16)
    b2 = params["conv2_b"].reshape(20, 1)
    fc1wt = params["fc1_w"].T.astype(jnp.bfloat16)                     # (320, 50)
    fc1b = params["fc1_b"].reshape(1, 50)
    fc2wt = params["fc2_w"].T.astype(jnp.bfloat16)                     # (50, 10)
    fc2b = params["fc2_b"].reshape(1, 10)
    alpha = params["mix_alpha"].reshape(1, 1).astype(jnp.float32)

    out = pl.pallas_call(
        _fused_net_kernel,
        grid=(B,),
        out_shape=jax.ShapeDtypeStruct((B, 1, 10), jnp.float32),
        in_specs=[
            pl.BlockSpec(memory_space=pltpu.MemorySpace.SMEM),          # mix_alpha scalar
            pl.BlockSpec((1, 1, 784), lambda b: (b, 0, 0)),             # x (per sample)
            pl.BlockSpec((10, 25), lambda b: (0, 0)),                   # conv1 weight
            pl.BlockSpec((10, 1), lambda b: (0, 0)),                    # conv1 bias
            pl.BlockSpec((4, 10, 10), lambda b: (0, 0, 0)),             # gate-conv weight
            pl.BlockSpec((25, 20, 10), lambda b: (0, 0, 0)),            # conv2 weight
            pl.BlockSpec((20, 1), lambda b: (0, 0)),                    # conv2 bias
            pl.BlockSpec((320, 50), lambda b: (0, 0)),                  # fc1 weight^T
            pl.BlockSpec((1, 50), lambda b: (0, 0)),                    # fc1 bias
            pl.BlockSpec((50, 10), lambda b: (0, 0)),                   # fc2 weight^T
            pl.BlockSpec((1, 10), lambda b: (0, 0)),                    # fc2 bias
        ],
        out_specs=pl.BlockSpec((1, 1, 10), lambda b: (b, 0, 0)),
        compiler_params=pltpu.CompilerParams(
            # batch elements are independent -> shard across v7x's 2 TensorCores;
            # harmless on single-core v5e/v6e.  (Footprint is tiny, no vmem_limit needed.)
            dimension_semantics=("parallel",),
        ),
    )(alpha, xf, w1m, b1, wmm, w2m, b2, fc1wt, fc1b, fc2wt, fc2b)
    return out.reshape(B, 10)


# ------------------------- pure-JAX reference --------------------------------

def ref_forward(params, x):
    dn = ("NCHW", "OIHW", "NCHW")
    c1 = lax.conv_general_dilated(x, params["conv1_w"], (1, 1), "VALID", dimension_numbers=dn)
    c1 = c1 + params["conv1_b"].reshape(1, -1, 1, 1)
    gate = lax.conv_general_dilated(c1, params["mask_w"], (2, 2), "VALID", dimension_numbers=dn)
    a1 = jax.nn.sigmoid(gate)
    mx = lax.reduce_window(c1, -jnp.inf, lax.max, (1, 1, 2, 2), (1, 1, 2, 2), "VALID")
    av = lax.reduce_window(c1, 0.0, lax.add, (1, 1, 2, 2), (1, 1, 2, 2), "VALID") * 0.25
    x1 = jax.nn.relu(a1 * mx + (1.0 - a1) * av)
    c2 = lax.conv_general_dilated(x1, params["conv2_w"], (1, 1), "VALID", dimension_numbers=dn)
    c2 = c2 + params["conv2_b"].reshape(1, -1, 1, 1)
    am = params["mix_alpha"].reshape(())
    mx2 = lax.reduce_window(c2, -jnp.inf, lax.max, (1, 1, 2, 2), (1, 1, 2, 2), "VALID")
    av2 = lax.reduce_window(c2, 0.0, lax.add, (1, 1, 2, 2), (1, 1, 2, 2), "VALID") * 0.25
    x2 = jax.nn.relu(am * mx2 + (1.0 - am) * av2)
    flat = x2.reshape(x.shape[0], 320)
    h = jax.nn.relu(flat @ params["fc1_w"].T + params["fc1_b"])
    logits = h @ params["fc2_w"].T + params["fc2_b"]
    return jax.nn.log_softmax(logits, axis=-1)


# ------------------------------ params ---------------------------------------

def init_params(key):
    ks = jax.random.split(key, 8)
    s = 0.1
    return {
        "conv1_w": s * jax.random.normal(ks[0], (10, 1, 5, 5), jnp.float32),
        "conv1_b": s * jax.random.normal(ks[1], (10,), jnp.float32),
        "mask_w":  s * jax.random.normal(ks[2], (10, 10, 2, 2), jnp.float32),
        "conv2_w": s * jax.random.normal(ks[3], (20, 10, 5, 5), jnp.float32),
        "conv2_b": s * jax.random.normal(ks[4], (20,), jnp.float32),
        "mix_alpha": jnp.array([[0.5]], jnp.float32),
        "fc1_w": s * jax.random.normal(ks[5], (50, 320), jnp.float32),
        "fc1_b": s * jax.random.normal(ks[6], (50,), jnp.float32),
        "fc2_w": s * jax.random.normal(ks[7], (10, 50), jnp.float32),
        "fc2_b": jnp.zeros((10,), jnp.float32),
    }


if __name__ == "__main__":
    key = jax.random.PRNGKey(0)
    kp, kx = jax.random.split(key)
    params = init_params(kp)
    # MNIST-shaped input (28x28 is required so that the final flatten yields 320).
    x = jax.random.normal(kx, (2, 1, 28, 28), jnp.float32)

    fwd = jax.jit(net_forward)
    out = jax.block_until_ready(fwd(params, x))

    assert out.shape == (2, 10), out.shape
    # log-softmax rows must sum (in probability space) to ~1
    assert bool(jnp.all(jnp.abs(jnp.sum(jnp.exp(out), axis=-1) - 1.0) < 1e-4))
    # cross-check against a pure-XLA reference of the same forward pass
    # (tolerance covers the bfloat16 MXU operands used inside the kernel).
    ref = jax.block_until_ready(jax.jit(ref_forward)(params, x))
    max_err = float(jnp.max(jnp.abs(out - ref)))
    assert max_err < 0.15, f"max |pallas - ref| = {max_err}"
    print("KERNEL_OK")
</pallas_src>

<mosaic_0001>
module attributes {stable_mosaic.version = 11 : i64} {
  func.func @_fused_net_kernel(%arg0: i32, %arg1: memref<1x1xf32, #tpu.memory_space<smem>>, %arg2: memref<1x1x784xf32, #tpu.memory_space<vmem>>, %arg3: memref<10x25xf32, #tpu.memory_space<vmem>>, %arg4: memref<10x1xf32, #tpu.memory_space<vmem>>, %arg5: memref<4x10x10xbf16, #tpu.memory_space<vmem>>, %arg6: memref<25x20x10xbf16, #tpu.memory_space<vmem>>, %arg7: memref<20x1xf32, #tpu.memory_space<vmem>>, %arg8: memref<320x50xbf16, #tpu.memory_space<vmem>>, %arg9: memref<1x50xf32, #tpu.memory_space<vmem>>, %arg10: memref<50x10xbf16, #tpu.memory_space<vmem>>, %arg11: memref<1x10xf32, #tpu.memory_space<vmem>>, %arg12: memref<1x1x10xf32, #tpu.memory_space<vmem>>) attributes {dimension_semantics = [#tpu.dimension_semantics<parallel>], iteration_bounds = array<i64: 2>, scalar_prefetch = 0 : i64, scratch_operands = 0 : i64, tpu.core_type = #tpu.core_type<tc>, window_params = [{transform_indices = @transform_0, window_bounds = array<i64: 1, 1>}, {transform_indices = @transform_1, window_bounds = array<i64: 1, 1, 784>}, {pipeline_mode = #tpu.pipeline_mode<synchronous>, transform_indices = @transform_2, window_bounds = array<i64: 10, 25>}, {pipeline_mode = #tpu.pipeline_mode<synchronous>, transform_indices = @transform_3, window_bounds = array<i64: 10, 1>}, {pipeline_mode = #tpu.pipeline_mode<synchronous>, transform_indices = @transform_4, window_bounds = array<i64: 4, 10, 10>}, {pipeline_mode = #tpu.pipeline_mode<synchronous>, transform_indices = @transform_5, window_bounds = array<i64: 25, 20, 10>}, {pipeline_mode = #tpu.pipeline_mode<synchronous>, transform_indices = @transform_6, window_bounds = array<i64: 20, 1>}, {pipeline_mode = #tpu.pipeline_mode<synchronous>, transform_indices = @transform_7, window_bounds = array<i64: 320, 50>}, {pipeline_mode = #tpu.pipeline_mode<synchronous>, transform_indices = @transform_8, window_bounds = array<i64: 1, 50>}, {pipeline_mode = #tpu.pipeline_mode<synchronous>, transform_indices = @transform_9, window_bounds = array<i64: 50, 10>}, {pipeline_mode = #tpu.pipeline_mode<synchronous>, transform_indices = @transform_10, window_bounds = array<i64: 1, 10>}, {transform_indices = @transform_11, window_bounds = array<i64: 1, 1, 10>}]} {
    %c0 = arith.constant 0 : index
    %c0_0 = arith.constant 0 : index
    %c0_1 = arith.constant 0 : index
    %0 = vector.load %arg2[%c0, %c0_0, %c0_1] : memref<1x1x784xf32, #tpu.memory_space<vmem>>, vector<1x1x784xf32>
    %1 = vector.shape_cast %0 : vector<1x1x784xf32> to vector<1x784xf32>
    %c0_2 = arith.constant 0 : index
    %c0_3 = arith.constant 0 : index
    %2 = vector.load %arg3[%c0_2, %c0_3] : memref<10x25xf32, #tpu.memory_space<vmem>>, vector<10x25xf32>
    %cst = arith.constant 0.000000e+00 : f32
    %3 = vector.broadcast %cst : f32 to vector<10x784xf32>
    %4 = vector.extract_strided_slice %2 {offsets = [0, 0], sizes = [10, 1], strides = [1, 1]} : vector<10x25xf32> to vector<10x1xf32>
    %5 = vector.broadcast %4 : vector<10x1xf32> to vector<10x784xf32>
    %6 = vector.broadcast %1 : vector<1x784xf32> to vector<10x784xf32>
    %7 = arith.mulf %5, %6 : vector<10x784xf32>
    %8 = arith.addf %3, %7 : vector<10x784xf32>
    %9 = vector.extract_strided_slice %2 {offsets = [0, 1], sizes = [10, 1], strides = [1, 1]} : vector<10x25xf32> to vector<10x1xf32>
    %10 = vector.extract_strided_slice %1 {offsets = [0, 1], sizes = [1, 783], strides = [1, 1]} : vector<1x784xf32> to vector<1x783xf32>
    %11 = vector.extract_strided_slice %1 {offsets = [0, 0], sizes = [1, 1], strides = [1, 1]} : vector<1x784xf32> to vector<1x1xf32>
    %12 = tpu.concatenate %10, %11 in 1 : vector<1x783xf32>, vector<1x1xf32> -> vector<1x784xf32>
    %13 = vector.broadcast %9 : vector<10x1xf32> to vector<10x784xf32>
    %14 = vector.broadcast %12 : vector<1x784xf32> to vector<10x784xf32>
    %15 = arith.mulf %13, %14 : vector<10x784xf32>
    %16 = arith.addf %8, %15 : vector<10x784xf32>
    %17 = vector.extract_strided_slice %2 {offsets = [0, 2], sizes = [10, 1], strides = [1, 1]} : vector<10x25xf32> to vector<10x1xf32>
    %18 = vector.extract_strided_slice %1 {offsets = [0, 2], sizes = [1, 782], strides = [1, 1]} : vector<1x784xf32> to vector<1x782xf32>
    %19 = vector.extract_strided_slice %1 {offsets = [0, 0], sizes = [1, 2], strides = [1, 1]} : vector<1x784xf32> to vector<1x2xf32>
    %20 = tpu.concatenate %18, %19 in 1 : vector<1x782xf32>, vector<1x2xf32> -> vector<1x784xf32>
    %21 = vector.broadcast %17 : vector<10x1xf32> to vector<10x784xf32>
    %22 = vector.broadcast %20 : vector<1x784xf32> to vector<10x784xf32>
    %23 = arith.mulf %21, %22 : vector<10x784xf32>
    %24 = arith.addf %16, %23 : vector<10x784xf32>
    %25 = vector.extract_strided_slice %2 {offsets = [0, 3], sizes = [10, 1], strides = [1, 1]} : vector<10x25xf32> to vector<10x1xf32>
    %26 = vector.extract_strided_slice %1 {offsets = [0, 3], sizes = [1, 781], strides = [1, 1]} : vector<1x784xf32> to vector<1x781xf32>
    %27 = vector.extract_strided_slice %1 {offsets = [0, 0], sizes = [1, 3], strides = [1, 1]} : vector<1x784xf32> to vector<1x3xf32>
    %28 = tpu.concatenate %26, %27 in 1 : vector<1x781xf32>, vector<1x3xf32> -> vector<1x784xf32>
    %29 = vector.broadcast %25 : vector<10x1xf32> to vector<10x784xf32>
    %30 = vector.broadcast %28 : vector<1x784xf32> to vector<10x784xf32>
    %31 = arith.mulf %29, %30 : vector<10x784xf32>
    %32 = arith.addf %24, %31 : vector<10x784xf32>
    %33 = vector.extract_strided_slice %2 {offsets = [0, 4], sizes = [10, 1], strides = [1, 1]} : vector<10x25xf32> to vector<10x1xf32>
    %34 = vector.extract_strided_slice %1 {offsets = [0, 4], sizes = [1, 780], strides = [1, 1]} : vector<1x784xf32> to vector<1x780xf32>
    %35 = vector.extract_strided_slice %1 {offsets = [0, 0], sizes = [1, 4], strides = [1, 1]} : vector<1x784xf32> to vector<1x4xf32>
    %36 = tpu.concatenate %34, %35 in 1 : vector<1x780xf32>, vector<1x4xf32> -> vector<1x784xf32>
    %37 = vector.broadcast %33 : vector<10x1xf32> to vector<10x784xf32>
    %38 = vector.broadcast %36 : vector<1x784xf32> to vector<10x784xf32>
    %39 = arith.mulf %37, %38 : vector<10x784xf32>
    %40 = arith.addf %32, %39 : vector<10x784xf32>
    %41 = vector.extract_strided_slice %2 {offsets = [0, 5], sizes = [10, 1], strides = [1, 1]} : vector<10x25xf32> to vector<10x1xf32>
    %42 = vector.extract_strided_slice %1 {offsets = [0, 28], sizes = [1, 756], strides = [1, 1]} : vector<1x784xf32> to vector<1x756xf32>
    %43 = vector.extract_strided_slice %1 {offsets = [0, 0], sizes = [1, 28], strides = [1, 1]} : vector<1x784xf32> to vector<1x28xf32>
    %44 = tpu.concatenate %42, %43 in 1 : vector<1x756xf32>, vector<1x28xf32> -> vector<1x784xf32>
    %45 = vector.broadcast %41 : vector<10x1xf32> to vector<10x784xf32>
    %46 = vector.broadcast %44 : vector<1x784xf32> to vector<10x784xf32>
    %47 = arith.mulf %45, %46 : vector<10x784xf32>
    %48 = arith.addf %40, %47 : vector<10x784xf32>
    %49 = vector.extract_strided_slice %2 {offsets = [0, 6], sizes = [10, 1], strides = [1, 1]} : vector<10x25xf32> to vector<10x1xf32>
    %50 = vector.extract_strided_slice %1 {offsets = [0, 29], sizes = [1, 755], strides = [1, 1]} : vector<1x784xf32> to vector<1x755xf32>
    %51 = vector.extract_strided_slice %1 {offsets = [0, 0], sizes = [1, 29], strides = [1, 1]} : vector<1x784xf32> to vector<1x29xf32>
    %52 = tpu.concatenate %50, %51 in 1 : vector<1x755xf32>, vector<1x29xf32> -> vector<1x784xf32>
    %53 = vector.broadcast %49 : vector<10x1xf32> to vector<10x784xf32>
    %54 = vector.broadcast %52 : vector<1x784xf32> to vector<10x784xf32>
    %55 = arith.mulf %53, %54 : vector<10x784xf32>
    %56 = arith.addf %48, %55 : vector<10x784xf32>
    %57 = vector.extract_strided_slice %2 {offsets = [0, 7], sizes = [10, 1], strides = [1, 1]} : vector<10x25xf32> to vector<10x1xf32>
    %58 = vector.extract_strided_slice %1 {offsets = [0, 30], sizes = [1, 754], strides = [1, 1]} : vector<1x784xf32> to vector<1x754xf32>
    %59 = vector.extract_strided_slice %1 {offsets = [0, 0], sizes = [1, 30], strides = [1, 1]} : vector<1x784xf32> to vector<1x30xf32>
    %60 = tpu.concatenate %58, %59 in 1 : vector<1x754xf32>, vector<1x30xf32> -> vector<1x784xf32>
    %61 = vector.broadcast %57 : vector<10x1xf32> to vector<10x784xf32>
    %62 = vector.broadcast %60 : vector<1x784xf32> to vector<10x784xf32>
    %63 = arith.mulf %61, %62 : vector<10x784xf32>
    %64 = arith.addf %56, %63 : vector<10x784xf32>
    %65 = vector.extract_strided_slice %2 {offsets = [0, 8], sizes = [10, 1], strides = [1, 1]} : vector<10x25xf32> to vector<10x1xf32>
    %66 = vector.extract_strided_slice %1 {offsets = [0, 31], sizes = [1, 753], strides = [1, 1]} : vector<1x784xf32> to vector<1x753xf32>
    %67 = vector.extract_strided_slice %1 {offsets = [0, 0], sizes = [1, 31], strides = [1, 1]} : vector<1x784xf32> to vector<1x31xf32>
    %68 = tpu.concatenate %66, %67 in 1 : vector<1x753xf32>, vector<1x31xf32> -> vector<1x784xf32>
    %69 = vector.broadcast %65 : vector<10x1xf32> to vector<10x784xf32>
    %70 = vector.broadcast %68 : vector<1x784xf32> to vector<10x784xf32>
    %71 = arith.mulf %69, %70 : vector<10x784xf32>
    %72 = arith.addf %64, %71 : vector<10x784xf32>
    %73 = vector.extract_strided_slice %2 {offsets = [0, 9], sizes = [10, 1], strides = [1, 1]} : vector<10x25xf32> to vector<10x1xf32>
    %74 = vector.extract_strided_slice %1 {offsets = [0, 32], sizes = [1, 752], strides = [1, 1]} : vector<1x784xf32> to vector<1x752xf32>
    %75 = vector.extract_strided_slice %1 {offsets = [0, 0], sizes = [1, 32], strides = [1, 1]} : vector<1x784xf32> to vector<1x32xf32>
    %76 = tpu.concatenate %74, %75 in 1 : vector<1x752xf32>, vector<1x32xf32> -> vector<1x784xf32>
    %77 = vector.broadcast %73 : vector<10x1xf32> to vector<10x784xf32>
    %78 = vector.broadcast %76 : vector<1x784xf32> to vector<10x784xf32>
    %79 = arith.mulf %77, %78 : vector<10x784xf32>
    %80 = arith.addf %72, %79 : vector<10x784xf32>
    %81 = vector.extract_strided_slice %2 {offsets = [0, 10], sizes = [10, 1], strides = [1, 1]} : vector<10x25xf32> to vector<10x1xf32>
    %82 = vector.extract_strided_slice %1 {offsets = [0, 56], sizes = [1, 728], strides = [1, 1]} : vector<1x784xf32> to vector<1x728xf32>
    %83 = vector.extract_strided_slice %1 {offsets = [0, 0], sizes = [1, 56], strides = [1, 1]} : vector<1x784xf32> to vector<1x56xf32>
    %84 = tpu.concatenate %82, %83 in 1 : vector<1x728xf32>, vector<1x56xf32> -> vector<1x784xf32>
    %85 = vector.broadcast %81 : vector<10x1xf32> to vector<10x784xf32>
    %86 = vector.broadcast %84 : vector<1x784xf32> to vector<10x784xf32>
    %87 = arith.mulf %85, %86 : vector<10x784xf32>
    %88 = arith.addf %80, %87 : vector<10x784xf32>
    %89 = vector.extract_strided_slice %2 {offsets = [0, 11], sizes = [10, 1], strides = [1, 1]} : vector<10x25xf32> to vector<10x1xf32>
    %90 = vector.extract_strided_slice %1 {offsets = [0, 57], sizes = [1, 727], strides = [1, 1]} : vector<1x784xf32> to vector<1x727xf32>
    %91 = vector.extract_strided_slice %1 {offsets = [0, 0], sizes = [1, 57], strides = [1, 1]} : vector<1x784xf32> to vector<1x57xf32>
    %92 = tpu.concatenate %90, %91 in 1 : vector<1x727xf32>, vector<1x57xf32> -> vector<1x784xf32>
    %93 = vector.broadcast %89 : vector<10x1xf32> to vector<10x784xf32>
    %94 = vector.broadcast %92 : vector<1x784xf32> to vector<10x784xf32>
    %95 = arith.mulf %93, %94 : vector<10x784xf32>
    %96 = arith.addf %88, %95 : vector<10x784xf32>
    %97 = vector.extract_strided_slice %2 {offsets = [0, 12], sizes = [10, 1], strides = [1, 1]} : vector<10x25xf32> to vector<10x1xf32>
    %98 = vector.extract_strided_slice %1 {offsets = [0, 58], sizes = [1, 726], strides = [1, 1]} : vector<1x784xf32> to vector<1x726xf32>
    %99 = vector.extract_strided_slice %1 {offsets = [0, 0], sizes = [1, 58], strides = [1, 1]} : vector<1x784xf32> to vector<1x58xf32>
    %100 = tpu.concatenate %98, %99 in 1 : vector<1x726xf32>, vector<1x58xf32> -> vector<1x784xf32>
    %101 = vector.broadcast %97 : vector<10x1xf32> to vector<10x784xf32>
    %102 = vector.broadcast %100 : vector<1x784xf32> to vector<10x784xf32>
    %103 = arith.mulf %101, %102 : vector<10x784xf32>
    %104 = arith.addf %96, %103 : vector<10x784xf32>
    %105 = vector.extract_strided_slice %2 {offsets = [0, 13], sizes = [10, 1], strides = [1, 1]} : vector<10x25xf32> to vector<10x1xf32>
    %106 = vector.extract_strided_slice %1 {offsets = [0, 59], sizes = [1, 725], strides = [1, 1]} : vector<1x784xf32> to vector<1x725xf32>
    %107 = vector.extract_strided_slice %1 {offsets = [0, 0], sizes = [1, 59], strides = [1, 1]} : vector<1x784xf32> to vector<1x59xf32>
    %108 = tpu.concatenate %106, %107 in 1 : vector<1x725xf32>, vector<1x59xf32> -> vector<1x784xf32>
    %109 = vector.broadcast %105 : vector<10x1xf32> to vector<10x784xf32>
    %110 = vector.broadcast %108 : vector<1x784xf32> to vector<10x784xf32>
    %111 = arith.mulf %109, %110 : vector<10x784xf32>
    %112 = arith.addf %104, %111 : vector<10x784xf32>
    %113 = vector.extract_strided_slice %2 {offsets = [0, 14], sizes = [10, 1], strides = [1, 1]} : vector<10x25xf32> to vector<10x1xf32>
    %114 = vector.extract_strided_slice %1 {offsets = [0, 60], sizes = [1, 724], strides = [1, 1]} : vector<1x784xf32> to vector<1x724xf32>
    %115 = vector.extract_strided_slice %1 {offsets = [0, 0], sizes = [1, 60], strides = [1, 1]} : vector<1x784xf32> to vector<1x60xf32>
    %116 = tpu.concatenate %114, %115 in 1 : vector<1x724xf32>, vector<1x60xf32> -> vector<1x784xf32>
    %117 = vector.broadcast %113 : vector<10x1xf32> to vector<10x784xf32>
    %118 = vector.broadcast %116 : vector<1x784xf32> to vector<10x784xf32>
    %119 = arith.mulf %117, %118 : vector<10x784xf32>
    %120 = arith.addf %112, %119 : vector<10x784xf32>
    %121 = vector.extract_strided_slice %2 {offsets = [0, 15], sizes = [10, 1], strides = [1, 1]} : vector<10x25xf32> to vector<10x1xf32>
    %122 = vector.extract_strided_slice %1 {offsets = [0, 84], sizes = [1, 700], strides = [1, 1]} : vector<1x784xf32> to vector<1x700xf32>
    %123 = vector.extract_strided_slice %1 {offsets = [0, 0], sizes = [1, 84], strides = [1, 1]} : vector<1x784xf32> to vector<1x84xf32>
    %124 = tpu.concatenate %122, %123 in 1 : vector<1x700xf32>, vector<1x84xf32> -> vector<1x784xf32>
    %125 = vector.broadcast %121 : vector<10x1xf32> to vector<10x784xf32>
    %126 = vector.broadcast %124 : vector<1x784xf32> to vector<10x784xf32>
    %127 = arith.mulf %125, %126 : vector<10x784xf32>
    %128 = arith.addf %120, %127 : vector<10x784xf32>
    %129 = vector.extract_strided_slice %2 {offsets = [0, 16], sizes = [10, 1], strides = [1, 1]} : vector<10x25xf32> to vector<10x1xf32>
    %130 = vector.extract_strided_slice %1 {offsets = [0, 85], sizes = [1, 699], strides = [1, 1]} : vector<1x784xf32> to vector<1x699xf32>
    %131 = vector.extract_strided_slice %1 {offsets = [0, 0], sizes = [1, 85], strides = [1, 1]} : vector<1x784xf32> to vector<1x85xf32>
    %132 = tpu.concatenate %130, %131 in 1 : vector<1x699xf32>, vector<1x85xf32> -> vector<1x784xf32>
    %133 = vector.broadcast %129 : vector<10x1xf32> to vector<10x784xf32>
    %134 = vector.broadcast %132 : vector<1x784xf32> to vector<10x784xf32>
    %135 = arith.mulf %133, %134 : vector<10x784xf32>
    %136 = arith.addf %128, %135 : vector<10x784xf32>
    %137 = vector.extract_strided_slice %2 {offsets = [0, 17], sizes = [10, 1], strides = [1, 1]} : vector<10x25xf32> to vector<10x1xf32>
    %138 = vector.extract_strided_slice %1 {offsets = [0, 86], sizes = [1, 698], strides = [1, 1]} : vector<1x784xf32> to vector<1x698xf32>
    %139 = vector.extract_strided_slice %1 {offsets = [0, 0], sizes = [1, 86], strides = [1, 1]} : vector<1x784xf32> to vector<1x86xf32>
    %140 = tpu.concatenate %138, %139 in 1 : vector<1x698xf32>, vector<1x86xf32> -> vector<1x784xf32>
    %141 = vector.broadcast %137 : vector<10x1xf32> to vector<10x784xf32>
    %142 = vector.broadcast %140 : vector<1x784xf32> to vector<10x784xf32>
    %143 = arith.mulf %141, %142 : vector<10x784xf32>
    %144 = arith.addf %136, %143 : vector<10x784xf32>
    %145 = vector.extract_strided_slice %2 {offsets = [0, 18], sizes = [10, 1], strides = [1, 1]} : vector<10x25xf32> to vector<10x1xf32>
    %146 = vector.extract_strided_slice %1 {offsets = [0, 87], sizes = [1, 697], strides = [1, 1]} : vector<1x784xf32> to vector<1x697xf32>
    %147 = vector.extract_strided_slice %1 {offsets = [0, 0], sizes = [1, 87], strides = [1, 1]} : vector<1x784xf32> to vector<1x87xf32>
    %148 = tpu.concatenate %146, %147 in 1 : vector<1x697xf32>, vector<1x87xf32> -> vector<1x784xf32>
    %149 = vector.broadcast %145 : vector<10x1xf32> to vector<10x784xf32>
    %150 = vector.broadcast %148 : vector<1x784xf32> to vector<10x784xf32>
    %151 = arith.mulf %149, %150 : vector<10x784xf32>
    %152 = arith.addf %144, %151 : vector<10x784xf32>
    %153 = vector.extract_strided_slice %2 {offsets = [0, 19], sizes = [10, 1], strides = [1, 1]} : vector<10x25xf32> to vector<10x1xf32>
    %154 = vector.extract_strided_slice %1 {offsets = [0, 88], sizes = [1, 696], strides = [1, 1]} : vector<1x784xf32> to vector<1x696xf32>
    %155 = vector.extract_strided_slice %1 {offsets = [0, 0], sizes = [1, 88], strides = [1, 1]} : vector<1x784xf32> to vector<1x88xf32>
    %156 = tpu.concatenate %154, %155 in 1 : vector<1x696xf32>, vector<1x88xf32> -> vector<1x784xf32>
    %157 = vector.broadcast %153 : vector<10x1xf32> to vector<10x784xf32>
    %158 = vector.broadcast %156 : vector<1x784xf32> to vector<10x784xf32>
    %159 = arith.mulf %157, %158 : vector<10x784xf32>
    %160 = arith.addf %152, %159 : vector<10x784xf32>
    %161 = vector.extract_strided_slice %2 {offsets = [0, 20], sizes = [10, 1], strides = [1, 1]} : vector<10x25xf32> to vector<10x1xf32>
    %162 = vector.extract_strided_slice %1 {offsets = [0, 112], sizes = [1, 672], strides = [1, 1]} : vector<1x784xf32> to vector<1x672xf32>
    %163 = vector.extract_strided_slice %1 {offsets = [0, 0], sizes = [1, 112], strides = [1, 1]} : vector<1x784xf32> to vector<1x112xf32>
    %164 = tpu.concatenate %162, %163 in 1 : vector<1x672xf32>, vector<1x112xf32> -> vector<1x784xf32>
    %165 = vector.broadcast %161 : vector<10x1xf32> to vector<10x784xf32>
    %166 = vector.broadcast %164 : vector<1x784xf32> to vector<10x784xf32>
    %167 = arith.mulf %165, %166 : vector<10x784xf32>
    %168 = arith.addf %160, %167 : vector<10x784xf32>
    %169 = vector.extract_strided_slice %2 {offsets = [0, 21], sizes = [10, 1], strides = [1, 1]} : vector<10x25xf32> to vector<10x1xf32>
    %170 = vector.extract_strided_slice %1 {offsets = [0, 113], sizes = [1, 671], strides = [1, 1]} : vector<1x784xf32> to vector<1x671xf32>
    %171 = vector.extract_strided_slice %1 {offsets = [0, 0], sizes = [1, 113], strides = [1, 1]} : vector<1x784xf32> to vector<1x113xf32>
    %172 = tpu.concatenate %170, %171 in 1 : vector<1x671xf32>, vector<1x113xf32> -> vector<1x784xf32>
    %173 = vector.broadcast %169 : vector<10x1xf32> to vector<10x784xf32>
    %174 = vector.broadcast %172 : vector<1x784xf32> to vector<10x784xf32>
    %175 = arith.mulf %173, %174 : vector<10x784xf32>
    %176 = arith.addf %168, %175 : vector<10x784xf32>
    %177 = vector.extract_strided_slice %2 {offsets = [0, 22], sizes = [10, 1], strides = [1, 1]} : vector<10x25xf32> to vector<10x1xf32>
    %178 = vector.extract_strided_slice %1 {offsets = [0, 114], sizes = [1, 670], strides = [1, 1]} : vector<1x784xf32> to vector<1x670xf32>
    %179 = vector.extract_strided_slice %1 {offsets = [0, 0], sizes = [1, 114], strides = [1, 1]} : vector<1x784xf32> to vector<1x114xf32>
    %180 = tpu.concatenate %178, %179 in 1 : vector<1x670xf32>, vector<1x114xf32> -> vector<1x784xf32>
    %181 = vector.broadcast %177 : vector<10x1xf32> to vector<10x784xf32>
    %182 = vector.broadcast %180 : vector<1x784xf32> to vector<10x784xf32>
    %183 = arith.mulf %181, %182 : vector<10x784xf32>
    %184 = arith.addf %176, %183 : vector<10x784xf32>
    %185 = vector.extract_strided_slice %2 {offsets = [0, 23], sizes = [10, 1], strides = [1, 1]} : vector<10x25xf32> to vector<10x1xf32>
    %186 = vector.extract_strided_slice %1 {offsets = [0, 115], sizes = [1, 669], strides = [1, 1]} : vector<1x784xf32> to vector<1x669xf32>
    %187 = vector.extract_strided_slice %1 {offsets = [0, 0], sizes = [1, 115], strides = [1, 1]} : vector<1x784xf32> to vector<1x115xf32>
    %188 = tpu.concatenate %186, %187 in 1 : vector<1x669xf32>, vector<1x115xf32> -> vector<1x784xf32>
    %189 = vector.broadcast %185 : vector<10x1xf32> to vector<10x784xf32>
    %190 = vector.broadcast %188 : vector<1x784xf32> to vector<10x784xf32>
    %191 = arith.mulf %189, %190 : vector<10x784xf32>
    %192 = arith.addf %184, %191 : vector<10x784xf32>
    %193 = vector.extract_strided_slice %2 {offsets = [0, 24], sizes = [10, 1], strides = [1, 1]} : vector<10x25xf32> to vector<10x1xf32>
    %194 = vector.extract_strided_slice %1 {offsets = [0, 116], sizes = [1, 668], strides = [1, 1]} : vector<1x784xf32> to vector<1x668xf32>
    %195 = vector.extract_strided_slice %1 {offsets = [0, 0], sizes = [1, 116], strides = [1, 1]} : vector<1x784xf32> to vector<1x116xf32>
    %196 = tpu.concatenate %194, %195 in 1 : vector<1x668xf32>, vector<1x116xf32> -> vector<1x784xf32>
    %197 = vector.broadcast %193 : vector<10x1xf32> to vector<10x784xf32>
    %198 = vector.broadcast %196 : vector<1x784xf32> to vector<10x784xf32>
    %199 = arith.mulf %197, %198 : vector<10x784xf32>
    %200 = arith.addf %192, %199 : vector<10x784xf32>
    %201 = vector.extract_strided_slice %200 {offsets = [0, 0], sizes = [10, 24], strides = [1, 1]} : vector<10x784xf32> to vector<10x24xf32>
    %202 = vector.extract_strided_slice %200 {offsets = [0, 28], sizes = [10, 24], strides = [1, 1]} : vector<10x784xf32> to vector<10x24xf32>
    %203 = vector.extract_strided_slice %200 {offsets = [0, 56], sizes = [10, 24], strides = [1, 1]} : vector<10x784xf32> to vector<10x24xf32>
    %204 = vector.extract_strided_slice %200 {offsets = [0, 84], sizes = [10, 24], strides = [1, 1]} : vector<10x784xf32> to vector<10x24xf32>
    %205 = vector.extract_strided_slice %200 {offsets = [0, 112], sizes = [10, 24], strides = [1, 1]} : vector<10x784xf32> to vector<10x24xf32>
    %206 = vector.extract_strided_slice %200 {offsets = [0, 140], sizes = [10, 24], strides = [1, 1]} : vector<10x784xf32> to vector<10x24xf32>
    %207 = vector.extract_strided_slice %200 {offsets = [0, 168], sizes = [10, 24], strides = [1, 1]} : vector<10x784xf32> to vector<10x24xf32>
    %208 = vector.extract_strided_slice %200 {offsets = [0, 196], sizes = [10, 24], strides = [1, 1]} : vector<10x784xf32> to vector<10x24xf32>
    %209 = vector.extract_strided_slice %200 {offsets = [0, 224], sizes = [10, 24], strides = [1, 1]} : vector<10x784xf32> to vector<10x24xf32>
    %210 = vector.extract_strided_slice %200 {offsets = [0, 252], sizes = [10, 24], strides = [1, 1]} : vector<10x784xf32> to vector<10x24xf32>
    %211 = vector.extract_strided_slice %200 {offsets = [0, 280], sizes = [10, 24], strides = [1, 1]} : vector<10x784xf32> to vector<10x24xf32>
    %212 = vector.extract_strided_slice %200 {offsets = [0, 308], sizes = [10, 24], strides = [1, 1]} : vector<10x784xf32> to vector<10x24xf32>
    %213 = vector.extract_strided_slice %200 {offsets = [0, 336], sizes = [10, 24], strides = [1, 1]} : vector<10x784xf32> to vector<10x24xf32>
    %214 = vector.extract_strided_slice %200 {offsets = [0, 364], sizes = [10, 24], strides = [1, 1]} : vector<10x784xf32> to vector<10x24xf32>
    %215 = vector.extract_strided_slice %200 {offsets = [0, 392], sizes = [10, 24], strides = [1, 1]} : vector<10x784xf32> to vector<10x24xf32>
    %216 = vector.extract_strided_slice %200 {offsets = [0, 420], sizes = [10, 24], strides = [1, 1]} : vector<10x784xf32> to vector<10x24xf32>
    %217 = vector.extract_strided_slice %200 {offsets = [0, 448], sizes = [10, 24], strides = [1, 1]} : vector<10x784xf32> to vector<10x24xf32>
    %218 = vector.extract_strided_slice %200 {offsets = [0, 476], sizes = [10, 24], strides = [1, 1]} : vector<10x784xf32> to vector<10x24xf32>
    %219 = vector.extract_strided_slice %200 {offsets = [0, 504], sizes = [10, 24], strides = [1, 1]} : vector<10x784xf32> to vector<10x24xf32>
    %220 = vector.extract_strided_slice %200 {offsets = [0, 532], sizes = [10, 24], strides = [1, 1]} : vector<10x784xf32> to vector<10x24xf32>
    %221 = vector.extract_strided_slice %200 {offsets = [0, 560], sizes = [10, 24], strides = [1, 1]} : vector<10x784xf32> to vector<10x24xf32>
    %222 = vector.extract_strided_slice %200 {offsets = [0, 588], sizes = [10, 24], strides = [1, 1]} : vector<10x784xf32> to vector<10x24xf32>
    %223 = vector.extract_strided_slice %200 {offsets = [0, 616], sizes = [10, 24], strides = [1, 1]} : vector<10x784xf32> to vector<10x24xf32>
    %224 = vector.extract_strided_slice %200 {offsets = [0, 644], sizes = [10, 24], strides = [1, 1]} : vector<10x784xf32> to vector<10x24xf32>
    %225 = tpu.concatenate %201, %202, %203, %204, %205, %206, %207, %208, %209, %210, %211, %212, %213, %214, %215, %216 in 1 : vector<10x24xf32>, vector<10x24xf32>, vector<10x24xf32>, vector<10x24xf32>, vector<10x24xf32>, vector<10x24xf32>, vector<10x24xf32>, vector<10x24xf32>, vector<10x24xf32>, vector<10x24xf32>, vector<10x24xf32>, vector<10x24xf32>, vector<10x24xf32>, vector<10x24xf32>, vector<10x24xf32>, vector<10x24xf32> -> vector<10x384xf32>
    %226 = tpu.concatenate %217, %218, %219, %220, %221, %222, %223, %224 in 1 : vector<10x24xf32>, vector<10x24xf32>, vector<10x24xf32>, vector<10x24xf32>, vector<10x24xf32>, vector<10x24xf32>, vector<10x24xf32>, vector<10x24xf32> -> vector<10x192xf32>
    %227 = tpu.concatenate %225, %226 in 1 : vector<10x384xf32>, vector<10x192xf32> -> vector<10x576xf32>
    %c0_4 = arith.constant 0 : index
    %c0_5 = arith.constant 0 : index
    %228 = vector.load %arg4[%c0_4, %c0_5] : memref<10x1xf32, #tpu.memory_space<vmem>>, vector<10x1xf32>
    %229 = vector.broadcast %228 : vector<10x1xf32> to vector<10x576xf32>
    %230 = arith.addf %227, %229 : vector<10x576xf32>
    %231 = vector.extract_strided_slice %230 {offsets = [0, 1], sizes = [10, 575], strides = [1, 1]} : vector<10x576xf32> to vector<10x575xf32>
    %232 = vector.extract_strided_slice %230 {offsets = [0, 0], sizes = [10, 1], strides = [1, 1]} : vector<10x576xf32> to vector<10x1xf32>
    %233 = tpu.concatenate %231, %232 in 1 : vector<10x575xf32>, vector<10x1xf32> -> vector<10x576xf32>
    %234 = vector.extract_strided_slice %230 {offsets = [0, 24], sizes = [10, 552], strides = [1, 1]} : vector<10x576xf32> to vector<10x552xf32>
    %235 = vector.extract_strided_slice %230 {offsets = [0, 0], sizes = [10, 24], strides = [1, 1]} : vector<10x576xf32> to vector<10x24xf32>
    %236 = tpu.concatenate %234, %235 in 1 : vector<10x552xf32>, vector<10x24xf32> -> vector<10x576xf32>
    %237 = vector.extract_strided_slice %230 {offsets = [0, 25], sizes = [10, 551], strides = [1, 1]} : vector<10x576xf32> to vector<10x551xf32>
    %238 = vector.extract_strided_slice %230 {offsets = [0, 0], sizes = [10, 25], strides = [1, 1]} : vector<10x576xf32> to vector<10x25xf32>
    %239 = tpu.concatenate %237, %238 in 1 : vector<10x551xf32>, vector<10x25xf32> -> vector<10x576xf32>
    %240 = arith.maximumf %230, %233 : vector<10x576xf32>
    %241 = arith.maximumf %236, %239 : vector<10x576xf32>
    %242 = arith.maximumf %240, %241 : vector<10x576xf32>
    %243 = arith.addf %230, %233 : vector<10x576xf32>
    %244 = arith.addf %243, %236 : vector<10x576xf32>
    %245 = arith.addf %244, %239 : vector<10x576xf32>
    %cst_6 = arith.constant 2.500000e-01 : f32
    %246 = vector.broadcast %cst_6 : f32 to vector<10x576xf32>
    %247 = arith.mulf %245, %246 : vector<10x576xf32>
    %c0_7 = arith.constant 0 : index
    %c0_8 = arith.constant 0 : index
    %c0_9 = arith.constant 0 : index
    %248 = vector.load %arg5[%c0_7, %c0_8, %c0_9] : memref<4x10x10xbf16, #tpu.memory_space<vmem>>, vector<1x10x10xbf16>
    %249 = vector.shape_cast %248 : vector<1x10x10xbf16> to vector<10x10xbf16>
    %250 = arith.truncf %230 : vector<10x576xf32> to vector<10x576xbf16>
    %cst_10 = arith.constant dense<0.000000e+00> : vector<10x576xf32>
    %251 = tpu.matmul %249, %250, %cst_10 {dimension_numbers = #tpu.dot_dimension_numbers<[1], [0], [0], [1], [0, 0, 1, 1], [], []>} : vector<10x10xbf16>, vector<10x576xbf16>, vector<10x576xf32> -> vector<10x576xf32>
    %c1 = arith.constant 1 : index
    %c0_11 = arith.constant 0 : index
    %c0_12 = arith.constant 0 : index
    %252 = vector.load %arg5[%c1, %c0_11, %c0_12] : memref<4x10x10xbf16, #tpu.memory_space<vmem>>, vector<1x10x10xbf16>
    %253 = vector.shape_cast %252 : vector<1x10x10xbf16> to vector<10x10xbf16>
    %254 = arith.truncf %233 : vector<10x576xf32> to vector<10x576xbf16>
    %cst_13 = arith.constant dense<0.000000e+00> : vector<10x576xf32>
    %255 = tpu.matmul %253, %254, %cst_13 {dimension_numbers = #tpu.dot_dimension_numbers<[1], [0], [0], [1], [0, 0, 1, 1], [], []>} : vector<10x10xbf16>, vector<10x576xbf16>, vector<10x576xf32> -> vector<10x576xf32>
    %256 = arith.addf %251, %255 : vector<10x576xf32>
    %c2 = arith.constant 2 : index
    %c0_14 = arith.constant 0 : index
    %c0_15 = arith.constant 0 : index
    %257 = vector.load %arg5[%c2, %c0_14, %c0_15] : memref<4x10x10xbf16, #tpu.memory_space<vmem>>, vector<1x10x10xbf16>
    %258 = vector.shape_cast %257 : vector<1x10x10xbf16> to vector<10x10xbf16>
    %259 = arith.truncf %236 : vector<10x576xf32> to vector<10x576xbf16>
    %cst_16 = arith.constant dense<0.000000e+00> : vector<10x576xf32>
    %260 = tpu.matmul %258, %259, %cst_16 {dimension_numbers = #tpu.dot_dimension_numbers<[1], [0], [0], [1], [0, 0, 1, 1], [], []>} : vector<10x10xbf16>, vector<10x576xbf16>, vector<10x576xf32> -> vector<10x576xf32>
    %261 = arith.addf %256, %260 : vector<10x576xf32>
    %c3 = arith.constant 3 : index
    %c0_17 = arith.constant 0 : index
    %c0_18 = arith.constant 0 : index
    %262 = vector.load %arg5[%c3, %c0_17, %c0_18] : memref<4x10x10xbf16, #tpu.memory_space<vmem>>, vector<1x10x10xbf16>
    %263 = vector.shape_cast %262 : vector<1x10x10xbf16> to vector<10x10xbf16>
    %264 = arith.truncf %239 : vector<10x576xf32> to vector<10x576xbf16>
    %cst_19 = arith.constant dense<0.000000e+00> : vector<10x576xf32>
    %265 = tpu.matmul %263, %264, %cst_19 {dimension_numbers = #tpu.dot_dimension_numbers<[1], [0], [0], [1], [0, 0, 1, 1], [], []>} : vector<10x10xbf16>, vector<10x576xbf16>, vector<10x576xf32> -> vector<10x576xf32>
    %266 = arith.addf %261, %265 : vector<10x576xf32>
    %267 = arith.negf %266 : vector<10x576xf32>
    %268 = math.exp %267 : vector<10x576xf32>
    %cst_20 = arith.constant 1.000000e+00 : f32
    %269 = vector.broadcast %cst_20 : f32 to vector<10x576xf32>
    %270 = arith.addf %269, %268 : vector<10x576xf32>
    %271 = arith.divf %269, %270 : vector<10x576xf32>
    %272 = arith.mulf %271, %242 : vector<10x576xf32>
    %cst_21 = arith.constant 1.000000e+00 : f32
    %273 = vector.broadcast %cst_21 : f32 to vector<10x576xf32>
    %274 = arith.subf %273, %271 : vector<10x576xf32>
    %275 = arith.mulf %274, %247 : vector<10x576xf32>
    %276 = arith.addf %272, %275 : vector<10x576xf32>
    %cst_22 = arith.constant 0.000000e+00 : f32
    %277 = vector.broadcast %cst_22 : f32 to vector<10x576xf32>
    %278 = arith.maximumf %276, %277 : vector<10x576xf32>
    %279 = arith.truncf %278 : vector<10x576xf32> to vector<10x576xbf16>
    %cst_23 = arith.constant 0.000000e+00 : f32
    %280 = vector.broadcast %cst_23 : f32 to vector<20x576xf32>
    %c0_24 = arith.constant 0 : index
    %c0_25 = arith.constant 0 : index
    %c0_26 = arith.constant 0 : index
    %281 = vector.load %arg6[%c0_24, %c0_25, %c0_26] : memref<25x20x10xbf16, #tpu.memory_space<vmem>>, vector<1x20x10xbf16>
    %282 = vector.shape_cast %281 : vector<1x20x10xbf16> to vector<20x10xbf16>
    %cst_27 = arith.constant dense<0.000000e+00> : vector<20x576xf32>
    %283 = tpu.matmul %282, %279, %cst_27 {dimension_numbers = #tpu.dot_dimension_numbers<[1], [0], [0], [1], [0, 0, 1, 1], [], []>} : vector<20x10xbf16>, vector<10x576xbf16>, vector<20x576xf32> -> vector<20x576xf32>
    %284 = arith.addf %280, %283 : vector<20x576xf32>
    %285 = vector.extract_strided_slice %279 {offsets = [0, 2], sizes = [10, 574], strides = [1, 1]} : vector<10x576xbf16> to vector<10x574xbf16>
    %286 = vector.extract_strided_slice %279 {offsets = [0, 0], sizes = [10, 2], strides = [1, 1]} : vector<10x576xbf16> to vector<10x2xbf16>
    %287 = tpu.concatenate %285, %286 in 1 : vector<10x574xbf16>, vector<10x2xbf16> -> vector<10x576xbf16>
    %c1_28 = arith.constant 1 : index
    %c0_29 = arith.constant 0 : index
    %c0_30 = arith.constant 0 : index
    %288 = vector.load %arg6[%c1_28, %c0_29, %c0_30] : memref<25x20x10xbf16, #tpu.memory_space<vmem>>, vector<1x20x10xbf16>
    %289 = vector.shape_cast %288 : vector<1x20x10xbf16> to vector<20x10xbf16>
    %cst_31 = arith.constant dense<0.000000e+00> : vector<20x576xf32>
    %290 = tpu.matmul %289, %287, %cst_31 {dimension_numbers = #tpu.dot_dimension_numbers<[1], [0], [0], [1], [0, 0, 1, 1], [], []>} : vector<20x10xbf16>, vector<10x576xbf16>, vector<20x576xf32> -> vector<20x576xf32>
    %291 = arith.addf %284, %290 : vector<20x576xf32>
    %292 = vector.extract_strided_slice %279 {offsets = [0, 4], sizes = [10, 572], strides = [1, 1]} : vector<10x576xbf16> to vector<10x572xbf16>
    %293 = vector.extract_strided_slice %279 {offsets = [0, 0], sizes = [10, 4], strides = [1, 1]} : vector<10x576xbf16> to vector<10x4xbf16>
    %294 = tpu.concatenate %292, %293 in 1 : vector<10x572xbf16>, vector<10x4xbf16> -> vector<10x576xbf16>
    %c2_32 = arith.constant 2 : index
    %c0_33 = arith.constant 0 : index
    %c0_34 = arith.constant 0 : index
    %295 = vector.load %arg6[%c2_32, %c0_33, %c0_34] : memref<25x20x10xbf16, #tpu.memory_space<vmem>>, vector<1x20x10xbf16>
    %296 = vector.shape_cast %295 : vector<1x20x10xbf16> to vector<20x10xbf16>
    %cst_35 = arith.constant dense<0.000000e+00> : vector<20x576xf32>
    %297 = tpu.matmul %296, %294, %cst_35 {dimension_numbers = #tpu.dot_dimension_numbers<[1], [0], [0], [1], [0, 0, 1, 1], [], []>} : vector<20x10xbf16>, vector<10x576xbf16>, vector<20x576xf32> -> vector<20x576xf32>
    %298 = arith.addf %291, %297 : vector<20x576xf32>
    %299 = vector.extract_strided_slice %279 {offsets = [0, 6], sizes = [10, 570], strides = [1, 1]} : vector<10x576xbf16> to vector<10x570xbf16>
    %300 = vector.extract_strided_slice %279 {offsets = [0, 0], sizes = [10, 6], strides = [1, 1]} : vector<10x576xbf16> to vector<10x6xbf16>
    %301 = tpu.concatenate %299, %300 in 1 : vector<10x570xbf16>, vector<10x6xbf16> -> vector<10x576xbf16>
    %c3_36 = arith.constant 3 : index
    %c0_37 = arith.constant 0 : index
    %c0_38 = arith.constant 0 : index
    %302 = vector.load %arg6[%c3_36, %c0_37, %c0_38] : memref<25x20x10xbf16, #tpu.memory_space<vmem>>, vector<1x20x10xbf16>
    %303 = vector.shape_cast %302 : vector<1x20x10xbf16> to vector<20x10xbf16>
    %cst_39 = arith.constant dense<0.000000e+00> : vector<20x576xf32>
    %304 = tpu.matmul %303, %301, %cst_39 {dimension_numbers = #tpu.dot_dimension_numbers<[1], [0], [0], [1], [0, 0, 1, 1], [], []>} : vector<20x10xbf16>, vector<10x576xbf16>, vector<20x576xf32> -> vector<20x576xf32>
    %305 = arith.addf %298, %304 : vector<20x576xf32>
    %306 = vector.extract_strided_slice %279 {offsets = [0, 8], sizes = [10, 568], strides = [1, 1]} : vector<10x576xbf16> to vector<10x568xbf16>
    %307 = vector.extract_strided_slice %279 {offsets = [0, 0], sizes = [10, 8], strides = [1, 1]} : vector<10x576xbf16> to vector<10x8xbf16>
    %308 = tpu.concatenate %306, %307 in 1 : vector<10x568xbf16>, vector<10x8xbf16> -> vector<10x576xbf16>
    %c4 = arith.constant 4 : index
    %c0_40 = arith.constant 0 : index
    %c0_41 = arith.constant 0 : index
    %309 = vector.load %arg6[%c4, %c0_40, %c0_41] : memref<25x20x10xbf16, #tpu.memory_space<vmem>>, vector<1x20x10xbf16>
    %310 = vector.shape_cast %309 : vector<1x20x10xbf16> to vector<20x10xbf16>
    %cst_42 = arith.constant dense<0.000000e+00> : vector<20x576xf32>
    %311 = tpu.matmul %310, %308, %cst_42 {dimension_numbers = #tpu.dot_dimension_numbers<[1], [0], [0], [1], [0, 0, 1, 1], [], []>} : vector<20x10xbf16>, vector<10x576xbf16>, vector<20x576xf32> -> vector<20x576xf32>
    %312 = arith.addf %305, %311 : vector<20x576xf32>
    %313 = vector.extract_strided_slice %279 {offsets = [0, 48], sizes = [10, 528], strides = [1, 1]} : vector<10x576xbf16> to vector<10x528xbf16>
    %314 = vector.extract_strided_slice %279 {offsets = [0, 0], sizes = [10, 48], strides = [1, 1]} : vector<10x576xbf16> to vector<10x48xbf16>
    %315 = tpu.concatenate %313, %314 in 1 : vector<10x528xbf16>, vector<10x48xbf16> -> vector<10x576xbf16>
    %c5 = arith.constant 5 : index
    %c0_43 = arith.constant 0 : index
    %c0_44 = arith.constant 0 : index
    %316 = vector.load %arg6[%c5, %c0_43, %c0_44] : memref<25x20x10xbf16, #tpu.memory_space<vmem>>, vector<1x20x10xbf16>
    %317 = vector.shape_cast %316 : vector<1x20x10xbf16> to vector<20x10xbf16>
    %cst_45 = arith.constant dense<0.000000e+00> : vector<20x576xf32>
    %318 = tpu.matmul %317, %315, %cst_45 {dimension_numbers = #tpu.dot_dimension_numbers<[1], [0], [0], [1], [0, 0, 1, 1], [], []>} : vector<20x10xbf16>, vector<10x576xbf16>, vector<20x576xf32> -> vector<20x576xf32>
    %319 = arith.addf %312, %318 : vector<20x576xf32>
    %320 = vector.extract_strided_slice %279 {offsets = [0, 50], sizes = [10, 526], strides = [1, 1]} : vector<10x576xbf16> to vector<10x526xbf16>
    %321 = vector.extract_strided_slice %279 {offsets = [0, 0], sizes = [10, 50], strides = [1, 1]} : vector<10x576xbf16> to vector<10x50xbf16>
    %322 = tpu.concatenate %320, %321 in 1 : vector<10x526xbf16>, vector<10x50xbf16> -> vector<10x576xbf16>
    %c6 = arith.constant 6 : index
    %c0_46 = arith.constant 0 : index
    %c0_47 = arith.constant 0 : index
    %323 = vector.load %arg6[%c6, %c0_46, %c0_47] : memref<25x20x10xbf16, #tpu.memory_space<vmem>>, vector<1x20x10xbf16>
    %324 = vector.shape_cast %323 : vector<1x20x10xbf16> to vector<20x10xbf16>
    %cst_48 = arith.constant dense<0.000000e+00> : vector<20x576xf32>
    %325 = tpu.matmul %324, %322, %cst_48 {dimension_numbers = #tpu.dot_dimension_numbers<[1], [0], [0], [1], [0, 0, 1, 1], [], []>} : vector<20x10xbf16>, vector<10x576xbf16>, vector<20x576xf32> -> vector<20x576xf32>
    %326 = arith.addf %319, %325 : vector<20x576xf32>
    %327 = vector.extract_strided_slice %279 {offsets = [0, 52], sizes = [10, 524], strides = [1, 1]} : vector<10x576xbf16> to vector<10x524xbf16>
    %328 = vector.extract_strided_slice %279 {offsets = [0, 0], sizes = [10, 52], strides = [1, 1]} : vector<10x576xbf16> to vector<10x52xbf16>
    %329 = tpu.concatenate %327, %328 in 1 : vector<10x524xbf16>, vector<10x52xbf16> -> vector<10x576xbf16>
    %c7 = arith.constant 7 : index
    %c0_49 = arith.constant 0 : index
    %c0_50 = arith.constant 0 : index
    %330 = vector.load %arg6[%c7, %c0_49, %c0_50] : memref<25x20x10xbf16, #tpu.memory_space<vmem>>, vector<1x20x10xbf16>
    %331 = vector.shape_cast %330 : vector<1x20x10xbf16> to vector<20x10xbf16>
    %cst_51 = arith.constant dense<0.000000e+00> : vector<20x576xf32>
    %332 = tpu.matmul %331, %329, %cst_51 {dimension_numbers = #tpu.dot_dimension_numbers<[1], [0], [0], [1], [0, 0, 1, 1], [], []>} : vector<20x10xbf16>, vector<10x576xbf16>, vector<20x576xf32> -> vector<20x576xf32>
    %333 = arith.addf %326, %332 : vector<20x576xf32>
    %334 = vector.extract_strided_slice %279 {offsets = [0, 54], sizes = [10, 522], strides = [1, 1]} : vector<10x576xbf16> to vector<10x522xbf16>
    %335 = vector.extract_strided_slice %279 {offsets = [0, 0], sizes = [10, 54], strides = [1, 1]} : vector<10x576xbf16> to vector<10x54xbf16>
    %336 = tpu.concatenate %334, %335 in 1 : vector<10x522xbf16>, vector<10x54xbf16> -> vector<10x576xbf16>
    %c8 = arith.constant 8 : index
    %c0_52 = arith.constant 0 : index
    %c0_53 = arith.constant 0 : index
    %337 = vector.load %arg6[%c8, %c0_52, %c0_53] : memref<25x20x10xbf16, #tpu.memory_space<vmem>>, vector<1x20x10xbf16>
    %338 = vector.shape_cast %337 : vector<1x20x10xbf16> to vector<20x10xbf16>
    %cst_54 = arith.constant dense<0.000000e+00> : vector<20x576xf32>
    %339 = tpu.matmul %338, %336, %cst_54 {dimension_numbers = #tpu.dot_dimension_numbers<[1], [0], [0], [1], [0, 0, 1, 1], [], []>} : vector<20x10xbf16>, vector<10x576xbf16>, vector<20x576xf32> -> vector<20x576xf32>
    %340 = arith.addf %333, %339 : vector<20x576xf32>
    %341 = vector.extract_strided_slice %279 {offsets = [0, 56], sizes = [10, 520], strides = [1, 1]} : vector<10x576xbf16> to vector<10x520xbf16>
    %342 = vector.extract_strided_slice %279 {offsets = [0, 0], sizes = [10, 56], strides = [1, 1]} : vector<10x576xbf16> to vector<10x56xbf16>
    %343 = tpu.concatenate %341, %342 in 1 : vector<10x520xbf16>, vector<10x56xbf16> -> vector<10x576xbf16>
    %c9 = arith.constant 9 : index
    %c0_55 = arith.constant 0 : index
    %c0_56 = arith.constant 0 : index
    %344 = vector.load %arg6[%c9, %c0_55, %c0_56] : memref<25x20x10xbf16, #tpu.memory_space<vmem>>, vector<1x20x10xbf16>
    %345 = vector.shape_cast %344 : vector<1x20x10xbf16> to vector<20x10xbf16>
    %cst_57 = arith.constant dense<0.000000e+00> : vector<20x576xf32>
    %346 = tpu.matmul %345, %343, %cst_57 {dimension_numbers = #tpu.dot_dimension_numbers<[1], [0], [0], [1], [0, 0, 1, 1], [], []>} : vector<20x10xbf16>, vector<10x576xbf16>, vector<20x576xf32> -> vector<20x576xf32>
    %347 = arith.addf %340, %346 : vector<20x576xf32>
    %348 = vector.extract_strided_slice %279 {offsets = [0, 96], sizes = [10, 480], strides = [1, 1]} : vector<10x576xbf16> to vector<10x480xbf16>
    %349 = vector.extract_strided_slice %279 {offsets = [0, 0], sizes = [10, 96], strides = [1, 1]} : vector<10x576xbf16> to vector<10x96xbf16>
    %350 = tpu.concatenate %348, %349 in 1 : vector<10x480xbf16>, vector<10x96xbf16> -> vector<10x576xbf16>
    %c10 = arith.constant 10 : index
    %c0_58 = arith.constant 0 : index
    %c0_59 = arith.constant 0 : index
    %351 = vector.load %arg6[%c10, %c0_58, %c0_59] : memref<25x20x10xbf16, #tpu.memory_space<vmem>>, vector<1x20x10xbf16>
    %352 = vector.shape_cast %351 : vector<1x20x10xbf16> to vector<20x10xbf16>
    %cst_60 = arith.constant dense<0.000000e+00> : vector<20x576xf32>
    %353 = tpu.matmul %352, %350, %cst_60 {dimension_numbers = #tpu.dot_dimension_numbers<[1], [0], [0], [1], [0, 0, 1, 1], [], []>} : vector<20x10xbf16>, vector<10x576xbf16>, vector<20x576xf32> -> vector<20x576xf32>
    %354 = arith.addf %347, %353 : vector<20x576xf32>
    %355 = vector.extract_strided_slice %279 {offsets = [0, 98], sizes = [10, 478], strides = [1, 1]} : vector<10x576xbf16> to vector<10x478xbf16>
    %356 = vector.extract_strided_slice %279 {offsets = [0, 0], sizes = [10, 98], strides = [1, 1]} : vector<10x576xbf16> to vector<10x98xbf16>
    %357 = tpu.concatenate %355, %356 in 1 : vector<10x478xbf16>, vector<10x98xbf16> -> vector<10x576xbf16>
    %c11 = arith.constant 11 : index
    %c0_61 = arith.constant 0 : index
    %c0_62 = arith.constant 0 : index
    %358 = vector.load %arg6[%c11, %c0_61, %c0_62] : memref<25x20x10xbf16, #tpu.memory_space<vmem>>, vector<1x20x10xbf16>
    %359 = vector.shape_cast %358 : vector<1x20x10xbf16> to vector<20x10xbf16>
    %cst_63 = arith.constant dense<0.000000e+00> : vector<20x576xf32>
    %360 = tpu.matmul %359, %357, %cst_63 {dimension_numbers = #tpu.dot_dimension_numbers<[1], [0], [0], [1], [0, 0, 1, 1], [], []>} : vector<20x10xbf16>, vector<10x576xbf16>, vector<20x576xf32> -> vector<20x576xf32>
    %361 = arith.addf %354, %360 : vector<20x576xf32>
    %362 = vector.extract_strided_slice %279 {offsets = [0, 100], sizes = [10, 476], strides = [1, 1]} : vector<10x576xbf16> to vector<10x476xbf16>
    %363 = vector.extract_strided_slice %279 {offsets = [0, 0], sizes = [10, 100], strides = [1, 1]} : vector<10x576xbf16> to vector<10x100xbf16>
    %364 = tpu.concatenate %362, %363 in 1 : vector<10x476xbf16>, vector<10x100xbf16> -> vector<10x576xbf16>
    %c12 = arith.constant 12 : index
    %c0_64 = arith.constant 0 : index
    %c0_65 = arith.constant 0 : index
    %365 = vector.load %arg6[%c12, %c0_64, %c0_65] : memref<25x20x10xbf16, #tpu.memory_space<vmem>>, vector<1x20x10xbf16>
    %366 = vector.shape_cast %365 : vector<1x20x10xbf16> to vector<20x10xbf16>
    %cst_66 = arith.constant dense<0.000000e+00> : vector<20x576xf32>
    %367 = tpu.matmul %366, %364, %cst_66 {dimension_numbers = #tpu.dot_dimension_numbers<[1], [0], [0], [1], [0, 0, 1, 1], [], []>} : vector<20x10xbf16>, vector<10x576xbf16>, vector<20x576xf32> -> vector<20x576xf32>
    %368 = arith.addf %361, %367 : vector<20x576xf32>
    %369 = vector.extract_strided_slice %279 {offsets = [0, 102], sizes = [10, 474], strides = [1, 1]} : vector<10x576xbf16> to vector<10x474xbf16>
    %370 = vector.extract_strided_slice %279 {offsets = [0, 0], sizes = [10, 102], strides = [1, 1]} : vector<10x576xbf16> to vector<10x102xbf16>
    %371 = tpu.concatenate %369, %370 in 1 : vector<10x474xbf16>, vector<10x102xbf16> -> vector<10x576xbf16>
    %c13 = arith.constant 13 : index
    %c0_67 = arith.constant 0 : index
    %c0_68 = arith.constant 0 : index
    %372 = vector.load %arg6[%c13, %c0_67, %c0_68] : memref<25x20x10xbf16, #tpu.memory_space<vmem>>, vector<1x20x10xbf16>
    %373 = vector.shape_cast %372 : vector<1x20x10xbf16> to vector<20x10xbf16>
    %cst_69 = arith.constant dense<0.000000e+00> : vector<20x576xf32>
    %374 = tpu.matmul %373, %371, %cst_69 {dimension_numbers = #tpu.dot_dimension_numbers<[1], [0], [0], [1], [0, 0, 1, 1], [], []>} : vector<20x10xbf16>, vector<10x576xbf16>, vector<20x576xf32> -> vector<20x576xf32>
    %375 = arith.addf %368, %374 : vector<20x576xf32>
    %376 = vector.extract_strided_slice %279 {offsets = [0, 104], sizes = [10, 472], strides = [1, 1]} : vector<10x576xbf16> to vector<10x472xbf16>
    %377 = vector.extract_strided_slice %279 {offsets = [0, 0], sizes = [10, 104], strides = [1, 1]} : vector<10x576xbf16> to vector<10x104xbf16>
    %378 = tpu.concatenate %376, %377 in 1 : vector<10x472xbf16>, vector<10x104xbf16> -> vector<10x576xbf16>
    %c14 = arith.constant 14 : index
    %c0_70 = arith.constant 0 : index
    %c0_71 = arith.constant 0 : index
    %379 = vector.load %arg6[%c14, %c0_70, %c0_71] : memref<25x20x10xbf16, #tpu.memory_space<vmem>>, vector<1x20x10xbf16>
    %380 = vector.shape_cast %379 : vector<1x20x10xbf16> to vector<20x10xbf16>
    %cst_72 = arith.constant dense<0.000000e+00> : vector<20x576xf32>
    %381 = tpu.matmul %380, %378, %cst_72 {dimension_numbers = #tpu.dot_dimension_numbers<[1], [0], [0], [1], [0, 0, 1, 1], [], []>} : vector<20x10xbf16>, vector<10x576xbf16>, vector<20x576xf32> -> vector<20x576xf32>
    %382 = arith.addf %375, %381 : vector<20x576xf32>
    %383 = vector.extract_strided_slice %279 {offsets = [0, 144], sizes = [10, 432], strides = [1, 1]} : vector<10x576xbf16> to vector<10x432xbf16>
    %384 = vector.extract_strided_slice %279 {offsets = [0, 0], sizes = [10, 144], strides = [1, 1]} : vector<10x576xbf16> to vector<10x144xbf16>
    %385 = tpu.concatenate %383, %384 in 1 : vector<10x432xbf16>, vector<10x144xbf16> -> vector<10x576xbf16>
    %c15 = arith.constant 15 : index
    %c0_73 = arith.constant 0 : index
    %c0_74 = arith.constant 0 : index
    %386 = vector.load %arg6[%c15, %c0_73, %c0_74] : memref<25x20x10xbf16, #tpu.memory_space<vmem>>, vector<1x20x10xbf16>
    %387 = vector.shape_cast %386 : vector<1x20x10xbf16> to vector<20x10xbf16>
    %cst_75 = arith.constant dense<0.000000e+00> : vector<20x576xf32>
    %388 = tpu.matmul %387, %385, %cst_75 {dimension_numbers = #tpu.dot_dimension_numbers<[1], [0], [0], [1], [0, 0, 1, 1], [], []>} : vector<20x10xbf16>, vector<10x576xbf16>, vector<20x576xf32> -> vector<20x576xf32>
    %389 = arith.addf %382, %388 : vector<20x576xf32>
    %390 = vector.extract_strided_slice %279 {offsets = [0, 146], sizes = [10, 430], strides = [1, 1]} : vector<10x576xbf16> to vector<10x430xbf16>
    %391 = vector.extract_strided_slice %279 {offsets = [0, 0], sizes = [10, 146], strides = [1, 1]} : vector<10x576xbf16> to vector<10x146xbf16>
    %392 = tpu.concatenate %390, %391 in 1 : vector<10x430xbf16>, vector<10x146xbf16> -> vector<10x576xbf16>
    %c16 = arith.constant 16 : index
    %c0_76 = arith.constant 0 : index
    %c0_77 = arith.constant 0 : index
    %393 = vector.load %arg6[%c16, %c0_76, %c0_77] : memref<25x20x10xbf16, #tpu.memory_space<vmem>>, vector<1x20x10xbf16>
    %394 = vector.shape_cast %393 : vector<1x20x10xbf16> to vector<20x10xbf16>
    %cst_78 = arith.constant dense<0.000000e+00> : vector<20x576xf32>
    %395 = tpu.matmul %394, %392, %cst_78 {dimension_numbers = #tpu.dot_dimension_numbers<[1], [0], [0], [1], [0, 0, 1, 1], [], []>} : vector<20x10xbf16>, vector<10x576xbf16>, vector<20x576xf32> -> vector<20x576xf32>
    %396 = arith.addf %389, %395 : vector<20x576xf32>
    %397 = vector.extract_strided_slice %279 {offsets = [0, 148], sizes = [10, 428], strides = [1, 1]} : vector<10x576xbf16> to vector<10x428xbf16>
    %398 = vector.extract_strided_slice %279 {offsets = [0, 0], sizes = [10, 148], strides = [1, 1]} : vector<10x576xbf16> to vector<10x148xbf16>
    %399 = tpu.concatenate %397, %398 in 1 : vector<10x428xbf16>, vector<10x148xbf16> -> vector<10x576xbf16>
    %c17 = arith.constant 17 : index
    %c0_79 = arith.constant 0 : index
    %c0_80 = arith.constant 0 : index
    %400 = vector.load %arg6[%c17, %c0_79, %c0_80] : memref<25x20x10xbf16, #tpu.memory_space<vmem>>, vector<1x20x10xbf16>
    %401 = vector.shape_cast %400 : vector<1x20x10xbf16> to vector<20x10xbf16>
    %cst_81 = arith.constant dense<0.000000e+00> : vector<20x576xf32>
    %402 = tpu.matmul %401, %399, %cst_81 {dimension_numbers = #tpu.dot_dimension_numbers<[1], [0], [0], [1], [0, 0, 1, 1], [], []>} : vector<20x10xbf16>, vector<10x576xbf16>, vector<20x576xf32> -> vector<20x576xf32>
    %403 = arith.addf %396, %402 : vector<20x576xf32>
    %404 = vector.extract_strided_slice %279 {offsets = [0, 150], sizes = [10, 426], strides = [1, 1]} : vector<10x576xbf16> to vector<10x426xbf16>
    %405 = vector.extract_strided_slice %279 {offsets = [0, 0], sizes = [10, 150], strides = [1, 1]} : vector<10x576xbf16> to vector<10x150xbf16>
    %406 = tpu.concatenate %404, %405 in 1 : vector<10x426xbf16>, vector<10x150xbf16> -> vector<10x576xbf16>
    %c18 = arith.constant 18 : index
    %c0_82 = arith.constant 0 : index
    %c0_83 = arith.constant 0 : index
    %407 = vector.load %arg6[%c18, %c0_82, %c0_83] : memref<25x20x10xbf16, #tpu.memory_space<vmem>>, vector<1x20x10xbf16>
    %408 = vector.shape_cast %407 : vector<1x20x10xbf16> to vector<20x10xbf16>
    %cst_84 = arith.constant dense<0.000000e+00> : vector<20x576xf32>
    %409 = tpu.matmul %408, %406, %cst_84 {dimension_numbers = #tpu.dot_dimension_numbers<[1], [0], [0], [1], [0, 0, 1, 1], [], []>} : vector<20x10xbf16>, vector<10x576xbf16>, vector<20x576xf32> -> vector<20x576xf32>
    %410 = arith.addf %403, %409 : vector<20x576xf32>
    %411 = vector.extract_strided_slice %279 {offsets = [0, 152], sizes = [10, 424], strides = [1, 1]} : vector<10x576xbf16> to vector<10x424xbf16>
    %412 = vector.extract_strided_slice %279 {offsets = [0, 0], sizes = [10, 152], strides = [1, 1]} : vector<10x576xbf16> to vector<10x152xbf16>
    %413 = tpu.concatenate %411, %412 in 1 : vector<10x424xbf16>, vector<10x152xbf16> -> vector<10x576xbf16>
    %c19 = arith.constant 19 : index
    %c0_85 = arith.constant 0 : index
    %c0_86 = arith.constant 0 : index
    %414 = vector.load %arg6[%c19, %c0_85, %c0_86] : memref<25x20x10xbf16, #tpu.memory_space<vmem>>, vector<1x20x10xbf16>
    %415 = vector.shape_cast %414 : vector<1x20x10xbf16> to vector<20x10xbf16>
    %cst_87 = arith.constant dense<0.000000e+00> : vector<20x576xf32>
    %416 = tpu.matmul %415, %413, %cst_87 {dimension_numbers = #tpu.dot_dimension_numbers<[1], [0], [0], [1], [0, 0, 1, 1], [], []>} : vector<20x10xbf16>, vector<10x576xbf16>, vector<20x576xf32> -> vector<20x576xf32>
    %417 = arith.addf %410, %416 : vector<20x576xf32>
    %418 = vector.extract_strided_slice %279 {offsets = [0, 192], sizes = [10, 384], strides = [1, 1]} : vector<10x576xbf16> to vector<10x384xbf16>
    %419 = vector.extract_strided_slice %279 {offsets = [0, 0], sizes = [10, 192], strides = [1, 1]} : vector<10x576xbf16> to vector<10x192xbf16>
    %420 = tpu.concatenate %418, %419 in 1 : vector<10x384xbf16>, vector<10x192xbf16> -> vector<10x576xbf16>
    %c20 = arith.constant 20 : index
    %c0_88 = arith.constant 0 : index
    %c0_89 = arith.constant 0 : index
    %421 = vector.load %arg6[%c20, %c0_88, %c0_89] : memref<25x20x10xbf16, #tpu.memory_space<vmem>>, vector<1x20x10xbf16>
    %422 = vector.shape_cast %421 : vector<1x20x10xbf16> to vector<20x10xbf16>
    %cst_90 = arith.constant dense<0.000000e+00> : vector<20x576xf32>
    %423 = tpu.matmul %422, %420, %cst_90 {dimension_numbers = #tpu.dot_dimension_numbers<[1], [0], [0], [1], [0, 0, 1, 1], [], []>} : vector<20x10xbf16>, vector<10x576xbf16>, vector<20x576xf32> -> vector<20x576xf32>
    %424 = arith.addf %417, %423 : vector<20x576xf32>
    %425 = vector.extract_strided_slice %279 {offsets = [0, 194], sizes = [10, 382], strides = [1, 1]} : vector<10x576xbf16> to vector<10x382xbf16>
    %426 = vector.extract_strided_slice %279 {offsets = [0, 0], sizes = [10, 194], strides = [1, 1]} : vector<10x576xbf16> to vector<10x194xbf16>
    %427 = tpu.concatenate %425, %426 in 1 : vector<10x382xbf16>, vector<10x194xbf16> -> vector<10x576xbf16>
    %c21 = arith.constant 21 : index
    %c0_91 = arith.constant 0 : index
    %c0_92 = arith.constant 0 : index
    %428 = vector.load %arg6[%c21, %c0_91, %c0_92] : memref<25x20x10xbf16, #tpu.memory_space<vmem>>, vector<1x20x10xbf16>
    %429 = vector.shape_cast %428 : vector<1x20x10xbf16> to vector<20x10xbf16>
    %cst_93 = arith.constant dense<0.000000e+00> : vector<20x576xf32>
    %430 = tpu.matmul %429, %427, %cst_93 {dimension_numbers = #tpu.dot_dimension_numbers<[1], [0], [0], [1], [0, 0, 1, 1], [], []>} : vector<20x10xbf16>, vector<10x576xbf16>, vector<20x576xf32> -> vector<20x576xf32>
    %431 = arith.addf %424, %430 : vector<20x576xf32>
    %432 = vector.extract_strided_slice %279 {offsets = [0, 196], sizes = [10, 380], strides = [1, 1]} : vector<10x576xbf16> to vector<10x380xbf16>
    %433 = vector.extract_strided_slice %279 {offsets = [0, 0], sizes = [10, 196], strides = [1, 1]} : vector<10x576xbf16> to vector<10x196xbf16>
    %434 = tpu.concatenate %432, %433 in 1 : vector<10x380xbf16>, vector<10x196xbf16> -> vector<10x576xbf16>
    %c22 = arith.constant 22 : index
    %c0_94 = arith.constant 0 : index
    %c0_95 = arith.constant 0 : index
    %435 = vector.load %arg6[%c22, %c0_94, %c0_95] : memref<25x20x10xbf16, #tpu.memory_space<vmem>>, vector<1x20x10xbf16>
    %436 = vector.shape_cast %435 : vector<1x20x10xbf16> to vector<20x10xbf16>
    %cst_96 = arith.constant dense<0.000000e+00> : vector<20x576xf32>
    %437 = tpu.matmul %436, %434, %cst_96 {dimension_numbers = #tpu.dot_dimension_numbers<[1], [0], [0], [1], [0, 0, 1, 1], [], []>} : vector<20x10xbf16>, vector<10x576xbf16>, vector<20x576xf32> -> vector<20x576xf32>
    %438 = arith.addf %431, %437 : vector<20x576xf32>
    %439 = vector.extract_strided_slice %279 {offsets = [0, 198], sizes = [10, 378], strides = [1, 1]} : vector<10x576xbf16> to vector<10x378xbf16>
    %440 = vector.extract_strided_slice %279 {offsets = [0, 0], sizes = [10, 198], strides = [1, 1]} : vector<10x576xbf16> to vector<10x198xbf16>
    %441 = tpu.concatenate %439, %440 in 1 : vector<10x378xbf16>, vector<10x198xbf16> -> vector<10x576xbf16>
    %c23 = arith.constant 23 : index
    %c0_97 = arith.constant 0 : index
    %c0_98 = arith.constant 0 : index
    %442 = vector.load %arg6[%c23, %c0_97, %c0_98] : memref<25x20x10xbf16, #tpu.memory_space<vmem>>, vector<1x20x10xbf16>
    %443 = vector.shape_cast %442 : vector<1x20x10xbf16> to vector<20x10xbf16>
    %cst_99 = arith.constant dense<0.000000e+00> : vector<20x576xf32>
    %444 = tpu.matmul %443, %441, %cst_99 {dimension_numbers = #tpu.dot_dimension_numbers<[1], [0], [0], [1], [0, 0, 1, 1], [], []>} : vector<20x10xbf16>, vector<10x576xbf16>, vector<20x576xf32> -> vector<20x576xf32>
    %445 = arith.addf %438, %444 : vector<20x576xf32>
    %446 = vector.extract_strided_slice %279 {offsets = [0, 200], sizes = [10, 376], strides = [1, 1]} : vector<10x576xbf16> to vector<10x376xbf16>
    %447 = vector.extract_strided_slice %279 {offsets = [0, 0], sizes = [10, 200], strides = [1, 1]} : vector<10x576xbf16> to vector<10x200xbf16>
    %448 = tpu.concatenate %446, %447 in 1 : vector<10x376xbf16>, vector<10x200xbf16> -> vector<10x576xbf16>
    %c24 = arith.constant 24 : index
    %c0_100 = arith.constant 0 : index
    %c0_101 = arith.constant 0 : index
    %449 = vector.load %arg6[%c24, %c0_100, %c0_101] : memref<25x20x10xbf16, #tpu.memory_space<vmem>>, vector<1x20x10xbf16>
    %450 = vector.shape_cast %449 : vector<1x20x10xbf16> to vector<20x10xbf16>
    %cst_102 = arith.constant dense<0.000000e+00> : vector<20x576xf32>
    %451 = tpu.matmul %450, %448, %cst_102 {dimension_numbers = #tpu.dot_dimension_numbers<[1], [0], [0], [1], [0, 0, 1, 1], [], []>} : vector<20x10xbf16>, vector<10x576xbf16>, vector<20x576xf32> -> vector<20x576xf32>
    %452 = arith.addf %445, %451 : vector<20x576xf32>
    %c0_103 = arith.constant 0 : index
    %c0_104 = arith.constant 0 : index
    %453 = vector.load %arg7[%c0_103, %c0_104] : memref<20x1xf32, #tpu.memory_space<vmem>>, vector<20x1xf32>
    %454 = vector.broadcast %453 : vector<20x1xf32> to vector<20x576xf32>
    %455 = arith.addf %452, %454 : vector<20x576xf32>
    %c0_105 = arith.constant 0 : index
    %c0_106 = arith.constant 0 : index
    %456 = memref.load %arg1[%c0_105, %c0_106] : memref<1x1xf32, #tpu.memory_space<smem>>
    %457 = vector.extract_strided_slice %455 {offsets = [0, 2], sizes = [20, 574], strides = [1, 1]} : vector<20x576xf32> to vector<20x574xf32>
    %458 = vector.extract_strided_slice %455 {offsets = [0, 0], sizes = [20, 2], strides = [1, 1]} : vector<20x576xf32> to vector<20x2xf32>
    %459 = tpu.concatenate %457, %458 in 1 : vector<20x574xf32>, vector<20x2xf32> -> vector<20x576xf32>
    %460 = vector.extract_strided_slice %455 {offsets = [0, 48], sizes = [20, 528], strides = [1, 1]} : vector<20x576xf32> to vector<20x528xf32>
    %461 = vector.extract_strided_slice %455 {offsets = [0, 0], sizes = [20, 48], strides = [1, 1]} : vector<20x576xf32> to vector<20x48xf32>
    %462 = tpu.concatenate %460, %461 in 1 : vector<20x528xf32>, vector<20x48xf32> -> vector<20x576xf32>
    %463 = vector.extract_strided_slice %455 {offsets = [0, 50], sizes = [20, 526], strides = [1, 1]} : vector<20x576xf32> to vector<20x526xf32>
    %464 = vector.extract_strided_slice %455 {offsets = [0, 0], sizes = [20, 50], strides = [1, 1]} : vector<20x576xf32> to vector<20x50xf32>
    %465 = tpu.concatenate %463, %464 in 1 : vector<20x526xf32>, vector<20x50xf32> -> vector<20x576xf32>
    %466 = arith.maximumf %455, %459 : vector<20x576xf32>
    %467 = arith.maximumf %462, %465 : vector<20x576xf32>
    %468 = arith.maximumf %466, %467 : vector<20x576xf32>
    %469 = arith.addf %455, %459 : vector<20x576xf32>
    %470 = arith.addf %469, %462 : vector<20x576xf32>
    %471 = arith.addf %470, %465 : vector<20x576xf32>
    %cst_107 = arith.constant 2.500000e-01 : f32
    %472 = vector.broadcast %cst_107 : f32 to vector<20x576xf32>
    %473 = arith.mulf %471, %472 : vector<20x576xf32>
    %474 = vector.broadcast %456 : f32 to vector<20x576xf32>
    %475 = arith.mulf %474, %468 : vector<20x576xf32>
    %cst_108 = arith.constant 1.000000e+00 : f32
    %476 = arith.subf %cst_108, %456 : f32
    %477 = vector.broadcast %476 : f32 to vector<20x576xf32>
    %478 = arith.mulf %477, %473 : vector<20x576xf32>
    %479 = arith.addf %475, %478 : vector<20x576xf32>
    %cst_109 = arith.constant 0.000000e+00 : f32
    %480 = vector.broadcast %cst_109 : f32 to vector<20x576xf32>
    %481 = arith.maximumf %479, %480 : vector<20x576xf32>
    %482 = vector.extract_strided_slice %481 {offsets = [0, 0], sizes = [20, 1], strides = [1, 1]} : vector<20x576xf32> to vector<20x1xf32>
    %483 = vector.extract_strided_slice %481 {offsets = [0, 4], sizes = [20, 1], strides = [1, 1]} : vector<20x576xf32> to vector<20x1xf32>
    %484 = vector.extract_strided_slice %481 {offsets = [0, 8], sizes = [20, 1], strides = [1, 1]} : vector<20x576xf32> to vector<20x1xf32>
    %485 = vector.extract_strided_slice %481 {offsets = [0, 12], sizes = [20, 1], strides = [1, 1]} : vector<20x576xf32> to vector<20x1xf32>
    %486 = vector.extract_strided_slice %481 {offsets = [0, 96], sizes = [20, 1], strides = [1, 1]} : vector<20x576xf32> to vector<20x1xf32>
    %487 = vector.extract_strided_slice %481 {offsets = [0, 100], sizes = [20, 1], strides = [1, 1]} : vector<20x576xf32> to vector<20x1xf32>
    %488 = vector.extract_strided_slice %481 {offsets = [0, 104], sizes = [20, 1], strides = [1, 1]} : vector<20x576xf32> to vector<20x1xf32>
    %489 = vector.extract_strided_slice %481 {offsets = [0, 108], sizes = [20, 1], strides = [1, 1]} : vector<20x576xf32> to vector<20x1xf32>
    %490 = vector.extract_strided_slice %481 {offsets = [0, 192], sizes = [20, 1], strides = [1, 1]} : vector<20x576xf32> to vector<20x1xf32>
    %491 = vector.extract_strided_slice %481 {offsets = [0, 196], sizes = [20, 1], strides = [1, 1]} : vector<20x576xf32> to vector<20x1xf32>
    %492 = vector.extract_strided_slice %481 {offsets = [0, 200], sizes = [20, 1], strides = [1, 1]} : vector<20x576xf32> to vector<20x1xf32>
    %493 = vector.extract_strided_slice %481 {offsets = [0, 204], sizes = [20, 1], strides = [1, 1]} : vector<20x576xf32> to vector<20x1xf32>
    %494 = vector.extract_strided_slice %481 {offsets = [0, 288], sizes = [20, 1], strides = [1, 1]} : vector<20x576xf32> to vector<20x1xf32>
    %495 = vector.extract_strided_slice %481 {offsets = [0, 292], sizes = [20, 1], strides = [1, 1]} : vector<20x576xf32> to vector<20x1xf32>
    %496 = vector.extract_strided_slice %481 {offsets = [0, 296], sizes = [20, 1], strides = [1, 1]} : vector<20x576xf32> to vector<20x1xf32>
    %497 = vector.extract_strided_slice %481 {offsets = [0, 300], sizes = [20, 1], strides = [1, 1]} : vector<20x576xf32> to vector<20x1xf32>
    %498 = tpu.concatenate %482, %483, %484, %485, %486, %487, %488, %489, %490, %491, %492, %493, %494, %495, %496, %497 in 1 : vector<20x1xf32>, vector<20x1xf32>, vector<20x1xf32>, vector<20x1xf32>, vector<20x1xf32>, vector<20x1xf32>, vector<20x1xf32>, vector<20x1xf32>, vector<20x1xf32>, vector<20x1xf32>, vector<20x1xf32>, vector<20x1xf32>, vector<20x1xf32>, vector<20x1xf32>, vector<20x1xf32>, vector<20x1xf32> -> vector<20x16xf32>
    %499 = vector.extract_strided_slice %498 {offsets = [0, 0], sizes = [1, 16], strides = [1, 1]} : vector<20x16xf32> to vector<1x16xf32>
    %500 = vector.extract_strided_slice %498 {offsets = [1, 0], sizes = [1, 16], strides = [1, 1]} : vector<20x16xf32> to vector<1x16xf32>
    %501 = vector.extract_strided_slice %498 {offsets = [2, 0], sizes = [1, 16], strides = [1, 1]} : vector<20x16xf32> to vector<1x16xf32>
    %502 = vector.extract_strided_slice %498 {offsets = [3, 0], sizes = [1, 16], strides = [1, 1]} : vector<20x16xf32> to vector<1x16xf32>
    %503 = vector.extract_strided_slice %498 {offsets = [4, 0], sizes = [1, 16], strides = [1, 1]} : vector<20x16xf32> to vector<1x16xf32>
    %504 = vector.extract_strided_slice %498 {offsets = [5, 0], sizes = [1, 16], strides = [1, 1]} : vector<20x16xf32> to vector<1x16xf32>
    %505 = vector.extract_strided_slice %498 {offsets = [6, 0], sizes = [1, 16], strides = [1, 1]} : vector<20x16xf32> to vector<1x16xf32>
    %506 = vector.extract_strided_slice %498 {offsets = [7, 0], sizes = [1, 16], strides = [1, 1]} : vector<20x16xf32> to vector<1x16xf32>
    %507 = vector.extract_strided_slice %498 {offsets = [8, 0], sizes = [1, 16], strides = [1, 1]} : vector<20x16xf32> to vector<1x16xf32>
    %508 = vector.extract_strided_slice %498 {offsets = [9, 0], sizes = [1, 16], strides = [1, 1]} : vector<20x16xf32> to vector<1x16xf32>
    %509 = vector.extract_strided_slice %498 {offsets = [10, 0], sizes = [1, 16], strides = [1, 1]} : vector<20x16xf32> to vector<1x16xf32>
    %510 = vector.extract_strided_slice %498 {offsets = [11, 0], sizes = [1, 16], strides = [1, 1]} : vector<20x16xf32> to vector<1x16xf32>
    %511 = vector.extract_strided_slice %498 {offsets = [12, 0], sizes = [1, 16], strides = [1, 1]} : vector<20x16xf32> to vector<1x16xf32>
    %512 = vector.extract_strided_slice %498 {offsets = [13, 0], sizes = [1, 16], strides = [1, 1]} : vector<20x16xf32> to vector<1x16xf32>
    %513 = vector.extract_strided_slice %498 {offsets = [14, 0], sizes = [1, 16], strides = [1, 1]} : vector<20x16xf32> to vector<1x16xf32>
    %514 = vector.extract_strided_slice %498 {offsets = [15, 0], sizes = [1, 16], strides = [1, 1]} : vector<20x16xf32> to vector<1x16xf32>
    %515 = vector.extract_strided_slice %498 {offsets = [16, 0], sizes = [1, 16], strides = [1, 1]} : vector<20x16xf32> to vector<1x16xf32>
    %516 = vector.extract_strided_slice %498 {offsets = [17, 0], sizes = [1, 16], strides = [1, 1]} : vector<20x16xf32> to vector<1x16xf32>
    %517 = vector.extract_strided_slice %498 {offsets = [18, 0], sizes = [1, 16], strides = [1, 1]} : vector<20x16xf32> to vector<1x16xf32>
    %518 = vector.extract_strided_slice %498 {offsets = [19, 0], sizes = [1, 16], strides = [1, 1]} : vector<20x16xf32> to vector<1x16xf32>
    %519 = tpu.concatenate %499, %500, %501, %502, %503, %504, %505, %506, %507, %508, %509, %510, %511, %512, %513, %514 in 1 : vector<1x16xf32>, vector<1x16xf32>, vector<1x16xf32>, vector<1x16xf32>, vector<1x16xf32>, vector<1x16xf32>, vector<1x16xf32>, vector<1x16xf32>, vector<1x16xf32>, vector<1x16xf32>, vector<1x16xf32>, vector<1x16xf32>, vector<1x16xf32>, vector<1x16xf32>, vector<1x16xf32>, vector<1x16xf32> -> vector<1x256xf32>
    %520 = tpu.concatenate %515, %516, %517, %518 in 1 : vector<1x16xf32>, vector<1x16xf32>, vector<1x16xf32>, vector<1x16xf32> -> vector<1x64xf32>
    %521 = tpu.concatenate %519, %520 in 1 : vector<1x256xf32>, vector<1x64xf32> -> vector<1x320xf32>
    %522 = arith.truncf %521 : vector<1x320xf32> to vector<1x320xbf16>
    %c0_110 = arith.constant 0 : index
    %c0_111 = arith.constant 0 : index
    %523 = vector.load %arg8[%c0_110, %c0_111] : memref<320x50xbf16, #tpu.memory_space<vmem>>, vector<320x50xbf16>
    %cst_112 = arith.constant dense<0.000000e+00> : vector<1x50xf32>
    %524 = tpu.matmul %522, %523, %cst_112 {dimension_numbers = #tpu.dot_dimension_numbers<[1], [0], [0], [1], [0, 0, 1, 1], [], []>} : vector<1x320xbf16>, vector<320x50xbf16>, vector<1x50xf32> -> vector<1x50xf32>
    %c0_113 = arith.constant 0 : index
    %c0_114 = arith.constant 0 : index
    %525 = vector.load %arg9[%c0_113, %c0_114] : memref<1x50xf32, #tpu.memory_space<vmem>>, vector<1x50xf32>
    %526 = arith.addf %524, %525 : vector<1x50xf32>
    %cst_115 = arith.constant 0.000000e+00 : f32
    %527 = vector.broadcast %cst_115 : f32 to vector<1x50xf32>
    %528 = arith.maximumf %526, %527 : vector<1x50xf32>
    %529 = arith.truncf %528 : vector<1x50xf32> to vector<1x50xbf16>
    %c0_116 = arith.constant 0 : index
    %c0_117 = arith.constant 0 : index
    %530 = vector.load %arg10[%c0_116, %c0_117] : memref<50x10xbf16, #tpu.memory_space<vmem>>, vector<50x10xbf16>
    %cst_118 = arith.constant dense<0.000000e+00> : vector<1x10xf32>
    %531 = tpu.matmul %529, %530, %cst_118 {dimension_numbers = #tpu.dot_dimension_numbers<[1], [0], [0], [1], [0, 0, 1, 1], [], []>} : vector<1x50xbf16>, vector<50x10xbf16>, vector<1x10xf32> -> vector<1x10xf32>
    %c0_119 = arith.constant 0 : index
    %c0_120 = arith.constant 0 : index
    %532 = vector.load %arg11[%c0_119, %c0_120] : memref<1x10xf32, #tpu.memory_space<vmem>>, vector<1x10xf32>
    %533 = arith.addf %531, %532 : vector<1x10xf32>
    %cst_121 = arith.constant dense<0xFF800000> : vector<1xf32>
    %534 = vector.multi_reduction <maximumf>, %533, %cst_121 [1] : vector<1x10xf32> to vector<1xf32>
    %535 = vector.shape_cast %534 : vector<1xf32> to vector<1x1xf32>
    %536 = vector.broadcast %535 : vector<1x1xf32> to vector<1x10xf32>
    %537 = arith.subf %533, %536 : vector<1x10xf32>
    %538 = math.exp %537 : vector<1x10xf32>
    %cst_122 = arith.constant dense<0.000000e+00> : vector<1xf32>
    %539 = vector.multi_reduction <add>, %538, %cst_122 [1] : vector<1x10xf32> to vector<1xf32>
    %540 = vector.shape_cast %539 : vector<1xf32> to vector<1x1xf32>
    %541 = math.log %540 : vector<1x1xf32>
    %542 = arith.addf %535, %541 : vector<1x1xf32>
    %543 = vector.broadcast %542 : vector<1x1xf32> to vector<1x10xf32>
    %544 = arith.subf %533, %543 : vector<1x10xf32>
    %c0_123 = arith.constant 0 : index
    %c0_124 = arith.constant 0 : index
    %c0_125 = arith.constant 0 : index
    %545 = vector.load %arg12[%c0_123, %c0_124, %c0_125] : memref<1x1x10xf32, #tpu.memory_space<vmem>>, vector<1x1x10xf32>
    %546 = vector.shape_cast %545 : vector<1x1x10xf32> to vector<1x10xf32>
    %547 = vector.shape_cast %544 : vector<1x10xf32> to vector<1x1x10xf32>
    tpu.vector_store %arg12[%c0_123, %c0_124, %c0_125], %547 {strides = array<i32>} : memref<1x1x10xf32, #tpu.memory_space<vmem>>, vector<1x1x10xf32>,
    return
  }
  func.func @transform_0(%arg0: i32) -> (i32, i32) {
    %c0_i32 = arith.constant 0 : i32
    %c0_i32_0 = arith.constant 0 : i32
    %c0_i32_1 = arith.constant 0 : i32
    return %c0_i32, %c0_i32_0 : i32, i32
  }
  func.func @transform_1(%arg0: i32) -> (i32, i32, i32) {
    %c0_i32 = arith.constant 0 : i32
    %c0_i32_0 = arith.constant 0 : i32
    %c0_i32_1 = arith.constant 0 : i32
    return %arg0, %c0_i32, %c0_i32_0 : i32, i32, i32
  }
  func.func @transform_2(%arg0: i32) -> (i32, i32) {
    %c0_i32 = arith.constant 0 : i32
    %c0_i32_0 = arith.constant 0 : i32
    %c0_i32_1 = arith.constant 0 : i32
    return %c0_i32, %c0_i32_0 : i32, i32
  }
  func.func @transform_3(%arg0: i32) -> (i32, i32) {
    %c0_i32 = arith.constant 0 : i32
    %c0_i32_0 = arith.constant 0 : i32
    %c0_i32_1 = arith.constant 0 : i32
    return %c0_i32, %c0_i32_0 : i32, i32
  }
  func.func @transform_4(%arg0: i32) -> (i32, i32, i32) {
    %c0_i32 = arith.constant 0 : i32
    %c0_i32_0 = arith.constant 0 : i32
    %c0_i32_1 = arith.constant 0 : i32
    %c0_i32_2 = arith.constant 0 : i32
    return %c0_i32, %c0_i32_0, %c0_i32_1 : i32, i32, i32
  }
  func.func @transform_5(%arg0: i32) -> (i32, i32, i32) {
    %c0_i32 = arith.constant 0 : i32
    %c0_i32_0 = arith.constant 0 : i32
    %c0_i32_1 = arith.constant 0 : i32
    %c0_i32_2 = arith.constant 0 : i32
    return %c0_i32, %c0_i32_0, %c0_i32_1 : i32, i32, i32
  }
  func.func @transform_6(%arg0: i32) -> (i32, i32) {
    %c0_i32 = arith.constant 0 : i32
    %c0_i32_0 = arith.constant 0 : i32
    %c0_i32_1 = arith.constant 0 : i32
    return %c0_i32, %c0_i32_0 : i32, i32
  }
  func.func @transform_7(%arg0: i32) -> (i32, i32) {
    %c0_i32 = arith.constant 0 : i32
    %c0_i32_0 = arith.constant 0 : i32
    %c0_i32_1 = arith.constant 0 : i32
    return %c0_i32, %c0_i32_0 : i32, i32
  }
  func.func @transform_8(%arg0: i32) -> (i32, i32) {
    %c0_i32 = arith.constant 0 : i32
    %c0_i32_0 = arith.constant 0 : i32
    %c0_i32_1 = arith.constant 0 : i32
    return %c0_i32, %c0_i32_0 : i32, i32
  }
  func.func @transform_9(%arg0: i32) -> (i32, i32) {
    %c0_i32 = arith.constant 0 : i32
    %c0_i32_0 = arith.constant 0 : i32
    %c0_i32_1 = arith.constant 0 : i32
    return %c0_i32, %c0_i32_0 : i32, i32
  }
  func.func @transform_10(%arg0: i32) -> (i32, i32) {
    %c0_i32 = arith.constant 0 : i32
    %c0_i32_0 = arith.constant 0 : i32
    %c0_i32_1 = arith.constant 0 : i32
    return %c0_i32, %c0_i32_0 : i32, i32
  }
  func.func @transform_11(%arg0: i32) -> (i32, i32, i32) {
    %c0_i32 = arith.constant 0 : i32
    %c0_i32_0 = arith.constant 0 : i32
    %c0_i32_1 = arith.constant 0 : i32
    return %arg0, %c0_i32, %c0_i32_0 : i32, i32, i32
  }
}

</mosaic_0001>

<bundles_post_ra>
// kernel: net_forward.1
= control target key start
LH: loop header
LB: loop body
LE: loop exit
PB: predicated region body
PF: predicated region fallthrough
CT: control target
= control target key end

     0   :  { %s14759_s0 = inlined_call_operand.<no memory space> [shape: f32[1,1], index: 0, kind: input, shape index: {}]   ;;  %s14760_s1 = inlined_call_operand.vmem [shape: f32[2,1,784], index: 1, kind: input, shape index: {}]   ;;  %s14761_s2 = inlined_call_operand.vmem [shape: f32[10,25], index: 2, kind: input, shape index: {}]   ;;  %s14762_s3 = inlined_call_operand.vmem [shape: f32[10,1], index: 3, kind: input, shape index: {}]   ;;  %s14763_s4 = inlined_call_operand.vmem [shape: bf16[4,10,10], index: 4, kind: input, shape index: {}]   ;;  %s14764_s5 = inlined_call_operand.vmem [shape: bf16[25,20,10], index: 5, kind: input, shape index: {}]   ;;  %s14765_s6 = inlined_call_operand.vmem [shape: f32[20,1], index: 6, kind: input, shape index: {}]   ;;  %s14766_s7 = inlined_call_operand.vmem [shape: bf16[320,50], index: 7, kind: input, shape index: {}]   ;;  %s14767_s8 = inlined_call_operand.vmem [shape: f32[1,50], index: 8, kind: input, shape index: {}]   ;;  %s14768_s9 = inlined_call_operand.vmem [shape: bf16[50,10], index: 9, kind: input, shape index: {}]   ;;  %s14769_s10 = inlined_call_operand.vmem [shape: f32[1,10], index: 10, kind: input, shape index: {}]   ;;  %s14770_s11 = inlined_call_operand.hbm [shape: f32[2,1,10], index: 11, kind: output, shape index: {}]  }
   0x1   :  { %15033 = sst [smem:[#allocation199_spill]] %s14760_s1 }
   0x2   :  { %15034 = sst [smem:[#allocation200_spill]] %s14761_s2 }
   0x3   :  { %15035 = sst [smem:[#allocation201_spill]] %s14762_s3 }
   0x4   :  { %15036 = sst [smem:[#allocation202_spill]] %s14763_s4 }
   0x5   :  { %15037 = sst [smem:[#allocation203_spill]] %s14764_s5 }
   0x6   :  { %15038 = sst [smem:[#allocation204_spill]] %s14765_s6 }
   0x7   :  { %16 = sst [smem:[#allocation2]] %s14759_s0 }
   0x8   :  { %17 = vsyncpa [#allocation4], 0 }
   0x9   :  { %19 = vsyncpa [#allocation4 + $0x1], 0  ;;  %s10013_s19 = smov 0   ;;  %s10015_s20 = smov 0  }
   0xa   :  { %s10017_s21 = smov 0   ;;  %s10019_s22 = smov 0  }
   0xb LB: > { %15039 = sst [smem:[#allocation6_spill]] %s9842_s21  ;;  %s10034_s0 = sadd.s32 4294967295, %s9846_s22   ;;  %s9846_s22 = sphi %s10019_s22, %s15813_s22   ;;  %s9842_s21 = sphi %s10017_s21, %s15815_s21   ;;  %s9838_s20 = sphi %s10015_s20, %s15817_s20   ;;  %s9834_s19 = sphi %s10013_s19, %s15816_s19  }
   0xc   : > { %s8699_s23 = sadd.s32 4294967294, %s9846_s22   ;;  %s10038_s24 = sadd.s32 1, %s9846_s22  }
   0xd   : > { %15040 = sst [smem:[#allocation7_spill]] %s10038_s24  ;;  %s268_s25 = sadd.s32 1, %s9842_s21 }
   0xe   : > { %s265_s26 = ssub.s32 %s9846_s22, %s10038_s24  ;;  %p278_p0 = scmp.ne.s32.totalorder %s9842_s21, %s9838_s20 }
   0xf   : > { %p266_p1 = scmp.eq.s32.totalorder %s265_s26, 0  ;;  %p279_p2 = scmp.eq.s32.totalorder %s10034_s0, 1 }
  0x10   : > { %p284_p3 = scmp.ne.s32.totalorder %s9838_s20, %s9834_s19  ;;  %p285_p4 = scmp.eq.s32.totalorder %s8699_s23, 1 }
  0x11   : > { %s10049_s27 = scalar_select %p266_p1, %s9842_s21, %s268_s25  }
  0x12   : > { %p10051_p5 = por %p279_p2, %p278_p0  ;;  %p10055_p6 = por %p285_p4, %p284_p3 }
  0x13   : > { %15041 = sst [smem:[#allocation8_spill]] %s10049_s27  ;;  %p8702_p7 = scmp.ge.s32.totalorder %s9846_s22, 1 }
  0x14   : > { %s15043_s29 = scalar_select %p10055_p6, 1, 0 }
  0x15   : > { %p340_p8 = scmp.lt.s32.totalorder %s9846_s22, 3 }
  0x16   : > { %15044 = sst [smem:[#allocation9_spill]] %s15043_s29 }
  0x17   : > { %p341_p9 = pnand %p8702_p7, %p340_p8 }
  0x19   : > { %344 = sbr.rel (%p341_p9) target bundleno = 3297 (0xce1), region = 64 }
  0x20   : > { %s15045_s2 = sld [smem:[#allocation200_spill]]  ;;  %p378_p10 = scmp.lt.s32.totalorder %s10034_s0, 1  ;;  %v397_v1 = vlaneseq  ;;  %v9848_v2 = vmov 1   ;;  %v9849_v3 = vmov 2   ;;  %v9850_v10 = vmov 3  }
  0x21   : > { %9501 = vset.pattern.permute.xlu1 %v9848_v2  ;;  %9502 = vset.pattern.permute.xlu0 %v9849_v3  ;;  %s15046_s1 = sld [smem:[#allocation199_spill]]  ;;  %s14775_s25 = smov 127   ;;  %v9853_v22 = vmov 4   ;;  %v9855_v23 = vmov 5   ;;  %v9857_v24 = vmov 6   ;;  %v9859_v25 = vmov 7  }
  0x22   : > { %s379_s13 = scalar_select %p378_p10, %s10034_s0, 1  ;;  %v398_v4 = vshrl.u32 %v397_v1, 7  ;;  %v9861_v26 = vmov 8   ;;  %v9862_v27 = vmov 9   ;;  %v9864_v28 = vmov 10  }
  0x23   : > { %s14773_s26 = smov 126   ;;  %s14771_s30 = smov 125   ;;  %v9866_v29 = vmov 11   ;;  %v9868_v32 = vmov 12   ;;  %v9870_v40 = vmov 13   ;;  %v9872_v49 = vmov 14  }
  0x24   : > { %s9360_s16 = smul.u32 7, %s379_s13  ;;  %v403_v6 = vsub.s32 1, %v398_v4  ;;  %v453_v7 = vsub.s32 6, %v398_v4  ;;  %v419_v8 = vsub.s32 5, %v398_v4  ;;  %v411_v9 = vsub.s32 3, %v398_v4  ;;  %s14788_s12 = smov 124  }
  0x25   : > { %v10079_v12 = vsub.s32 0, %v398_v4  ;;  %v407_v18 = vsub.s32 2, %v398_v4  ;;  %v415_v19 = vsub.s32 4, %v398_v4  ;;  %s14777_s13 = smov 100   ;;  %s14786_s14 = smov 99   ;;  %v9875_v60 = vmov 15  }
  0x26   : > { %v10064_v0 = vld [vmem:[%s15045_s2] sm:$0xff]  ;;  %v10073_v5 = vld [vmem:[%s15045_s2 + $0x8] sm:$0x3]  ;;  %s9863_s15 = smov 98   ;;  %s14817_s17 = smov 96   ;;  %vm14961_vm0 = vcmask 1039360  }
  0x27   : > { %483 = vperm.xlu1 %9501, %v10064_v0   ;;  %566 = vperm.xlu0 %9502, %v10064_v0   ;;  %s381_s23 = scalar_lea.vmem %s15046_s1, %s9360_s16  ;;  %s9865_s16 = smov 97   ;;  %vm14960_vm1 = vcmask 1031168   ;;  %vm635_vm2 = vcmask 1022976   ;;  %vm14959_vm3 = vcmask 1014784   ;;  %vm801_vm4 = vcmask 818176  }
  0x28   : > { %v383_v11 = vld [vmem:[%s381_s23] sm:$0x7f]  ;;  %s14826_s18 = smov 72   ;;  %s9871_s23 = smov 71   ;;  %vm889_vm5 = vcmask 809984   ;;  %vm977_vm6 = vcmask 801792  }
  0x29   : > { %v10081_v13 = vrot.slane %v383_v11, %v403_v6  ;;  %v10083_v14 = vrot.slane %v383_v11, %v453_v7  ;;  %v10085_v15 = vrot.slane %v383_v11, %v419_v8  ;;  %v10089_v16 = vrot.slane %v383_v11, %v411_v9  ;;  %s15168_s3 = sld [smem:[#allocation201_spill]]  ;;  %s15683_s1 = smov 56  }
  0x2a   : > { %v10092_v17 = vrot.slane %v383_v11, %v10079_v12  ;;  %v10099_v20 = vrot.slane %v383_v11, %v407_v18  ;;  %v10107_v21 = vrot.slane %v383_v11, %v415_v19  ;;  %v14782_v7 = vmov 16   ;;  %s15700_s4 = sld [smem:[#allocation202_spill]]  ;;  %s9934_s27 = smov 90  }
  0x2b   : > { %487 = vperm.xlu1 %9501, %v10073_v5   ;;  %9505 = vset.pattern.permute.xlu0 %v9850_v10  ;;  %15047 = vst [vmem:[#allocation10_spill] sm:$0xff] %v10085_v15  ;;  %15048 = vst [vmem:[#allocation11_spill] sm:$0xff] %v10089_v16  ;;  %vm1065_vm7 = vcmask 793600   ;;  %vm15011_vm8 = vcmask 588800   ;;  %vm14963_vm9 = vcmask 785408   ;;  %vm1417_vm10 = vcmask 572416  }
  0x2c   : > { %457 = vrot.lane.b32.xlu0 %v10081_v13, %s14775_s25  ;;  %15049 = vst [vmem:[#allocation12_spill] sm:$0xff] %v10107_v21  ;;  %vm817_vm11 = vcmask 949248   ;;  %vm1329_vm12 = vcmask 580608   ;;  %vm905_vm13 = vcmask 941056   ;;  %vm1593_vm14 = vcmask 556032   ;;  %s15708_s21 = smov 126  }
  0x2d   : > { %vm993_vm15 = vcmask 932864   ;;  %s15714_s5 = sld [smem:[#allocation203_spill]]  ;;  %s15738_s6 = sld [smem:[#allocation204_spill]] }
  0x2f   : > { %9503 = vset.pattern.permute.xlu1 %v9849_v3 }
  0x30   : > { %570 = vperm.xlu1 %9503, %v10073_v5   ;;  %461 = vrot.lane.b32.xlu0 %v10089_v16, %s14775_s25 }
  0x34   : > { %455 = vrot.lane.b32.xlu1 %v10092_v17, %s14775_s25  ;;  %653 = vperm.xlu0 %9505, %v10073_v5  }
  0x35   : > { %9504 = vset.pattern.permute.xlu1 %v9850_v10 }
  0x38   : > { %459 = vrot.lane.b32.xlu1 %v10099_v20, %s14775_s25  ;;  %540 = vrot.lane.b32.xlu0 %v10081_v13, %s14773_s26 }
  0x39   : > { %9507 = vset.pattern.permute.xlu0 %v9853_v22 }
  0x3c   : > { %649 = vperm.xlu1 %9504, %v10064_v0   ;;  %544 = vrot.lane.b32.xlu0 %v10089_v16, %s14773_s26 }
  0x40   : > { %463 = vrot.lane.b32.xlu1 %v10107_v21, %s14775_s25  ;;  %736 = vperm.xlu0 %9507, %v10073_v5  }
  0x41   : > { %9506 = vset.pattern.permute.xlu1 %v9853_v22 }
  0x44   : > { %538 = vrot.lane.b32.xlu1 %v10092_v17, %s14773_s26  ;;  %623 = vrot.lane.b32.xlu0 %v10081_v13, %s14771_s30 }
  0x45   : > { %9509 = vset.pattern.permute.xlu0 %v9855_v23 }
  0x48   : > { %542 = vrot.lane.b32.xlu1 %v10099_v20, %s14773_s26  ;;  %627 = vrot.lane.b32.xlu0 %v10089_v16, %s14771_s30 }
  0x4c   : > { %732 = vperm.xlu1 %9506, %v10064_v0   ;;  %824 = vperm.xlu0 %9509, %v10073_v5  }
  0x50   : > { %546 = vrot.lane.b32.xlu1 %v10107_v21, %s14773_s26  ;;  %706 = vrot.lane.b32.xlu0 %v10081_v13, %s14788_s12 }
  0x51   : > { %9508 = vset.pattern.permute.xlu1 %v9855_v23  ;;  %9511 = vset.pattern.permute.xlu0 %v9857_v24 }
  0x54   : > { %621 = vrot.lane.b32.xlu1 %v10092_v17, %s14771_s30  ;;  %710 = vrot.lane.b32.xlu0 %v10089_v16, %s14788_s12 }
  0x58   : > { %625 = vrot.lane.b32.xlu1 %v10099_v20, %s14771_s30  ;;  %912 = vperm.xlu0 %9511, %v10073_v5  }
  0x5c   : > { %820 = vperm.xlu1 %9508, %v10064_v0   ;;  %789 = vrot.lane.b32.xlu0 %v10081_v13, %s14777_s13 }
  0x5d   : > { %9513 = vset.pattern.permute.xlu0 %v9859_v25 }
  0x60   : > { %629 = vrot.lane.b32.xlu1 %v10107_v21, %s14771_s30  ;;  %793 = vrot.lane.b32.xlu0 %v10089_v16, %s14777_s13 }
  0x61   : > { %9510 = vset.pattern.permute.xlu1 %v9857_v24 }
  0x64   : > { %704 = vrot.lane.b32.xlu1 %v10092_v17, %s14788_s12  ;;  %1000 = vperm.xlu0 %9513, %v10073_v5  }
  0x68   : > { %708 = vrot.lane.b32.xlu1 %v10099_v20, %s14788_s12  ;;  %877 = vrot.lane.b32.xlu0 %v10081_v13, %s14786_s14 }
  0x69   : > { %9515 = vset.pattern.permute.xlu0 %v9861_v26 }
  0x6c   : > { %908 = vperm.xlu1 %9510, %v10064_v0   ;;  %881 = vrot.lane.b32.xlu0 %v10089_v16, %s14786_s14 }
  0x70   : > { %712 = vrot.lane.b32.xlu1 %v10107_v21, %s14788_s12  ;;  %1088 = vperm.xlu0 %9515, %v10073_v5  }
  0x71   : > { %9512 = vset.pattern.permute.xlu1 %v9859_v25 }
  0x74   : > { %787 = vrot.lane.b32.xlu1 %v10092_v17, %s14777_s13  ;;  %467 = vrot.lane.b32.xlu0 %v10083_v14, %s14775_s25 }
  0x75   : > { %9517 = vset.pattern.permute.xlu0 %v9862_v27 }
  0x78   : > { %791 = vrot.lane.b32.xlu1 %v10099_v20, %s14777_s13  ;;  %965 = vrot.lane.b32.xlu0 %v10081_v13, %s9863_s15 }
  0x7c   : > { %996 = vperm.xlu1 %9512, %v10064_v0   ;;  %969 = vrot.lane.b32.xlu0 %v10089_v16, %s9863_s15 }
  0x80   : > { %795 = vrot.lane.b32.xlu1 %v10107_v21, %s14777_s13  ;;  %1176 = vperm.xlu0 %9517, %v10073_v5  }
  0x81   : > { %9514 = vset.pattern.permute.xlu1 %v9861_v26  ;;  %v14781_v26 = vmov 17  }
  0x84   : > { %875 = vrot.lane.b32.xlu1 %v10092_v17, %s14786_s14  ;;  %550 = vrot.lane.b32.xlu0 %v10083_v14, %s14773_s26 }
  0x85   : > { %9519 = vset.pattern.permute.xlu0 %v9864_v28 }
  0x88   : > { %879 = vrot.lane.b32.xlu1 %v10099_v20, %s14786_s14  ;;  %1053 = vrot.lane.b32.xlu0 %v10081_v13, %s9865_s16 }
  0x8c   : > { %1084 = vperm.xlu1 %9514, %v10064_v0   ;;  %1057 = vrot.lane.b32.xlu0 %v10089_v16, %s9865_s16 }
  0x90   : > { %465 = vrot.lane.b32.xlu1 %v10085_v15, %s14775_s25  ;;  %1264 = vperm.xlu0 %9519, %v10073_v5   ;;  %s14779_s25 = smov 116  }
  0x91   : > { %9516 = vset.pattern.permute.xlu1 %v9862_v27 }
  0x94   : > { %883 = vrot.lane.b32.xlu1 %v10107_v21, %s14786_s14  ;;  %633 = vrot.lane.b32.xlu0 %v10083_v14, %s14771_s30 }
  0x95   : > { %9521 = vset.pattern.permute.xlu0 %v9866_v29 }
  0x98   : > { %963 = vrot.lane.b32.xlu1 %v10092_v17, %s9863_s15  ;;  %1141 = vrot.lane.b32.xlu0 %v10081_v13, %s14817_s17 }
  0x9c   : > { %967 = vrot.lane.b32.xlu1 %v10099_v20, %s9863_s15  ;;  %1145 = vrot.lane.b32.xlu0 %v10089_v16, %s14817_s17 }
  0xa0   : > { %1172 = vperm.xlu1 %9516, %v10064_v0   ;;  %1352 = vperm.xlu0 %9521, %v10073_v5  }
  0xa4   : > { %548 = vrot.lane.b32.xlu1 %v10085_v15, %s14773_s26  ;;  %716 = vrot.lane.b32.xlu0 %v10083_v14, %s14788_s12  ;;  %s9874_s26 = smov 70  }
  0xa5   : > { %9518 = vset.pattern.permute.xlu1 %v9864_v28  ;;  %9523 = vset.pattern.permute.xlu0 %v9868_v32 }
  0xa6   : > { %v10199_v30 = vpop.permute.xlu1 %483  ;;  %v10201_v31 = vpop.permute.xlu0 %566 }
  0xa8   : > { %971 = vrot.lane.b32.xlu1 %v10107_v21, %s9863_s15  ;;  %1229 = vrot.lane.b32.xlu0 %v10081_v13, %s14826_s18 }
  0xaa   : > { %v10207_v33 = vpop.permute.xlu1 %487  ;;  %v10209_v34 = vpop.permute.xlu0 %457 }
  0xac   : > { %1051 = vrot.lane.b32.xlu1 %v10092_v17, %s9865_s16  ;;  %1233 = vrot.lane.b32.xlu0 %v10089_v16, %s14826_s18 }
  0xae   : > { %v10221_v36 = vpop.permute.xlu0 %461 }
  0xaf   : > { %v10215_v35 = vpop.permute.xlu1 %570 }
  0xb0   : > { %1055 = vrot.lane.b32.xlu1 %v10099_v20, %s9865_s16  ;;  %1440 = vperm.xlu0 %9523, %v10073_v5  }
  0xb3   : > { %v10224_v37 = vpop.permute.xlu1 %455  ;;  %v10227_v38 = vpop.permute.xlu0 %653 }
  0xb4   : > { %1260 = vperm.xlu1 %9518, %v10064_v0   ;;  %1235 = vrot.lane.b32.xlu0 %v10107_v21, %s14826_s18 }
  0xb5   : > { %9524 = vset.pattern.permute.xlu0 %v9870_v40 }
  0xb7   : > { %v10231_v39 = vpop.permute.xlu1 %459  ;;  %v10235_v41 = vpop.permute.xlu0 %540 }
  0xb8   : > { %631 = vrot.lane.b32.xlu1 %v10085_v15, %s14771_s30  ;;  %1315 = vrot.lane.b32.xlu0 %v10092_v17, %s9871_s23  ;;  %s9873_s30 = smov 115  }
  0xb9   : > { %9520 = vset.pattern.permute.xlu1 %v9866_v29 }
  0xbb   : > { %v10239_v42 = vpop.permute.xlu1 %649  ;;  %v10243_v43 = vpop.permute.xlu0 %544 }
  0xbc   : > { %1059 = vrot.lane.b32.xlu1 %v10107_v21, %s9865_s16  ;;  %1319 = vrot.lane.b32.xlu0 %v10099_v20, %s9871_s23 }
  0xbf   : > { %v10247_v44 = vpop.permute.xlu1 %463  ;;  %v10251_v45 = vpop.permute.xlu0 %736 }
  0xc0   : > { %1139 = vrot.lane.b32.xlu1 %v10092_v17, %s14817_s17  ;;  %1524 = vperm.xlu0 %9524, %v10064_v0  }
  0xc3   : > { %v10254_v46 = vpop.permute.xlu1 %538  ;;  %v10258_v47 = vpop.permute.xlu0 %623 }
  0xc4   : > { %1143 = vrot.lane.b32.xlu1 %v10099_v20, %s14817_s17  ;;  %887 = vrot.lane.b32.xlu0 %v10083_v14, %s14786_s14 }
  0xc5   : > { %9527 = vset.pattern.permute.xlu0 %v9872_v49 }
  0xc7   : > { %v10262_v48 = vpop.permute.xlu1 %542  ;;  %v10265_v50 = vpop.permute.xlu0 %627 }
  0xc8   : > { %1348 = vperm.xlu1 %9520, %v10064_v0   ;;  %902 = vrot.lane.b32.xlu0 %v10092_v17, %s9873_s30  ;;  %s14876_s30 = smov 69  }
  0xcb   : > { %v10268_v51 = vpop.permute.xlu1 %732  ;;  %v10272_v52 = vpop.permute.xlu0 %824 }
  0xcc   : > { %714 = vrot.lane.b32.xlu1 %v10085_v15, %s14788_s12  ;;  %1405 = vrot.lane.b32.xlu0 %v10081_v13, %s9874_s26  ;;  %s9886_s12 = smov 114  }
  0xcd   : > { %9522 = vset.pattern.permute.xlu1 %v9868_v32 }
  0xcf   : > { %v10276_v53 = vpop.permute.xlu1 %546  ;;  %v10280_v54 = vpop.permute.xlu0 %706 }
  0xd0   : > { %1147 = vrot.lane.b32.xlu1 %v10107_v21, %s14817_s17  ;;  %1409 = vrot.lane.b32.xlu0 %v10089_v16, %s9874_s26 }
  0xd3   : > { %v10284_v55 = vpop.permute.xlu1 %621  ;;  %v10288_v56 = vpop.permute.xlu0 %710 }
  0xd4   : > { %1227 = vrot.lane.b32.xlu1 %v10092_v17, %s14826_s18  ;;  %1616 = vperm.xlu0 %9527, %v10073_v5  }
  0xd7   : > { %v10291_v57 = vpop.permute.xlu1 %625  ;;  %v10295_v58 = vpop.permute.xlu0 %912 }
  0xd8   : > { %1231 = vrot.lane.b32.xlu1 %v10099_v20, %s14826_s18  ;;  %1411 = vrot.lane.b32.xlu0 %v10107_v21, %s9874_s26 }
  0xd9   : > { %9528 = vset.pattern.permute.xlu0 %v9875_v60 }
  0xdb   : > { %v10299_v59 = vpop.permute.xlu1 %820  ;;  %v10302_v61 = vpop.permute.xlu0 %789 }
  0xdc   : > { %1436 = vperm.xlu1 %9522, %v10064_v0   ;;  %1491 = vrot.lane.b32.xlu0 %v10092_v17, %s14876_s30 }
  0xdf   : > { %v10306_v62 = vpop.permute.xlu1 %629  ;;  %v10310_v63 = vpop.permute.xlu0 %793 }
  0xe0   : > { %797 = vrot.lane.b32.xlu1 %v10085_v15, %s14777_s13  ;;  %1495 = vrot.lane.b32.xlu0 %v10099_v20, %s14876_s30 }
  0xe1   : > { %9525 = vset.pattern.permute.xlu1 %v9870_v40 }
  0xe3   : > { %v10314_v1 = vpop.permute.xlu1 %704  ;;  %v10318_v2 = vpop.permute.xlu0 %1000 }
  0xe4   : > { %799 = vrot.lane.b32.xlu1 %v10083_v14, %s14777_s13  ;;  %15050 = vst [vmem:[#allocation13_spill] sm:$0xff] %v10318_v2  ;;  %1700 = vperm.xlu0 %9528, %v10064_v0   ;;  %s9879_s13 = smov 113  }
  0xe7   : > { %v10321_v3 = vpop.permute.xlu1 %708  ;;  %v10325_v4 = vpop.permute.xlu0 %877 }
  0xe8   : > { %814 = vrot.lane.b32.xlu1 %v10092_v17, %s14779_s25  ;;  %1063 = vrot.lane.b32.xlu0 %v10083_v14, %s9865_s16  ;;  %s14847_s25 = smov 68  }
  0xe9   : > { %9531 = vset.pattern.permute.xlu0 %v14782_v7 }
  0xeb   : > { %v10329_v6 = vpop.permute.xlu1 %908  ;;  %v10334_v8 = vpop.permute.xlu0 %881 }
  0xec   : > { %1317 = vrot.lane.b32.xlu1 %v10081_v13, %s9871_s23  ;;  %1078 = vrot.lane.b32.xlu0 %v10092_v17, %s9879_s13  ;;  %s14840_s13 = smov 44  }
  0xef   : > { %v10337_v9 = vpop.permute.xlu1 %712  ;;  %v10341_v10 = vpop.permute.xlu0 %1088 }
  0xf0   : > { %1321 = vrot.lane.b32.xlu1 %v10089_v16, %s9871_s23  ;;  %15051 = vst [vmem:[#allocation14_spill] sm:$0xff] %v10341_v10  ;;  %1581 = vrot.lane.b32.xlu0 %v10081_v13, %s14847_s25  ;;  %v14792_v10 = vmov 0  }
  0xf1   : > { %3089 = vmatprep.mubr.bf16.mxu0 %v14792_v10  ;;  %3132 = vmatprep.mubr.bf16.mxu1 %v14792_v10 }
  0xf3   : > { %v10345_v11 = vpop.permute.xlu1 %787  ;;  %v10348_v18 = vpop.permute.xlu0 %467 }
  0xf4   : > { %1528 = vperm.xlu1 %9525, %v10073_v5   ;;  %1585 = vrot.lane.b32.xlu0 %v10089_v16, %s14847_s25 }
  0xf7   : > { %v10352_v19 = vpop.permute.xlu1 %791  ;;  %v10356_v22 = vpop.permute.xlu0 %965 }
  0xf8   : > { %885 = vrot.lane.b32.xlu1 %v10085_v15, %s14786_s14  ;;  %1792 = vperm.xlu0 %9531, %v10073_v5   ;;  %s14809_s14 = smov 88  }
  0xf9   : > { %9526 = vset.pattern.permute.xlu1 %v9872_v49 }
  0xfb   : > { %v10359_v23 = vpop.permute.xlu1 %996  ;;  %v10363_v24 = vpop.permute.xlu0 %969 }
  0xfc   : > { %15052 = vst [vmem:[#allocation15_spill] sm:$0xff] %v10359_v23  ;;  %1323 = vrot.lane.b32.xlu1 %v10107_v21, %s9871_s23  ;;  %15053 = vst [vmem:[#allocation16_spill] sm:$0xff] %v10363_v24  ;;  %1587 = vrot.lane.b32.xlu0 %v10107_v21, %s14847_s25 }
  0xfd   : > { %9532 = vset.pattern.permute.xlu0 %v14781_v26 }
  0xff   : > { %v10367_v25 = vpop.permute.xlu1 %795  ;;  %v10372_v27 = vpop.permute.xlu0 %1176 }
 0x100   : > { %1403 = vrot.lane.b32.xlu1 %v10092_v17, %s9874_s26  ;;  %15054 = vst [vmem:[#allocation17_spill] sm:$0xff] %v10372_v27  ;;  %1667 = vrot.lane.b32.xlu0 %v10092_v17, %s14840_s13  ;;  %v14791_v27 = vmov 18  }
 0x103   : > { %v10376_v28 = vpop.permute.xlu1 %875  ;;  %v10380_v29 = vpop.permute.xlu0 %550 }
 0x104   : > { %1407 = vrot.lane.b32.xlu1 %v10099_v20, %s9874_s26  ;;  %15055 = vst [vmem:[#allocation18_spill] sm:$0xff] %v10380_v29  ;;  %1671 = vrot.lane.b32.xlu0 %v10099_v20, %s14840_s13 }
 0x107   : > { %v10384_v32 = vpop.permute.xlu1 %879  ;;  %v10387_v40 = vpop.permute.xlu0 %1053 }
 0x108   : > { %1612 = vperm.xlu1 %9526, %v10064_v0   ;;  %15056 = vst [vmem:[#allocation19_spill] sm:$0xff] %v10387_v40  ;;  %1876 = vperm.xlu0 %9532, %v10064_v0   ;;  %v14803_v40 = vmov 19  }
 0x10b   : > { %v10390_v49 = vpop.permute.xlu1 %1084  ;;  %v10394_v26 = vpop.permute.xlu0 %1057 }
 0x10c   : > { %15057 = vst [vmem:[#allocation20_spill] sm:$0xff] %v10390_v49  ;;  %973 = vrot.lane.b32.xlu1 %v10085_v15, %s9863_s15  ;;  %15058 = vst [vmem:[#allocation21_spill] sm:$0xff] %v10394_v26  ;;  %1239 = vrot.lane.b32.xlu0 %v10083_v14, %s14826_s18 }
 0x10d   : > { %9529 = vset.pattern.permute.xlu1 %v9875_v60  ;;  %9535 = vset.pattern.permute.xlu0 %v14791_v27 }
 0x10f   : > { %v10398_v7 = vpop.permute.xlu1 %465  ;;  %v10405_v49 = vpop.permute.xlu0 %1264 }
 0x110   : > { %975 = vrot.lane.b32.xlu1 %v10083_v14, %s9863_s15  ;;  %15059 = vst [vmem:[#allocation22_spill] sm:$0xff] %v10405_v49  ;;  %1254 = vrot.lane.b32.xlu0 %v10092_v17, %s14809_s14  ;;  %s9887_s15 = smov 43   ;;  %s14883_s14 = smov 41  }
 0x113   : > { %v10409_v60 = vpop.permute.xlu1 %883  ;;  %v10412_v26 = vpop.permute.xlu0 %633 }
 0x114   : > { %990 = vrot.lane.b32.xlu1 %v10092_v17, %s9886_s12  ;;  %15060 = vst [vmem:[#allocation23_spill] sm:$0xff] %v10412_v26  ;;  %1757 = vrot.lane.b32.xlu0 %v10081_v13, %s9887_s15  ;;  %s14972_s12 = smov 42  }
 0x117   : > { %v10416_v27 = vpop.permute.xlu1 %963  ;;  %v10420_v10 = vpop.permute.xlu0 %1141 }
 0x118   : > { %1493 = vrot.lane.b32.xlu1 %v10081_v13, %s14876_s30  ;;  %15061 = vst [vmem:[#allocation24_spill] sm:$0xff] %v10420_v10  ;;  %1761 = vrot.lane.b32.xlu0 %v10089_v16, %s9887_s15 }
 0x11b   : > { %v10424_v49 = vpop.permute.xlu1 %967  ;;  %v10428_v26 = vpop.permute.xlu0 %1145 }
 0x11c   : > { %1497 = vrot.lane.b32.xlu1 %v10089_v16, %s14876_s30  ;;  %15062 = vst [vmem:[#allocation25_spill] sm:$0xff] %v10428_v26  ;;  %1968 = vperm.xlu0 %9535, %v10073_v5   ;;  %v15066_v26 = vmov 16  }
 0x11f   : > { %v10431_v2 = vpop.permute.xlu1 %1172  ;;  %v10434_v23 = vpop.permute.xlu0 %1352 }
 0x120   : > { %15063 = vst [vmem:[#allocation26_spill] sm:$0xff] %v10431_v2  ;;  %1704 = vperm.xlu1 %9529, %v10073_v5   ;;  %15064 = vst [vmem:[#allocation27_spill] sm:$0xff] %v10434_v23  ;;  %1763 = vrot.lane.b32.xlu0 %v10107_v21, %s9887_s15 }
 0x121   : > { %9536 = vset.pattern.permute.xlu0 %v14803_v40 }
 0x123   : > { %v10438_v10 = vpop.permute.xlu1 %548  ;;  %v10444_v29 = vpop.permute.xlu0 %716 }
 0x124   : > { %15065 = vst [vmem:[#allocation28_spill] sm:$0xff] %v10438_v10  ;;  %1061 = vrot.lane.b32.xlu1 %v10085_v15, %s9865_s16  ;;  %15067 = vst [vmem:[#allocation29_spill] sm:$0xff] %v10444_v29  ;;  %1843 = vrot.lane.b32.xlu0 %v10092_v17, %s14972_s12  ;;  %s9891_s16 = smov 86  }
 0x125   : > { %9530 = vset.pattern.permute.xlu1 %v15066_v26 }
 0x127   : > { %v10448_v23 = vpop.permute.xlu1 %971  ;;  %v10452_v2 = vpop.permute.xlu0 %1229 }
 0x128   : > { %15068 = vst [vmem:[#allocation30_spill] sm:$0xff] %v10448_v23  ;;  %1499 = vrot.lane.b32.xlu1 %v10107_v21, %s14876_s30  ;;  %15069 = vst [vmem:[#allocation31_spill] sm:$0xff] %v10452_v2  ;;  %1847 = vrot.lane.b32.xlu0 %v10099_v20, %s14972_s12 }
 0x12b   : > { %v10456_v10 = vpop.permute.xlu1 %1051  ;;  %v10460_v26 = vpop.permute.xlu0 %1233 }
 0x12c   : > { %15070 = vst [vmem:[#allocation32_spill] sm:$0xff] %v10456_v10  ;;  %1579 = vrot.lane.b32.xlu1 %v10092_v17, %s14847_s25  ;;  %15071 = vst [vmem:[#allocation33_spill] sm:$0xff] %v10460_v26  ;;  %2052 = vperm.xlu0 %9536, %v10064_v0   ;;  %v14812_v10 = vmov 20  }
 0x12f   : > { %v10463_v40 = vpop.permute.xlu1 %1055  ;;  %v10467_v29 = vpop.permute.xlu0 %1440 }
 0x130   : > { %15072 = vst [vmem:[#allocation34_spill] sm:$0xff] %v10463_v40  ;;  %1583 = vrot.lane.b32.xlu1 %v10099_v20, %s14847_s25  ;;  %15073 = vst [vmem:[#allocation35_spill] sm:$0xff] %v10467_v29  ;;  %1415 = vrot.lane.b32.xlu0 %v10083_v14, %s9874_s26  ;;  %v15077_v29 = vmov 17  }
 0x131   : > { %9539 = vset.pattern.permute.xlu0 %v14812_v10 }
 0x133   : > { %v10471_v2 = vpop.permute.xlu1 %1260  ;;  %v10475_v26 = vpop.permute.xlu0 %1235 }
 0x134   : > { %15074 = vst [vmem:[#allocation36_spill] sm:$0xff] %v10471_v2  ;;  %1788 = vperm.xlu1 %9530, %v10064_v0   ;;  %15075 = vst [vmem:[#allocation37_spill] sm:$0xff] %v10475_v26  ;;  %1430 = vrot.lane.b32.xlu0 %v10092_v17, %s9891_s16  ;;  %s14829_s16 = smov 112  }
 0x137   : > { %v10478_v40 = vpop.permute.xlu1 %631  ;;  %v10483_v23 = vpop.permute.xlu0 %1315 }
 0x138   : > { %15076 = vst [vmem:[#allocation38_spill] sm:$0xff] %v10478_v40  ;;  %1149 = vrot.lane.b32.xlu1 %v10085_v15, %s14817_s17  ;;  %15078 = vst [vmem:[#allocation39_spill] sm:$0xff] %v10483_v23  ;;  %1933 = vrot.lane.b32.xlu0 %v10081_v13, %s14883_s14 }
 0x139   : > { %9533 = vset.pattern.permute.xlu1 %v15077_v29 }
 0x13b   : > { %v10487_v2 = vpop.permute.xlu1 %1059  ;;  %v10491_v10 = vpop.permute.xlu0 %1319 }
 0x13c   : > { %15079 = vst [vmem:[#allocation40_spill] sm:$0xff] %v10487_v2  ;;  %1151 = vrot.lane.b32.xlu1 %v10083_v14, %s14817_s17  ;;  %15080 = vst [vmem:[#allocation41_spill] sm:$0xff] %v10491_v10  ;;  %1937 = vrot.lane.b32.xlu0 %v10089_v16, %s14883_s14  ;;  %s14880_s17 = smov 40  }
 0x13f   : > { %v10495_v40 = vpop.permute.xlu1 %1139  ;;  %v10499_v29 = vpop.permute.xlu0 %1524 }
 0x140   : > { %15081 = vst [vmem:[#allocation42_spill] sm:$0xff] %v10495_v40  ;;  %1166 = vrot.lane.b32.xlu1 %v10092_v17, %s14829_s16  ;;  %15082 = vst [vmem:[#allocation43_spill] sm:$0xff] %v10499_v29  ;;  %2144 = vperm.xlu0 %9539, %v10073_v5   ;;  %v14821_v40 = vmov 21   ;;  %s14845_s16 = smov 16  }
 0x143   : > { %v10502_v23 = vpop.permute.xlu1 %1143  ;;  %v10506_v2 = vpop.permute.xlu0 %887 }
 0x144   : > { %15083 = vst [vmem:[#allocation44_spill] sm:$0xff] %v10502_v23  ;;  %1669 = vrot.lane.b32.xlu1 %v10081_v13, %s14840_s13  ;;  %15084 = vst [vmem:[#allocation45_spill] sm:$0xff] %v10506_v2  ;;  %1939 = vrot.lane.b32.xlu0 %v10107_v21, %s14883_s14 }
 0x145   : > { %9540 = vset.pattern.permute.xlu0 %v14821_v40  ;;  %v15090_v40 = vmov 18  }
 0x147   : > { %v10510_v10 = vpop.permute.xlu1 %1348  ;;  %v10515_v29 = vpop.permute.xlu0 %902 }
 0x148   : > { %15085 = vst [vmem:[#allocation46_spill] sm:$0xff] %v10510_v10  ;;  %1673 = vrot.lane.b32.xlu1 %v10089_v16, %s14840_s13  ;;  %15086 = vst [vmem:[#allocation47_spill] sm:$0xff] %v10515_v29  ;;  %2019 = vrot.lane.b32.xlu0 %v10092_v17, %s14880_s17 }
 0x14b   : > { %v10519_v23 = vpop.permute.xlu1 %714  ;;  %v10522_v2 = vpop.permute.xlu0 %1405 }
 0x14c   : > { %15087 = vst [vmem:[#allocation48_spill] sm:$0xff] %v10519_v23  ;;  %1880 = vperm.xlu1 %9533, %v10073_v5   ;;  %15088 = vst [vmem:[#allocation49_spill] sm:$0xff] %v10522_v2  ;;  %2023 = vrot.lane.b32.xlu0 %v10099_v20, %s14880_s17 }
 0x14f   : > { %v10526_v10 = vpop.permute.xlu1 %1147  ;;  %v10531_v29 = vpop.permute.xlu0 %1409 }
 0x150   : > { %15089 = vst [vmem:[#allocation50_spill] sm:$0xff] %v10526_v10  ;;  %1237 = vrot.lane.b32.xlu1 %v10085_v15, %s14826_s18  ;;  %15091 = vst [vmem:[#allocation51_spill] sm:$0xff] %v10531_v29  ;;  %2228 = vperm.xlu0 %9540, %v10064_v0   ;;  %s14837_s18 = smov 84  }
 0x151   : > { %9534 = vset.pattern.permute.xlu1 %v15090_v40  ;;  %v14832_v40 = vmov 22  }
 0x153   : > { %v10534_v26 = vpop.permute.xlu1 %1227  ;;  %v10538_v2 = vpop.permute.xlu0 %1616 }
 0x154   : > { %15092 = vst [vmem:[#allocation52_spill] sm:$0xff] %v10534_v26  ;;  %1675 = vrot.lane.b32.xlu1 %v10107_v21, %s14840_s13  ;;  %15093 = vst [vmem:[#allocation53_spill] sm:$0xff] %v10538_v2  ;;  %1591 = vrot.lane.b32.xlu0 %v10083_v14, %s14847_s25  ;;  %s9901_s13 = smov 15   ;;  %s9903_s25 = smov 59  }
 0x155   : > { %9543 = vset.pattern.permute.xlu0 %v14832_v40 }
 0x157   : > { %v10542_v10 = vpop.permute.xlu1 %1231  ;;  %v10547_v29 = vpop.permute.xlu0 %1411 }
 0x158   : > { %15094 = vst [vmem:[#allocation54_spill] sm:$0xff] %v10542_v10  ;;  %1755 = vrot.lane.b32.xlu1 %v10092_v17, %s9887_s15  ;;  %15095 = vst [vmem:[#allocation55_spill] sm:$0xff] %v10547_v29  ;;  %1606 = vrot.lane.b32.xlu0 %v10092_v17, %s14837_s18  ;;  %s9899_s18 = smov 87  }
 0x15b   : > { %v10551_v26 = vpop.permute.xlu1 %1436  ;;  %v10555_v2 = vpop.permute.xlu0 %1491 }
 0x15c   : > { %15096 = vst [vmem:[#allocation56_spill] sm:$0xff] %v10551_v26  ;;  %1759 = vrot.lane.b32.xlu1 %v10099_v20, %s9887_s15  ;;  %15097 = vst [vmem:[#allocation57_spill] sm:$0xff] %v10555_v2  ;;  %2109 = vrot.lane.b32.xlu0 %v10081_v13, %s14845_s16  ;;  %v15101_v26 = vmov 19  }
 0x15f   : > { %v10559_v10 = vpop.permute.xlu1 %797  ;;  %v10562_v40 = vpop.permute.xlu0 %1495 }
 0x160   : > { %15098 = vst [vmem:[#allocation58_spill] sm:$0xff] %v10559_v10  ;;  %1964 = vperm.xlu1 %9534, %v10064_v0   ;;  %15099 = vst [vmem:[#allocation59_spill] sm:$0xff] %v10562_v40  ;;  %2113 = vrot.lane.b32.xlu0 %v10089_v16, %s14845_s16 }
 0x163   : > { %v10566_v29 = vpop.permute.xlu1 %799  ;;  %v10571_v2 = vpop.permute.xlu0 %1700 }
 0x164   : > { %15100 = vst [vmem:[#allocation60_spill] sm:$0xff] %v10566_v29  ;;  %1325 = vrot.lane.b32.xlu1 %v10085_v15, %s9871_s23  ;;  %15102 = vst [vmem:[#allocation61_spill] sm:$0xff] %v10571_v2  ;;  %2320 = vperm.xlu0 %9543, %v10073_v5  }
 0x165   : > { %9537 = vset.pattern.permute.xlu1 %v15101_v26  ;;  %v14843_v26 = vmov 23  }
 0x167   : > { %v10574_v23 = vpop.permute.xlu1 %814  ;;  %v10578_v0 = vpop.permute.xlu0 %1063 }
 0x168   : > { %15103 = vst [vmem:[#allocation62_spill] sm:$0xff] %v10574_v23  ;;  %1327 = vrot.lane.b32.xlu1 %v10083_v14, %s9871_s23  ;;  %15104 = vst [vmem:[#allocation63_spill] sm:$0xff] %v10578_v0  ;;  %2115 = vrot.lane.b32.xlu0 %v10107_v21, %s14845_s16  ;;  %v14856_v23 = vmov 24   ;;  %s9904_s16 = smov 14   ;;  %s15138_s23 = smov 68  }
 0x169   : > { %9544 = vset.pattern.permute.xlu0 %v14843_v26 }
 0x16b   : > { %v10582_v40 = vpop.permute.xlu1 %1317  ;;  %v10586_v2 = vpop.permute.xlu0 %1078 }
 0x16c   : > { %15105 = vst [vmem:[#allocation64_spill] sm:$0xff] %v10582_v40  ;;  %1342 = vrot.lane.b32.xlu1 %v10092_v17, %s9899_s18  ;;  %15106 = vst [vmem:[#allocation65_spill] sm:$0xff] %v10586_v2  ;;  %2195 = vrot.lane.b32.xlu0 %v10092_v17, %s9901_s13  ;;  %v10607_v2 = vld [vmem:[%s15045_s2] sm:$0xff]  ;;  %s14898_s18 = smov 13  }
 0x16f   : > { %v10590_v5 = vpop.permute.xlu1 %1321  ;;  %v10594_v0 = vpop.permute.xlu0 %1581 }
 0x170   : > { %15107 = vst [vmem:[#allocation66_spill] sm:$0xff] %v10590_v5  ;;  %1845 = vrot.lane.b32.xlu1 %v10081_v13, %s14972_s12  ;;  %15108 = vst [vmem:[#allocation67_spill] sm:$0xff] %v10594_v0  ;;  %2199 = vrot.lane.b32.xlu0 %v10099_v20, %s9901_s13  ;;  %v10615_v0 = vld [vmem:[%s15045_s2 + $0x8] sm:$0x3]  ;;  %s9925_s2 = smov 52  }
 0x173   : > { %v10598_v40 = vpop.permute.xlu1 %1528  ;;  %v10602_v26 = vpop.permute.xlu0 %1585 }
 0x174   : > { %15109 = vst [vmem:[#allocation68_spill] sm:$0xff] %v10598_v40  ;;  %1849 = vrot.lane.b32.xlu1 %v10089_v16, %s14972_s12  ;;  %15110 = vst [vmem:[#allocation69_spill] sm:$0xff] %v10602_v26  ;;  %2404 = vperm.xlu0 %9544, %v10607_v2  }
 0x177   : > { %v10610_v5 = vpop.permute.xlu1 %885  ;;  %v10618_v40 = vpop.permute.xlu0 %1792 }
 0x178   : > { %15111 = vst [vmem:[#allocation70_spill] sm:$0xff] %v10610_v5  ;;  %2056 = vperm.xlu1 %9537, %v10615_v0   ;;  %15112 = vst [vmem:[#allocation71_spill] sm:$0xff] %v10618_v40  ;;  %1767 = vrot.lane.b32.xlu0 %v10083_v14, %s9887_s15  ;;  %v15114_v5 = vmov 20  }
 0x179   : > { %9547 = vset.pattern.permute.xlu0 %v14856_v23 }
 0x17b   : > { %v10622_v26 = vpop.permute.xlu1 %1323  ;;  %v10628_v10 = vpop.permute.xlu0 %1587 }
 0x17c   : > { %15113 = vst [vmem:[#allocation72_spill] sm:$0xff] %v10622_v26  ;;  %1413 = vrot.lane.b32.xlu1 %v10085_v15, %s9874_s26  ;;  %15115 = vst [vmem:[#allocation73_spill] sm:$0xff] %v10628_v10  ;;  %1782 = vrot.lane.b32.xlu0 %v10092_v17, %s9903_s25  ;;  %s9905_s26 = smov 85   ;;  %s9907_s25 = smov 12  }
 0x17d   : > { %9538 = vset.pattern.permute.xlu1 %v15114_v5 }
 0x17f   : > { %v10631_v29 = vpop.permute.xlu1 %1403  ;;  %v10635_v40 = vpop.permute.xlu0 %1667 }
 0x180   : > { %15116 = vst [vmem:[#allocation74_spill] sm:$0xff] %v10631_v29  ;;  %1851 = vrot.lane.b32.xlu1 %v10107_v21, %s14972_s12  ;;  %15117 = vst [vmem:[#allocation75_spill] sm:$0xff] %v10635_v40  ;;  %2285 = vrot.lane.b32.xlu0 %v10081_v13, %s9904_s16  ;;  %v15124_v29 = vmov 0  }
 0x183   : > { %v10639_v26 = vpop.permute.xlu1 %1407  ;;  %v10643_v5 = vpop.permute.xlu0 %1671 }
 0x184   : > { %15118 = vst [vmem:[#allocation76_spill] sm:$0xff] %v10639_v26  ;;  %1931 = vrot.lane.b32.xlu1 %v10092_v17, %s14883_s14  ;;  %15119 = vst [vmem:[#allocation77_spill] sm:$0xff] %v10643_v5  ;;  %2289 = vrot.lane.b32.xlu0 %v10089_v16, %s9904_s16 }
 0x187   : > { %v10647_v23 = vpop.permute.xlu1 %1612  ;;  %v10651_v40 = vpop.permute.xlu0 %1876 }
 0x188   : > { %15120 = vst [vmem:[#allocation78_spill] sm:$0xff] %v10647_v23  ;;  %1935 = vrot.lane.b32.xlu1 %v10099_v20, %s14883_s14  ;;  %15121 = vst [vmem:[#allocation79_spill] sm:$0xff] %v10651_v40  ;;  %2496 = vperm.xlu0 %9547, %v10615_v0   ;;  %v15125_v23 = vmov 21  }
 0x18b   : > { %v10654_v10 = vpop.permute.xlu1 %973  ;;  %v10657_v26 = vpop.permute.xlu0 %1239 }
 0x18c   : > { %15122 = vst [vmem:[#allocation80_spill] sm:$0xff] %v10654_v10  ;;  %2140 = vperm.xlu1 %9538, %v10607_v2   ;;  %15123 = vst [vmem:[#allocation81_spill] sm:$0xff] %v10657_v26  ;;  %9548 = vset.pattern.permute.xlu0 %v15124_v29 }
 0x18d   : > { %388 = vperm.xlu0 %9548, %v10607_v2  }
 0x18f   : > { %v10660_v5 = vpop.permute.xlu1 %975  ;;  %v10666_v40 = vpop.permute.xlu0 %1254 }
 0x190   : > { %1501 = vrot.lane.b32.xlu1 %v10085_v15, %s14876_s30  ;;  %15126 = vst [vmem:[#allocation82_spill] sm:$0xff] %v10666_v40 }
 0x191   : > { %9541 = vset.pattern.permute.xlu1 %v15125_v23  ;;  %393 = vperm.xlu0 %9548, %v10615_v0  }
 0x193   : > { %v10668_v24 = vpop.permute.xlu1 %990  ;;  %v10673_v26 = vpop.permute.xlu0 %1757 }
 0x194   : > { %15127 = vst [vmem:[#allocation83_spill] sm:$0xff] %v10668_v24  ;;  %1503 = vrot.lane.b32.xlu1 %v10083_v14, %s14876_s30  ;;  %15128 = vst [vmem:[#allocation84_spill] sm:$0xff] %v10673_v26  ;;  %s15151_s30 = smov 44  }
 0x195   : > { %2291 = vrot.lane.b32.xlu0 %v10107_v21, %s9904_s16 }
 0x197   : > { %v10675_v10 = vpop.permute.xlu1 %1493  ;;  %v10680_v23 = vpop.permute.xlu0 %1761 }
 0x198   : > { %15129 = vst [vmem:[#allocation85_spill] sm:$0xff] %v10675_v10  ;;  %1518 = vrot.lane.b32.xlu1 %v10092_v17, %s9905_s26  ;;  %15130 = vst [vmem:[#allocation86_spill] sm:$0xff] %v10680_v23  ;;  %s15144_s26 = smov 16  }
 0x199   : > { %2371 = vrot.lane.b32.xlu0 %v10092_v17, %s14898_s18 }
 0x19b   : > { %v10682_v40 = vpop.permute.xlu1 %1497  ;;  %v10688_v26 = vpop.permute.xlu0 %1968 }
 0x19c   : > { %15131 = vst [vmem:[#allocation87_spill] sm:$0xff] %v10682_v40  ;;  %2021 = vrot.lane.b32.xlu1 %v10081_v13, %s14880_s17  ;;  %15132 = vst [vmem:[#allocation88_spill] sm:$0xff] %v10688_v26 }
 0x19d   : > { %2375 = vrot.lane.b32.xlu0 %v10099_v20, %s14898_s18 }
 0x19f   : > { %v10690_v10 = vpop.permute.xlu1 %1704  ;;  %v10696_v23 = vpop.permute.xlu0 %1763 }
 0x1a0   : > { %15133 = vst [vmem:[#allocation89_spill] sm:$0xff] %v10690_v10  ;;  %2025 = vrot.lane.b32.xlu1 %v10089_v16, %s14880_s17  ;;  %15134 = vst [vmem:[#allocation90_spill] sm:$0xff] %v10696_v23  ;;  %v15139_v10 = vmov 22  }
 0x1a1   : > { %1941 = vrot.lane.b32.xlu0 %v10085_v15, %s14883_s14  ;;  %s14896_s14 = smov 60  }
 0x1a3   : > { %v10698_v40 = vpop.permute.xlu1 %1061  ;;  %v10703_v24 = vpop.permute.xlu0 %1843 }
 0x1a4   : > { %15135 = vst [vmem:[#allocation91_spill] sm:$0xff] %v10698_v40  ;;  %2232 = vperm.xlu1 %9541, %v10615_v0   ;;  %15136 = vst [vmem:[#allocation92_spill] sm:$0xff] %v10703_v24 }
 0x1a5   : > { %2379 = vrot.lane.b32.xlu0 %v10107_v21, %s14898_s18 }
 0x1a7   : > { %v10705_v26 = vpop.permute.xlu1 %1499  ;;  %v10712_v23 = vpop.permute.xlu0 %1847 }
 0x1a8   : > { %15137 = vst [vmem:[#allocation93_spill] sm:$0xff] %v10705_v26  ;;  %1589 = vrot.lane.b32.xlu1 %v10085_v15, %s15138_s23  ;;  %15140 = vst [vmem:[#allocation94_spill] sm:$0xff] %v10712_v23 }
 0x1a9   : > { %9542 = vset.pattern.permute.xlu1 %v15139_v10  ;;  %2459 = vrot.lane.b32.xlu0 %v10092_v17, %s9907_s25 }
 0x1ab   : > { %v10714_v40 = vpop.permute.xlu1 %1579  ;;  %v10720_v24 = vpop.permute.xlu0 %2052 }
 0x1ac   : > { %15141 = vst [vmem:[#allocation95_spill] sm:$0xff] %v10714_v40  ;;  %2027 = vrot.lane.b32.xlu1 %v10107_v21, %s14880_s17  ;;  %15142 = vst [vmem:[#allocation96_spill] sm:$0xff] %v10720_v24 }
 0x1ad   : > { %2463 = vrot.lane.b32.xlu0 %v10099_v20, %s9907_s25 }
 0x1af   : > { %v10722_v26 = vpop.permute.xlu1 %1583  ;;  %v10728_v10 = vpop.permute.xlu0 %1415 }
 0x1b0   : > { %15143 = vst [vmem:[#allocation97_spill] sm:$0xff] %v10722_v26  ;;  %2107 = vrot.lane.b32.xlu1 %v10092_v17, %s15144_s26  ;;  %15145 = vst [vmem:[#allocation98_spill] sm:$0xff] %v10728_v10 }
 0x1b1   : > { %2029 = vrot.lane.b32.xlu0 %v10085_v15, %s14880_s17  ;;  %s14887_s17 = smov 32  }
 0x1b3   : > { %v10730_v23 = vpop.permute.xlu1 %1788  ;;  %v10736_v40 = vpop.permute.xlu0 %1430 }
 0x1b4   : > { %15146 = vst [vmem:[#allocation99_spill] sm:$0xff] %v10730_v23  ;;  %2111 = vrot.lane.b32.xlu1 %v10099_v20, %s15144_s26  ;;  %15147 = vst [vmem:[#allocation100_spill] sm:$0xff] %v10736_v40  ;;  %v15152_v23 = vmov 23  }
 0x1b5   : > { %2467 = vrot.lane.b32.xlu0 %v10107_v21, %s9907_s25 }
 0x1b7   : > { %v10738_v24 = vpop.permute.xlu1 %1149  ;;  %v10743_v26 = vpop.permute.xlu0 %1933 }
 0x1b8   : > { %15148 = vst [vmem:[#allocation101_spill] sm:$0xff] %v10738_v24  ;;  %2316 = vperm.xlu1 %9542, %v10607_v2   ;;  %15149 = vst [vmem:[#allocation102_spill] sm:$0xff] %v10743_v26 }
 0x1b9   : > { %2117 = vrot.lane.b32.xlu0 %v10085_v15, %s15144_s26 }
 0x1bb   : > { %v10745_v10 = vpop.permute.xlu1 %1151  ;;  %v10752_v40 = vpop.permute.xlu0 %1937 }
 0x1bc   : > { %15150 = vst [vmem:[#allocation103_spill] sm:$0xff] %v10745_v10  ;;  %1677 = vrot.lane.b32.xlu1 %v10085_v15, %s15151_s30  ;;  %15153 = vst [vmem:[#allocation104_spill] sm:$0xff] %v10752_v40 }
 0x1bd   : > { %9545 = vset.pattern.permute.xlu1 %v15152_v23  ;;  %2134 = vrot.lane.b32.xlu0 %v10092_v17, %s14887_s17  ;;  %s14894_s17 = smov 30  }
 0x1bf   : > { %v10754_v24 = vpop.permute.xlu1 %1166  ;;  %v10760_v26 = vpop.permute.xlu0 %2144 }
 0x1c0   : > { %15154 = vst [vmem:[#allocation105_spill] sm:$0xff] %v10754_v24  ;;  %1679 = vrot.lane.b32.xlu1 %v10083_v14, %s15151_s30  ;;  %15155 = vst [vmem:[#allocation106_spill] sm:$0xff] %v10760_v26 }
 0x1c1   : > { %2207 = vrot.lane.b32.xlu0 %v10083_v14, %s9901_s13 }
 0x1c3   : > { %v10762_v10 = vpop.permute.xlu1 %1669  ;;  %v10768_v23 = vpop.permute.xlu0 %1939 }
 0x1c4   : > { %15156 = vst [vmem:[#allocation107_spill] sm:$0xff] %v10762_v10  ;;  %1694 = vrot.lane.b32.xlu1 %v10092_v17, %s14896_s14  ;;  %15157 = vst [vmem:[#allocation108_spill] sm:$0xff] %v10768_v23  ;;  %s14923_s14 = smov 58  }
 0x1c5   : > { %2293 = vrot.lane.b32.xlu0 %v10085_v15, %s9904_s16 }
 0x1c7   : > { %v10770_v40 = vpop.permute.xlu1 %1673  ;;  %v10776_v26 = vpop.permute.xlu0 %2019 }
 0x1c8   : > { %15158 = vst [vmem:[#allocation109_spill] sm:$0xff] %v10770_v40  ;;  %2197 = vrot.lane.b32.xlu1 %v10081_v13, %s9901_s13  ;;  %15159 = vst [vmem:[#allocation110_spill] sm:$0xff] %v10776_v26 }
 0x1c9   : > { %2310 = vrot.lane.b32.xlu0 %v10092_v17, %s14894_s17  ;;  %s14975_s17 = smov 28  }
 0x1cb   : > { %v10778_v10 = vpop.permute.xlu1 %1880  ;;  %v10784_v23 = vpop.permute.xlu0 %2023 }
 0x1cc   : > { %15160 = vst [vmem:[#allocation111_spill] sm:$0xff] %v10778_v10  ;;  %2201 = vrot.lane.b32.xlu1 %v10089_v16, %s9901_s13  ;;  %15161 = vst [vmem:[#allocation112_spill] sm:$0xff] %v10784_v23  ;;  %v15165_v10 = vmov 24  }
 0x1cd   : > { %2383 = vrot.lane.b32.xlu0 %v10083_v14, %s14898_s18  ;;  %s15194_s18 = smov 41  }
 0x1cf   : > { %v10786_v40 = vpop.permute.xlu1 %1237  ;;  %v10791_v24 = vpop.permute.xlu0 %2228 }
 0x1d0   : > { %15162 = vst [vmem:[#allocation113_spill] sm:$0xff] %v10786_v40  ;;  %2408 = vperm.xlu1 %9545, %v10615_v0   ;;  %15163 = vst [vmem:[#allocation114_spill] sm:$0xff] %v10791_v24  ;;  %v2775_v0 = vld [vmem:[%s15168_s3 + $0x8] sm:$0x3] }
 0x1d1   : > { %2469 = vrot.lane.b32.xlu0 %v10085_v15, %s9907_s25 }
 0x1d3   : > { %v10793_v26 = vpop.permute.xlu1 %1675  ;;  %v10800_v23 = vpop.permute.xlu0 %1591 }
 0x1d4   : > { %15164 = vst [vmem:[#allocation115_spill] sm:$0xff] %v10793_v26  ;;  %1765 = vrot.lane.b32.xlu1 %v10085_v15, %s9887_s15  ;;  %15166 = vst [vmem:[#allocation116_spill] sm:$0xff] %v10800_v23  ;;  %s15182_s15 = smov 13  }
 0x1d5   : > { %9546 = vset.pattern.permute.xlu1 %v15165_v10  ;;  %2486 = vrot.lane.b32.xlu0 %v10092_v17, %s14975_s17  ;;  %s15613_s17 = smov 100  }
 0x1d7   : > { %v10802_v40 = vpop.permute.xlu1 %1755  ;;  %v10811_v24 = vpop.permute.xlu0 %1606 }
 0x1d8   : > { %15167 = vst [vmem:[#allocation117_spill] sm:$0xff] %v10802_v40  ;;  %2203 = vrot.lane.b32.xlu1 %v10107_v21, %s9901_s13  ;;  %15169 = vst [vmem:[#allocation118_spill] sm:$0xff] %v10811_v24 }
 0x1d9   : > { %2783 = vperm.xlu0 %9548, %v2775_v0  }
 0x1db   : > { %v10813_v26 = vpop.permute.xlu1 %1759  ;;  %v10817_v10 = vpop.permute.xlu0 %2109 }
 0x1dc   : > { %15170 = vst [vmem:[#allocation119_spill] sm:$0xff] %v10813_v26  ;;  %2283 = vrot.lane.b32.xlu1 %v10092_v17, %s9904_s16  ;;  %15171 = vst [vmem:[#allocation120_spill] sm:$0xff] %v10817_v10  ;;  %v473_v10 = vsel %vm14961_vm0, %v10221_v36, %v10247_v44 }
 0x1df   : > { %v10819_v23 = vpop.permute.xlu1 %1964  ;;  %v10823_v21 = vpop.permute.xlu0 %2113 }
 0x1e0   : > { %15172 = vst [vmem:[#allocation121_spill] sm:$0xff] %v10819_v23  ;;  %2287 = vrot.lane.b32.xlu1 %v10099_v20, %s9904_s16  ;;  %15173 = vst [vmem:[#allocation122_spill] sm:$0xff] %v10823_v21  ;;  %v470_v21 = vsel %vm14961_vm0, %v10224_v37, %v10209_v34 }
 0x1e3   : > { %v10825_v40 = vpop.permute.xlu1 %1325  ;;  %v10830_v26 = vpop.permute.xlu0 %2320 }
 0x1e4   : > { %15174 = vst [vmem:[#allocation123_spill] sm:$0xff] %v10825_v40  ;;  %2492 = vperm.xlu1 %9546, %v10607_v2   ;;  %15176 = vst [vmem:[#allocation125_spill] sm:$0xff] %v10830_v26  ;;  %v471_v2 = vsel %vm14961_vm0, %v10209_v34, %v10231_v39 }
 0x1e5   : > { %v497_v34 = vrot.slane %v471_v2, %v10079_v12 }
 0x1e7   : > { %v10828_v24 = vpop.permute.xlu1 %1327 }
 0x1e8   : > { %15175 = vst [vmem:[#allocation124_spill] sm:$0xff] %v10828_v24  ;;  %1853 = vrot.lane.b32.xlu1 %v10085_v15, %s14972_s12  ;;  %v472_v24 = vsel %vm14961_vm0, %v10231_v39, %v10221_v36  ;;  %v553_v39 = vsel %vm14960_vm1, %v10254_v46, %v10235_v41  ;;  %v555_v36 = vsel %vm14960_vm1, %v10262_v48, %v10243_v43 }
 0x1e9   : > { %9549 = vset.pattern.permute.xlu1 %v15124_v29  ;;  %v10848_v29 = vpop.permute.xlu0 %2115  ;;  %v501_v37 = vrot.slane %v472_v24, %v10079_v12  ;;  %v576_v23 = vrot.slane %v553_v39, %v10079_v12  ;;  %v636_v39 = vsel %vm635_vm2, %v10284_v55, %v10258_v47 }
 0x1ea   : > { %15178 = vst [vmem:[#allocation127_spill] sm:$0xff] %v10848_v29  ;;  %v505_v29 = vrot.slane %v473_v10, %v10079_v12 }
 0x1eb   : > { %v10835_v0 = vpop.permute.xlu1 %1342  ;;  %v10890_v40 = vmul.f32 %v501_v37, %v10199_v30 }
 0x1ec   : > { %15177 = vst [vmem:[#allocation126_spill] sm:$0xff] %v10835_v0  ;;  %1855 = vrot.lane.b32.xlu1 %v10083_v14, %s14972_s12  ;;  %v493_v0 = vrot.slane %v470_v21, %v10079_v12  ;;  %v554_v21 = vsel %vm14960_vm1, %v10235_v41, %v10262_v48  ;;  %v556_v41 = vsel %vm14960_vm1, %v10243_v43, %v10276_v53  ;;  %s15592_s12 = smov 84  }
 0x1ed   : > { %v10882_v10 = vpop.permute.xlu0 %2195  ;;  %v10887_v48 = vmul.f32 %v497_v34, %v10199_v30  ;;  %15183 = vst [vmem:[#allocation131_spill] sm:$0xff] %v10890_v40  ;;  %v584_v43 = vrot.slane %v555_v36, %v10079_v12  ;;  %v10910_v40 = vmul.f32 %v505_v29, %v10199_v30  ;;  %v10913_v55 = vmul.f32 %v505_v29, %v10207_v33 }
 0x1ee   : > { %v10873_v24 = vmul.f32 %v493_v0, %v10199_v30  ;;  %v10876_v46 = vmul.f32 %v493_v0, %v10207_v33  ;;  %15181 = vst [vmem:[#allocation130_spill] sm:$0xff] %v10882_v10  ;;  %v580_v0 = vrot.slane %v554_v21, %v10079_v12  ;;  %v637_v10 = vsel %vm635_vm2, %v10258_v47, %v10291_v57 }
 0x1ef   : > { %v10850_v26 = vpop.permute.xlu1 %1845  ;;  %v10907_v21 = vmul.f32 %v501_v37, %v10207_v33  ;;  %15185 = vst [vmem:[#allocation133_spill] sm:$0xff] %v10910_v40  ;;  %15186 = vst [vmem:[#allocation134_spill] sm:$0xff] %v10913_v55  ;;  %v10919_v47 = vmul.f32 %v576_v23, %v10201_v31  ;;  %v639_v37 = vsel %vm635_vm2, %v10265_v50, %v10306_v62 }
 0x1f0   : > { %15179 = vst [vmem:[#allocation128_spill] sm:$0xff] %v10850_v26  ;;  %1870 = vrot.lane.b32.xlu1 %v10092_v17, %s14923_s14  ;;  %v638_v26 = vsel %vm635_vm2, %v10291_v57, %v10265_v50  ;;  %v659_v57 = vrot.slane %v636_v39, %v10079_v12  ;;  %v10931_v29 = vmul.f32 %v580_v0, %v10201_v31  ;;  %s14998_s14 = smov 56  }
 0x1f1   : > { %v10939_v39 = vmul.f32 %v584_v43, %v10201_v31  ;;  %v10942_v55 = vmul.f32 %v580_v0, %v10215_v35  ;;  %v10945_v50 = vmul.f32 %v584_v43, %v10215_v35  ;;  %v720_v40 = vsel %vm14959_vm3, %v10280_v54, %v10321_v3 }
 0x1f2   : > { %v721_v0 = vsel %vm14959_vm3, %v10321_v3, %v10288_v56 }
 0x1f3   : > { %v10870_v2 = vpop.permute.xlu1 %1849  ;;  %15188 = vst [vmem:[#allocation136_spill] sm:$0xff] %v10939_v39  ;;  %15189 = vst [vmem:[#allocation137_spill] sm:$0xff] %v10945_v50  ;;  %v671_v39 = vrot.slane %v639_v37, %v10079_v12  ;;  %v10965_v50 = vmul.f32 %v659_v57, %v10239_v42 }
 0x1f4   : > { %15180 = vst [vmem:[#allocation129_spill] sm:$0xff] %v10870_v2  ;;  %2373 = vrot.lane.b32.xlu1 %v10081_v13, %s15182_s15  ;;  %v10897_v2 = vmul.f32 %v497_v34, %v10207_v33  ;;  %v588_v34 = vrot.slane %v556_v41, %v10079_v12  ;;  %v663_v41 = vrot.slane %v637_v10, %v10079_v12  ;;  %v10950_v10 = vpop.permute.xlu0 %2199 }
 0x1f5   : > { %15190 = vst [vmem:[#allocation138_spill] sm:$0xff] %v10950_v10 }
 0x1f6   : > { %15184 = vst [vmem:[#allocation132_spill] sm:$0xff] %v10897_v2  ;;  %v10922_v2 = vmul.f32 %v576_v23, %v10215_v35  ;;  %v719_v23 = vsel %vm14959_vm3, %v10314_v1, %v10280_v54  ;;  %v10956_v1 = vmul.f32 %v588_v34, %v10215_v35  ;;  %v10968_v54 = vmul.f32 %v659_v57, %v10227_v38 }
 0x1f7   : > { %v10916_v36 = vpop.permute.xlu1 %2056  ;;  %v742_v10 = vrot.slane %v719_v23, %v10079_v12  ;;  %v10977_v3 = vmul.f32 %v663_v41, %v10239_v42  ;;  %v802_v57 = vsel %vm801_vm4, %v10345_v11, %v10302_v61  ;;  %v10987_v23 = vmul.f32 %v663_v41, %v10227_v38 }
 0x1f8   : > { %15187 = vst [vmem:[#allocation135_spill] sm:$0xff] %v10916_v36  ;;  %2377 = vrot.lane.b32.xlu1 %v10089_v16, %s15182_s15  ;;  %v667_v36 = vrot.slane %v638_v26, %v10079_v12  ;;  %v10953_v26 = vmul.f32 %v588_v34, %v10201_v31  ;;  %15192 = vst [vmem:[#allocation140_spill] sm:$0xff] %v10956_v1  ;;  %v722_v34 = vsel %vm14959_vm3, %v10288_v56, %v10337_v9 }
 0x1f9   : > { %15196 = vst [vmem:[#allocation143_spill] sm:$0xff] %v10987_v23  ;;  %v750_v56 = vrot.slane %v721_v0, %v10079_v12  ;;  %v803_v1 = vsel %vm801_vm4, %v10302_v61, %v10352_v19  ;;  %v11003_v11 = vmul.f32 %v671_v39, %v10227_v38  ;;  %v754_v41 = vrot.slane %v722_v34, %v10079_v12 }
 0x1fa   : > { %15191 = vst [vmem:[#allocation139_spill] sm:$0xff] %v10953_v26  ;;  %v10980_v37 = vmul.f32 %v667_v36, %v10239_v42  ;;  %v804_v26 = vsel %vm801_vm4, %v10352_v19, %v10310_v63  ;;  %v11009_v23 = vmul.f32 %v742_v10, %v10268_v51  ;;  %v11012_v61 = vmul.f32 %v742_v10, %v10251_v45 }
 0x1fb   : > { %v10962_v43 = vpop.permute.xlu1 %1413  ;;  %15198 = vst [vmem:[#allocation145_spill] sm:$0xff] %v11003_v11  ;;  %v830_v19 = vrot.slane %v802_v57, %v10079_v12  ;;  %v834_v34 = vrot.slane %v803_v1, %v10079_v12  ;;  %v890_v10 = vsel %vm889_vm5, %v10376_v28, %v10325_v4  ;;  %v11030_v57 = vmul.f32 %v750_v56, %v10268_v51 }
 0x1fc   : > { %15193 = vst [vmem:[#allocation141_spill] sm:$0xff] %v10962_v43  ;;  %1943 = vrot.lane.b32.xlu1 %v10083_v14, %s15194_s18  ;;  %15195 = vst [vmem:[#allocation142_spill] sm:$0xff] %v10980_v37  ;;  %v746_v43 = vrot.slane %v720_v40, %v10079_v12  ;;  %v10997_v37 = vmul.f32 %v667_v36, %v10227_v38  ;;  %v11000_v40 = vmul.f32 %v671_v39, %v10239_v42  ;;  %s9913_s18 = smov 57  }
 0x1fd   : > { %v805_v36 = vsel %vm801_vm4, %v10310_v63, %v10367_v25  ;;  %15201 = vst [vmem:[#allocation148_spill] sm:$0xff] %v11030_v57  ;;  %v891_v1 = vsel %vm889_vm5, %v10325_v4, %v10384_v32  ;;  %v11045_v11 = vmul.f32 %v754_v41, %v10251_v45  ;;  %v474_v4 = vsel %vm14961_vm0, %v10247_v44, %v10398_v7 }
 0x1fe   : > { %15197 = vst [vmem:[#allocation144_spill] sm:$0xff] %v11000_v40  ;;  %v11018_v40 = vpop.permute.xlu0 %2404  ;;  %v11022_v39 = vmul.f32 %v746_v43, %v10268_v51  ;;  %v11033_v63 = vmul.f32 %v746_v43, %v10251_v45  ;;  %v842_v28 = vrot.slane %v805_v36, %v10079_v12  ;;  %v892_v43 = vsel %vm889_vm5, %v10384_v32, %v10334_v8 }
 0x1ff   : > { %v11006_v0 = vpop.permute.xlu1 %1851  ;;  %15200 = vst [vmem:[#allocation147_spill] sm:$0xff] %v11018_v40  ;;  %v11036_v40 = vmul.f32 %v750_v56, %v10251_v45  ;;  %15204 = vst [vmem:[#allocation151_spill] sm:$0xff] %v11045_v11  ;;  %v11054_v56 = vmul.f32 %v830_v19, %v10299_v59  ;;  %v11066_v32 = vmul.f32 %v830_v19, %v10272_v52 }
 0x200   : > { %15199 = vst [vmem:[#allocation146_spill] sm:$0xff] %v11006_v0  ;;  %1958 = vrot.lane.b32.xlu1 %v10092_v17, %s9913_s18  ;;  %v838_v0 = vrot.slane %v804_v26, %v10079_v12  ;;  %v11042_v26 = vmul.f32 %v754_v41, %v10268_v51  ;;  %v475_v41 = vsel %vm14961_vm0, %v10398_v7, %v10348_v18  ;;  %s15230_s18 = smov 40   ;;  %vm15002_vm0 = vcmask 113664  }
 0x201   : > { %15202 = vst [vmem:[#allocation149_spill] sm:$0xff] %v11036_v40  ;;  %v918_v40 = vrot.slane %v890_v10, %v10079_v12  ;;  %15206 = vst [vmem:[#allocation153_spill] sm:$0xff] %v11066_v32  ;;  %v11069_v36 = vmul.f32 %v834_v34, %v10299_v59  ;;  %v922_v10 = vrot.slane %v891_v1, %v10079_v12 }
 0x202   : > { %15203 = vst [vmem:[#allocation150_spill] sm:$0xff] %v11042_v26  ;;  %v11076_v44 = vmul.f32 %v834_v34, %v10272_v52  ;;  %v11079_v11 = vmul.f32 %v838_v0, %v10272_v52  ;;  %v926_v7 = vrot.slane %v892_v43, %v10079_v12  ;;  %v893_v18 = vsel %vm889_vm5, %v10334_v8, %v10409_v60  ;;  %v11085_v19 = vpop.permute.xlu0 %1767 }
 0x203   : > { %v11051_v57 = vpop.permute.xlu1 %1931  ;;  %15210 = vst [vmem:[#allocation157_spill] sm:$0xff] %v11085_v19  ;;  %v11088_v26 = vmul.f32 %v842_v28, %v10299_v59  ;;  %v509_v1 = vrot.slane %v474_v4, %v10079_v12  ;;  %v513_v34 = vrot.slane %v475_v41, %v10079_v12  ;;  %v11098_v43 = vmul.f32 %v842_v28, %v10272_v52  ;;  %v15217_v28 = vld [vmem:[#allocation16_spill] sm:$0xff] }
 0x204   : > { %15205 = vst [vmem:[#allocation152_spill] sm:$0xff] %v11051_v57  ;;  %2461 = vrot.lane.b32.xlu1 %v10081_v13, %s9907_s25  ;;  %v11072_v57 = vmul.f32 %v838_v0, %v10299_v59  ;;  %15208 = vst [vmem:[#allocation155_spill] sm:$0xff] %v11076_v44  ;;  %v978_v0 = vsel %vm977_vm6, %v10416_v27, %v10356_v22  ;;  %v11101_v8 = vmul.f32 %v918_v40, %v10329_v6  ;;  %v15239_v44 = vld [vmem:[#allocation34_spill] sm:$0xff] }
 0x205   : > { %15209 = vst [vmem:[#allocation156_spill] sm:$0xff] %v11079_v11  ;;  %15211 = vst [vmem:[#allocation158_spill] sm:$0xff] %v11088_v26  ;;  %v11104_v19 = vmul.f32 %v918_v40, %v10295_v58  ;;  %v979_v4 = vsel %vm977_vm6, %v10356_v22, %v10424_v49  ;;  %v11112_v27 = vmul.f32 %v922_v10, %v10329_v6 }
 0x206   : > { %15207 = vst [vmem:[#allocation154_spill] sm:$0xff] %v11072_v57  ;;  %15213 = vst [vmem:[#allocation160_spill] sm:$0xff] %v11098_v43  ;;  %v930_v41 = vrot.slane %v893_v18, %v10079_v12  ;;  %v15218_v43 = vld [vmem:[#allocation28_spill] sm:$0xff]  ;;  %v11122_v26 = vmul.f32 %v926_v7, %v10329_v6  ;;  %v11125_v22 = vmul.f32 %v922_v10, %v10295_v58 }
 0x207   : > { %v11095_v11 = vpop.permute.xlu1 %1935  ;;  %15214 = vst [vmem:[#allocation161_spill] sm:$0xff] %v11101_v8  ;;  %15215 = vst [vmem:[#allocation162_spill] sm:$0xff] %v11104_v19  ;;  %v557_v40 = vsel %vm14960_vm1, %v10276_v53, %v15218_v43  ;;  %v15221_v19 = vld [vmem:[#allocation18_spill] sm:$0xff]  ;;  %v11138_v53 = vmul.f32 %v513_v34, %v10199_v30 }
 0x208   : > { %15212 = vst [vmem:[#allocation159_spill] sm:$0xff] %v11095_v11  ;;  %2465 = vrot.lane.b32.xlu1 %v10089_v16, %s9907_s25  ;;  %15216 = vst [vmem:[#allocation163_spill] sm:$0xff] %v11112_v27  ;;  %v980_v11 = vsel %vm977_vm6, %v10424_v49, %v15217_v28  ;;  %v1006_v16 = vrot.slane %v978_v0, %v10079_v12  ;;  %v558_v18 = vsel %vm14960_vm1, %v15218_v43, %v15221_v19  ;;  %v15228_v43 = vld [vmem:[#allocation32_spill] sm:$0xff]  ;;  %vm15018_vm1 = vcmask 130048  }
 0x209   : > { %15219 = vst [vmem:[#allocation16_spill] sm:$0xff] %v11122_v26  ;;  %15220 = vst [vmem:[#allocation28_spill] sm:$0xff] %v11125_v22  ;;  %v11132_v27 = vmul.f32 %v926_v7, %v10295_v58  ;;  %v11135_v49 = vmul.f32 %v509_v1, %v10199_v30  ;;  %v1010_v26 = vrot.slane %v979_v4, %v10079_v12  ;;  %v15226_v22 = vld [vmem:[#allocation30_spill] sm:$0xff]  ;;  %v15227_v7 = vld [vmem:[#allocation19_spill] sm:$0xff] }
 0x20a   : > { %15224 = vst [vmem:[#allocation165_spill] sm:$0xff] %v11138_v53  ;;  %v1014_v10 = vrot.slane %v980_v11, %v10079_v12  ;;  %v592_v0 = vrot.slane %v557_v40, %v10079_v12  ;;  %v981_v19 = vsel %vm977_vm6, %v15217_v28, %v15226_v22  ;;  %v11156_v30 = vmul.f32 %v509_v1, %v10207_v33 }
 0x20b   : > { %15222 = vst [vmem:[#allocation18_spill] sm:$0xff] %v11132_v27  ;;  %15223 = vst [vmem:[#allocation164_spill] sm:$0xff] %v11135_v49  ;;  %v11141_v57 = vpop.permute.xlu1 %2140  ;;  %v1066_v27 = vsel %vm1065_vm7, %v15228_v43, %v15227_v7  ;;  %v11151_v49 = vpop.permute.xlu0 %1782  ;;  %v11159_v11 = vmul.f32 %v513_v34, %v10207_v33  ;;  %v11162_v4 = vmul.f32 %v930_v41, %v10329_v6  ;;  %v15235_v43 = vld [vmem:[#allocation15_spill] sm:$0xff] }
 0x20c   : > { %15225 = vst [vmem:[#allocation166_spill] sm:$0xff] %v11141_v57  ;;  %15229 = vst [vmem:[#allocation30_spill] sm:$0xff] %v11151_v49  ;;  %2031 = vrot.lane.b32.xlu1 %v10083_v14, %s15230_s18  ;;  %v596_v28 = vrot.slane %v558_v18, %v10079_v12  ;;  %v11166_v40 = vmul.f32 %v930_v41, %v10295_v58  ;;  %v11169_v57 = vmul.f32 %v1006_v16, %v15235_v43  ;;  %v15237_v49 = vld [vmem:[#allocation13_spill] sm:$0xff] }
 0x20d   : > { %15231 = vst [vmem:[#allocation19_spill] sm:$0xff] %v11156_v30  ;;  %15232 = vst [vmem:[#allocation32_spill] sm:$0xff] %v11159_v11  ;;  %v11172_v53 = vmul.f32 %v1006_v16, %v15237_v49  ;;  %v1067_v1 = vsel %vm1065_vm7, %v15227_v7, %v15239_v44  ;;  %v11178_v33 = vmul.f32 %v1010_v26, %v15235_v43  ;;  %v15241_v11 = vld [vmem:[#allocation21_spill] sm:$0xff] }
 0x20e   : > { %15233 = vst [vmem:[#allocation167_spill] sm:$0xff] %v11162_v4  ;;  %15234 = vst [vmem:[#allocation168_spill] sm:$0xff] %v11166_v40  ;;  %v1018_v34 = vrot.slane %v981_v19, %v10079_v12  ;;  %v1094_v18 = vrot.slane %v1066_v27, %v10079_v12  ;;  %v1068_v41 = vsel %vm1065_vm7, %v15239_v44, %v15241_v11  ;;  %v15248_v19 = vld [vmem:[#allocation37_spill] sm:$0xff] }
 0x20f   : > { %15236 = vst [vmem:[#allocation15_spill] sm:$0xff] %v11169_v57  ;;  %15238 = vst [vmem:[#allocation13_spill] sm:$0xff] %v11172_v53  ;;  %v11185_v30 = vpop.permute.xlu1 %1501  ;;  %v11188_v16 = vmul.f32 %v1014_v10, %v15235_v43  ;;  %v11191_v40 = vmul.f32 %v1010_v26, %v15237_v49  ;;  %v11194_v7 = vmul.f32 %v1014_v10, %v15237_v49  ;;  %v15272_v57 = vld [vmem:[#allocation29_spill] sm:$0xff] }
 0x210   : > { %15240 = vst [vmem:[#allocation34_spill] sm:$0xff] %v11178_v33  ;;  %15242 = vst [vmem:[#allocation21_spill] sm:$0xff] %v11185_v30  ;;  %v11197_v4 = vmul.f32 %v592_v0, %v10201_v31  ;;  %2046 = vrot.lane.b32.xlu1 %v10092_v17, %s14998_s14  ;;  %v11202_v44 = vmul.f32 %v596_v28, %v10201_v31  ;;  %v1098_v27 = vrot.slane %v1067_v1, %v10079_v12  ;;  %v15249_v30 = vld [vmem:[#allocation33_spill] sm:$0xff]  ;;  %v15253_v31 = vld [vmem:[#allocation23_spill] sm:$0xff]  ;;  %s15682_s14 = smov 60  }
 0x211   : > { %15243 = vst [vmem:[#allocation169_spill] sm:$0xff] %v11188_v16  ;;  %15244 = vst [vmem:[#allocation170_spill] sm:$0xff] %v11191_v40  ;;  %v1245_v26 = vsel %vm15011_vm8, %v15249_v30, %v15248_v19  ;;  %v15250_v16 = vld [vmem:[#allocation38_spill] sm:$0xff]  ;;  %v1102_v40 = vrot.slane %v1068_v41, %v10079_v12  ;;  %v11224_v19 = vmul.f32 %v1018_v34, %v15235_v43 }
 0x212   : > { %15245 = vst [vmem:[#allocation171_spill] sm:$0xff] %v11194_v7  ;;  %15246 = vst [vmem:[#allocation172_spill] sm:$0xff] %v11197_v4  ;;  %v640_v10 = vsel %vm635_vm2, %v10306_v62, %v15250_v16  ;;  %v11212_v7 = vmul.f32 %v592_v0, %v10215_v35  ;;  %v11215_v4 = vmul.f32 %v596_v28, %v10215_v35  ;;  %v15257_v62 = vld [vmem:[#allocation20_spill] sm:$0xff] }
 0x213   : > { %15247 = vst [vmem:[#allocation173_spill] sm:$0xff] %v11202_v44  ;;  %v641_v1 = vsel %vm635_vm2, %v15250_v16, %v15253_v31  ;;  %v11221_v44 = vpop.permute.xlu0 %2285  ;;  %15255 = vst [vmem:[#allocation174_spill] sm:$0xff] %v11224_v19  ;;  %v11227_v53 = vmul.f32 %v1018_v34, %v15237_v49  ;;  %v11230_v0 = vmul.f32 %v1094_v18, %v15257_v62  ;;  %v11235_v28 = vpop.permute.xlu1 %1503  ;;  %v15261_v31 = vld [vmem:[#allocation24_spill] sm:$0xff]  ;;  %vm1505_vm2 = vcmask 564224  }
 0x214   : > { %15251 = vst [vmem:[#allocation33_spill] sm:$0xff] %v11212_v7  ;;  %15252 = vst [vmem:[#allocation38_spill] sm:$0xff] %v11215_v4  ;;  %v15259_v7 = vld [vmem:[#allocation40_spill] sm:$0xff]  ;;  %v1282_v41 = vrot.slane %v1245_v26, %v10079_v12  ;;  %v675_v16 = vrot.slane %v640_v10, %v10079_v12  ;;  %2119 = vrot.lane.b32.xlu1 %v10083_v14, %s15144_s26  ;;  %v679_v26 = vrot.slane %v641_v1, %v10079_v12  ;;  %v15267_v10 = vld [vmem:[#allocation25_spill] sm:$0xff] }
 0x215   : > { %15254 = vst [vmem:[#allocation23_spill] sm:$0xff] %v11221_v44  ;;  %15256 = vst [vmem:[#allocation175_spill] sm:$0xff] %v11227_v53  ;;  %v1069_v35 = vsel %vm1065_vm7, %v15241_v11, %v15259_v7  ;;  %v15262_v44 = vld [vmem:[#allocation42_spill] sm:$0xff]  ;;  %v15263_v34 = vld [vmem:[#allocation44_spill] sm:$0xff] }
 0x216   : > { %15258 = vst [vmem:[#allocation20_spill] sm:$0xff] %v11230_v0  ;;  %15260 = vst [vmem:[#allocation40_spill] sm:$0xff] %v11235_v28  ;;  %v1154_v4 = vsel %vm14963_vm9, %v15262_v44, %v15261_v31  ;;  %v1155_v53 = vsel %vm14963_vm9, %v15261_v31, %v15263_v34  ;;  %v15264_v11 = vld [vmem:[#allocation14_spill] sm:$0xff]  ;;  %v11251_v28 = vmul.f32 %v1098_v27, %v15257_v62 }
 0x217   : > { %v11248_v19 = vmul.f32 %v1094_v18, %v15264_v11  ;;  %v1156_v44 = vsel %vm14963_vm9, %v15263_v34, %v15267_v10  ;;  %v11258_v0 = vmul.f32 %v1102_v40, %v15257_v62  ;;  %v11261_v31 = vmul.f32 %v1098_v27, %v15264_v11  ;;  %v15270_v18 = vld [vmem:[#allocation48_spill] sm:$0xff]  ;;  %v11275_v8 = vpop.permute.xlu1 %1518 }
 0x218   : > { %15266 = vst [vmem:[#allocation42_spill] sm:$0xff] %v11251_v28  ;;  %v1106_v33 = vrot.slane %v1069_v35, %v10079_v12  ;;  %v11268_v28 = vmul.f32 %v1102_v40, %v15264_v11  ;;  %v1182_v1 = vrot.slane %v1154_v4, %v10079_v12  ;;  %v1186_v34 = vrot.slane %v1155_v53, %v10079_v12  ;;  %v15274_v27 = vld [vmem:[#allocation36_spill] sm:$0xff]  ;;  %v15276_v35 = vld [vmem:[#allocation22_spill] sm:$0xff]  ;;  %v11287_v4 = vpop.permute.xlu0 %2289 }
 0x219   : > { %15265 = vst [vmem:[#allocation24_spill] sm:$0xff] %v11248_v19  ;;  %15268 = vst [vmem:[#allocation44_spill] sm:$0xff] %v11258_v0  ;;  %v723_v19 = vsel %vm14959_vm3, %v10337_v9, %v15270_v18  ;;  %v724_v0 = vsel %vm14959_vm3, %v15270_v18, %v15272_v57  ;;  %v11281_v32 = vmul.f32 %v1282_v41, %v15276_v35  ;;  %2205 = vrot.lane.b32.xlu1 %v10085_v15, %s9901_s13  ;;  %s9915_s13 = smov 31   ;;  %vm14994_vm3 = vcmask 121856  }
 0x21a   : > { %15269 = vst [vmem:[#allocation14_spill] sm:$0xff] %v11261_v31  ;;  %15271 = vst [vmem:[#allocation25_spill] sm:$0xff] %v11268_v28  ;;  %v11278_v31 = vmul.f32 %v1282_v41, %v15274_v27  ;;  %v11284_v9 = vmul.f32 %v675_v16, %v10239_v42  ;;  %v1190_v40 = vrot.slane %v1156_v44, %v10079_v12  ;;  %v15282_v41 = vld [vmem:[#allocation50_spill] sm:$0xff] }
 0x21b   : > { %15273 = vst [vmem:[#allocation48_spill] sm:$0xff] %v11275_v8  ;;  %15277 = vst [vmem:[#allocation36_spill] sm:$0xff] %v11281_v32  ;;  %v11292_v57 = vmul.f32 %v679_v26, %v10239_v42  ;;  %v11295_v53 = vmul.f32 %v675_v16, %v10227_v38  ;;  %v758_v18 = vrot.slane %v723_v19, %v10079_v12  ;;  %v15285_v42 = vld [vmem:[#allocation31_spill] sm:$0xff]  ;;  %v15288_v19 = vld [vmem:[#allocation26_spill] sm:$0xff] }
 0x21c   : > { %15275 = vst [vmem:[#allocation29_spill] sm:$0xff] %v11278_v31  ;;  %15278 = vst [vmem:[#allocation22_spill] sm:$0xff] %v11284_v9  ;;  %v1157_v8 = vsel %vm14963_vm9, %v15267_v10, %v15282_v41  ;;  %v11302_v44 = vmul.f32 %v679_v26, %v10227_v38  ;;  %v762_v32 = vrot.slane %v724_v0, %v10079_v12  ;;  %v15286_v31 = vld [vmem:[#allocation52_spill] sm:$0xff]  ;;  %v15289_v10 = vld [vmem:[#allocation17_spill] sm:$0xff]  ;;  %v11323_v26 = vpop.permute.xlu1 %2021 }
 0x21d   : > { %15279 = vst [vmem:[#allocation176_spill] sm:$0xff] %v11287_v4  ;;  %15280 = vst [vmem:[#allocation177_spill] sm:$0xff] %v11292_v57  ;;  %v11305_v4 = vmul.f32 %v1106_v33, %v15257_v62  ;;  %v1242_v16 = vsel %vm15011_vm8, %v15286_v31, %v15285_v42  ;;  %v11315_v57 = vmul.f32 %v1182_v1, %v15288_v19  ;;  %v15293_v31 = vld [vmem:[#allocation54_spill] sm:$0xff]  ;;  %2222 = vrot.lane.b32.xlu1 %v10092_v17, %s9915_s13  ;;  %s15581_s13 = smov 88  }
 0x21e   : > { %15281 = vst [vmem:[#allocation178_spill] sm:$0xff] %v11295_v53  ;;  %15283 = vst [vmem:[#allocation50_spill] sm:$0xff] %v11302_v44  ;;  %v11312_v53 = vmul.f32 %v1106_v33, %v15264_v11  ;;  %v11318_v9 = vmul.f32 %v1182_v1, %v15289_v10  ;;  %v11321_v38 = vmul.f32 %v1186_v34, %v15288_v19 }
 0x21f   : > { %15284 = vst [vmem:[#allocation179_spill] sm:$0xff] %v11305_v4  ;;  %15291 = vst [vmem:[#allocation26_spill] sm:$0xff] %v11323_v26  ;;  %v11326_v0 = vmul.f32 %v1190_v40, %v15288_v19  ;;  %v1194_v44 = vrot.slane %v1157_v8, %v10079_v12  ;;  %v1243_v33 = vsel %vm15011_vm8, %v15285_v42, %v15293_v31 }
 0x220   : > { %15287 = vst [vmem:[#allocation31_spill] sm:$0xff] %v11312_v53  ;;  %15290 = vst [vmem:[#allocation52_spill] sm:$0xff] %v11318_v9  ;;  %v1244_v53 = vsel %vm15011_vm8, %v15293_v31, %v15249_v30  ;;  %v11337_v1 = vmul.f32 %v1186_v34, %v15289_v10  ;;  %v11340_v26 = vmul.f32 %v1190_v40, %v15289_v10  ;;  %v15299_v30 = vld [vmem:[#allocation55_spill] sm:$0xff]  ;;  %v15301_v34 = vld [vmem:[#allocation60_spill] sm:$0xff] }
 0x221   : > { %15292 = vst [vmem:[#allocation17_spill] sm:$0xff] %v11326_v0  ;;  %v11343_v4 = vmul.f32 %v758_v18, %v10268_v51  ;;  %v1270_v8 = vrot.slane %v1242_v16, %v10079_v12  ;;  %v11347_v42 = vmul.f32 %v762_v32, %v10268_v51  ;;  %v11350_v0 = vmul.f32 %v758_v18, %v10251_v45  ;;  %v15300_v31 = vld [vmem:[#allocation51_spill] sm:$0xff]  ;;  %v15304_v18 = vld [vmem:[#allocation62_spill] sm:$0xff] }
 0x222   : > { %15294 = vst [vmem:[#allocation54_spill] sm:$0xff] %v11337_v1  ;;  %15295 = vst [vmem:[#allocation180_spill] sm:$0xff] %v11340_v26  ;;  %v1421_v28 = vsel %vm1417_vm10, %v15300_v31, %v15299_v30  ;;  %v15302_v1 = vld [vmem:[#allocation58_spill] sm:$0xff]  ;;  %v11358_v26 = vpop.permute.xlu0 %2496  ;;  %v1278_v16 = vrot.slane %v1244_v53, %v10079_v12  ;;  %v11370_v30 = vmul.f32 %v762_v32, %v10251_v45  ;;  %v15310_v53 = vld [vmem:[#allocation39_spill] sm:$0xff]  ;;  %2295 = vrot.lane.b32.xlu1 %v10083_v14, %s9904_s16  ;;  %s9916_s16 = smov 29  }
 0x223   : > { %15296 = vst [vmem:[#allocation181_spill] sm:$0xff] %v11343_v4  ;;  %15297 = vst [vmem:[#allocation182_spill] sm:$0xff] %v11347_v42  ;;  %v807_v40 = vsel %vm801_vm4, %v15302_v1, %v15301_v34  ;;  %v1274_v4 = vrot.slane %v1243_v33, %v10079_v12  ;;  %v806_v51 = vsel %vm801_vm4, %v10367_v25, %v15302_v1  ;;  %v15309_v33 = vld [vmem:[#allocation64_spill] sm:$0xff]  ;;  %v15312_v45 = vld [vmem:[#allocation41_spill] sm:$0xff]  ;;  %vm1081_vm4 = vcmask 924672  }
 0x224   : > { %15298 = vst [vmem:[#allocation183_spill] sm:$0xff] %v11350_v0  ;;  %15303 = vst [vmem:[#allocation51_spill] sm:$0xff] %v11358_v26  ;;  %v818_v42 = vsel %vm817_vm11, %v807_v40, %v15304_v18  ;;  %v11367_v0 = vpop.permute.xlu1 %2025  ;;  %v11373_v34 = vmul.f32 %v1194_v44, %v15288_v19  ;;  %v11376_v26 = vmul.f32 %v1194_v44, %v15289_v10  ;;  %v15313_v40 = vld [vmem:[#allocation45_spill] sm:$0xff]  ;;  %v15314_v18 = vld [vmem:[#allocation70_spill] sm:$0xff]  ;;  %vm15008_vm11 = vcmask 359424  }
 0x225   : > { %15305 = vst [vmem:[#allocation60_spill] sm:$0xff] %v11367_v0  ;;  %15306 = vst [vmem:[#allocation58_spill] sm:$0xff] %v11370_v30  ;;  %v1330_v9 = vsel %vm1329_vm12, %v15310_v53, %v15309_v33  ;;  %v11384_v25 = vmul.f32 %v1270_v8, %v15274_v27  ;;  %v1458_v1 = vrot.slane %v1421_v28, %v10079_v12 }
 0x226   : > { %15307 = vst [vmem:[#allocation62_spill] sm:$0xff] %v11373_v34  ;;  %15308 = vst [vmem:[#allocation184_spill] sm:$0xff] %v11376_v26  ;;  %v1331_v32 = vsel %vm1329_vm12, %v15309_v33, %v15312_v45  ;;  %v895_v44 = vsel %vm889_vm5, %v15314_v18, %v15313_v40  ;;  %v11394_v30 = vmul.f32 %v1270_v8, %v15276_v35  ;;  %v15316_v34 = vld [vmem:[#allocation66_spill] sm:$0xff]  ;;  %2381 = vrot.lane.b32.xlu1 %v10085_v15, %s15182_s15  ;;  %s14995_s15 = smov 104  }
 0x227   : > { %15311 = vst [vmem:[#allocation64_spill] sm:$0xff] %v11384_v25  ;;  %v846_v53 = vrot.slane %v806_v51, %v10079_v12  ;;  %v850_v26 = vrot.slane %v818_v42, %v10079_v12  ;;  %v1332_v0 = vsel %vm1329_vm12, %v15312_v45, %v15316_v34  ;;  %v11402_v28 = vmul.f32 %v1274_v4, %v15274_v27 }
 0x228   : > { %15315 = vst [vmem:[#allocation39_spill] sm:$0xff] %v11394_v30  ;;  %v11405_v33 = vmul.f32 %v1278_v16, %v15274_v27  ;;  %v1358_v25 = vrot.slane %v1330_v9, %v10079_v12  ;;  %v894_v8 = vsel %vm889_vm5, %v10409_v60, %v15314_v18  ;;  %v11411_v51 = vpop.permute.xlu1 %2232  ;;  %v11414_v42 = vmul.f32 %v1274_v4, %v15276_v35  ;;  %v15322_v30 = vld [vmem:[#allocation47_spill] sm:$0xff]  ;;  %v11422_v9 = vpop.permute.xlu0 %388 }
 0x229   : > { %15317 = vst [vmem:[#allocation41_spill] sm:$0xff] %v11402_v28  ;;  %15319 = vst [vmem:[#allocation70_spill] sm:$0xff] %v11411_v51  ;;  %v11417_v45 = vmul.f32 %v1278_v16, %v15276_v35  ;;  %v1362_v40 = vrot.slane %v1331_v32, %v10079_v12  ;;  %v15323_v60 = vld [vmem:[#allocation35_spill] sm:$0xff]  ;;  %v15325_v51 = vld [vmem:[#allocation56_spill] sm:$0xff]  ;;  %v1366_v16 = vrot.slane %v1332_v0, %v10079_v12  ;;  %vm1769_vm5 = vcmask 351232  }
 0x22a   : > { %15318 = vst [vmem:[#allocation45_spill] sm:$0xff] %v11405_v33  ;;  %15320 = vst [vmem:[#allocation66_spill] sm:$0xff] %v11414_v42  ;;  %v906_v33 = vsel %vm905_vm13, %v895_v44, %v15322_v30  ;;  %v11427_v18 = vmul.f32 %v1458_v1, %v15323_v60  ;;  %v11430_v4 = vmul.f32 %v1458_v1, %v15325_v51  ;;  %2398 = vrot.lane.b32.xlu1 %v10092_v17, %s9916_s16  ;;  %vm14962_vm13 = vcmask 719872   ;;  %s15567_s16 = smov 124  }
 0x22b   : > { %15321 = vst [vmem:[#allocation185_spill] sm:$0xff] %v11417_v45  ;;  %v15327_v45 = vld [vmem:[#allocation72_spill] sm:$0xff]  ;;  %v11437_v30 = vmul.f32 %v846_v53, %v10299_v59  ;;  %v11440_v44 = vmul.f32 %v846_v53, %v10272_v52  ;;  %v11443_v15 = vmul.f32 %v850_v26, %v10299_v59  ;;  %v11447_v1 = vmul.f32 %v850_v26, %v10272_v52  ;;  %v15336_v59 = vld [vmem:[#allocation27_spill] sm:$0xff] }
 0x22c   : > { %15324 = vst [vmem:[#allocation47_spill] sm:$0xff] %v11427_v18  ;;  %15326 = vst [vmem:[#allocation186_spill] sm:$0xff] %v11430_v4  ;;  %v1333_v32 = vsel %vm1329_vm12, %v15316_v34, %v15327_v45  ;;  %v934_v18 = vrot.slane %v894_v8, %v10079_v12  ;;  %v15332_v4 = vld [vmem:[#allocation46_spill] sm:$0xff]  ;;  %v938_v42 = vrot.slane %v906_v33, %v10079_v12  ;;  %v15333_v34 = vld [vmem:[#allocation49_spill] sm:$0xff]  ;;  %v11456_v28 = vpop.permute.xlu1 %1589 }
 0x22d   : > { %15328 = vst [vmem:[#allocation187_spill] sm:$0xff] %v11437_v30  ;;  %15329 = vst [vmem:[#allocation188_spill] sm:$0xff] %v11440_v44  ;;  %v11450_v0 = vmul.f32 %v1358_v25, %v15332_v4  ;;  %v15334_v45 = vld [vmem:[#allocation74_spill] sm:$0xff]  ;;  %v11459_v53 = vmul.f32 %v1362_v40, %v15332_v4  ;;  %v1370_v52 = vrot.slane %v1333_v32, %v10079_v12  ;;  %v15338_v26 = vld [vmem:[#allocation76_spill] sm:$0xff] }
 0x22e   : > { %15330 = vst [vmem:[#allocation189_spill] sm:$0xff] %v11443_v15  ;;  %15331 = vst [vmem:[#allocation190_spill] sm:$0xff] %v11447_v1  ;;  %v1418_v30 = vsel %vm1417_vm10, %v15334_v45, %v15333_v34  ;;  %v11462_v15 = vmul.f32 %v1358_v25, %v15336_v59  ;;  %v1419_v8 = vsel %vm1417_vm10, %v15333_v34, %v15338_v26  ;;  %v15342_v1 = vld [vmem:[#allocation69_spill] sm:$0xff]  ;;  %2471 = vrot.lane.b32.xlu1 %v10083_v14, %s9907_s25  ;;  %s14973_s25 = smov 108  }
 0x22f   : > { %15335 = vst [vmem:[#allocation49_spill] sm:$0xff] %v11456_v28  ;;  %v11470_v33 = vmul.f32 %v1362_v40, %v15336_v59  ;;  %v11473_v45 = vmul.f32 %v1366_v16, %v15332_v4  ;;  %v15341_v28 = vld [vmem:[#allocation73_spill] sm:$0xff]  ;;  %v1420_v32 = vsel %vm1417_vm10, %v15338_v26, %v15300_v31  ;;  %v11482_v44 = vmul.f32 %v1366_v16, %v15336_v59 }
 0x230   : > { %15337 = vst [vmem:[#allocation74_spill] sm:$0xff] %v11462_v15  ;;  %v1597_v25 = vsel %vm1593_vm14, %v15342_v1, %v15341_v28  ;;  %v11485_v34 = vmul.f32 %v934_v18, %v10329_v6  ;;  %v11488_v40 = vmul.f32 %v934_v18, %v10295_v58  ;;  %v11494_v15 = vmul.f32 %v938_v42, %v10329_v6  ;;  %v11502_v26 = vpop.permute.xlu1 %2027 }
 0x231   : > { %15339 = vst [vmem:[#allocation76_spill] sm:$0xff] %v11470_v33  ;;  %15340 = vst [vmem:[#allocation191_spill] sm:$0xff] %v11473_v45  ;;  %v1446_v33 = vrot.slane %v1418_v30, %v10079_v12  ;;  %v11491_v45 = vpop.permute.xlu0 %393  ;;  %v11497_v28 = vmul.f32 %v938_v42, %v10295_v58  ;;  %v1450_v31 = vrot.slane %v1419_v8, %v10079_v12  ;;  %v15351_v42 = vld [vmem:[#allocation80_spill] sm:$0xff] }
 0x232   : > { %15343 = vst [vmem:[#allocation69_spill] sm:$0xff] %v11482_v44  ;;  %15344 = vst [vmem:[#allocation192_spill] sm:$0xff] %v11485_v34  ;;  %v427_v16 = vmul.f32 %v10092_v17, %v11422_v9  ;;  %v11505_v18 = vmul.f32 %v1370_v52, %v15332_v4  ;;  %v1634_v30 = vrot.slane %v1597_v25, %v10079_v12  ;;  %v2774_v4 = vld [vmem:[%s15168_s3] sm:$0xff]  ;;  %s15706_s3 = smov 28  }
 0x233   : > { %15345 = vst [vmem:[#allocation193_spill] sm:$0xff] %v11488_v40  ;;  %15346 = vst [vmem:[#allocation194_spill] sm:$0xff] %v11494_v15  ;;  %v1454_v40 = vrot.slane %v1420_v32, %v10079_v12  ;;  %v428_v58 = vmul.f32 %v10081_v13, %v11422_v9  ;;  %v11514_v6 = vmul.f32 %v1370_v52, %v15336_v59  ;;  %2778 = vperm.xlu1 %9549, %v2774_v4   ;;  %v15363_v4 = vld [vmem:[#allocation87_spill] sm:$0xff] }
 0x234   : > { %15347 = vst [vmem:[#allocation195_spill] sm:$0xff] %v11497_v28  ;;  %15348 = vst [vmem:[#allocation196_spill] sm:$0xff] %v11502_v26  ;;  %v982_v8 = vsel %vm977_vm6, %v15226_v22, %v15351_v42  ;;  %v983_v25 = vsel %vm977_vm6, %v15351_v42, %v10660_v5  ;;  %v433_v32 = vmul.f32 %v10092_v17, %v11491_v45  ;;  %v15352_v28 = vld [vmem:[#allocation53_spill] sm:$0xff]  ;;  %v15354_v22 = vld [vmem:[#allocation83_spill] sm:$0xff]  ;;  %vm14971_vm6 = vcmask 916480  }
 0x235   : > { %15349 = vst [vmem:[#allocation197_spill] sm:$0xff] %v11505_v18  ;;  %15350 = vst [vmem:[#allocation198_spill] sm:$0xff] %v11514_v6  ;;  %v11528_v14 = vmul.f32 %v1634_v30, %v15352_v28  ;;  %v11531_v52 = vmul.f32 %v1446_v33, %v15325_v51  ;;  %v11534_v59 = vmul.f32 %v1446_v33, %v15323_v60  ;;  %v15355_v17 = vld [vmem:[#allocation85_spill] sm:$0xff]  ;;  %v11547_v6 = vpop.permute.xlu1 %2107 }
 0x236   : > { %v994_v15 = vsel %vm993_vm15, %v983_v25, %v15354_v22  ;;  %v11539_v5 = vmul.f32 %v1450_v31, %v15325_v51  ;;  %v15356_v42 = vld [vmem:[#allocation57_spill] sm:$0xff]  ;;  %v526_v34 = vadd.f32 %v10873_v24, %v427_v16  ;;  %15357 = vst [vmem:[#allocation83_spill] sm:$0xff] %v11547_v6  ;;  %v11550_v33 = vmul.f32 %v1454_v40, %v15325_v51  ;;  %v15359_v16 = vld [vmem:[#allocation59_spill] sm:$0xff] }
 0x237   : > { %15353 = vst [vmem:[#allocation80_spill] sm:$0xff] %v11528_v14  ;;  %v1506_v26 = vsel %vm1505_vm2, %v15356_v42, %v15355_v17  ;;  %v434_v14 = vmul.f32 %v10081_v13, %v11491_v45  ;;  %v1022_v18 = vrot.slane %v982_v8, %v10079_v12  ;;  %v429_v25 = vmul.f32 %v10099_v20, %v11422_v9  ;;  %v15361_v8 = vld [vmem:[#allocation78_spill] sm:$0xff] }
 0x238   : > { %15358 = vst [vmem:[#allocation85_spill] sm:$0xff] %v11550_v33  ;;  %v527_v22 = vadd.f32 %v10887_v48, %v428_v58  ;;  %v11557_v42 = vmul.f32 %v1450_v31, %v15323_v60  ;;  %v1026_v24 = vrot.slane %v994_v15, %v10079_v12  ;;  %v1507_v13 = vsel %vm1505_vm2, %v15355_v17, %v15359_v16  ;;  %v15364_v58 = vld [vmem:[#allocation63_spill] sm:$0xff] }
 0x239   : > { %v532_v51 = vadd.f32 %v10876_v46, %v433_v32  ;;  %v11565_v6 = vmul.f32 %v1454_v40, %v15323_v60  ;;  %v11568_v33 = vmul.f32 %v1634_v30, %v15361_v8  ;;  %v1534_v48 = vrot.slane %v1506_v26, %v10079_v12  ;;  %v15365_v15 = vld [vmem:[#allocation91_spill] sm:$0xff]  ;;  %v15366_v40 = vld [vmem:[#allocation132_spill] sm:$0xff]  ;;  %v11581_v60 = vpop.permute.xlu1 %2111 }
 0x23a   : > { %v1508_v31 = vsel %vm1505_vm2, %v15359_v16, %v15363_v4  ;;  %v1071_v44 = vsel %vm1065_vm7, %v15365_v15, %v15364_v58  ;;  %v609_v17 = vadd.f32 %v10919_v47, %v526_v34  ;;  %v435_v46 = vmul.f32 %v10099_v20, %v11491_v45  ;;  %15367 = vst [vmem:[#allocation87_spill] sm:$0xff] %v11581_v60 }
 0x23b   : > { %15360 = vst [vmem:[#allocation57_spill] sm:$0xff] %v11565_v6  ;;  %15362 = vst [vmem:[#allocation59_spill] sm:$0xff] %v11568_v33  ;;  %v533_v32 = vadd.f32 %v15366_v40, %v434_v14  ;;  %v11584_v30 = vmul.f32 %v1022_v18, %v15235_v43  ;;  %v1538_v26 = vrot.slane %v1507_v13, %v10079_v12  ;;  %v15369_v33 = vld [vmem:[#allocation131_spill] sm:$0xff]  ;;  %vm15007_vm15 = vcmask 343040  }
 0x23c   : > { %v528_v16 = vadd.f32 %v15369_v33, %v429_v25  ;;  %v610_v6 = vadd.f32 %v10931_v29, %v527_v22  ;;  %v11590_v58 = vmul.f32 %v1022_v18, %v15237_v49  ;;  %v11593_v47 = vmul.f32 %v1026_v24, %v15235_v43  ;;  %v15373_v14 = vld [vmem:[#allocation43_spill] sm:$0xff]  ;;  %v15374_v33 = vld [vmem:[#allocation65_spill] sm:$0xff]  ;;  %v15375_v43 = vld [vmem:[#allocation90_spill] sm:$0xff] }
 0x23d   : > { %15368 = vst [vmem:[#allocation63_spill] sm:$0xff] %v11584_v30  ;;  %v11596_v20 = vmul.f32 %v1026_v24, %v15237_v49  ;;  %v615_v34 = vadd.f32 %v10922_v2, %v532_v51  ;;  %v11600_v40 = vmul.f32 %v1534_v48, %v15373_v14  ;;  %v1542_v13 = vrot.slane %v1508_v31, %v10079_v12  ;;  %v15376_v25 = vld [vmem:[#allocation86_spill] sm:$0xff]  ;;  %v11614_v24 = vpop.permute.xlu1 %2316 }
 0x23e   : > { %15370 = vst [vmem:[#allocation91_spill] sm:$0xff] %v11590_v58  ;;  %15371 = vst [vmem:[#allocation132_spill] sm:$0xff] %v11593_v47  ;;  %v1070_v29 = vsel %vm1065_vm7, %v15259_v7, %v15365_v15  ;;  %v1082_v18 = vsel %vm1081_vm4, %v1071_v44, %v15374_v33  ;;  %v1773_v49 = vsel %vm1769_vm5, %v15376_v25, %v15375_v43  ;;  %v15378_v7 = vld [vmem:[#allocation68_spill] sm:$0xff]  ;;  %v15388_v58 = vld [vmem:[#allocation142_spill] sm:$0xff]  ;;  %vm1945_vm7 = vcmask 334848  }
 0x23f   : > { %15372 = vst [vmem:[#allocation131_spill] sm:$0xff] %v11596_v20  ;;  %v692_v2 = vadd.f32 %v10965_v50, %v609_v17  ;;  %v534_v51 = vadd.f32 %v10907_v21, %v435_v46  ;;  %v616_v22 = vadd.f32 %v10942_v55, %v533_v32  ;;  %15377 = vst [vmem:[#allocation65_spill] sm:$0xff] %v11614_v24  ;;  %v15379_v44 = vld [vmem:[#allocation136_spill] sm:$0xff]  ;;  %v15380_v17 = vld [vmem:[#allocation93_spill] sm:$0xff]  ;;  %vm2033_vm4 = vcmask 326656  }
 0x240   : > { %v11617_v31 = vmul.f32 %v1538_v26, %v15373_v14  ;;  %v11620_v15 = vmul.f32 %v1534_v48, %v15378_v7  ;;  %v611_v33 = vadd.f32 %v15379_v44, %v528_v16  ;;  %v693_v20 = vadd.f32 %v10977_v3, %v610_v6  ;;  %v15381_v6 = vld [vmem:[#allocation67_spill] sm:$0xff] }
 0x241   : > { %v1110_v43 = vrot.slane %v1070_v29, %v10079_v12  ;;  %v1114_v50 = vrot.slane %v1082_v18, %v10079_v12  ;;  %v1509_v21 = vsel %vm1505_vm2, %v15363_v4, %v15380_v17  ;;  %v698_v55 = vadd.f32 %v10968_v54, %v615_v34  ;;  %v15382_v16 = vld [vmem:[#allocation95_spill] sm:$0xff]  ;;  %v15383_v4 = vld [vmem:[#allocation137_spill] sm:$0xff] }
 0x242   : > { %v11631_v46 = vmul.f32 %v1538_v26, %v15378_v7  ;;  %v11634_v48 = vmul.f32 %v1542_v13, %v15373_v14  ;;  %v11637_v32 = vmul.f32 %v1542_v13, %v15378_v7  ;;  %v1810_v3 = vrot.slane %v1773_v49, %v10079_v12  ;;  %v15384_v54 = vld [vmem:[#allocation143_spill] sm:$0xff]  ;;  %v11646_v26 = vpop.permute.xlu1 %1677 }
 0x243   : > { %v1594_v29 = vsel %vm1593_vm14, %v15382_v16, %v15381_v6  ;;  %v775_v18 = vadd.f32 %v11009_v23, %v692_v2  ;;  %v617_v44 = vadd.f32 %v15383_v4, %v534_v51  ;;  %v699_v34 = vadd.f32 %v15384_v54, %v616_v22  ;;  %15385 = vst [vmem:[#allocation86_spill] sm:$0xff] %v11646_v26  ;;  %v15386_v17 = vld [vmem:[#allocation71_spill] sm:$0xff]  ;;  %v15393_v16 = vld [vmem:[#allocation97_spill] sm:$0xff] }
 0x244   : > { %v11649_v47 = vmul.f32 %v1810_v3, %v15386_v17  ;;  %v1546_v13 = vrot.slane %v1509_v21, %v10079_v12  ;;  %v694_v30 = vadd.f32 %v15388_v58, %v611_v33  ;;  %v776_v49 = vadd.f32 %v11022_v39, %v693_v20 }
 0x245   : > { %v11655_v24 = vmul.f32 %v1110_v43, %v15257_v62  ;;  %v11658_v23 = vmul.f32 %v1114_v50, %v15257_v62  ;;  %v11661_v2 = vmul.f32 %v1110_v43, %v15264_v11  ;;  %v781_v51 = vadd.f32 %v11012_v61, %v698_v55  ;;  %v15394_v62 = vld [vmem:[#allocation101_spill] sm:$0xff]  ;;  %v15397_v55 = vld [vmem:[#allocation103_spill] sm:$0xff] }
 0x246   : > { %15387 = vst [vmem:[#allocation136_spill] sm:$0xff] %v11649_v47  ;;  %v11665_v22 = vmul.f32 %v1114_v50, %v15264_v11  ;;  %v1622_v21 = vrot.slane %v1594_v29, %v10079_v12  ;;  %v1595_v39 = vsel %vm1593_vm14, %v15381_v6, %v15393_v16  ;;  %v1596_v58 = vsel %vm1593_vm14, %v15393_v16, %v15342_v1  ;;  %v11680_v33 = vpop.permute.xlu1 %1679  ;;  %v15398_v6 = vld [vmem:[#allocation148_spill] sm:$0xff]  ;;  %v15439_v47 = vld [vmem:[#allocation42_spill] sm:$0xff] }
 0x247   : > { %15389 = vst [vmem:[#allocation67_spill] sm:$0xff] %v11655_v24  ;;  %15390 = vst [vmem:[#allocation95_spill] sm:$0xff] %v11658_v23  ;;  %v1158_v20 = vsel %vm14963_vm9, %v15282_v41, %v15394_v62  ;;  %v863_v61 = vadd.f32 %v11054_v56, %v775_v18  ;;  %v700_v11 = vadd.f32 %v10997_v37, %v617_v44  ;;  %v15399_v37 = vld [vmem:[#allocation105_spill] sm:$0xff] }
 0x248   : > { %15391 = vst [vmem:[#allocation137_spill] sm:$0xff] %v11661_v2  ;;  %15392 = vst [vmem:[#allocation143_spill] sm:$0xff] %v11665_v22  ;;  %v782_v43 = vadd.f32 %v11033_v63, %v699_v34  ;;  %v11683_v50 = vmul.f32 %v1546_v13, %v15373_v14  ;;  %v1159_v1 = vsel %vm14963_vm9, %v15394_v62, %v15397_v55  ;;  %v15400_v18 = vld [vmem:[#allocation153_spill] sm:$0xff]  ;;  %v15403_v62 = vld [vmem:[#allocation75_spill] sm:$0xff]  ;;  %vm15004_vm9 = vcmask 97280  }
 0x249   : > { %15395 = vst [vmem:[#allocation142_spill] sm:$0xff] %v11680_v33  ;;  %v777_v29 = vadd.f32 %v15398_v6, %v694_v30  ;;  %v864_v4 = vadd.f32 %v11069_v36, %v776_v49  ;;  %v1626_v41 = vrot.slane %v1595_v39, %v10079_v12  ;;  %v1630_v56 = vrot.slane %v1596_v58, %v10079_v12  ;;  %v15402_v30 = vld [vmem:[#allocation107_spill] sm:$0xff]  ;;  %v15404_v39 = vld [vmem:[#allocation161_spill] sm:$0xff]  ;;  %v15409_v33 = vld [vmem:[#allocation154_spill] sm:$0xff] }
 0x24a   : > { %15396 = vst [vmem:[#allocation97_spill] sm:$0xff] %v11683_v50  ;;  %v1170_v63 = vsel %vm14971_vm6, %v1159_v1, %v15399_v37  ;;  %v869_v44 = vadd.f32 %v15400_v18, %v781_v51  ;;  %v11696_v54 = vmul.f32 %v1546_v13, %v15378_v7  ;;  %v11699_v34 = vmul.f32 %v1622_v21, %v15361_v8  ;;  %v15405_v55 = vld [vmem:[#allocation149_spill] sm:$0xff]  ;;  %v15406_v1 = vld [vmem:[#allocation155_spill] sm:$0xff]  ;;  %v11711_v6 = vpop.permute.xlu1 %1694  ;;  %v15422_v14 = vld [vmem:[#allocation34_spill] sm:$0xff] }
 0x24b   : > { %v1198_v16 = vrot.slane %v1158_v20, %v10079_v12  ;;  %v1682_v36 = vsel %vm15008_vm11, %v15403_v62, %v15402_v30  ;;  %v11706_v49 = vmul.f32 %v1622_v21, %v15352_v28  ;;  %v951_v58 = vadd.f32 %v15404_v39, %v863_v61  ;;  %15407 = vst [vmem:[#allocation103_spill] sm:$0xff] %v11711_v6  ;;  %v15408_v18 = vld [vmem:[#allocation77_spill] sm:$0xff]  ;;  %v15410_v7 = vld [vmem:[#allocation163_spill] sm:$0xff]  ;;  %v15416_v6 = vld [vmem:[#allocation156_spill] sm:$0xff] }
 0x24c   : > { %15401 = vst [vmem:[#allocation101_spill] sm:$0xff] %v11696_v54  ;;  %v783_v51 = vadd.f32 %v15405_v55, %v700_v11  ;;  %v870_v13 = vadd.f32 %v15406_v1, %v782_v43  ;;  %v1202_v37 = vrot.slane %v1170_v63, %v10079_v12  ;;  %v1683_v20 = vsel %vm15008_vm11, %v15402_v30, %v15408_v18  ;;  %v15411_v43 = vld [vmem:[#allocation162_spill] sm:$0xff]  ;;  %v15412_v30 = vld [vmem:[#allocation99_spill] sm:$0xff]  ;;  %v15438_v24 = vld [vmem:[#allocation169_spill] sm:$0xff] }
 0x24d   : > { %v865_v62 = vadd.f32 %v15409_v33, %v777_v29  ;;  %v952_v26 = vadd.f32 %v15410_v7, %v864_v4  ;;  %v11720_v21 = vmul.f32 %v1626_v41, %v15361_v8  ;;  %v11723_v61 = vmul.f32 %v1630_v56, %v15361_v8  ;;  %v15415_v4 = vld [vmem:[#allocation15_spill] sm:$0xff]  ;;  %v15417_v8 = vld [vmem:[#allocation28_spill] sm:$0xff]  ;;  %v15440_v50 = vld [vmem:[#allocation82_spill] sm:$0xff] }
 0x24e   : > { %v1710_v11 = vrot.slane %v1682_v36, %v10079_v12  ;;  %v957_v39 = vadd.f32 %v15411_v43, %v869_v44  ;;  %v11728_v63 = vmul.f32 %v1626_v41, %v15352_v28  ;;  %v11731_v55 = vmul.f32 %v1630_v56, %v15352_v28  ;;  %v11743_v43 = vpop.permute.xlu1 %2197 }
 0x24f   : > { %v11734_v33 = vmul.f32 %v1810_v3, %v15412_v30  ;;  %v11737_v7 = vmul.f32 %v1198_v16, %v15288_v19  ;;  %v1714_v29 = vrot.slane %v1683_v20, %v10079_v12  ;;  %v1039_v1 = vadd.f32 %v15415_v4, %v951_v58  ;;  %15418 = vst [vmem:[#allocation153_spill] sm:$0xff] %v11743_v43  ;;  %v15421_v3 = vld [vmem:[#allocation16_spill] sm:$0xff]  ;;  %v15424_v58 = vld [vmem:[#allocation61_spill] sm:$0xff] }
 0x250   : > { %v871_v36 = vadd.f32 %v15416_v6, %v783_v51  ;;  %v958_v44 = vadd.f32 %v15417_v8, %v870_v13  ;;  %v11746_v41 = vmul.f32 %v1198_v16, %v15289_v10  ;;  %v11749_v56 = vmul.f32 %v1202_v37, %v15288_v19  ;;  %v15425_v51 = vld [vmem:[#allocation108_spill] sm:$0xff]  ;;  %v15427_v6 = vld [vmem:[#allocation13_spill] sm:$0xff] }
 0x251   : > { %15413 = vst [vmem:[#allocation148_spill] sm:$0xff] %v11734_v33  ;;  %15414 = vst [vmem:[#allocation105_spill] sm:$0xff] %v11737_v7  ;;  %v953_v28 = vadd.f32 %v15421_v3, %v865_v62  ;;  %v1040_v22 = vadd.f32 %v15422_v14, %v952_v26  ;;  %v11754_v20 = vmul.f32 %v1202_v37, %v15289_v10  ;;  %v15426_v8 = vld [vmem:[#allocation104_spill] sm:$0xff]  ;;  %v15430_v62 = vld [vmem:[#allocation37_spill] sm:$0xff]  ;;  %vm1345_vm6 = vcmask 711680  }
 0x252   : > { %15419 = vst [vmem:[#allocation107_spill] sm:$0xff] %v11746_v41  ;;  %15420 = vst [vmem:[#allocation75_spill] sm:$0xff] %v11749_v56  ;;  %v11757_v4 = vmul.f32 %v1710_v11, %v15424_v58  ;;  %v1949_v13 = vsel %vm1945_vm7, %v15426_v8, %v15425_v51  ;;  %v1045_v16 = vadd.f32 %v15427_v6, %v957_v39  ;;  %v15428_v41 = vld [vmem:[#allocation109_spill] sm:$0xff]  ;;  %v15432_v37 = vld [vmem:[#allocation11_spill] sm:$0xff]  ;;  %v11780_v7 = vpop.permute.xlu1 %2201 }
 0x253   : > { %15423 = vst [vmem:[#allocation161_spill] sm:$0xff] %v11754_v20  ;;  %v1684_v19 = vsel %vm15008_vm11, %v15408_v18, %v15428_v41  ;;  %v15429_v56 = vld [vmem:[#allocation113_spill] sm:$0xff]  ;;  %v430_v3 = vmul.f32 %v15432_v37, %v11422_v9  ;;  %v11775_v20 = vmul.f32 %v1714_v29, %v15424_v58  ;;  %v15433_v39 = vld [vmem:[#allocation18_spill] sm:$0xff]  ;;  %v15435_v18 = vld [vmem:[#allocation20_spill] sm:$0xff]  ;;  %v1128_v33 = vadd.f32 %v15439_v47, %v1040_v22 }
 0x254   : > { %v1246_v14 = vsel %vm15011_vm8, %v15430_v62, %v15429_v56  ;;  %v15431_v26 = vld [vmem:[#allocation81_spill] sm:$0xff]  ;;  %v959_v6 = vadd.f32 %v15433_v39, %v871_v36  ;;  %v15434_v51 = vld [vmem:[#allocation170_spill] sm:$0xff]  ;;  %v1127_v2 = vadd.f32 %v15435_v18, %v1039_v1  ;;  %15436 = vst [vmem:[#allocation149_spill] sm:$0xff] %v11780_v7  ;;  %v11783_v62 = vrot.slane %v1949_v13, %v10079_v12  ;;  %v15441_v1 = vld [vmem:[#allocation24_spill] sm:$0xff] }
 0x255   : > { %v1247_v10 = vsel %vm15011_vm8, %v15429_v56, %v15431_v26  ;;  %v1046_v23 = vadd.f32 %v15434_v51, %v958_v44  ;;  %v1041_v56 = vadd.f32 %v15438_v24, %v953_v28  ;;  %v436_v26 = vmul.f32 %v15432_v37, %v11491_v45  ;;  %v15442_v39 = vld [vmem:[#allocation89_spill] sm:$0xff]  ;;  %v15443_v28 = vld [vmem:[#allocation88_spill] sm:$0xff]  ;;  %v15448_v37 = vld [vmem:[#allocation14_spill] sm:$0xff] }
 0x256   : > { %15437 = vst [vmem:[#allocation155_spill] sm:$0xff] %v11783_v62  ;;  %v1718_v54 = vrot.slane %v1684_v19, %v10079_v12  ;;  %v1258_v36 = vsel %vm14962_vm13, %v1247_v10, %v15440_v50  ;;  %v1286_v44 = vrot.slane %v1246_v14, %v10079_v12  ;;  %v1133_v51 = vadd.f32 %v15441_v1, %v1045_v16  ;;  %v15445_v47 = vld [vmem:[#allocation133_spill] sm:$0xff]  ;;  %v15446_v19 = vld [vmem:[#allocation115_spill] sm:$0xff]  ;;  %v11811_v1 = vpop.permute.xlu1 %2408  ;;  %v15450_v7 = vld [vmem:[#allocation134_spill] sm:$0xff] }
 0x257   : > { %v11795_v18 = vmul.f32 %v1710_v11, %v15442_v39  ;;  %v11798_v13 = vmul.f32 %v1714_v29, %v15442_v39  ;;  %v11802_v24 = vmul.f32 %v11783_v62, %v15443_v28  ;;  %v529_v22 = vadd.f32 %v15445_v47, %v430_v3  ;;  %v15447_v10 = vld [vmem:[#allocation171_spill] sm:$0xff]  ;;  %15449 = vst [vmem:[#allocation154_spill] sm:$0xff] %v11811_v1  ;;  %v15451_v62 = vld [vmem:[#allocation44_spill] sm:$0xff] }
 0x258   : > { %v1685_v50 = vsel %vm15008_vm11, %v15428_v41, %v15446_v19  ;;  %v1047_v14 = vadd.f32 %v15447_v10, %v959_v6  ;;  %v1134_v16 = vadd.f32 %v15448_v37, %v1046_v23  ;;  %v1215_v11 = vadd.f32 %v11315_v57, %v1127_v2  ;;  %v15454_v57 = vld [vmem:[#allocation52_spill] sm:$0xff]  ;;  %v15460_v10 = vld [vmem:[#allocation54_spill] sm:$0xff] }
 0x259   : > { %15444 = vst [vmem:[#allocation77_spill] sm:$0xff] %v11802_v24  ;;  %v1290_v29 = vrot.slane %v1258_v36, %v10079_v12  ;;  %v535_v43 = vadd.f32 %v15450_v7, %v436_v26  ;;  %v1216_v24 = vadd.f32 %v11321_v38, %v1128_v33  ;;  %v1129_v3 = vadd.f32 %v15451_v62, %v1041_v56  ;;  %v15456_v26 = vld [vmem:[#allocation84_spill] sm:$0xff]  ;;  %v15457_v38 = vld [vmem:[#allocation117_spill] sm:$0xff]  ;;  %v15458_v62 = vld [vmem:[#allocation139_spill] sm:$0xff] }
 0x25a   : > { %v11818_v47 = vmul.f32 %v1718_v54, %v15424_v58  ;;  %v11821_v41 = vmul.f32 %v1718_v54, %v15442_v39  ;;  %v11824_v23 = vmul.f32 %v1286_v44, %v15274_v27  ;;  %v1221_v2 = vadd.f32 %v15454_v57, %v1133_v51  ;;  %v15459_v36 = vld [vmem:[#allocation119_spill] sm:$0xff]  ;;  %v15461_v19 = vld [vmem:[#allocation64_spill] sm:$0xff]  ;;  %v15462_v51 = vld [vmem:[#allocation25_spill] sm:$0xff] }
 0x25b   : > { %v11828_v6 = vmul.f32 %v1286_v44, %v15276_v35  ;;  %v1722_v7 = vrot.slane %v1685_v50, %v10079_v12  ;;  %v1770_v33 = vsel %vm1769_vm5, %v15457_v38, %v15456_v26  ;;  %v612_v56 = vadd.f32 %v15458_v62, %v529_v22  ;;  %v11841_v44 = vpop.permute.xlu1 %1765  ;;  %v15466_v38 = vld [vmem:[#allocation41_spill] sm:$0xff] }
 0x25c   : > { %15452 = vst [vmem:[#allocation163_spill] sm:$0xff] %v11821_v41  ;;  %15453 = vst [vmem:[#allocation162_spill] sm:$0xff] %v11824_v23  ;;  %v1771_v54 = vsel %vm1769_vm5, %v15456_v26, %v15459_v36  ;;  %v1222_v37 = vadd.f32 %v15460_v10, %v1134_v16  ;;  %v1303_v23 = vadd.f32 %v15461_v19, %v1215_v11  ;;  %v15467_v22 = vld [vmem:[#allocation17_spill] sm:$0xff]  ;;  %v15472_v26 = vld [vmem:[#allocation144_spill] sm:$0xff]  ;;  %vm15003_vm13 = vcmask 105472  }
 0x25d   : > { %15455 = vst [vmem:[#allocation15_spill] sm:$0xff] %v11828_v6  ;;  %v1135_v57 = vadd.f32 %v15462_v51, %v1047_v14  ;;  %15463 = vst [vmem:[#allocation156_spill] sm:$0xff] %v11841_v44  ;;  %v11844_v50 = vmul.f32 %v1290_v29, %v15274_v27  ;;  %v15465_v6 = vld [vmem:[#allocation140_spill] sm:$0xff]  ;;  %v1304_v60 = vadd.f32 %v15466_v38, %v1216_v24  ;;  %v15469_v14 = vld [vmem:[#allocation39_spill] sm:$0xff] }
 0x25e   : > { %v618_v1 = vadd.f32 %v15465_v6, %v535_v43  ;;  %v1217_v62 = vadd.f32 %v15467_v22, %v1129_v3  ;;  %v11850_v41 = vmul.f32 %v1290_v29, %v15276_v35  ;;  %v1798_v16 = vrot.slane %v1770_v33, %v10079_v12  ;;  %v15470_v6 = vld [vmem:[#allocation128_spill] sm:$0xff]  ;;  %v15473_v29 = vld [vmem:[#allocation94_spill] sm:$0xff]  ;;  %v15477_v22 = vld [vmem:[#allocation145_spill] sm:$0xff] }
 0x25f   : > { %15464 = vst [vmem:[#allocation28_spill] sm:$0xff] %v11844_v50  ;;  %v1772_v19 = vsel %vm1769_vm5, %v15459_v36, %v15376_v25  ;;  %v1309_v11 = vadd.f32 %v15469_v14, %v1221_v2  ;;  %v11858_v27 = vmul.f32 %v1722_v7, %v15424_v58  ;;  %v1802_v43 = vrot.slane %v1771_v54, %v10079_v12  ;;  %v15471_v24 = vld [vmem:[#allocation92_spill] sm:$0xff]  ;;  %v15474_v10 = vld [vmem:[#allocation66_spill] sm:$0xff]  ;;  %v11871_v38 = vpop.permute.xlu1 %2203  ;;  %v15478_v58 = vld [vmem:[#allocation45_spill] sm:$0xff] }
 0x260   : > { %15468 = vst [vmem:[#allocation16_spill] sm:$0xff] %v11850_v41  ;;  %v1858_v3 = vsel %vm15007_vm15, %v15471_v24, %v15470_v6  ;;  %v695_v35 = vadd.f32 %v15472_v26, %v612_v56  ;;  %v1859_v33 = vsel %vm15007_vm15, %v15470_v6, %v15473_v29  ;;  %v1310_v51 = vadd.f32 %v15474_v10, %v1222_v37  ;;  %v15475_v2 = vld [vmem:[#allocation180_spill] sm:$0xff]  ;;  %v15494_v41 = vld [vmem:[#allocation111_spill] sm:$0xff] }
 0x261   : > { %v1391_v25 = vadd.f32 %v11450_v0, %v1303_v23  ;;  %v1223_v36 = vadd.f32 %v15475_v2, %v1135_v57  ;;  %15476 = vst [vmem:[#allocation34_spill] sm:$0xff] %v11871_v38  ;;  %v1806_v54 = vrot.slane %v1772_v19, %v10079_v12  ;;  %v701_v14 = vadd.f32 %v15477_v22, %v618_v1  ;;  %v15479_v23 = vld [vmem:[#allocation74_spill] sm:$0xff]  ;;  %v15482_v19 = vld [vmem:[#allocation76_spill] sm:$0xff]  ;;  %v15483_v2 = vld [vmem:[#allocation185_spill] sm:$0xff] }
 0x262   : > { %v1392_v24 = vadd.f32 %v11459_v53, %v1304_v60  ;;  %v1305_v56 = vadd.f32 %v15478_v58, %v1217_v62  ;;  %v11878_v26 = vmul.f32 %v1722_v7, %v15442_v39  ;;  %v11881_v6 = vmul.f32 %v1798_v16, %v15412_v30  ;;  %v15480_v53 = vld [vmem:[#allocation150_spill] sm:$0xff]  ;;  %v15481_v62 = vld [vmem:[#allocation129_spill] sm:$0xff] }
 0x263   : > { %v11884_v0 = vmul.f32 %v1798_v16, %v15386_v17  ;;  %v1397_v37 = vadd.f32 %v15479_v23, %v1309_v11  ;;  %v11888_v57 = vmul.f32 %v1802_v43, %v15412_v30  ;;  %v1886_v1 = vrot.slane %v1858_v3, %v10079_v12  ;;  %v11899_v11 = vpop.permute.xlu1 %2283  ;;  %v15484_v3 = vld [vmem:[#allocation151_spill] sm:$0xff] }
 0x264   : > { %v1890_v60 = vrot.slane %v1859_v33, %v10079_v12  ;;  %v778_v58 = vadd.f32 %v15480_v53, %v695_v35  ;;  %v1860_v7 = vsel %vm15007_vm15, %v15473_v29, %v15481_v62  ;;  %v1398_v10 = vadd.f32 %v15482_v19, %v1310_v51  ;;  %v15485_v35 = vld [vmem:[#allocation191_spill] sm:$0xff]  ;;  %v15487_v51 = vld [vmem:[#allocation72_spill] sm:$0xff] }
 0x265   : > { %v1479_v16 = vadd.f32 %v11531_v52, %v1391_v25  ;;  %v1311_v22 = vadd.f32 %v15483_v2, %v1223_v36  ;;  %v11902_v23 = vmul.f32 %v1806_v54, %v15412_v30  ;;  %v784_v39 = vadd.f32 %v15484_v3, %v701_v14  ;;  %v15486_v52 = vld [vmem:[#allocation123_spill] sm:$0xff] }
 0x266   : > { %v1480_v33 = vadd.f32 %v11539_v5, %v1392_v24  ;;  %v1393_v53 = vadd.f32 %v15485_v35, %v1305_v56  ;;  %v11908_v44 = vmul.f32 %v1802_v43, %v15386_v17  ;;  %v11911_v29 = vmul.f32 %v1806_v54, %v15386_v17  ;;  %v15488_v19 = vld [vmem:[#allocation79_spill] sm:$0xff]  ;;  %v15489_v43 = vld [vmem:[#allocation158_spill] sm:$0xff]  ;;  %v15491_v54 = vld [vmem:[#allocation152_spill] sm:$0xff]  ;;  %v11930_v35 = vpop.permute.xlu0 %2291 }
 0x267   : > { %v11916_v25 = vsel %vm1329_vm12, %v15487_v51, %v15486_v52  ;;  %v1485_v36 = vadd.f32 %v11534_v59, %v1397_v37  ;;  %v11920_v2 = vmul.f32 %v1886_v1, %v15488_v19  ;;  %v11923_v5 = vmul.f32 %v1890_v60, %v15488_v19  ;;  %v15490_v56 = vld [vmem:[#allocation102_spill] sm:$0xff]  ;;  %15492 = vst [vmem:[#allocation104_spill] sm:$0xff] %v11930_v35  ;;  %v15493_v37 = vld [vmem:[#allocation69_spill] sm:$0xff]  ;;  %v11935_v30 = vpop.permute.xlu1 %2287 }
 0x268   : > { %v1894_v14 = vrot.slane %v1860_v7, %v10079_v12  ;;  %v866_v24 = vadd.f32 %v15489_v43, %v778_v58  ;;  %v1946_v3 = vsel %vm1945_vm7, %v15491_v54, %v15490_v56  ;;  %v1486_v51 = vadd.f32 %v11557_v42, %v1398_v10  ;;  %v15495_v7 = vld [vmem:[#allocation160_spill] sm:$0xff]  ;;  %v15496_v43 = vld [vmem:[#allocation85_spill] sm:$0xff]  ;;  %v15497_v42 = vld [vmem:[#allocation159_spill] sm:$0xff] }
 0x269   : > { %v1567_v59 = vadd.f32 %v11600_v40, %v1479_v16  ;;  %v1399_v17 = vadd.f32 %v15493_v37, %v1311_v22  ;;  %v11938_v50 = vmul.f32 %v1886_v1, %v15494_v41  ;;  %v872_v38 = vadd.f32 %v15495_v7, %v784_v39  ;;  %v15498_v10 = vld [vmem:[#allocation12_spill] sm:$0xff]  ;;  %v15500_v7 = vld [vmem:[#allocation57_spill] sm:$0xff] }
 0x26a   : > { %v1568_v58 = vadd.f32 %v11617_v31, %v1480_v33  ;;  %v1481_v54 = vadd.f32 %v15496_v43, %v1393_v53  ;;  %v11944_v35 = vmul.f32 %v1890_v60, %v15494_v41  ;;  %v1947_v40 = vsel %vm1945_vm7, %v15490_v56, %v15497_v42  ;;  %v15499_v33 = vld [vmem:[#allocation167_spill] sm:$0xff] }
 0x26b   : > { %v431_v16 = vmul.f32 %v15498_v10, %v11422_v9  ;;  %v1573_v1 = vadd.f32 %v11620_v15, %v1485_v36  ;;  %v11953_v22 = vmul.f32 %v1894_v14, %v15488_v19  ;;  %v11956_v31 = vmul.f32 %v1894_v14, %v15494_v41  ;;  %v11966_v36 = vpop.permute.xlu1 %2492  ;;  %v15501_v14 = vld [vmem:[#allocation168_spill] sm:$0xff] }
 0x26c   : > { %v1974_v39 = vrot.slane %v1946_v3, %v10079_v12  ;;  %v954_v60 = vadd.f32 %v15499_v33, %v866_v24  ;;  %v1948_v53 = vsel %vm1945_vm7, %v15497_v42, %v15426_v8  ;;  %v1574_v56 = vadd.f32 %v11631_v46, %v1486_v51  ;;  %v15502_v33 = vld [vmem:[#allocation146_spill] sm:$0xff]  ;;  %v15504_v51 = vld [vmem:[#allocation164_spill] sm:$0xff] }
 0x26d   : > { %v1655_v37 = vadd.f32 %v11699_v34, %v1567_v59  ;;  %v1487_v15 = vadd.f32 %v15500_v7, %v1399_v17  ;;  %v1978_v43 = vrot.slane %v1947_v40, %v10079_v12  ;;  %v960_v41 = vadd.f32 %v15501_v14, %v872_v38  ;;  %v15503_v46 = vld [vmem:[#allocation10_spill] sm:$0xff]  ;;  %v11980_v59 = vpop.permute.xlu0 %2371  ;;  %v15505_v40 = vld [vmem:[#allocation121_spill] sm:$0xff] }
 0x26e   : > { %v1656_v3 = vadd.f32 %v11720_v21, %v1568_v58  ;;  %v1569_v24 = vadd.f32 %v11634_v48, %v1481_v54  ;;  %v11975_v8 = vsel %vm15007_vm15, %v15481_v62, %v15502_v33  ;;  %v432_v34 = vmul.f32 %v15503_v46, %v11422_v9  ;;  %v15506_v58 = vld [vmem:[#allocation174_spill] sm:$0xff] }
 0x26f   : > { %v530_v17 = vadd.f32 %v15504_v51, %v431_v16  ;;  %v1661_v42 = vadd.f32 %v11706_v49, %v1573_v1  ;;  %v1995_v38 = vmul.f32 %v1974_v39, %v15505_v40  ;;  %v1982_v21 = vrot.slane %v1948_v53, %v10079_v12  ;;  %v11994_v14 = vpop.permute.xlu1 %1853  ;;  %v15508_v1 = vld [vmem:[#allocation175_spill] sm:$0xff] }
 0x270   : > { %v1042_v48 = vadd.f32 %v15506_v58, %v954_v60  ;;  %v437_v54 = vmul.f32 %v15498_v10, %v11491_v45  ;;  %v11989_v62 = vmul.f32 %v1974_v39, %v15443_v28  ;;  %v1662_v9 = vadd.f32 %v11728_v63, %v1574_v56  ;;  %15507 = vst [vmem:[#allocation13_spill] sm:$0xff] %v11994_v14  ;;  %v15509_v10 = vld [vmem:[#allocation165_spill] sm:$0xff]  ;;  %v15510_v39 = vld [vmem:[#allocation172_spill] sm:$0xff] }
 0x271   : > { %v1743_v16 = vadd.f32 %v11757_v4, %v1655_v37  ;;  %v1575_v7 = vadd.f32 %v11637_v32, %v1487_v15  ;;  %v1996_v49 = vmul.f32 %v1978_v43, %v15505_v40  ;;  %v1048_v53 = vadd.f32 %v15508_v1, %v960_v41  ;;  %v15511_v37 = vld [vmem:[#allocation19_spill] sm:$0xff]  ;;  %v15519_v1 = vld [vmem:[#allocation22_spill] sm:$0xff] }
 0x272   : > { %v1744_v60 = vadd.f32 %v11775_v20, %v1656_v3  ;;  %v1657_v51 = vadd.f32 %v11723_v61, %v1569_v24  ;;  %v531_v58 = vadd.f32 %v15509_v10, %v432_v34  ;;  %v613_v33 = vadd.f32 %v15510_v39, %v530_v17  ;;  %v15512_v15 = vld [vmem:[#allocation179_spill] sm:$0xff]  ;;  %v15513_v24 = vld [vmem:[#allocation26_spill] sm:$0xff]  ;;  %v15520_v39 = vld [vmem:[#allocation32_spill] sm:$0xff] }
 0x273   : > { %v438_v63 = vmul.f32 %v15503_v46, %v11491_v45  ;;  %v1749_v4 = vadd.f32 %v11795_v18, %v1661_v42  ;;  %v12006_v32 = vmul.f32 %v1982_v21, %v15505_v40  ;;  %v2002_v56 = vmul.f32 %v1978_v43, %v15443_v28  ;;  %v15514_v34 = vld [vmem:[#allocation110_spill] sm:$0xff]  ;;  %v12016_v45 = vpop.permute.xlu0 %2375  ;;  %v12019_v46 = vpop.permute.xlu1 %1855  ;;  %v15516_v42 = vld [vmem:[#allocation112_spill] sm:$0xff] }
 0x274   : > { %v536_v41 = vadd.f32 %v15511_v37, %v437_v54  ;;  %v1130_v20 = vadd.f32 %v15512_v15, %v1042_v48  ;;  %v1750_v61 = vadd.f32 %v11798_v13, %v1662_v9  ;;  %v1831_v3 = vadd.f32 %v11881_v6, %v1743_v16  ;;  %15515 = vst [vmem:[#allocation109_spill] sm:$0xff] %v12019_v46  ;;  %v15517_v54 = vld [vmem:[#allocation31_spill] sm:$0xff]  ;;  %v15518_v9 = vld [vmem:[#allocation173_spill] sm:$0xff]  ;;  %v15522_v15 = vld [vmem:[#allocation60_spill] sm:$0xff] }
 0x275   : > { %v2034_v17 = vsel %vm2033_vm4, %v15514_v34, %v15513_v24  ;;  %v1663_v18 = vadd.f32 %v11731_v55, %v1575_v7  ;;  %v1832_v43 = vadd.f32 %v11888_v57, %v1744_v60  ;;  %v2035_v48 = vsel %vm2033_vm4, %v15513_v24, %v15516_v42  ;;  %v15521_v37 = vld [vmem:[#allocation33_spill] sm:$0xff]  ;;  %v15524_v34 = vld [vmem:[#allocation163_spill] sm:$0xff]  ;;  %v15559_v46 = vld [vmem:[#allocation176_spill] sm:$0xff] }
 0x276   : > { %v1745_v13 = vadd.f32 %v11818_v47, %v1657_v51  ;;  %v1136_v6 = vadd.f32 %v15517_v54, %v1048_v53  ;;  %v614_v16 = vadd.f32 %v15518_v9, %v531_v58  ;;  %v696_v10 = vadd.f32 %v15519_v1, %v613_v33  ;;  %v15523_v51 = vld [vmem:[#allocation62_spill] sm:$0xff] }
 0x277   : > { %v537_v55 = vadd.f32 %v15520_v39, %v438_v63  ;;  %v1837_v7 = vadd.f32 %v11884_v0, %v1749_v4  ;;  %v619_v57 = vadd.f32 %v15521_v37, %v536_v41  ;;  %v2062_v60 = vrot.slane %v2034_v17, %v10079_v12  ;;  %v12041_v54 = vpop.permute.xlu1 %1870  ;;  %v15526_v17 = vld [vmem:[#allocation184_spill] sm:$0xff] }
 0x278   : > { %v2036_v47 = vsel %vm2033_vm4, %v15516_v42, %v15522_v15  ;;  %v1218_v53 = vadd.f32 %v15523_v51, %v1130_v20  ;;  %v1838_v24 = vadd.f32 %v11908_v44, %v1750_v61  ;;  %v1919_v58 = vadd.f32 %v11920_v2, %v1831_v3  ;;  %15525 = vst [vmem:[#allocation113_spill] sm:$0xff] %v12041_v54  ;;  %v15527_v20 = vld [vmem:[#allocation177_spill] sm:$0xff] }
 0x279   : > { %v2066_v33 = vrot.slane %v2035_v48, %v10079_v12  ;;  %v1751_v63 = vadd.f32 %v15524_v34, %v1663_v18  ;;  %v2003_v0 = vmul.f32 %v1982_v21, %v15443_v28  ;;  %v1920_v4 = vadd.f32 %v11923_v5, %v1832_v43  ;;  %v15528_v2 = vld [vmem:[#allocation181_spill] sm:$0xff]  ;;  %v12055_v48 = vpop.permute.xlu0 %1941  ;;  %v15530_v21 = vld [vmem:[#allocation38_spill] sm:$0xff]  ;;  %v15532_v43 = vld [vmem:[#allocation96_spill] sm:$0xff] }
 0x27a   : > { %v1833_v41 = vadd.f32 %v11902_v23, %v1745_v13  ;;  %v1224_v42 = vadd.f32 %v15526_v17, %v1136_v6  ;;  %v12048_v44 = vadd.f32 %v15527_v20, %v614_v16  ;;  %v12051_v61 = vadd.f32 %v15528_v2, %v696_v10  ;;  %15529 = vst [vmem:[#allocation37_spill] sm:$0xff] %v12055_v48  ;;  %v15531_v5 = vld [vmem:[#allocation178_spill] sm:$0xff]  ;;  %v15533_v6 = vld [vmem:[#allocation29_spill] sm:$0xff]  ;;  %v15535_v34 = vld [vmem:[#allocation36_spill] sm:$0xff] }
 0x27b   : > { %v1925_v3 = vadd.f32 %v11938_v50, %v1837_v7  ;;  %v2070_v18 = vrot.slane %v2036_v47, %v10079_v12  ;;  %v12058_v9 = vadd.f32 %v15530_v21, %v537_v55  ;;  %v12061_v23 = vadd.f32 %v15531_v5, %v619_v57  ;;  %v2374_v7 = vpop.permute.xlu1 %2373  ;;  %v15534_v47 = vld [vmem:[#allocation135_spill] sm:$0xff]  ;;  %v15542_v2 = vld [vmem:[#allocation153_spill] sm:$0xff] }
 0x27c   : > { %v2083_v13 = vmul.f32 %v2062_v60, %v15532_v43  ;;  %v1306_v16 = vadd.f32 %v15533_v6, %v1218_v53  ;;  %v1926_v1 = vadd.f32 %v11944_v35, %v1838_v24  ;;  %v2007_v10 = vadd.f32 %v1995_v38, %v1919_v58  ;;  %v15536_v38 = vld [vmem:[#allocation197_spill] sm:$0xff]  ;;  %v15538_v58 = vld [vmem:[#allocation83_spill] sm:$0xff] }
 0x27d   : > { %v2084_v39 = vmul.f32 %v2066_v33, %v15532_v43  ;;  %v1839_v50 = vadd.f32 %v11911_v29, %v1751_v63  ;;  %v2008_v37 = vadd.f32 %v1996_v49, %v1920_v4  ;;  %v2089_v51 = vmul.f32 %v2062_v60, %v15534_v47  ;;  %v15537_v29 = vld [vmem:[#allocation120_spill] sm:$0xff]  ;;  %v15539_v60 = vld [vmem:[#allocation87_spill] sm:$0xff]  ;;  %v15540_v63 = vld [vmem:[#allocation122_spill] sm:$0xff] }
 0x27e   : > { %v1921_v55 = vadd.f32 %v11953_v22, %v1833_v41  ;;  %v1312_v57 = vadd.f32 %v15535_v34, %v1224_v42  ;;  %v2013_v17 = vadd.f32 %v11989_v62, %v1925_v3  ;;  %v2090_v20 = vmul.f32 %v2066_v33, %v15534_v47  ;;  %v12088_v42 = vpop.permute.xlu0 %2379  ;;  %v15543_v3 = vld [vmem:[#allocation130_spill] sm:$0xff] }
 0x27f   : > { %v2085_v53 = vmul.f32 %v2070_v18, %v15532_v43  ;;  %v12075_v35 = vmul.f32 %v2070_v18, %v15534_v47  ;;  %v1394_v24 = vadd.f32 %v15536_v38, %v1306_v16  ;;  %v2122_v49 = vsel %vm15018_vm1, %v15538_v58, %v15537_v29  ;;  %15541 = vst [vmem:[#allocation81_spill] sm:$0xff] %v12088_v42  ;;  %v12093_v21 = vpop.permute.xlu1 %2377  ;;  %v15545_v16 = vld [vmem:[#allocation198_spill] sm:$0xff] }
 0x280   : > { %v2123_v22 = vsel %vm15018_vm1, %v15537_v29, %v15539_v60  ;;  %v2124_v62 = vsel %vm15018_vm1, %v15539_v60, %v15540_v63  ;;  %v2014_v33 = vadd.f32 %v2002_v56, %v1926_v1  ;;  %v2095_v4 = vadd.f32 %v2083_v13, %v2007_v10  ;;  %15544 = vst [vmem:[#allocation11_spill] sm:$0xff] %v12093_v21  ;;  %v15546_v38 = vld [vmem:[#allocation138_spill] sm:$0xff]  ;;  %v15547_v10 = vld [vmem:[#allocation23_spill] sm:$0xff] }
 0x281   : > { %v1927_v41 = vadd.f32 %v11956_v31, %v1839_v50  ;;  %v2210_v18 = vsel %vm14994_vm3, %v15543_v3, %v15542_v2  ;;  %v2096_v5 = vadd.f32 %v2084_v39, %v2008_v37  ;;  %v2009_v6 = vadd.f32 %v12006_v32, %v1921_v55  ;;  %v15548_v37 = vld [vmem:[#allocation186_spill] sm:$0xff]  ;;  %v15552_v3 = vld [vmem:[#allocation97_spill] sm:$0xff] }
 0x282   : > { %v1400_v34 = vadd.f32 %v15545_v16, %v1312_v57  ;;  %v2211_v56 = vsel %vm14994_vm3, %v15542_v2, %v15546_v38  ;;  %v2150_v13 = vrot.slane %v2122_v49, %v10079_v12  ;;  %v2154_v31 = vrot.slane %v2123_v22, %v10079_v12  ;;  %v2460_v2 = vpop.permute.xlu0 %2459  ;;  %v15554_v16 = vld [vmem:[#allocation114_spill] sm:$0xff] }
 0x283   : > { %v12103_v1 = vrot.slane %v2124_v62, %v10079_v12  ;;  %v2298_v50 = vsel %vm15002_vm0, %v11899_v11, %v15547_v10  ;;  %v2101_v39 = vadd.f32 %v2089_v51, %v2013_v17  ;;  %v1482_v32 = vadd.f32 %v15548_v37, %v1394_v24  ;;  %v12118_v22 = vpop.permute.xlu1 %1943  ;;  %v15550_v51 = vld [vmem:[#allocation47_spill] sm:$0xff] }
 0x284   : > { %v2238_v55 = vrot.slane %v2210_v18, %v10079_v12  ;;  %v2299_v57 = vsel %vm15002_vm0, %v15547_v10, %v11935_v30  ;;  %v2102_v29 = vadd.f32 %v2090_v20, %v2014_v33  ;;  %v12113_v58 = vadd.f32 %v2003_v0, %v1927_v41  ;;  %15549 = vst [vmem:[#allocation18_spill] sm:$0xff] %v12118_v22  ;;  %v15551_v20 = vld [vmem:[#allocation166_spill] sm:$0xff] }
 0x285   : > { %v2242_v49 = vrot.slane %v2211_v56, %v10079_v12  ;;  %v2386_v60 = vsel %vm15003_vm13, %v11980_v59, %v2374_v7  ;;  %v2097_v11 = vadd.f32 %v2085_v53, %v2009_v6  ;;  %v1488_v17 = vadd.f32 %v15550_v51, %v1400_v34  ;;  %v15553_v53 = vld [vmem:[#allocation106_spill] sm:$0xff] }
 0x286   : > { %v2326_v24 = vrot.slane %v2298_v50, %v10079_v12  ;;  %v2387_v62 = vsel %vm15003_vm13, %v2374_v7, %v12016_v45  ;;  %v2171_v0 = vmul.f32 %v2150_v13, %v15551_v20  ;;  %v2172_v33 = vmul.f32 %v2154_v31, %v15551_v20  ;;  %v15555_v50 = vld [vmem:[#allocation149_spill] sm:$0xff] }
 0x287   : > { %v2173_v41 = vmul.f32 %v12103_v1, %v15551_v20  ;;  %v2330_v59 = vrot.slane %v2299_v57, %v10079_v12  ;;  %v1570_v18 = vadd.f32 %v15552_v3, %v1482_v32  ;;  %v2177_v6 = vmul.f32 %v2150_v13, %v15553_v53  ;;  %v12138_v22 = vpop.permute.xlu1 %1958  ;;  %v15557_v57 = vld [vmem:[#allocation101_spill] sm:$0xff]  ;;  %v15561_v20 = vld [vmem:[#allocation147_spill] sm:$0xff] }
 0x288   : > { %v2259_v34 = vmul.f32 %v2238_v55, %v15554_v16  ;;  %v2414_v56 = vrot.slane %v2386_v60, %v10079_v12  ;;  %v2183_v10 = vadd.f32 %v2171_v0, %v2095_v4  ;;  %v2260_v7 = vmul.f32 %v2242_v49, %v15554_v16  ;;  %15556 = vst [vmem:[#allocation170_spill] sm:$0xff] %v12138_v22  ;;  %v15558_v3 = vld [vmem:[#allocation65_spill] sm:$0xff] }
 0x289   : > { %v2212_v37 = vsel %vm14994_vm3, %v15546_v38, %v15555_v50  ;;  %v2418_v51 = vrot.slane %v2387_v62, %v10079_v12  ;;  %v1576_v54 = vadd.f32 %v15557_v57, %v1488_v17  ;;  %v2189_v32 = vadd.f32 %v2177_v6, %v2101_v39  ;;  %v15560_v38 = vld [vmem:[#allocation70_spill] sm:$0xff]  ;;  %v2464_v39 = vpop.permute.xlu0 %2463 }
 0x28a   : > { %v2347_v13 = vmul.f32 %v2326_v24, %v15558_v3  ;;  %v2300_v60 = vsel %vm15002_vm0, %v11935_v30, %v15559_v46  ;;  %v2178_v4 = vmul.f32 %v2154_v31, %v15553_v53  ;;  %v2184_v0 = vadd.f32 %v2172_v33, %v2096_v5 }
 0x28b   : > { %v2185_v28 = vadd.f32 %v2173_v41, %v2097_v11  ;;  %v2348_v48 = vmul.f32 %v2330_v59, %v15558_v3  ;;  %v2265_v14 = vmul.f32 %v2238_v55, %v15560_v38  ;;  %v2271_v62 = vadd.f32 %v2259_v34, %v2183_v10  ;;  %v2462_v31 = vpop.permute.xlu1 %2461  ;;  %v15562_v41 = vld [vmem:[#allocation125_spill] sm:$0xff] }
 0x28c   : > { %v2246_v22 = vrot.slane %v2212_v37, %v10079_v12  ;;  %v2435_v17 = vmul.f32 %v2414_v56, %v15561_v20  ;;  %v2266_v6 = vmul.f32 %v2242_v49, %v15560_v38  ;;  %v2272_v57 = vadd.f32 %v2260_v7, %v2184_v0  ;;  %v15563_v0 = vld [vmem:[#allocation154_spill] sm:$0xff] }
 0x28d   : > { %v2334_v47 = vrot.slane %v2300_v60, %v10079_v12  ;;  %v2436_v30 = vmul.f32 %v2418_v51, %v15561_v20  ;;  %v2359_v5 = vadd.f32 %v2347_v13, %v2271_v62  ;;  %v2388_v11 = vsel %vm15003_vm13, %v12016_v45, %v12093_v21 }
 0x28e   : > { %v2474_v55 = vsel %vm15004_vm9, %v2460_v2, %v2462_v31  ;;  %v2475_v33 = vsel %vm15004_vm9, %v2462_v31, %v2464_v39  ;;  %v2353_v34 = vmul.f32 %v2326_v24, %v15562_v41  ;;  %v2360_v10 = vadd.f32 %v2348_v48, %v2272_v57 }
 0x28f   : > { %v2502_v49 = vrot.slane %v2474_v55, %v10079_v12  ;;  %v2506_v7 = vrot.slane %v2475_v33, %v10079_v12  ;;  %v2277_v37 = vadd.f32 %v2265_v14, %v2189_v32  ;;  %v2261_v60 = vmul.f32 %v2246_v22, %v15554_v16  ;;  %v12166_v21 = vpop.permute.xlu1 %2465 }
 0x290   : > { %v2441_v13 = vmul.f32 %v2414_v56, %v15563_v0  ;;  %v2447_v62 = vadd.f32 %v2435_v17, %v2359_v5  ;;  %v2448_v46 = vadd.f32 %v2436_v30, %v2360_v10  ;;  %v2422_v45 = vrot.slane %v2388_v11, %v10079_v12  ;;  %v15564_v56 = vld [vmem:[#allocation51_spill] sm:$0xff] }
 0x291   : > { %v2523_v2 = vmul.f32 %v2502_v49, %v11966_v36  ;;  %v2524_v31 = vmul.f32 %v2506_v7, %v11966_v36  ;;  %v2190_v48 = vadd.f32 %v2178_v4, %v2102_v29  ;;  %v2349_v24 = vmul.f32 %v2334_v47, %v15558_v3  ;;  %v15566_v11 = vld [vmem:[#allocation59_spill] sm:$0xff] }
 0x292   : > { %v2354_v57 = vmul.f32 %v2330_v59, %v15562_v41  ;;  %v2476_v14 = vsel %vm15004_vm9, %v2464_v39, %v12166_v21  ;;  %v2365_v32 = vadd.f32 %v2353_v34, %v2277_v37  ;;  %v2529_v17 = vmul.f32 %v2502_v49, %v15564_v56 }
 0x293   : > { %v12173_v30 = vadd.f32 %v2523_v2, %v2447_v62  ;;  %v12175_v5 = vadd.f32 %v2524_v31, %v2448_v46  ;;  %v1658_v55 = vadd.f32 %v15566_v11, %v1570_v18  ;;  %v2278_v33 = vadd.f32 %v2266_v6, %v2190_v48  ;;  %v15568_v46 = vld [vmem:[#allocation187_spill] sm:$0xff]  ;;  %v15569_v18 = vld [vmem:[#allocation50_spill] sm:$0xff]  ;;  %v15571_v2 = vld [vmem:[#allocation80_spill] sm:$0xff] }
 0x294   : > { %v2273_v10 = vadd.f32 %v2261_v60, %v2185_v28  ;;  %v2510_v29 = vrot.slane %v2476_v14, %v10079_v12  ;;  %v2442_v4 = vmul.f32 %v2418_v51, %v15563_v0  ;;  %v2453_v3 = vadd.f32 %v2441_v13, %v2365_v32  ;;  %v15570_v13 = vld [vmem:[#allocation183_spill] sm:$0xff] }
 0x295   : > { %15565 = vst [vmem:[#allocation20_spill] sm:$0xff] %v12175_v5  ;;  %v2437_v59 = vmul.f32 %v2422_v45, %v15561_v20  ;;  %2581 = vrot.lane.b32.xlu0 %v12175_v5, %s14973_s25  ;;  %2549 = vrot.lane.b32.xlu1 %v12173_v30, %s15567_s16  ;;  %v867_v39 = vadd.f32 %v15568_v46, %v12051_v61  ;;  %v15577_v11 = vld [vmem:[#allocation127_spill] sm:$0xff] }
 0x296   : > { %v703_v28 = vadd.f32 %v15569_v18, %v12058_v9  ;;  %v2103_v6 = vadd.f32 %v12075_v35, %v12113_v58  ;;  %v2361_v51 = vadd.f32 %v2349_v24, %v2273_v10  ;;  %v2366_v34 = vadd.f32 %v2354_v57, %v2278_v33  ;;  %v15579_v10 = vld [vmem:[#allocation155_spill] sm:$0xff] }
 0x297   : > { %v2530_v49 = vmul.f32 %v2506_v7, %v15564_v56  ;;  %v12192_v37 = vadd.f32 %v2529_v17, %v2453_v3  ;;  %v2525_v60 = vmul.f32 %v2510_v29, %v11966_v36  ;;  %v785_v62 = vadd.f32 %v15570_v13, %v12061_v23  ;;  %v15573_v3 = vld [vmem:[#allocation192_spill] sm:$0xff]  ;;  %v15582_v18 = vld [vmem:[#allocation63_spill] sm:$0xff] }
 0x298   : > { %v1664_v31 = vadd.f32 %v15571_v2, %v1576_v54  ;;  %v1746_v61 = vadd.f32 %v11858_v27, %v1658_v55  ;;  %v2179_v9 = vmul.f32 %v12103_v1, %v15553_v53  ;;  %v2267_v35 = vmul.f32 %v2246_v22, %v15560_v38  ;;  %v15572_v54 = vld [vmem:[#allocation182_spill] sm:$0xff]  ;;  %v12212_v22 = vpop.permute.xlu0 %2029  ;;  %v15578_v55 = vld [vmem:[#allocation188_spill] sm:$0xff]  ;;  %v12242_v2 = vpop.permute.xlu1 %2031 }
 0x299   : > { %v2454_v58 = vadd.f32 %v2442_v4, %v2366_v34  ;;  %v2449_v48 = vadd.f32 %v2437_v59, %v2361_v51  ;;  %2587 = vrot.lane.b32.xlu0 %v12175_v5, %s14995_s15  ;;  %2551 = vrot.lane.b32.xlu1 %v12192_v37, %s15567_s16  ;;  %v1898_v23 = vrot.slane %v11975_v8, %v10079_v12  ;;  %v15574_v1 = vld [vmem:[#allocation58_spill] sm:$0xff]  ;;  %v15580_v59 = vld [vmem:[#allocation148_spill] sm:$0xff] }
 0x29a   : > { %v780_v27 = vadd.f32 %v15572_v54, %v12048_v44  ;;  %v955_v7 = vadd.f32 %v15573_v3, %v867_v39  ;;  %v786_v24 = vadd.f32 %v15574_v1, %v703_v28  ;;  %v2191_v57 = vadd.f32 %v2179_v9, %v2103_v6  ;;  %v15583_v28 = vld [vmem:[#allocation189_spill] sm:$0xff]  ;;  %v15584_v51 = vld [vmem:[#allocation190_spill] sm:$0xff]  ;;  %15586 = vst [vmem:[#allocation82_spill] sm:$0xff] %v12242_v2 }
 0x29b   : > { %v2355_v14 = vmul.f32 %v2334_v47, %v15562_v41  ;;  %v12215_v32 = vadd.f32 %v2530_v49, %v2454_v58  ;;  %v12217_v17 = vadd.f32 %v2525_v60, %v2449_v48  ;;  %v2125_v8 = vsel %vm15018_vm1, %v15540_v63, %v15577_v11  ;;  %v15585_v49 = vld [vmem:[#allocation124_spill] sm:$0xff]  ;;  %v15588_v9 = vld [vmem:[#allocation193_spill] sm:$0xff]  ;;  %v15633_v2 = vld [vmem:[#allocation86_spill] sm:$0xff] }
 0x29c   : > { %v873_v33 = vadd.f32 %v15578_v55, %v785_v62  ;;  %v1752_v44 = vadd.f32 %v11878_v26, %v1664_v31  ;;  %v1998_v4 = vmul.f32 %v15579_v10, %v15505_v40  ;;  %v1834_v46 = vadd.f32 %v15580_v59, %v1746_v61  ;;  %v15589_v58 = vld [vmem:[#allocation196_spill] sm:$0xff]  ;;  %v12251_v54 = vpop.permute.xlu0 %2467  ;;  %v15594_v1 = vld [vmem:[#allocation141_spill] sm:$0xff]  ;;  %v15597_v55 = vld [vmem:[#allocation195_spill] sm:$0xff] }
 0x29d   : > { %15575 = vst [vmem:[#allocation169_spill] sm:$0xff] %v12215_v32  ;;  %15576 = vst [vmem:[#allocation42_spill] sm:$0xff] %v12217_v17  ;;  %v2279_v39 = vadd.f32 %v2267_v35, %v2191_v57  ;;  %v2443_v47 = vmul.f32 %v2422_v45, %v15563_v0  ;;  %2583 = vrot.lane.b32.xlu1 %v12215_v32, %s14973_s25  ;;  %2620 = vrot.lane.b32.xlu0 %v12217_v17, %s15581_s13  ;;  %v15595_v57 = vld [vmem:[#allocation67_spill] sm:$0xff]  ;;  %s14980_s25 = smov 120  }
 0x29e   : > { %v1374_v63 = vrot.slane %v11916_v25, %v10079_v12  ;;  %v1043_v26 = vadd.f32 %v15582_v18, %v955_v7  ;;  %v868_v6 = vadd.f32 %v15583_v28, %v780_v27  ;;  %v874_v34 = vadd.f32 %v15584_v51, %v786_v24  ;;  %v15587_v25 = vld [vmem:[#allocation126_spill] sm:$0xff]  ;;  %15590 = vst [vmem:[#allocation24_spill] sm:$0xff] %v12251_v54  ;;  %v15598_v10 = vld [vmem:[#allocation111_spill] sm:$0xff] }
 0x29f   : > { %v1335_v60 = vsel %vm1329_vm12, %v15486_v52, %v15585_v49  ;;  %v1910_v45 = vmul.f32 %v1898_v23, %v15488_v19  ;;  %v2367_v13 = vadd.f32 %v2355_v14, %v2279_v39  ;;  %v2531_v62 = vmul.f32 %v2510_v29, %v15564_v56  ;;  %v15591_v52 = vld [vmem:[#allocation136_spill] sm:$0xff]  ;;  %v15593_v7 = vld [vmem:[#allocation98_spill] sm:$0xff]  ;;  %v15600_v28 = vld [vmem:[#allocation55_spill] sm:$0xff] }
 0x2a0   : > { %v2162_v31 = vrot.slane %v2125_v8, %v10079_v12  ;;  %v1346_v61 = vsel %vm1345_vm6, %v1335_v60, %v15587_v25  ;;  %v961_v35 = vadd.f32 %v15588_v9, %v873_v33  ;;  %v2037_v48 = vsel %vm2033_vm4, %v15522_v15, %v15589_v58  ;;  %v15596_v15 = vld [vmem:[#allocation194_spill] sm:$0xff]  ;;  %v15601_v49 = vld [vmem:[#allocation91_spill] sm:$0xff]  ;;  %v12279_v25 = vpop.permute.xlu1 %2046  ;;  %v15606_v9 = vld [vmem:[#allocation105_spill] sm:$0xff] }
 0x2a1   : > { %vm1433_vm12 = vcmask 703488   ;;  %v1840_v27 = vadd.f32 %v15591_v52, %v1752_v44  ;;  %v1922_v3 = vadd.f32 %v1910_v45, %v1834_v46  ;;  %v2455_v29 = vadd.f32 %v2443_v47, %v2367_v13  ;;  %2589 = vrot.lane.b32.xlu1 %v12215_v32, %s14995_s15  ;;  %2626 = vrot.lane.b32.xlu0 %v12217_v17, %s15592_s12  ;;  %v15599_v47 = vld [vmem:[#allocation46_spill] sm:$0xff]  ;;  %v15608_v52 = vld [vmem:[#allocation131_spill] sm:$0xff]  ;;  %s15681_s15 = smov 72  }
 0x2a2   : > { %v1423_v24 = vsel %vm1417_vm10, %v15594_v1, %v15593_v7  ;;  %v1131_v14 = vadd.f32 %v15595_v57, %v1043_v26  ;;  %v956_v8 = vadd.f32 %v15596_v15, %v868_v6  ;;  %v962_v33 = vadd.f32 %v15597_v55, %v874_v34  ;;  %v15602_v60 = vld [vmem:[#allocation34_spill] sm:$0xff]  ;;  %v15603_v34 = vld [vmem:[#allocation100_spill] sm:$0xff]  ;;  %15604 = vst [vmem:[#allocation133_spill] sm:$0xff] %v12279_v25  ;;  %v15611_v55 = vld [vmem:[#allocation93_spill] sm:$0xff] }
 0x2a3   : > { %v1378_v44 = vrot.slane %v1346_v61, %v10079_v12  ;;  %v1916_v59 = vmul.f32 %v1898_v23, %v15598_v10  ;;  %v2074_v46 = vrot.slane %v2037_v48, %v10079_v12  ;;  %v12267_v39 = vadd.f32 %v2531_v62, %v2455_v29  ;;  %v15605_v62 = vld [vmem:[#allocation27_spill] sm:$0xff]  ;;  %v15627_v25 = vld [vmem:[#allocation161_spill] sm:$0xff] }
 0x2a4   : > { %v1383_v18 = vmul.f32 %v1374_v63, %v15599_v47  ;;  %v1422_v51 = vsel %vm1417_vm10, %v15600_v28, %v15594_v1  ;;  %v1049_v26 = vadd.f32 %v15601_v49, %v961_v35  ;;  %v2213_v6 = vsel %vm14994_vm3, %v15555_v50, %v15602_v60  ;;  %v15607_v50 = vld [vmem:[#allocation132_spill] sm:$0xff]  ;;  %v15615_v49 = vld [vmem:[#allocation95_spill] sm:$0xff] }
 0x2a5   : > { %v1434_v45 = vsel %vm1433_vm12, %v1423_v24, %v15603_v34  ;;  %v1928_v23 = vadd.f32 %v1916_v59, %v1840_v27  ;;  %v2010_v13 = vadd.f32 %v1998_v4, %v1922_v3  ;;  %2622 = vrot.lane.b32.xlu1 %v12267_v39, %s15581_s13  ;;  %2555 = vrot.lane.b32.xlu0 %v12173_v30, %s14980_s25  ;;  %v12291_v27 = vpop.permute.xlu0 %2117  ;;  %v15612_v59 = vld [vmem:[#allocation77_spill] sm:$0xff]  ;;  %v15616_v34 = vld [vmem:[#allocation143_spill] sm:$0xff]  ;;  %vm1521_vm10 = vcmask 695296  }
 0x2a6   : > { %v12286_v61 = vmul.f32 %v1374_v63, %v15605_v62  ;;  %v1219_v35 = vadd.f32 %v15606_v9, %v1131_v14  ;;  %v1044_v48 = vadd.f32 %v15607_v50, %v956_v8  ;;  %v1050_v29 = vadd.f32 %v15608_v52, %v962_v33  ;;  %v15609_v14 = vld [vmem:[#allocation137_spill] sm:$0xff]  ;;  %v15618_v9 = vld [vmem:[#allocation104_spill] sm:$0xff] }
 0x2a7   : > { %v2180_v4 = vmul.f32 %v2162_v31, %v15553_v53  ;;  %v12295_v3 = vmul.f32 %v1378_v44, %v15599_v47  ;;  %v2086_v7 = vmul.f32 %v2074_v46, %v15532_v43  ;;  %v2250_v1 = vrot.slane %v2213_v6, %v10079_v12  ;;  %v15610_v8 = vld [vmem:[#allocation21_spill] sm:$0xff]  ;;  %v15619_v50 = vld [vmem:[#allocation176_spill] sm:$0xff] }
 0x2a8   : > { %v12300_v63 = vmul.f32 %v1378_v44, %v15605_v62  ;;  %v1462_v24 = vrot.slane %v1422_v51, %v10079_v12  ;;  %v12304_v57 = vrot.slane %v1434_v45, %v10079_v12  ;;  %v1137_v15 = vadd.f32 %v15609_v14, %v1049_v26  ;;  %v15614_v44 = vld [vmem:[#allocation162_spill] sm:$0xff]  ;;  %v15617_v26 = vld [vmem:[#allocation11_spill] sm:$0xff] }
 0x2a9   : > { %v1510_v33 = vsel %vm1505_vm2, %v15611_v55, %v15610_v8  ;;  %v2016_v47 = vadd.f32 %v15612_v59, %v1928_v23  ;;  %v2098_v28 = vadd.f32 %v2086_v7, %v2010_v13  ;;  %2628 = vrot.lane.b32.xlu1 %v12267_v39, %s15592_s12  ;;  %2593 = vrot.lane.b32.xlu0 %v12175_v5, %s15613_s17  ;;  %v15620_v13 = vld [vmem:[#allocation135_spill] sm:$0xff]  ;;  %v15621_v7 = vld [vmem:[#allocation166_spill] sm:$0xff]  ;;  %v12327_v59 = vpop.permute.xlu1 %2119  ;;  %s14990_s12 = smov 80   ;;  %vm1609_vm6 = vcmask 687104   ;;  %v15640_v5 = vld [vmem:[#allocation40_spill] sm:$0xff] }
 0x2aa   : > { %v1307_v51 = vadd.f32 %v15614_v44, %v1219_v35  ;;  %v1132_v6 = vadd.f32 %v15615_v49, %v1044_v48  ;;  %v1138_v45 = vadd.f32 %v15616_v34, %v1050_v29  ;;  %v2389_v62 = vsel %vm15003_vm13, %v15617_v26, %v12088_v42  ;;  %15622 = vst [vmem:[#allocation171_spill] sm:$0xff] %v12327_v59  ;;  %v15623_v35 = vld [vmem:[#allocation56_spill] sm:$0xff]  ;;  %v15624_v44 = vld [vmem:[#allocation107_spill] sm:$0xff]  ;;  %v12334_v34 = vpop.permute.xlu0 %2134 }
 0x2ab   : > { %v2301_v23 = vsel %vm15002_vm0, %v15619_v50, %v15618_v9  ;;  %v2092_v52 = vmul.f32 %v2074_v46, %v15620_v13  ;;  %v2174_v14 = vmul.f32 %v2162_v31, %v15621_v7  ;;  %v2262_v55 = vmul.f32 %v2250_v1, %v15554_v16  ;;  %15625 = vst [vmem:[#allocation14_spill] sm:$0xff] %v12334_v34  ;;  %v15631_v42 = vld [vmem:[#allocation43_spill] sm:$0xff] }
 0x2ac   : > { %v1471_v48 = vmul.f32 %v1462_v24, %v15623_v35  ;;  %v12331_v29 = vrot.slane %v1510_v33, %v10079_v12  ;;  %v1225_v49 = vadd.f32 %v15624_v44, %v1137_v15  ;;  %v2477_v26 = vsel %vm15004_vm9, %v12166_v21, %v12251_v54  ;;  %v15626_v44 = vld [vmem:[#allocation75_spill] sm:$0xff]  ;;  %v15628_v21 = vld [vmem:[#allocation49_spill] sm:$0xff] }
 0x2ad   : > { %v2104_v46 = vadd.f32 %v2092_v52, %v2016_v47  ;;  %v2186_v31 = vadd.f32 %v2174_v14, %v2098_v28  ;;  %v2426_v50 = vrot.slane %v2389_v62, %v10079_v12  ;;  %2557 = vrot.lane.b32.xlu1 %v12192_v37, %s14980_s25  ;;  %2632 = vrot.lane.b32.xlu0 %v12217_v17, %s14990_s12  ;;  %v15629_v54 = vld [vmem:[#allocation73_spill] sm:$0xff]  ;;  %v15630_v14 = vld [vmem:[#allocation35_spill] sm:$0xff]  ;;  %s14992_s25 = smov 76   ;;  %vm1785_vm12 = vcmask 482304  }
 0x2ae   : > { %v1395_v33 = vadd.f32 %v1383_v18, %v1307_v51  ;;  %v2338_v15 = vrot.slane %v2301_v23, %v10079_v12  ;;  %v1220_v34 = vadd.f32 %v15626_v44, %v1132_v6  ;;  %v1226_v16 = vadd.f32 %v15627_v25, %v1138_v45  ;;  %v15632_v51 = vld [vmem:[#allocation15_spill] sm:$0xff]  ;;  %v15635_v44 = vld [vmem:[#allocation65_spill] sm:$0xff] }
 0x2af   : > { %v1598_v47 = vsel %vm1593_vm14, %v15629_v54, %v15628_v21  ;;  %v2268_v28 = vmul.f32 %v2250_v1, %v15560_v38  ;;  %v2274_v62 = vadd.f32 %v2262_v55, %v2186_v31  ;;  %v2514_v52 = vrot.slane %v2477_v26, %v10079_v12  ;;  %v15634_v6 = vld [vmem:[#allocation115_spill] sm:$0xff]  ;;  %v12361_v55 = vpop.permute.xlu1 %2205  ;;  %v15637_v31 = vld [vmem:[#allocation16_spill] sm:$0xff]  ;;  %v15639_v38 = vld [vmem:[#allocation90_spill] sm:$0xff] }
 0x2b0   : > { %v1477_v59 = vmul.f32 %v1462_v24, %v15630_v14  ;;  %v1559_v18 = vmul.f32 %v12331_v29, %v15631_v42  ;;  %v1313_v23 = vadd.f32 %v15632_v51, %v1225_v49  ;;  %v1686_v25 = vsel %vm15008_vm11, %v15634_v6, %v15633_v2  ;;  %v15636_v49 = vld [vmem:[#allocation28_spill] sm:$0xff] }
 0x2b1   : > { %v2192_v45 = vadd.f32 %v2180_v4, %v2104_v46  ;;  %v2350_v54 = vmul.f32 %v2338_v15, %v15635_v44  ;;  %v2438_v1 = vmul.f32 %v2426_v50, %v15561_v20  ;;  %2595 = vrot.lane.b32.xlu1 %v12215_v32, %s15613_s17  ;;  %2640 = vrot.lane.b32.xlu0 %v12217_v17, %s14992_s25  ;;  %v12370_v46 = vpop.permute.xlu0 %2207  ;;  %v15638_v6 = vld [vmem:[#allocation156_spill] sm:$0xff]  ;;  %v15643_v17 = vld [vmem:[#allocation146_spill] sm:$0xff]  ;;  %s15651_s17 = smov 116  }
 0x2b2   : > { %v1483_v24 = vadd.f32 %v1471_v48, %v1395_v33  ;;  %v1308_v26 = vadd.f32 %v15636_v49, %v1220_v34  ;;  %v1314_v51 = vadd.f32 %v15637_v31, %v1226_v16  ;;  %v1638_v4 = vrot.slane %v1598_v47, %v10079_v12  ;;  %v15641_v47 = vld [vmem:[#allocation48_spill] sm:$0xff]  ;;  %v15642_v31 = vld [vmem:[#allocation13_spill] sm:$0xff] }
 0x2b3   : > { %v1774_v20 = vsel %vm1769_vm5, %v15639_v38, %v15638_v6  ;;  %v2280_v44 = vadd.f32 %v2268_v28, %v2192_v45  ;;  %v2362_v53 = vadd.f32 %v2350_v54, %v2274_v62  ;;  %v2526_v32 = vmul.f32 %v2514_v52, %v11966_v36  ;;  %v12399_v45 = vpop.permute.xlu1 %2222  ;;  %v15645_v54 = vld [vmem:[#allocation116_spill] sm:$0xff] }
 0x2b4   : > { %v1511_v48 = vsel %vm1505_vm2, %v15610_v8, %v15640_v5  ;;  %v2356_v34 = vmul.f32 %v2338_v15, %v15562_v41  ;;  %v1401_v16 = vadd.f32 %v12286_v61, %v1313_v23  ;;  %v1726_v33 = vrot.slane %v1686_v25, %v10079_v12  ;;  %v15644_v15 = vld [vmem:[#allocation78_spill] sm:$0xff] }
 0x2b5   : > { %v1522_v49 = vsel %vm1521_vm10, %v1511_v48, %v15641_v47  ;;  %v1862_v38 = vsel %vm15007_vm15, %v15643_v17, %v15642_v31  ;;  %v2444_v28 = vmul.f32 %v2426_v50, %v15563_v0  ;;  %v2450_v62 = vadd.f32 %v2438_v1, %v2362_v53  ;;  %2634 = vrot.lane.b32.xlu1 %v12267_v39, %s14990_s12  ;;  %v15646_v1 = vld [vmem:[#allocation61_spill] sm:$0xff]  ;;  %v15649_v48 = vld [vmem:[#allocation108_spill] sm:$0xff]  ;;  %v15650_v47 = vld [vmem:[#allocation99_spill] sm:$0xff]  ;;  %s15654_s12 = smov 112  }
 0x2b6   : > { %v1571_v5 = vadd.f32 %v1559_v18, %v1483_v24  ;;  %v1396_v8 = vadd.f32 %v12295_v3, %v1308_v26  ;;  %v1647_v61 = vmul.f32 %v1638_v4, %v15644_v15  ;;  %vm15006_vm2 = vcmask 490496   ;;  %2644 = vrot.lane.b32.xlu0 %v12267_v39, %s14992_s25 }
 0x2b7   : > { %v1814_v23 = vrot.slane %v1774_v20, %v10079_v12  ;;  %v1402_v25 = vadd.f32 %v12300_v63, %v1314_v51  ;;  %v2368_v17 = vadd.f32 %v2356_v34, %v2280_v44  ;;  %v2532_v50 = vmul.f32 %v2514_v52, %v15564_v56  ;;  %v12405_v20 = vpop.permute.xlu0 %2293  ;;  %v15648_v51 = vld [vmem:[#allocation37_spill] sm:$0xff] }
 0x2b8   : > { %v12397_v53 = vadd.f32 %v2526_v32, %v2450_v62  ;;  %v1489_v18 = vadd.f32 %v1477_v59, %v1401_v16  ;;  %v1599_v3 = vsel %vm1593_vm14, %v15628_v21, %v15645_v54  ;;  %v1735_v24 = vmul.f32 %v1726_v33, %v15646_v1  ;;  %v15647_v21 = vld [vmem:[#allocation68_spill] sm:$0xff] }
 0x2b9   : > { %v1902_v26 = vrot.slane %v1862_v38, %v10079_v12  ;;  %v1472_v63 = vmul.f32 %v12304_v57, %v15623_v35  ;;  %v1478_v32 = vmul.f32 %v12304_v57, %v15630_v14  ;;  %v1554_v52 = vrot.slane %v1522_v49, %v10079_v12  ;;  %v15652_v49 = vld [vmem:[#allocation118_spill] sm:$0xff] }
 0x2ba   : > { %v2456_v59 = vadd.f32 %v2444_v28, %v2368_v17  ;;  %2642 = vrot.lane.b32.xlu1 %v12397_v53, %s14992_s25  ;;  %v1565_v44 = vmul.f32 %v12331_v29, %v15647_v21  ;;  %v1950_v34 = vsel %vm1945_vm7, %v15649_v48, %v15648_v51  ;;  %v1659_v16 = vadd.f32 %v1647_v61, %v1571_v5  ;;  %v15656_v48 = vld [vmem:[#allocation142_spill] sm:$0xff] }
 0x2bb   : > { %v1823_v35 = vmul.f32 %v1814_v23, %v15650_v47  ;;  %2561 = vrot.lane.b32.xlu0 %v12173_v30, %s15651_s17  ;;  %v1484_v57 = vadd.f32 %v1472_v63, %v1396_v8  ;;  %v1490_v14 = vadd.f32 %v1478_v32, %v1402_v25  ;;  %v1610_v38 = vsel %vm1609_vm6, %v1599_v3, %v15652_v49  ;;  %v12434_v25 = vpop.permute.xlu1 %2295  ;;  %v15658_v49 = vld [vmem:[#allocation157_spill] sm:$0xff] }
 0x2bc   : > { %v12425_v28 = vadd.f32 %v2532_v50, %v2456_v59  ;;  %v1577_v62 = vadd.f32 %v1565_v44, %v1489_v18  ;;  %v1747_v17 = vadd.f32 %v1735_v24, %v1659_v16  ;;  %v1911_v29 = vmul.f32 %v1902_v26, %v15488_v19  ;;  %v15653_v18 = vld [vmem:[#allocation53_spill] sm:$0xff]  ;;  %v12443_v24 = vpop.permute.xlu0 %2310  ;;  %v15657_v16 = vld [vmem:[#allocation103_spill] sm:$0xff] }
 0x2bd   : > { %vm15005_vm14 = vcmask 474112   ;;  %v1560_v54 = vmul.f32 %v1554_v52, %v15631_v42  ;;  %v1566_v5 = vmul.f32 %v1554_v52, %v15647_v21  ;;  %v1990_v61 = vrot.slane %v1950_v34, %v10079_v12  ;;  %v15655_v52 = vld [vmem:[#allocation89_spill] sm:$0xff] }
 0x2be   : > { %v2038_v8 = vsel %vm2033_vm4, %v15589_v58, %v12212_v22  ;;  %2646 = vrot.lane.b32.xlu1 %v12425_v28, %s14992_s25  ;;  %v1642_v50 = vrot.slane %v1610_v38, %v10079_v12  ;;  %v1653_v3 = vmul.f32 %v1638_v4, %v15653_v18  ;;  %v2126_v42 = vsel %vm15018_vm1, %v15577_v11, %v12291_v27  ;;  %s14997_s25 = smov 92  }
 0x2bf   : > { %v1835_v63 = vadd.f32 %v1823_v35, %v1747_v17  ;;  %2569 = vrot.lane.b32.xlu0 %v12173_v30, %s15654_s12  ;;  %v1572_v58 = vadd.f32 %v1560_v54, %v1484_v57  ;;  %v1578_v32 = vadd.f32 %v1566_v5, %v1490_v14  ;;  %v1741_v59 = vmul.f32 %v1726_v33, %v15655_v52  ;;  %v15659_v33 = vld [vmem:[#allocation71_spill] sm:$0xff] }
 0x2c0   : > { %vm1961_vm10 = vcmask 465920   ;;  %v1665_v21 = vadd.f32 %v1653_v3, %v1577_v62  ;;  %v2078_v44 = vrot.slane %v2038_v8, %v10079_v12  ;;  %v1687_v4 = vsel %vm15008_vm11, %v15633_v2, %v15656_v48  ;;  %v15660_v62 = vld [vmem:[#allocation88_spill] sm:$0xff]  ;;  %v12474_v8 = vpop.permute.xlu1 %2381  ;;  %v15664_v48 = vld [vmem:[#allocation106_spill] sm:$0xff] }
 0x2c1   : > { %v1923_v34 = vadd.f32 %v1911_v29, %v1835_v63  ;;  %vm15020_vm6 = vcmask 457728   ;;  %v2166_v11 = vrot.slane %v2126_v42, %v10079_v12  ;;  %v1698_v35 = vsel %vm15006_vm2, %v1687_v4, %v15657_v16 }
 0x2c2   : > { %v1775_v57 = vsel %vm1769_vm5, %v15638_v6, %v15658_v49  ;;  %v1829_v14 = vmul.f32 %v1814_v23, %v15659_v33  ;;  %2563 = vrot.lane.b32.xlu1 %v12192_v37, %s15651_s17  ;;  %v1999_v38 = vmul.f32 %v1990_v61, %v15505_v40  ;;  %v2005_v2 = vmul.f32 %v1990_v61, %v15660_v62  ;;  %s15666_s17 = smov 96  }
 0x2c3   : > { %v1648_v17 = vmul.f32 %v1642_v50, %v15644_v15  ;;  %v1654_v29 = vmul.f32 %v1642_v50, %v15653_v18  ;;  %2573 = vrot.lane.b32.xlu0 %v12192_v37, %s15654_s12  ;;  %v1753_v54 = vadd.f32 %v1741_v59, %v1665_v21  ;;  %v2302_v6 = vsel %vm15002_vm0, %v15618_v9, %v12405_v20  ;;  %v2384_v50 = vpop.permute.xlu0 %2383  ;;  %v15661_v18 = vld [vmem:[#allocation30_spill] sm:$0xff]  ;;  %v15662_v59 = vld [vmem:[#allocation109_spill] sm:$0xff]  ;;  %v15663_v21 = vld [vmem:[#allocation20_spill] sm:$0xff] }
 0x2c4   : > { %v1917_v23 = vmul.f32 %v1902_v26, %v15598_v10  ;;  %v2214_v5 = vsel %vm14994_vm3, %v15602_v60, %v12361_v55  ;;  %v2087_v15 = vmul.f32 %v2078_v44, %v15532_v43  ;;  %v1730_v61 = vrot.slane %v1698_v35, %v10079_v12  ;;  %v15665_v35 = vld [vmem:[#allocation113_spill] sm:$0xff] }
 0x2c5   : > { %v1786_v3 = vsel %vm1785_vm12, %v1775_v57, %v15661_v18  ;;  %v2011_v42 = vadd.f32 %v1999_v38, %v1923_v34  ;;  %v2093_v63 = vmul.f32 %v2078_v44, %v15620_v13  ;;  %v2175_v9 = vmul.f32 %v2166_v11, %v15621_v7  ;;  %v15667_v38 = vld [vmem:[#allocation18_spill] sm:$0xff] }
 0x2c6   : > { %v1841_v26 = vadd.f32 %v1829_v14, %v1753_v54  ;;  %v1863_v60 = vsel %vm15007_vm15, %v15642_v31, %v15662_v59  ;;  %2571 = vrot.lane.b32.xlu1 %v15663_v21, %s15654_s12  ;;  %v12488_v4 = vmul.f32 %v2166_v11, %v15664_v48  ;;  %v12491_v16 = vrot.slane %v2302_v6, %v10079_v12  ;;  %v15668_v6 = vld [vmem:[#allocation82_spill] sm:$0xff] }
 0x2c7   : > { %v1874_v34 = vsel %vm15005_vm14, %v1863_v60, %v15665_v35  ;;  %v2254_v44 = vrot.slane %v2214_v5, %v10079_v12  ;;  %2599 = vrot.lane.b32.xlu0 %v15663_v21, %s15666_s17  ;;  %v1660_v49 = vadd.f32 %v1648_v17, %v1572_v58  ;;  %v12498_v57 = vadd.f32 %v1654_v29, %v1578_v32  ;;  %v15669_v32 = vld [vmem:[#allocation170_spill] sm:$0xff]  ;;  %v15670_v29 = vld [vmem:[#allocation81_spill] sm:$0xff] }
 0x2c8   : > { %v1818_v31 = vrot.slane %v1786_v3, %v10079_v12  ;;  %v1929_v14 = vadd.f32 %v1917_v23, %v1841_v26  ;;  %v1736_v11 = vmul.f32 %v1730_v61, %v15646_v1  ;;  %v1951_v54 = vsel %vm1945_vm7, %v15648_v51, %v15667_v38  ;;  %v2399_v23 = vpop.permute.xlu1 %2398  ;;  %v15671_v3 = vld [vmem:[#allocation169_spill] sm:$0xff] }
 0x2c9   : > { %v2039_v18 = vsel %vm2033_vm4, %v12212_v22, %v15668_v6  ;;  %v2099_v5 = vadd.f32 %v2087_v15, %v2011_v42  ;;  %v1742_v59 = vmul.f32 %v1730_v61, %v15655_v52  ;;  %v1906_v58 = vrot.slane %v1874_v34, %v10079_v12  ;;  %v15672_v51 = vld [vmem:[#allocation65_spill] sm:$0xff]  ;;  %v2470_v22 = vpop.permute.xlu0 %2469  ;;  %v15673_v15 = vld [vmem:[#allocation171_spill] sm:$0xff]  ;;  %v15674_v61 = vld [vmem:[#allocation114_spill] sm:$0xff] }
 0x2ca   : > { %v1962_v17 = vsel %vm1961_vm10, %v1951_v54, %v15669_v32  ;;  %v2390_v1 = vsel %vm15003_vm13, %v15670_v29, %v12474_v8  ;;  %2575 = vrot.lane.b32.xlu1 %v15671_v3, %s15654_s12  ;;  %v2351_v26 = vmul.f32 %v12491_v16, %v15672_v51  ;;  %vm15021_vm5 = vcmask 261120   ;;  %v15675_v34 = vld [vmem:[#allocation133_spill] sm:$0xff] }
 0x2cb   : > { %v2127_v52 = vsel %vm15018_vm1, %v12291_v27, %v15673_v15  ;;  %v2263_v42 = vmul.f32 %v2254_v44, %v15674_v61  ;;  %2607 = vrot.lane.b32.xlu0 %v15663_v21, %s14997_s25  ;;  %v1824_v60 = vmul.f32 %v1818_v31, %v15650_v47  ;;  %v2017_v35 = vadd.f32 %v2005_v2, %v1929_v14  ;;  %v15676_v15 = vld [vmem:[#allocation24_spill] sm:$0xff]  ;;  %v15677_v2 = vld [vmem:[#allocation14_spill] sm:$0xff] }
 0x2cc   : > { %v2050_v38 = vsel %vm15020_vm6, %v2039_v18, %v15675_v34  ;;  %vm2225_vm7 = vcmask 252928   ;;  %v1994_v54 = vrot.slane %v1962_v17, %v10079_v12  ;;  %v2187_v6 = vadd.f32 %v2175_v9, %v2099_v5 }
 0x2cd   : > { %v2215_v27 = vsel %vm14994_vm3, %v12361_v55, %v12370_v46  ;;  %v2430_v32 = vrot.slane %v2390_v1, %v10079_v12  ;;  %v1748_v29 = vadd.f32 %v1736_v11, %v1660_v49  ;;  %v2478_v21 = vsel %vm15004_vm9, %v15676_v15, %v2470_v22  ;;  %v2472_v11 = vpop.permute.xlu1 %2471 }
 0x2ce   : > { %v1912_v47 = vmul.f32 %v1906_v58, %v15488_v19  ;;  %v2138_v14 = vsel %vm15021_vm5, %v2127_v52, %v15677_v2  ;;  %2601 = vrot.lane.b32.xlu1 %v15671_v3, %s15666_s17  ;;  %v2082_v9 = vrot.slane %v2050_v38, %v10079_v12  ;;  %v2275_v18 = vadd.f32 %v2263_v42, %v2187_v6  ;;  %v15678_v52 = vld [vmem:[#allocation147_spill] sm:$0xff]  ;;  %v2487_v38 = vpop.permute.xlu0 %2486 }
 0x2cf   : > { %vm15010_vm12 = vcmask 244736   ;;  %v2303_v55 = vsel %vm15002_vm0, %v12405_v20, %v12434_v25  ;;  %2611 = vrot.lane.b32.xlu0 %v15671_v3, %s14997_s25  ;;  %v1836_v46 = vadd.f32 %v1824_v60, %v1748_v29  ;;  %v2105_v49 = vadd.f32 %v2093_v63, %v2017_v35  ;;  %v15679_v25 = vld [vmem:[#allocation70_spill] sm:$0xff] }
 0x2d0   : > { %v2226_v19 = vsel %vm2225_vm7, %v2215_v27, %v12399_v45  ;;  %vm2401_vm10 = vcmask 236544   ;;  %v2000_v5 = vmul.f32 %v1994_v54, %v15505_v40  ;;  %v2170_v17 = vrot.slane %v2138_v14, %v10079_v12  ;;  %v15680_v45 = vld [vmem:[#allocation42_spill] sm:$0xff] }
 0x2d1   : > { %v2391_v1 = vsel %vm15003_vm13, %v12474_v8, %v2384_v50  ;;  %v2439_v42 = vmul.f32 %v2430_v32, %v15678_v52  ;;  %v1924_v20 = vadd.f32 %v1912_v47, %v1836_v46  ;;  %v2269_v34 = vmul.f32 %v2254_v44, %v15679_v25 }
 0x2d2   : > { %v2314_v63 = vsel %vm15010_vm12, %v2303_v55, %v12443_v24  ;;  %vm15009_vm3 = vcmask 228352   ;;  %2609 = vrot.lane.b32.xlu1 %v15680_v45, %s14997_s25  ;;  %v2088_v3 = vmul.f32 %v2082_v9, %v15532_v43  ;;  %v2258_v40 = vrot.slane %v2226_v19, %v10079_v12 }
 0x2d3   : > { %v2363_v60 = vadd.f32 %v2351_v26, %v2275_v18  ;;  %v2479_v35 = vsel %vm15004_vm9, %v2470_v22, %v2472_v11  ;;  %2653 = vrot.lane.b32.xlu0 %v12397_v53, %s15681_s15  ;;  %v2518_v8 = vrot.slane %v2478_v21, %v10079_v12  ;;  %v1830_v50 = vmul.f32 %v1818_v31, %v15659_v33 }
 0x2d4   : > { %v2193_v24 = vadd.f32 %v12488_v4, %v2105_v49  ;;  %v2402_v44 = vsel %vm2401_vm10, %v2391_v1, %v2399_v23  ;;  %v2012_v6 = vadd.f32 %v2000_v5, %v1924_v20  ;;  %v2176_v43 = vmul.f32 %v2170_v17, %v15621_v7 }
 0x2d5   : > { %v2346_v27 = vrot.slane %v2314_v63, %v10079_v12  ;;  %v2451_v26 = vadd.f32 %v2439_v42, %v2363_v60  ;;  %v1754_v22 = vadd.f32 %v1742_v59, %v12498_v57  ;;  %v1918_v29 = vmul.f32 %v1906_v58, %v15598_v10 }
 0x2d6   : > { %v2281_v15 = vadd.f32 %v2269_v34, %v2193_v24  ;;  %v2490_v21 = vsel %vm15009_vm3, %v2479_v35, %v2487_v38  ;;  %2613 = vrot.lane.b32.xlu1 %v12267_v39, %s14997_s25  ;;  %v2100_v33 = vadd.f32 %v2088_v3, %v2012_v6  ;;  %v2264_v4 = vmul.f32 %v2258_v40, %v15674_v61  ;;  %s15000_s25 = smov 36  }
 0x2d7   : > { %v2527_v31 = vmul.f32 %v2518_v8, %v11966_v36  ;;  %v2434_v7 = vrot.slane %v2402_v44, %v10079_v12  ;;  %2659 = vrot.lane.b32.xlu0 %v12397_v53, %s15138_s23  ;;  %v2357_v57 = vmul.f32 %v12491_v16, %v15562_v41  ;;  %v1842_v10 = vadd.f32 %v1830_v50, %v1754_v22 }
 0x2d8   : > { %v2006_v59 = vmul.f32 %v1994_v54, %v15660_v62  ;;  %v2445_v58 = vmul.f32 %v2430_v32, %v15563_v0  ;;  %v2188_v23 = vadd.f32 %v2176_v43, %v2100_v33  ;;  %v2352_v39 = vmul.f32 %v2346_v27, %v15672_v51 }
 0x2d9   : > { %v2539_v47 = vadd.f32 %v2527_v31, %v2451_v26  ;;  %v2522_v61 = vrot.slane %v2490_v21, %v10079_v12  ;;  %v1930_v2 = vadd.f32 %v1918_v29, %v1842_v10  ;;  %v2094_v14 = vmul.f32 %v2082_v9, %v15620_v13 }
 0x2da   : > { %v2369_v18 = vadd.f32 %v2357_v57, %v2281_v15  ;;  %2655 = vrot.lane.b32.xlu1 %v12425_v28, %s15681_s15  ;;  %v2276_v55 = vadd.f32 %v2264_v4, %v2188_v23  ;;  %v2440_v16 = vmul.f32 %v2434_v7, %v15678_v52  ;;  %v2182_v54 = vmul.f32 %v2170_v17, %v15664_v48 }
 0x2db   : > { %2740 = vrot.lane.b32.xlu0 %v2539_v47, %s15151_s30  ;;  %v2018_v62 = vadd.f32 %v2006_v59, %v1930_v2  ;;  %v2528_v46 = vmul.f32 %v2522_v61, %v11966_v36  ;;  %v2533_v12 = vmul.f32 %v2518_v8, %v15564_v56  ;;  %v2270_v13 = vmul.f32 %v2258_v40, %v15679_v25 }
 0x2dc   : > { %v2457_v32 = vadd.f32 %v2445_v58, %v2369_v18  ;;  %v2364_v51 = vadd.f32 %v2352_v39, %v2276_v55  ;;  %v2358_v11 = vmul.f32 %v2346_v27, %v15562_v41  ;;  %v2446_v1 = vmul.f32 %v2434_v7, %v15563_v0  ;;  %v12620_v0 = vpop.permute.xlu1 %2778 }
 0x2dd   : > { %v2106_v49 = vadd.f32 %v2094_v14, %v2018_v62  ;;  %v2534_v52 = vmul.f32 %v2522_v61, %v15564_v56  ;;  %v12622_v56 = vpop.permute.xlu0 %2783  ;;  %vm2665_vm7 = vcmask 195584   ;;  %vm2668_vm10 = vcmask 392192  }
 0x2de   : > { %2661 = vrot.lane.b32.xlu1 %v12425_v28, %s15138_s23  ;;  %v2452_v9 = vadd.f32 %v2440_v16, %v2364_v51  ;;  %v2545_v5 = vadd.f32 %v2533_v12, %v2457_v32  ;;  %s15012_s23 = smov 64   ;;  %vm2675_vm0 = vcmask 982016   ;;  %vm15684_vm13 = vcmask 916480  }
 0x2df   : > { %2746 = vrot.lane.b32.xlu0 %v2539_v47, %s15230_s18  ;;  %v2194_v19 = vadd.f32 %v2182_v54, %v2106_v49  ;;  %vm15685_vm9 = vcmask 785408   ;;  %vm2648_vm14 = vcmask 621568   ;;  %vm2682_vm2 = vcmask 523264  }
 0x2e0   : > { %v2540_v48 = vadd.f32 %v2528_v46, %v2452_v9  ;;  %vm2615_vm15 = vcmask 752640   ;;  %vm15687_vm11 = vcmask 785408   ;;  %vm2696_vm3 = vcmask 654336  }
 0x2e1   : > { %v2282_v17 = vadd.f32 %v2270_v13, %v2194_v19  ;;  %vm15689_vm12 = vcmask 916480  }
 0x2e2   : > { %2742 = vrot.lane.b32.xlu1 %v2545_v5, %s15151_s30 }
 0x2e3   : > { %2754 = vrot.lane.b32.xlu0 %v2540_v48, %s15000_s25  ;;  %v2370_v36 = vadd.f32 %v2358_v11, %v2282_v17 }
 0x2e5   : > { %v2458_v42 = vadd.f32 %v2446_v1, %v2370_v36 }
 0x2e6   : > { %2748 = vrot.lane.b32.xlu1 %v2545_v5, %s15230_s18 }
 0x2e7   : > { %2702 = vrot.lane.b32.xlu0 %v12397_v53, %s15012_s23  ;;  %v2546_v41 = vadd.f32 %v2534_v52, %v2458_v42 }
 0x2ea   : > { %2756 = vrot.lane.b32.xlu1 %v2546_v41, %s15000_s25  ;;  %s15016_s25 = smov 48  }
 0x2eb   : > { %2708 = vrot.lane.b32.xlu0 %v12397_v53, %s15682_s14 }
 0x2ee   : > { %2704 = vrot.lane.b32.xlu1 %v12425_v28, %s15012_s23  ;;  %s15014_s23 = smov 63  }
 0x2ef   : > { %2716 = vrot.lane.b32.xlu0 %v12397_v53, %s15683_s1 }
 0x2f2   : > { %2710 = vrot.lane.b32.xlu1 %v12425_v28, %s15682_s14 }
 0x2f3   : > { %2720 = vrot.lane.b32.xlu0 %v12425_v28, %s15683_s1 }
 0x2f6   : > { %2718 = vrot.lane.b32.xlu1 %v2539_v47, %s15683_s1 }
 0x2f7   : > { %2728 = vrot.lane.b32.xlu0 %v2539_v47, %s9925_s2 }
 0x2fa   : > { %2722 = vrot.lane.b32.xlu1 %v2545_v5, %s15683_s1 }
 0x2fb   : > { %2734 = vrot.lane.b32.xlu0 %v2539_v47, %s15016_s25 }
 0x2fe   : > { %2730 = vrot.lane.b32.xlu1 %v2545_v5, %s9925_s2  ;;  %s15686_s2 = smov 127  }
 0x302   : > { %2736 = vrot.lane.b32.xlu1 %v2545_v5, %s15016_s25  ;;  %s9929_s25 = smov 39  }
 0x307   : > { %v2582_v53 = vpop.permute.xlu0 %2581  ;;  %v2550_v20 = vpop.permute.xlu1 %2549 }
 0x308   : > { %v2666_v33 = vsel %vm2665_vm7, %v12173_v30, %v2550_v20 }
 0x30b   : > { %v2588_v25 = vpop.permute.xlu0 %2587  ;;  %v2552_v28 = vpop.permute.xlu1 %2551 }
 0x30c   : > { %v2678_v2 = vsel %vm15018_vm1, %v2582_v53, %v2588_v25  ;;  %v2667_v14 = vsel %vm2665_vm7, %v12192_v37, %v2552_v28 }
 0x30f   : > { %v2621_v34 = vpop.permute.xlu0 %2620  ;;  %v12624_v63 = vpop.permute.xlu1 %2583 }
 0x313   : > { %v2627_v45 = vpop.permute.xlu0 %2626  ;;  %v2590_v3 = vpop.permute.xlu1 %2589 }
 0x314   : > { %v2679_v9 = vsel %vm15018_vm1, %v12624_v63, %v2590_v3 }
 0x317   : > { %v2556_v40 = vpop.permute.xlu0 %2555  ;;  %v12626_v60 = vpop.permute.xlu1 %2622 }
 0x318   : > { %v2669_v4 = vsel %vm2668_vm10, %v2666_v33, %v2556_v40 }
 0x31b   : > { %v2594_v35 = vpop.permute.xlu0 %2593  ;;  %v12628_v8 = vpop.permute.xlu1 %2628 }
 0x31c   : > { %v2680_v55 = vsel %vm2033_vm4, %v2678_v2, %v2594_v35 }
 0x31f   : > { %v2633_v50 = vpop.permute.xlu0 %2632  ;;  %v2558_v24 = vpop.permute.xlu1 %2557 }
 0x320   : > { %v2670_v16 = vsel %vm2668_vm10, %v2667_v14, %v2558_v24 }
 0x323   : > { %v2641_v44 = vpop.permute.xlu0 %2640  ;;  %v2596_v38 = vpop.permute.xlu1 %2595 }
 0x324   : > { %v2681_v5 = vsel %vm2033_vm4, %v2679_v9, %v2596_v38 }
 0x327   : > { %v12630_v6 = vpop.permute.xlu1 %2634 }
 0x328   : > { %v2645_v43 = vpop.permute.xlu0 %2644 }
 0x32c   : > { %v2643_v27 = vpop.permute.xlu1 %2642 }
 0x32d   : > { %v2562_v26 = vpop.permute.xlu0 %2561  ;;  %v2649_v54 = vsel %vm2648_vm14, %v2641_v44, %v2643_v27 }
 0x32e   : > { %v2671_v7 = vsel %vm15011_vm8, %v2669_v4, %v2562_v26 }
 0x330   : > { %v2647_v22 = vpop.permute.xlu1 %2646 }
 0x331   : > { %v2570_v29 = vpop.permute.xlu0 %2569 }
 0x334   : > { %v2564_v15 = vpop.permute.xlu1 %2563 }
 0x335   : > { %v2574_v21 = vpop.permute.xlu0 %2573  ;;  %v2672_v32 = vsel %vm15011_vm8, %v2670_v16, %v2564_v15  ;;  %vm2699_vm8 = vcmask 850944  }
 0x338   : > { %v2572_v31 = vpop.permute.xlu1 %2571 }
 0x339   : > { %v2600_v57 = vpop.permute.xlu0 %2599  ;;  %v2577_v10 = vsel %vm15684_vm13, %v2570_v29, %v2572_v31 }
 0x33a   : > { %v2673_v59 = vsel %vm15685_vm9, %v2671_v7, %v2577_v10  ;;  %vm15019_vm9 = vcmask 64512   ;;  %v2683_v51 = vsel %vm2682_vm2, %v2680_v55, %v2600_v57 }
 0x33b   : > { %v2676_v58 = vsel %vm2675_vm0, %v2673_v59, %v2582_v53  ;;  %v2690_v49 = vsel %vm15019_vm9, %v2621_v34, %v2627_v45  ;;  %v2691_v40 = vsel %vm15019_vm9, %v12626_v60, %v12628_v8  ;;  %vm3041_vm9 = vcmask 1044480  }
 0x33c   : > { %v12640_v23 = vadd.f32 %v12620_v0, %v2676_v58  ;;  %v2576_v39 = vpop.permute.xlu1 %2575  ;;  %v2692_v19 = vsel %vm15021_vm5, %v2690_v49, %v2633_v50  ;;  %v2693_v50 = vsel %vm15021_vm5, %v2691_v40, %v12630_v6  ;;  %v15027_v40 = vmov 0.0  }
 0x33d   : > { %v2608_v47 = vpop.permute.xlu0 %2607  ;;  %v2578_v18 = vsel %vm15684_vm13, %v2574_v21, %v2576_v39  ;;  %vm15688_vm13 = vcmask 719872   ;;  %v2694_v48 = vsel %vm15020_vm6, %v2692_v19, %v2649_v54 }
 0x33e   : > { %2806 = vrot.lane.b32.xlu0 %v12640_v23, %s15686_s2  ;;  %v2674_v37 = vsel %vm15687_vm11, %v2672_v32, %v2578_v18  ;;  %vm15690_vm11 = vmmov %vm15688_vm13 }
 0x33f   : > { %v2677_v36 = vsel %vm2675_vm0, %v2674_v37, %v12624_v63 }
 0x340   : > { %v2602_v30 = vpop.permute.xlu1 %2601  ;;  %v12680_v63 = vadd.f32 %v12622_v56, %v2677_v36 }
 0x341   : > { %v2612_v61 = vpop.permute.xlu0 %2611  ;;  %v2684_v52 = vsel %vm2682_vm2, %v2681_v5, %v2602_v30 }
 0x344   : > { %v2610_v62 = vpop.permute.xlu1 %2609 }
 0x345   : > { %v2654_v46 = vpop.permute.xlu0 %2653  ;;  %v2616_v12 = vsel %vm2615_vm15, %v2608_v47, %v2610_v62 }
 0x346   : > { %v2685_v13 = vsel %vm15688_vm13, %v2683_v51, %v2616_v12  ;;  %v2697_v42 = vsel %vm2696_vm3, %v2694_v48, %v2654_v46  ;;  %vm15691_vm13 = vcmask 588800  }
 0x347   : > { %v2687_v11 = vsel %vm15689_vm12, %v2685_v13, %v2621_v34  ;;  %v2650_v34 = vsel %vm2648_vm14, %v2645_v43, %v2647_v22 }
 0x348   : > { %v12664_v17 = vadd.f32 %v12620_v0, %v2687_v11  ;;  %v2614_v1 = vpop.permute.xlu1 %2613  ;;  %v2695_v44 = vsel %vm15020_vm6, %v2693_v50, %v2650_v34 }
 0x349   : > { %v2660_v41 = vpop.permute.xlu0 %2659  ;;  %v2617_v53 = vsel %vm2615_vm15, %v2612_v61, %v2614_v1 }
 0x34a   : > { %v2700_v20 = vsel %vm2699_vm8, %v2697_v42, %v2660_v41  ;;  %v2686_v25 = vsel %vm15690_vm11, %v2684_v52, %v2617_v53  ;;  %2808 = vrot.lane.b32.xlu1 %v12664_v17, %s15686_s2  ;;  %vm15692_vm11 = vcmask 785408  }
 0x34b   : > { %v12676_v28 = vadd.f32 %v12620_v0, %v2700_v20  ;;  %v2688_v45 = vsel %vm15689_vm12, %v2686_v25, %v12626_v60  ;;  %vm15693_vm12 = vmmov %vm15691_vm13 }
 0x34c   : > { %v2656_v3 = vpop.permute.xlu1 %2655  ;;  %v12694_v24 = vadd.f32 %v12622_v56, %v2688_v45 }
 0x34d   : > { %v2741_v35 = vpop.permute.xlu0 %2740  ;;  %2810 = vrot.lane.b32.xlu0 %v12676_v28, %s15686_s2  ;;  %v2698_v38 = vsel %vm2696_vm3, %v2695_v44, %v2656_v3  ;;  %v12803_v3 = vld [vmem:[%s15700_s4 + $0x8] sm:$0x1f]  }
 0x34e   : > { %2816 = vrot.lane.b32.xlu1 %v12680_v63, %s15686_s2 }
 0x350   : > { %v2662_v43 = vpop.permute.xlu1 %2661 }
 0x351   : > { %v2747_v27 = vpop.permute.xlu0 %2746  ;;  %2818 = vrot.lane.b32.xlu0 %v12694_v24, %s15686_s2  ;;  %v2701_v60 = vsel %vm2699_vm8, %v2698_v38, %v2662_v43 }
 0x352   : > { %v12702_v8 = vadd.f32 %v12622_v56, %v2701_v60  ;;  %v2770_v26 = vsel %vm15018_vm1, %v2741_v35, %v2747_v27 }
 0x354   : > { %2820 = vrot.lane.b32.xlu1 %v12702_v8, %s15686_s2  ;;  %v2743_v6 = vpop.permute.xlu1 %2742 }
 0x355   : > { %v2755_v22 = vpop.permute.xlu0 %2754 }
 0x356   : > { %v2772_v29 = vsel %vm2033_vm4, %v2770_v26, %v2755_v22  ;;  %v3020_v26 = vpack.c.bf16 %v12694_v24, %v12664_v17  ;;  %v3019_v22 = vpack.c.bf16 %v12680_v63, %v12640_v23 }
 0x357   : > { %v12709_v15 = vadd.f32 %v12620_v0, %v2772_v29 }
 0x358   : > { %v2749_v21 = vpop.permute.xlu1 %2748  ;;  %v3193_v29 = vsel %vm3041_vm9, %v3019_v22, 0 }
 0x359   : > { %v2703_v33 = vpop.permute.xlu0 %2702  ;;  %2814 = vrot.lane.b32.xlu0 %v12709_v15, %s15686_s2  ;;  %v2771_v4 = vsel %vm15018_vm1, %v2743_v6, %v2749_v21  ;;  %v15701_v21 = vmov 0  }
 0x35c   : > { %v2757_v31 = vpop.permute.xlu1 %2756 }
 0x35d   : > { %v2709_v7 = vpop.permute.xlu0 %2708  ;;  %2844 = vrot.lane.b32.xlu0 %v12640_v23, %s15014_s23  ;;  %v2773_v57 = vsel %vm2033_vm4, %v2771_v4, %v2757_v31 }
 0x35e   : > { %v12718_v10 = vadd.f32 %v12622_v56, %v2773_v57  ;;  %v2760_v61 = vsel %vm2665_vm7, %v2703_v33, %v2709_v7  ;;  %v12830_v33 = vld [vmem:[%s15700_s4] sm:$0x1f]  }
 0x360   : > { %2824 = vrot.lane.b32.xlu1 %v12718_v10, %s15686_s2  ;;  %v2705_v59 = vpop.permute.xlu1 %2704  ;;  %v3023_v4 = vpack.c.bf16 %v12718_v10, %v12709_v15 }
 0x361   : > { %v2717_v58 = vpop.permute.xlu0 %2716 }
 0x362   : > { %v3205_v7 = vsel %vm3041_vm9, %v3023_v4, 0  ;;  %v9662_v4 = vld [vmem:[%s15700_s4 + $0x10] sm:$0x1f]  }
 0x364   : > { %2846 = vrot.lane.b32.xlu1 %v12680_v63, %s15014_s23  ;;  %v2711_v39 = vpop.permute.xlu1 %2710  ;;  %s15695_s23 = smov 104  }
 0x365   : > { %v2721_v47 = vpop.permute.xlu0 %2720  ;;  %v2761_v49 = vsel %vm2665_vm7, %v2705_v59, %v2711_v39 }
 0x368   : > { %v2719_v30 = vpop.permute.xlu1 %2718 }
 0x369   : > { %v2729_v2 = vpop.permute.xlu0 %2728  ;;  %v2724_v14 = vsel %vm15020_vm6, %v2717_v58, %v2719_v30 }
 0x36a   : > { %v2762_v18 = vsel %vm2668_vm10, %v2760_v61, %v2724_v14 }
 0x36b   : > { %v2764_v55 = vsel %vm15691_vm13, %v2762_v18, %v2729_v2  ;;  %vm15694_vm13 = vmmov %vm15692_vm11 }
 0x36c   : > { %v2723_v16 = vpop.permute.xlu1 %2722 }
 0x36d   : > { %v2735_v62 = vpop.permute.xlu0 %2734  ;;  %v2725_v46 = vsel %vm15020_vm6, %v2721_v47, %v2723_v16 }
 0x36e   : > { %v2766_v54 = vsel %vm15692_vm11, %v2764_v55, %v2735_v62  ;;  %v2763_v37 = vsel %vm2668_vm10, %v2761_v49, %v2725_v46  ;;  %vm15696_vm11 = vcmask 1039360   ;;  %v3021_v62 = vpack.c.bf16 %v12702_v8, %v12676_v28 }
 0x36f   : > { %v2768_v32 = vsel %vm2675_vm0, %v2766_v54, %v2741_v35  ;;  %vm15699_vm1 = vmmov %vm15696_vm11 }
 0x370   : > { %v12731_v51 = vadd.f32 %v12620_v0, %v2768_v32  ;;  %v2731_v12 = vpop.permute.xlu1 %2730 }
 0x371   : > { %v2765_v13 = vsel %vm15693_vm12, %v2763_v37, %v2731_v12  ;;  %vm15697_vm12 = vmmov %vm15696_vm11 }
 0x372   : > { %2812 = vrot.lane.b32.xlu0 %v12731_v51, %s15686_s2 }
 0x374   : > { %v2737_v9 = vpop.permute.xlu1 %2736 }
 0x375   : > { %v2767_v19 = vsel %vm15694_vm13, %v2765_v13, %v2737_v9  ;;  %vm15698_vm13 = vmmov %vm15696_vm11 }
 0x376   : > { %v2769_v11 = vsel %vm2675_vm0, %v2767_v19, %v2743_v6  ;;  %2853 = vrot.lane.b32.xlu0 %v12640_v23, %s15695_s23 }
 0x377   : > { %v12744_v0 = vadd.f32 %v12622_v56, %v2769_v11 }
 0x379   : > { %2822 = vrot.lane.b32.xlu1 %v12744_v0, %s15686_s2  ;;  %s9928_s2 = smov 103   ;;  %v3022_v49 = vpack.c.bf16 %v12744_v0, %v12731_v51 }
 0x37a   : > { %2857 = vrot.lane.b32.xlu0 %v12676_v28, %s15695_s23 }
 0x37d   : > { %2855 = vrot.lane.b32.xlu1 %v12664_v17, %s15695_s23 }
 0x37e   : > { %2865 = vrot.lane.b32.xlu0 %v12694_v24, %s15695_s23 }
 0x381   : > { %2863 = vrot.lane.b32.xlu1 %v12680_v63, %s15695_s23 }
 0x382   : > { %2859 = vrot.lane.b32.xlu0 %v12731_v51, %s15695_s23 }
 0x385   : > { %2867 = vrot.lane.b32.xlu1 %v12702_v8, %s15695_s23 }
 0x386   : > { %2869 = vrot.lane.b32.xlu0 %v12744_v0, %s15695_s23 }
 0x389   : > { %2861 = vrot.lane.b32.xlu1 %v12709_v15, %s15695_s23 }
 0x38a   : > { %2891 = vrot.lane.b32.xlu0 %v12640_v23, %s15230_s18 }
 0x38d   : > { %2871 = vrot.lane.b32.xlu1 %v12718_v10, %s15695_s23 }
 0x38e   : > { %2899 = vrot.lane.b32.xlu0 %v12640_v23, %s9928_s2 }
 0x391   : > { %2893 = vrot.lane.b32.xlu1 %v12680_v63, %s15230_s18 }
 0x392   : > { %2903 = vrot.lane.b32.xlu0 %v12676_v28, %s9928_s2 }
 0x395   : > { %2901 = vrot.lane.b32.xlu1 %v12664_v17, %s9928_s2 }
 0x396   : > { %2911 = vrot.lane.b32.xlu0 %v12694_v24, %s9928_s2 }
 0x399   : > { %2909 = vrot.lane.b32.xlu1 %v12680_v63, %s9928_s2 }
 0x39a   : > { %2905 = vrot.lane.b32.xlu0 %v12731_v51, %s9928_s2 }
 0x39d   : > { %2913 = vrot.lane.b32.xlu1 %v12702_v8, %s9928_s2 }
 0x39e   : > { %2915 = vrot.lane.b32.xlu0 %v12744_v0, %s9928_s2 }
 0x3a1   : > { %2907 = vrot.lane.b32.xlu1 %v12709_v15, %s9928_s2 }
 0x3a2   : > { %2938 = vrot.lane.b32.xlu0 %v12640_v23, %s9929_s25 }
 0x3a5   : > { %2917 = vrot.lane.b32.xlu1 %v12718_v10, %s9928_s2  ;;  %s9932_s2 = smov 94  }
 0x3a9   : > { %2940 = vrot.lane.b32.xlu1 %v12680_v63, %s9929_s25  ;;  %s15705_s25 = smov 30  }
 0x3b0   : > { %v2807_v56 = vpop.permute.xlu0 %2806 }
 0x3bc   : > { %v2809_v5 = vpop.permute.xlu1 %2808 }
 0x3bd   : > { %v12786_v42 = vsel %vm15697_vm12, %v2807_v56, %v2809_v5  ;;  %vm2850_vm12 = vcmask 515072  }
 0x3be   : > { %v2977_v18 = vadd.f32 %v12786_v42, %v12640_v23 }
 0x3bf   : > { %v2811_v48 = vpop.permute.xlu0 %2810 }
 0x3c0   : > { %v2817_v1 = vpop.permute.xlu1 %2816  ;;  %v12791_v20 = vsel %vm15698_vm13, %v2809_v5, %v2811_v48 }
 0x3c1   : > { %v2978_v55 = vadd.f32 %v12791_v20, %v12664_v17 }
 0x3c3   : > { %v2819_v36 = vpop.permute.xlu0 %2818 }
 0x3c4   : > { %v12783_v52 = vsel %vm15696_vm11, %v2817_v1, %v2819_v36  ;;  %vm3037_vm11 = vcmask 80896  }
 0x3c5   : > { %v3027_v53 = vpack.c.bf16 %v12783_v52, %v12786_v42  ;;  %v2982_v9 = vadd.f32 %v12783_v52, %v12680_v63 }
 0x3c6   : > { %v2821_v41 = vpop.permute.xlu1 %2820 }
 0x3c7   : > { %v12794_v25 = vsel %vm15699_vm1, %v2819_v36, %v2821_v41  ;;  %v3043_v45 = vsel %vm3041_vm9, %v3027_v53, 0  ;;  %vm9931_vm1 = vmmov 0  }
 0x3c8   : > { %v3028_v34 = vpack.c.bf16 %v12794_v25, %v12791_v20  ;;  %v2983_v53 = vadd.f32 %v12794_v25, %v12694_v24 }
 0x3ca   : > { %8706 = vmatprep.subr.msk.bf16.mxu0 %vm3041_vm9, %v3028_v34 }
 0x3cb   : > { %3058 = vmatpush1.bf16.msra.mxu0 %v3043_v45  ;;  %v2815_v35 = vpop.permute.xlu0 %2814 }
 0x3cc   : > { %9084 = vmatprep.subr.bf16.mxu0 %v15027_v40 }
 0x3ce   : > { %8707 = vmatmul.mubr.msk.bf16.vlgmr.msra.gmra.mrb[0].mxu0 %vm3037_vm11, %v12803_v3 }
 0x3cf   : > { %9086 = vmatprep.mubr.msk.bf16.mxu0 %vm9931_vm1, %v15027_v40  ;;  %v2845_v44 = vpop.permute.xlu0 %2844 }
 0x3d0   : > { %v12810_v43 = vsel %vm2850_vm12, %v2815_v35, %v2845_v44 }
 0x3d2   : > { %v2825_v50 = vpop.permute.xlu1 %2824 }
 0x3d6   : > { %v2847_v38 = vpop.permute.xlu1 %2846 }
 0x3d7   : > { %v12812_v27 = vsel %vm2850_vm12, %v2825_v50, %v2847_v38  ;;  %vm15702_vm12 = vmmov %vm15698_vm13 }
 0x3d8   : > { %v3031_v60 = vpack.c.bf16 %v12812_v27, %v12810_v43  ;;  %vm15703_vm6 = vmmov %vm15702_vm12 }
 0x3d9   : > { %vm15704_vm5 = vmmov %vm15703_vm6 }
 0x3da   : > { %v3055_v6 = vsel %vm3041_vm9, %v3031_v60, 0 }
 0x3db   : > { %9085 = vmatpush3.bf16.msra.mxu0 %v3055_v6 }
 0x3dc   : > { %8712 = vmatprep.subr.msk.bf16.mxu0 %vm3041_vm9, %v3020_v26 }
 0x3de   : > { %9087 = vmatmul.mubr.msk.bf16.vlgmr.msra.gmra.mrb[4].mxu0 %vm3037_vm11, %v12803_v3 }
 0x3df   : > { %3208 = vmatpush1.bf16.msra.mxu0 %v3193_v29  ;;  %3239 = vmatprep.mubr.bf16.mxu0 %v15701_v21 }
 0x3e0   : > { %9090 = vmatprep.subr.bf16.mxu0 %v15027_v40 }
 0x3e4   : > { %v2813_v31 = vpop.permute.xlu0 %2812 }
 0x3e5   : > { %v12846_v30 = vsel %vm15703_vm6, %v2811_v48, %v2813_v31  ;;  %v12849_v61 = vsel %vm15704_vm5, %v2813_v31, %v2815_v35  ;;  %v3199_v48 = vsel %vm3041_vm9, %v3021_v62, 0  ;;  %v2981_v31 = vadd.f32 %v12810_v43, %v12709_v15 }
 0x3e6   : > { %8713 = vmatmul.mubr.msk.bf16.vlgmr.msra.gmra.mrb[0].mxu0 %vm3037_vm11, %v12830_v33  ;;  %v2979_v11 = vadd.f32 %v12846_v30, %v12676_v28  ;;  %v2980_v26 = vadd.f32 %v12849_v61, %v12731_v51  ;;  %vm2919_vm6 = vcmask 842752   ;;  %vm2944_vm5 = vcmask 318464  }
 0x3e7   : > { %9091 = vmatpush3.bf16.msra.mxu0 %v3205_v7  ;;  %9092 = vmatprep.mubr.msk.bf16.mxu0 %vm9931_vm1, %v15027_v40 }
 0x3e8   : > { %v2854_v57 = vpop.permute.xlu0 %2853 }
 0x3eb   : > { %v2823_v59 = vpop.permute.xlu1 %2822 }
 0x3ec   : > { %v2858_v58 = vpop.permute.xlu0 %2857  ;;  %v12840_v39 = vsel %vm15698_vm13, %v2821_v41, %v2823_v59  ;;  %v12843_v47 = vsel %vm15702_vm12, %v2823_v59, %v2825_v50  ;;  %vm15712_vm13 = vcmask 244736  }
 0x3ed   : > { %v3030_v2 = vpack.c.bf16 %v12843_v47, %v12849_v61  ;;  %v3029_v14 = vpack.c.bf16 %v12840_v39, %v12846_v30  ;;  %vm15713_vm12 = vmmov %vm15712_vm13 }
 0x3ee   : > { %9093 = vmatmul.mubr.msk.bf16.vlgmr.msra.gmra.mrb[4].mxu0 %vm3037_vm11, %v12830_v33 }
 0x3ef   : > { %v2856_v16 = vpop.permute.xlu1 %2855  ;;  %3397 = vmatprep.mubr.bf16.mxu0 %v15701_v21  ;;  %8708 = vmatprep.subr.msk.bf16.mxu1 %vm3041_vm9, %v3030_v2  ;;  %v3049_v12 = vsel %vm3041_vm9, %v3029_v14, 0  ;;  %v2985_v14 = vadd.f32 %v12843_v47, %v12744_v0 }
 0x3f0   : > { %v2866_v54 = vpop.permute.xlu0 %2865  ;;  %v12866_v32 = vsel %vm2699_vm8, %v2854_v57, %v2856_v16  ;;  %v12869_v46 = vsel %vm2699_vm8, %v2856_v16, %v2858_v58  ;;  %3101 = vmatpush1.bf16.msra.mxu1 %v3049_v12 }
 0x3f1   : > { %v12875_v37 = vadd.f32 %v2977_v18, %v12866_v32  ;;  %v12878_v13 = vadd.f32 %v2978_v55, %v12869_v46  ;;  %8714 = vmatprep.subr.msk.bf16.mxu1 %vm3041_vm9, %v3022_v49  ;;  %v2986_v49 = vadd.f32 %v12812_v27, %v12718_v10 }
 0x3f3   : > { %v2864_v19 = vpop.permute.xlu1 %2863  ;;  %8709 = vmatmul.mubr.msk.bf16.vlgmr.msra.gmra.mrb[0].mxu1 %vm3037_vm11, %v12803_v3  ;;  %v2984_v3 = vadd.f32 %v12840_v39, %v12702_v8 }
 0x3f4   : > { %v2860_v56 = vpop.permute.xlu0 %2859  ;;  %v12886_v5 = vsel %vm2699_vm8, %v2864_v19, %v2866_v54  ;;  %3251 = vmatpush1.bf16.msra.mxu1 %v3199_v48  ;;  %3282 = vmatprep.mubr.bf16.mxu1 %v15701_v21 }
 0x3f5   : > { %v12892_v1 = vsel %vm2699_vm8, %v2858_v58, %v2860_v56  ;;  %v12895_v36 = vadd.f32 %v2982_v9, %v12886_v5  ;;  %v3337_v34 = vpack.c.bf16 %v12886_v5, %v12866_v32 }
 0x3f6   : > { %v12899_v41 = vadd.f32 %v2979_v11, %v12892_v1 }
 0x3f7   : > { %v2868_v45 = vpop.permute.xlu1 %2867  ;;  %v3351_v29 = vsel %vm3041_vm9, %v3337_v34, 0 }
 0x3f8   : > { %v2870_v35 = vpop.permute.xlu0 %2869  ;;  %v12908_v50 = vsel %vm2699_vm8, %v2866_v54, %v2868_v45 }
 0x3f9   : > { %v12911_v44 = vsel %vm2699_vm8, %v2868_v45, %v2870_v35  ;;  %v12914_v38 = vadd.f32 %v2983_v53, %v12908_v50  ;;  %v3338_v60 = vpack.c.bf16 %v12908_v50, %v12869_v46  ;;  %v2947_v45 = vmax.f32 %v12640_v23, %v12786_v42 }
 0x3fa   : > { %v12919_v6 = vadd.f32 %v2984_v3, %v12911_v44  ;;  %v3339_v55 = vpack.c.bf16 %v12911_v44, %v12892_v1  ;;  %v2948_v3 = vmax.f32 %v12664_v17, %v12791_v20 }
 0x3fb   : > { %8720 = vmatprep.subr.msk.bf16.mxu0 %vm3041_vm9, %v3338_v60  ;;  %v2862_v22 = vpop.permute.xlu1 %2861 }
 0x3fc   : > { %v2892_v7 = vpop.permute.xlu0 %2891  ;;  %v12931_v57 = vsel %vm2699_vm8, %v2860_v56, %v2862_v22  ;;  %3366 = vmatpush1.bf16.msra.mxu0 %v3351_v29  ;;  %v3357_v19 = vsel %vm3041_vm9, %v3339_v55, 0 }
 0x3fd   : > { %v12934_v59 = vsel %vm2033_vm4, %v2862_v22, %v2892_v7  ;;  %v12937_v58 = vadd.f32 %v2980_v26, %v12931_v57  ;;  %9096 = vmatprep.subr.bf16.mxu0 %v15027_v40 }
 0x3fe   : > { %v12941_v2 = vadd.f32 %v2981_v31, %v12934_v59 }
 0x3ff   : > { %v2872_v18 = vpop.permute.xlu1 %2871  ;;  %8721 = vmatmul.mubr.msk.bf16.vlgmr.msra.gmra.mrb[0].mxu0 %vm3037_vm11, %v9662_v4  ;;  %8715 = vmatmul.mubr.msk.bf16.vlgmr.msra.gmra.mrb[0].mxu1 %vm3037_vm11, %v12830_v33 }
 0x400   : > { %v2900_v16 = vpop.permute.xlu0 %2899  ;;  %v12949_v62 = vsel %vm2699_vm8, %v2870_v35, %v2872_v18  ;;  %9098 = vmatprep.mubr.msk.bf16.mxu0 %vm9931_vm1, %v15027_v40  ;;  %3440 = vmatprep.mubr.bf16.mxu1 %v15701_v21 }
 0x401   : > { %v12956_v54 = vadd.f32 %v2985_v14, %v12949_v62  ;;  %v3340_v12 = vpack.c.bf16 %v12949_v62, %v12931_v57 }
 0x403   : > { %8722 = vmatprep.subr.msk.bf16.mxu1 %vm3041_vm9, %v3340_v12  ;;  %v2894_v9 = vpop.permute.xlu1 %2893 }
 0x404   : > { %v2904_v33 = vpop.permute.xlu0 %2903  ;;  %v12966_v11 = vsel %vm2033_vm4, %v2872_v18, %v2894_v9  ;;  %3409 = vmatpush1.bf16.msra.mxu1 %v3357_v19  ;;  %v2949_v18 = vmax.f32 %v12676_v28, %v12846_v30 }
 0x405   : > { %v12969_v56 = vadd.f32 %v2986_v49, %v12966_v11  ;;  %v3341_v48 = vpack.c.bf16 %v12966_v11, %v12934_v59 }
 0x407   : > { %v2902_v53 = vpop.permute.xlu1 %2901  ;;  %v3363_v34 = vsel %vm3041_vm9, %v3341_v48, 0 }
 0x408   : > { %v2912_v35 = vpop.permute.xlu0 %2911  ;;  %v2920_v60 = vsel %vm2919_vm6, %v2900_v16, %v2902_v53  ;;  %v2921_v26 = vsel %vm2919_vm6, %v2902_v53, %v2904_v33  ;;  %9097 = vmatpush3.bf16.msra.mxu0 %v3363_v34 }
 0x409   : > { %v2957_v22 = vmax.f32 %v12866_v32, %v2920_v60  ;;  %v2958_v29 = vmax.f32 %v12869_v46, %v2921_v26  ;;  %v12983_v31 = vadd.f32 %v12875_v37, %v2920_v60  ;;  %v12986_v7 = vadd.f32 %v12878_v13, %v2921_v26 }
 0x40a   : > { %v2952_v32 = vmax.f32 %v12680_v63, %v12783_v52 }
 0x40b   : > { %v12988_v23 = vmax.f32 %v2947_v45, %v2957_v22  ;;  %v12990_v42 = vmax.f32 %v2948_v3, %v2958_v29  ;;  %v2910_v17 = vpop.permute.xlu1 %2909  ;;  %9099 = vmatmul.mubr.msk.bf16.vlgmr.msra.gmra.mrb[4].mxu0 %vm3037_vm11, %v9662_v4  ;;  %8723 = vmatmul.mubr.msk.bf16.vlgmr.msra.gmra.mrb[0].mxu1 %vm3037_vm11, %v9662_v4  ;;  %v2951_v45 = vmax.f32 %v12709_v15, %v12810_v43 }
 0x40c   : > { %v2906_v20 = vpop.permute.xlu0 %2905  ;;  %v2924_v14 = vsel %vm2919_vm6, %v2910_v17, %v2912_v35  ;;  %3565 = vmatprep.mubr.bf16.mxu0 %v15701_v21  ;;  %3608 = vmatprep.mubr.bf16.mxu1 %v15701_v21  ;;  %v2955_v15 = vmax.f32 %v12744_v0, %v12843_v47 }
 0x40d   : > { %v2922_v46 = vsel %vm2919_vm6, %v2904_v33, %v2906_v20  ;;  %v2962_v37 = vmax.f32 %v12886_v5, %v2924_v14  ;;  %v13001_v13 = vadd.f32 %v12895_v36, %v2924_v14  ;;  %v3505_v63 = vpack.c.bf16 %v2924_v14, %v2920_v60 }
 0x40e   : > { %v2959_v55 = vmax.f32 %v12892_v1, %v2922_v46  ;;  %v13008_v4 = vadd.f32 %v12899_v41, %v2922_v46  ;;  %v2953_v5 = vmax.f32 %v12694_v24, %v12794_v25  ;;  %v2954_v41 = vmax.f32 %v12702_v8, %v12840_v39 }
 0x40f   : > { %v13010_v16 = vmax.f32 %v2952_v32, %v2962_v37  ;;  %v2914_v52 = vpop.permute.xlu1 %2913 }
 0x410   : > { %v13014_v12 = vmax.f32 %v2949_v18, %v2959_v55  ;;  %v2916_v36 = vpop.permute.xlu0 %2915  ;;  %v2925_v49 = vsel %vm2919_vm6, %v2912_v35, %v2914_v52 }
 0x411   : > { %v2926_v9 = vsel %vm2919_vm6, %v2914_v52, %v2916_v36  ;;  %v2963_v28 = vmax.f32 %v12908_v50, %v2925_v49  ;;  %v13020_v30 = vadd.f32 %v12914_v38, %v2925_v49  ;;  %v3506_v1 = vpack.c.bf16 %v2925_v49, %v2921_v26  ;;  %v9663_v38 = vld [vmem:[%s15700_s4 + $0x18] sm:$0x1f]   ;;  %s15707_s4 = smov 92  }
 0x412   : > { %v2964_v19 = vmax.f32 %v12911_v44, %v2926_v9  ;;  %v13026_v24 = vadd.f32 %v12919_v6, %v2926_v9  ;;  %v3519_v50 = vsel %vm3041_vm9, %v3505_v63, 0  ;;  %v2950_v44 = vmax.f32 %v12731_v51, %v12849_v61 }
 0x413   : > { %v13028_v25 = vmax.f32 %v2953_v5, %v2963_v28  ;;  %8728 = vmatprep.subr.msk.bf16.mxu0 %vm3041_vm9, %v3506_v1  ;;  %v2908_v33 = vpop.permute.xlu1 %2907  ;;  %v3507_v61 = vpack.c.bf16 %v2926_v9, %v2922_v46 }
 0x414   : > { %v13035_v48 = vmax.f32 %v2954_v41, %v2964_v19  ;;  %v2939_v8 = vpop.permute.xlu0 %2938  ;;  %v2923_v39 = vsel %vm2919_vm6, %v2906_v20, %v2908_v33  ;;  %3534 = vmatpush1.bf16.msra.mxu0 %v3519_v50  ;;  %v2956_v20 = vmax.f32 %v12718_v10, %v12812_v27 }
 0x415   : > { %v2945_v6 = vsel %vm2944_vm5, %v2908_v33, %v2939_v8  ;;  %v2960_v53 = vmax.f32 %v12931_v57, %v2923_v39  ;;  %v13043_v34 = vadd.f32 %v12937_v58, %v2923_v39  ;;  %9102 = vmatprep.subr.bf16.mxu0 %v15027_v40  ;;  %v3525_v29 = vsel %vm3041_vm9, %v3507_v61, 0 }
 0x416   : > { %v2961_v3 = vmax.f32 %v12934_v59, %v2945_v6  ;;  %v13050_v35 = vadd.f32 %v12941_v2, %v2945_v6 }
 0x417   : > { %v13052_v60 = vmax.f32 %v2950_v44, %v2960_v53  ;;  %8729 = vmatmul.mubr.msk.bf16.vlgmr.msra.gmra.mrb[0].mxu0 %vm3037_vm11, %v9663_v38  ;;  %v2918_v51 = vpop.permute.xlu1 %2917 }
 0x418   : > { %v13055_v57 = vmax.f32 %v2951_v45, %v2961_v3  ;;  %v2927_v58 = vsel %vm2919_vm6, %v2916_v36, %v2918_v51  ;;  %9104 = vmatprep.mubr.msk.bf16.mxu0 %vm9931_vm1, %v15027_v40  ;;  %vm5520_vm6 = vcmask 769024  }
 0x419   : > { %v2965_v43 = vmax.f32 %v12949_v62, %v2927_v58  ;;  %v13064_v59 = vadd.f32 %v12956_v54, %v2927_v58  ;;  %v3508_v2 = vpack.c.bf16 %v2927_v58, %v2923_v39 }
 0x41b   : > { %v13066_v26 = vmax.f32 %v2955_v15, %v2965_v43  ;;  %8730 = vmatprep.subr.msk.bf16.mxu1 %vm3041_vm9, %v3508_v2  ;;  %v2941_v22 = vpop.permute.xlu1 %2940 }
 0x41c   : > { %v2946_v17 = vsel %vm2944_vm5, %v2918_v51, %v2941_v22  ;;  %3577 = vmatpush1.bf16.msra.mxu1 %v3525_v29  ;;  %vm15715_vm5 = vmmov %vm15713_vm12 }
 0x41d   : > { %v2966_v0 = vmax.f32 %v12966_v11, %v2946_v17  ;;  %v13075_v47 = vadd.f32 %v12969_v56, %v2946_v17  ;;  %v3509_v62 = vpack.c.bf16 %v2946_v17, %v2945_v6 }
 0x41f   : > { %v13077_v54 = vmax.f32 %v2956_v20, %v2966_v0  ;;  %8731 = vmatmul.mubr.msk.bf16.vlgmr.msra.gmra.mrb[0].mxu1 %vm3037_vm11, %v9663_v38  ;;  %v3531_v14 = vsel %vm3041_vm9, %v3509_v62, 0 }
 0x420   : > { %9103 = vmatpush3.bf16.msra.mxu0 %v3531_v14  ;;  %5585 = vmatprep.mubr.bf16.mxu1 %v15701_v21 }
 0x423   : > { %9105 = vmatmul.mubr.msk.bf16.vlgmr.msra.gmra.mrb[4].mxu0 %vm3037_vm11, %v9663_v38 }
 0x424   : > { %3870 = vmatprep.mubr.bf16.mxu0 %v15701_v21 }
 0x4ea   : > { %v3567_v10 = vpop.f32.mrb[0].mxu0 }
 0x4eb   : > { %v8733_v27 = vmul.f32 -1.442695, %v3567_v10  ;;  %v3569_v11 = vpop.f32.mrb[1].mxu0  ;;  %v3007_v10 = vmul.f32 0.25, %v12983_v31  ;;  %v3013_v31 = vmul.f32 0.25, %v13020_v30  ;;  %v3011_v30 = vmul.f32 0.25, %v13050_v35 }
 0x4ec   : > { %v8734_v32 = vmul.f32 -1.442695, %v3569_v11  ;;  %v3571_v56 = vpop.f32.mrb[2].mxu0 }
 0x4ed   : > { %9738 = vpow2.f32 %v8733_v27  ;;  %v8738_v46 = vmul.f32 -1.442695, %v3571_v56  ;;  %v3573_v37 = vpop.f32.mrb[3].mxu0  ;;  %v3008_v56 = vmul.f32 0.25, %v12986_v7 }
 0x4ee   : > { %9740 = vpow2.f32 %v8734_v32  ;;  %v8739_v18 = vmul.f32 -1.442695, %v3573_v37 }
 0x4ef   : > { %9742 = vpow2.f32 %v8738_v46 }
 0x4f0   : > { %9744 = vpow2.f32 %v8739_v18 }
 0x4f2   : > { %v3610_v55 = vpop.f32.mrb[0].mxu1 }
 0x4f3   : > { %v8735_v63 = vmul.f32 -1.442695, %v3610_v55  ;;  %v3612_v52 = vpop.f32.mrb[1].mxu1  ;;  %v3012_v55 = vmul.f32 0.25, %v13001_v13  ;;  %v3014_v13 = vmul.f32 0.25, %v13026_v24 }
 0x4f4   : > { %v8736_v5 = vmul.f32 -1.442695, %v3612_v52  ;;  %v3614_v36 = vpop.f32.mrb[2].mxu1 }
 0x4f5   : > { %9746 = vpow2.f32 %v8735_v63  ;;  %v8740_v49 = vmul.f32 -1.442695, %v3614_v36  ;;  %v3616_v9 = vpop.f32.mrb[3].mxu1 }
 0x4f6   : > { %9748 = vpow2.f32 %v8736_v5  ;;  %v8741_v28 = vmul.f32 -1.442695, %v3616_v9  ;;  %v3653_v1 = vpop.f32.mrb[4].mxu0 }
 0x4f7   : > { %v9739_v41 = vpop.eup %9738  ;;  %9750 = vpow2.f32 %v8740_v49  ;;  %v8737_v19 = vmul.f32 -1.442695, %v3653_v1  ;;  %v9106_v33 = vpop.f32.mrb[5].mxu0 }
 0x4f8   : > { %v9741_v50 = vpop.eup %9740  ;;  %v3700_v38 = vadd.f32 1.0, %v9739_v41  ;;  %9752 = vpow2.f32 %v8741_v28  ;;  %v3656_v8 = vpop.f32.mrb[6].mxu0 }
 0x4f9   : > { %v9743_v39 = vpop.eup %9742  ;;  %v3701_v44 = vadd.f32 1.0, %v9741_v50  ;;  %9754 = vpow2.f32 %v8737_v19  ;;  %v9107_v6 = vpop.f32.mrb[7].mxu0  ;;  %v8742_v3 = vmul.f32 -1.442695, %v3656_v8  ;;  %v3009_v19 = vmul.f32 0.25, %v13008_v4 }
 0x4fa   : > { %v9745_v53 = vpop.eup %9744  ;;  %9756 = vrcp.f32 %v3700_v38  ;;  %v3705_v45 = vadd.f32 1.0, %v9743_v39  ;;  %v3010_v50 = vmul.f32 0.25, %v13043_v34  ;;  %v3015_v38 = vmul.f32 0.25, %v13064_v59 }
 0x4fb   : > { %9758 = vrcp.f32 %v3701_v44  ;;  %v3706_v51 = vadd.f32 1.0, %v9745_v53 }
 0x4fc   : > { %9760 = vrcp.f32 %v3705_v45 }
 0x4fd   : > { %9762 = vrcp.f32 %v3706_v51 }
 0x4fe   : > { %9764 = vpow2.f32 %v8742_v3 }
 0x4ff   : > { %v9747_v61 = vpop.eup %9746 }
 0x500   : > { %v9749_v58 = vpop.eup %9748  ;;  %v3702_v15 = vadd.f32 1.0, %v9747_v61 }
 0x501   : > { %v9751_v43 = vpop.eup %9750  ;;  %v3703_v2 = vadd.f32 1.0, %v9749_v58 }
 0x502   : > { %v9753_v22 = vpop.eup %9752  ;;  %9766 = vrcp.f32 %v3702_v15  ;;  %v3707_v29 = vadd.f32 1.0, %v9751_v43 }
 0x503   : > { %v9755_v17 = vpop.eup %9754  ;;  %9768 = vrcp.f32 %v3703_v2  ;;  %v3708_v20 = vadd.f32 1.0, %v9753_v22 }
 0x504   : > { %v9757_v0 = vpop.eup %9756  ;;  %9770 = vrcp.f32 %v3707_v29  ;;  %v3704_v62 = vadd.f32 1.0, %v9755_v17 }
 0x505   : > { %v9759_v14 = vpop.eup %9758  ;;  %v3730_v27 = vmul.f32 %v9757_v0, %v12988_v23  ;;  %v3740_v11 = vsub.f32 1.0, %v9757_v0  ;;  %9772 = vrcp.f32 %v3708_v20 }
 0x506   : > { %v9761_v32 = vpop.eup %9760  ;;  %v3731_v46 = vmul.f32 %v9759_v14, %v12990_v42  ;;  %v3741_v37 = vsub.f32 1.0, %v9759_v14  ;;  %9774 = vrcp.f32 %v3704_v62 }
 0x507   : > { %v9763_v18 = vpop.eup %9762  ;;  %v3750_v63 = vmul.f32 %v3740_v11, %v3007_v10  ;;  %v3735_v52 = vmul.f32 %v9761_v32, %v13010_v16  ;;  %v3745_v5 = vsub.f32 1.0, %v9761_v32 }
 0x508   : > { %v9765_v36 = vpop.eup %9764  ;;  %v3751_v23 = vmul.f32 %v3741_v37, %v3008_v56  ;;  %v3736_v49 = vmul.f32 %v9763_v18, %v13028_v25  ;;  %v3746_v9 = vsub.f32 1.0, %v9763_v18 }
 0x509   : > { %v3760_v28 = vadd.f32 %v3750_v63, %v3730_v27  ;;  %v3755_v7 = vmul.f32 %v3745_v5, %v3012_v55  ;;  %v3709_v1 = vadd.f32 1.0, %v9765_v36 }
 0x50a   : > { %v3761_v42 = vadd.f32 %v3751_v23, %v3731_v46  ;;  %v3756_v41 = vmul.f32 %v3746_v9, %v3013_v31 }
 0x50b   : > { %v3765_v33 = vadd.f32 %v3755_v7, %v3735_v52  ;;  %9776 = vrcp.f32 %v3709_v1  ;;  %v3770_v39 = vmax.f32 %v3760_v28, 0.0 }
 0x50c   : > { %v9767_v16 = vpop.eup %9766  ;;  %v3766_v25 = vadd.f32 %v3756_v41, %v3736_v49  ;;  %v3771_v4 = vmax.f32 %v3761_v42, 0.0  ;;  %v9664_v42 = vld [vmem:[%s15714_s5 + $0x84] sm:$0xff]  }
 0x50d   : > { %v9769_v8 = vpop.eup %9768  ;;  %v3775_v44 = vmax.f32 %v3765_v33, 0.0  ;;  %v3732_v6 = vmul.f32 %v9767_v16, %v13014_v12  ;;  %v3742_v53 = vsub.f32 1.0, %v9767_v16 }
 0x50e   : > { %v9771_v45 = vpop.eup %9770  ;;  %v3776_v3 = vmax.f32 %v3766_v25, 0.0  ;;  %v3733_v24 = vmul.f32 %v9769_v8, %v13052_v60  ;;  %v3743_v51 = vsub.f32 1.0, %v9769_v8 }
 0x50f   : > { %v9773_v61 = vpop.eup %9772  ;;  %v13099_v58 = vpack.c.bf16 %v3775_v44, %v3770_v39  ;;  %v3752_v34 = vmul.f32 %v3742_v53, %v3009_v19  ;;  %v3737_v35 = vmul.f32 %v9771_v45, %v13035_v48  ;;  %v3747_v59 = vsub.f32 1.0, %v9771_v45 }
 0x510   : > { %v9775_v15 = vpop.eup %9774  ;;  %v13102_v43 = vpack.c.bf16 %v3776_v3, %v3771_v4  ;;  %v3753_v2 = vmul.f32 %v3743_v51, %v3010_v50  ;;  %v3738_v12 = vmul.f32 %v9773_v61, %v13066_v26  ;;  %v3748_v22 = vsub.f32 1.0, %v9773_v61 }
 0x511   : > { %v3762_v29 = vadd.f32 %v3752_v34, %v3732_v6  ;;  %v3757_v17 = vmul.f32 %v3747_v59, %v3014_v13  ;;  %v3734_v20 = vmul.f32 %v9775_v15, %v13055_v57  ;;  %v3744_v60 = vsub.f32 1.0, %v9775_v15  ;;  %5503 = vrot.lane.b32.xlu0 %v13099_v58, %s15705_s25 }
 0x512   : > { %v3763_v0 = vadd.f32 %v3753_v2, %v3733_v24  ;;  %v3758_v62 = vmul.f32 %v3748_v22, %v3015_v38  ;;  %5505 = vrot.lane.b32.xlu1 %v13102_v43, %s15705_s25  ;;  %v3016_v26 = vmul.f32 0.25, %v13075_v47  ;;  %v9665_v38 = vld [vmem:[%s15714_s5 + $0x8c] ss:$0 sps:$4 sm:$0x33]  }
 0x513   : > { %v3767_v48 = vadd.f32 %v3757_v17, %v3737_v35  ;;  %v3754_v14 = vmul.f32 %v3744_v60, %v3011_v30  ;;  %v3772_v11 = vmax.f32 %v3762_v29, 0.0 }
 0x514   : > { %v3768_v10 = vadd.f32 %v3758_v62, %v3738_v12  ;;  %v3773_v46 = vmax.f32 %v3763_v0, 0.0  ;;  %v9666_v12 = vld [vmem:[%s15714_s5 + $0x90] sm:$0xff]  }
 0x515   : > { %v9777_v27 = vpop.eup %9776  ;;  %v3777_v32 = vmax.f32 %v3767_v48, 0.0  ;;  %v3764_v56 = vadd.f32 %v3754_v14, %v3734_v20 }
 0x516   : > { %v3778_v57 = vmax.f32 %v3768_v10, 0.0  ;;  %v3739_v37 = vmul.f32 %v9777_v27, %v13077_v54  ;;  %v3749_v18 = vsub.f32 1.0, %v9777_v27  ;;  %v9667_v27 = vld [vmem:[%s15714_s5 + $0xc] sm:$0xff]  }
 0x517   : > { %v13112_v55 = vpack.c.bf16 %v3777_v32, %v3772_v11  ;;  %v3774_v47 = vmax.f32 %v3764_v56, 0.0 }
 0x518   : > { %v13114_v63 = vpack.c.bf16 %v3778_v57, %v3773_v46  ;;  %v3759_v52 = vmul.f32 %v3749_v18, %v3016_v26  ;;  %v9668_v26 = vld [vmem:[%s15714_s5 + $0x98] ss:$0 sps:$4 sm:$0x33]  }
 0x519   : > { %5507 = vrot.lane.b32.xlu0 %v13112_v55, %s15705_s25 }
 0x51a   : > { %v3769_v5 = vadd.f32 %v3759_v52, %v3739_v37  ;;  %5509 = vrot.lane.b32.xlu1 %v13114_v63, %s15705_s25  ;;  %v9669_v52 = vld [vmem:[%s15714_s5 + $0x14] ss:$0 sps:$4 sm:$0x33]  }
 0x51c   : > { %v3779_v36 = vmax.f32 %v3769_v5, 0.0 }
 0x51e   : > { %v13120_v31 = vpack.c.bf16 %v3779_v36, %v3774_v47  ;;  %5518 = vrot.lane.b32.xlu1 %v13099_v58, %s9932_s2  ;;  %s9933_s2 = smov 26  }
 0x520   : > { %5511 = vrot.lane.b32.xlu0 %v13120_v31, %s15705_s25 }
 0x522   : > { %5669 = vrot.lane.b32.xlu1 %v13102_v43, %s15706_s3 }
 0x524   : > { %5667 = vrot.lane.b32.xlu0 %v13099_v58, %s15706_s3 }
 0x526   : > { %5673 = vrot.lane.b32.xlu1 %v13114_v63, %s15706_s3 }
 0x528   : > { %5671 = vrot.lane.b32.xlu0 %v13112_v55, %s15706_s3 }
 0x52a   : > { %5682 = vrot.lane.b32.xlu1 %v13099_v58, %s15707_s4  ;;  %s15709_s4 = smov 48  }
 0x52c   : > { %5675 = vrot.lane.b32.xlu0 %v13120_v31, %s15706_s3  ;;  %s9935_s3 = smov 24  }
 0x52e   : > { %5832 = vrot.lane.b32.xlu1 %v13102_v43, %s9933_s2 }
 0x530   : > { %5830 = vrot.lane.b32.xlu0 %v13099_v58, %s9933_s2 }
 0x532   : > { %5836 = vrot.lane.b32.xlu1 %v13114_v63, %s9933_s2 }
 0x534   : > { %5834 = vrot.lane.b32.xlu0 %v13112_v55, %s9933_s2 }
 0x536   : > { %5845 = vrot.lane.b32.xlu1 %v13099_v58, %s9934_s27  ;;  %s9936_s27 = smov 110  }
 0x538   : > { %5838 = vrot.lane.b32.xlu0 %v13120_v31, %s9933_s2  ;;  %s15023_s2 = smov 122  }
 0x53a   : > { %3795 = vrot.lane.b32.xlu1 %v13102_v43, %s15708_s21 }
 0x53c   : > { %3793 = vrot.lane.b32.xlu0 %v13099_v58, %s15708_s21 }
 0x53e   : > { %5994 = vrot.lane.b32.xlu1 %v13099_v58, %s9935_s3 }
 0x540   : > { %3797 = vrot.lane.b32.xlu0 %v13112_v55, %s15708_s21 }
 0x542   : > { %5998 = vrot.lane.b32.xlu1 %v13112_v55, %s9935_s3 }
 0x544   : > { %5996 = vrot.lane.b32.xlu0 %v13102_v43, %s9935_s3 }
 0x546   : > { %3801 = vrot.lane.b32.xlu1 %v13120_v31, %s15708_s21 }
 0x548   : > { %3799 = vrot.lane.b32.xlu0 %v13114_v63, %s15708_s21 }
 0x54a   : > { %6002 = vrot.lane.b32.xlu1 %v13120_v31, %s9935_s3 }
 0x54c   : > { %6000 = vrot.lane.b32.xlu0 %v13114_v63, %s9935_s3  ;;  %s15710_s3 = smov 108  }
 0x54e   : > { %6157 = vrot.lane.b32.xlu1 %v13102_v43, %s15654_s12 }
 0x550   : > { %6009 = vrot.lane.b32.xlu0 %v13099_v58, %s15581_s13  ;;  %s9937_s13 = smov 46  }
 0x552   : > { %6161 = vrot.lane.b32.xlu1 %v13114_v63, %s15654_s12 }
 0x554   : > { %6159 = vrot.lane.b32.xlu0 %v13112_v55, %s15654_s12 }
 0x556   : > { %6169 = vrot.lane.b32.xlu1 %v13099_v58, %s15709_s4 }
 0x558   : > { %6163 = vrot.lane.b32.xlu0 %v13120_v31, %s15654_s12 }
 0x55a   : > { %4070 = vrot.lane.b32.xlu1 %v13102_v43, %s15567_s16 }
 0x55c   : > { %4068 = vrot.lane.b32.xlu0 %v13099_v58, %s15567_s16 }
 0x55e   : > { %6317 = vrot.lane.b32.xlu1 %v13102_v43, %s9936_s27 }
 0x560   : > { %4072 = vrot.lane.b32.xlu0 %v13112_v55, %s15567_s16 }
 0x562   : > { %6321 = vrot.lane.b32.xlu1 %v13114_v63, %s9936_s27 }
 0x564   : > { %6319 = vrot.lane.b32.xlu0 %v13112_v55, %s9936_s27 }
 0x566   : > { %4076 = vrot.lane.b32.xlu1 %v13120_v31, %s15567_s16 }
 0x568   : > { %4074 = vrot.lane.b32.xlu0 %v13114_v63, %s15567_s16  ;;  %s15711_s16 = smov 120  }
 0x56a   : > { %6329 = vrot.lane.b32.xlu1 %v13099_v58, %s9937_s13  ;;  %s15718_s13 = smov 80  }
 0x56c   : > { %6323 = vrot.lane.b32.xlu0 %v13120_v31, %s9936_s27  ;;  %s9939_s27 = smov 106  }
 0x56e   : > { %4229 = vrot.lane.b32.xlu1 %v13102_v43, %s15023_s2 }
 0x570   : > { %4227 = vrot.lane.b32.xlu0 %v13099_v58, %s15023_s2 }
 0x572   : > { %6478 = vrot.lane.b32.xlu1 %v13102_v43, %s15710_s3 }
 0x574   : > { %4231 = vrot.lane.b32.xlu0 %v13112_v55, %s15023_s2 }
 0x576   : > { %6482 = vrot.lane.b32.xlu1 %v13114_v63, %s15710_s3 }
 0x578   : > { %6480 = vrot.lane.b32.xlu0 %v13112_v55, %s15710_s3 }
 0x57a   : > { %4235 = vrot.lane.b32.xlu1 %v13120_v31, %s15023_s2 }
 0x57c   : > { %4233 = vrot.lane.b32.xlu0 %v13114_v63, %s15023_s2  ;;  %s15716_s2 = smov 42  }
 0x57e   : > { %6490 = vrot.lane.b32.xlu1 %v13099_v58, %s15151_s30  ;;  %s15773_s30 = smov 125  }
 0x580   : > { %6484 = vrot.lane.b32.xlu0 %v13120_v31, %s15710_s3 }
 0x582   : > { %4388 = vrot.lane.b32.xlu1 %v13102_v43, %s15711_s16 }
 0x583   : > { %v5504_v54 = vpop.permute.xlu0 %5503 }
 0x584   : > { %4386 = vrot.lane.b32.xlu0 %v13099_v58, %s15711_s16  ;;  %v5506_v23 = vpop.permute.xlu1 %5505 }
 0x585   : > { %v5514_v49 = vsel %vm15712_vm13, %v5504_v54, %v5506_v23  ;;  %vm15717_vm13 = vmmov %vm15715_vm5 }
 0x586   : > { %6638 = vrot.lane.b32.xlu1 %v13102_v43, %s9939_s27  ;;  %v5543_v1 = vsel %vm3041_vm9, %v5514_v49, 0 }
 0x588   : > { %4390 = vrot.lane.b32.xlu0 %v13112_v55, %s15711_s16 }
 0x58a   : > { %6642 = vrot.lane.b32.xlu1 %v13114_v63, %s9939_s27 }
 0x58b   : > { %v5508_v9 = vpop.permute.xlu0 %5507 }
 0x58c   : > { %6640 = vrot.lane.b32.xlu0 %v13112_v55, %s9939_s27  ;;  %v5510_v28 = vpop.permute.xlu1 %5509  ;;  %v5515_v7 = vsel %vm15713_vm12, %v5506_v23, %v5508_v9  ;;  %vm15719_vm12 = vcmask 228352  }
 0x58d   : > { %8866 = vmatprep.subr.msk.bf16.mxu1 %vm3041_vm9, %v5515_v7  ;;  %v5516_v19 = vsel %vm15715_vm5, %v5508_v9, %v5510_v28 }
 0x58e   : > { %4394 = vrot.lane.b32.xlu1 %v13120_v31, %s15711_s16  ;;  %5554 = vmatpush1.bf16.msra.mxu1 %v5543_v1  ;;  %v5549_v30 = vsel %vm3041_vm9, %v5516_v19, 0  ;;  %v3955_v1 = vsel %vm3041_vm9, %v13099_v58, 0 }
 0x590   : > { %4392 = vrot.lane.b32.xlu0 %v13114_v63, %s15711_s16  ;;  %v5519_v41 = vpop.permute.xlu1 %5518  ;;  %s9941_s16 = smov 62  }
 0x591   : > { %8867 = vmatmul.mubr.msk.bf16.vlgmr.msra.gmra.mrb[4].mxu1 %vm3037_vm11, %v9664_v42 }
 0x592   : > { %v5512_v13 = vpop.permute.xlu0 %5511  ;;  %6650 = vrot.lane.b32.xlu1 %v13099_v58, %s15716_s2  ;;  %5595 = vmatprep.mubr.bf16.mxu1 %v15701_v21  ;;  %s15025_s2 = smov 78  }
 0x593   : > { %v5517_v33 = vsel %vm15717_vm13, %v5510_v28, %v5512_v13  ;;  %vm5840_vm13 = vcmask 211968  }
 0x594   : > { %v5523_v16 = vsel %vm5520_vm6, %v5517_v33, %v5519_v41  ;;  %6644 = vrot.lane.b32.xlu0 %v13120_v31, %s9939_s27  ;;  %v5670_v50 = vpop.permute.xlu1 %5669  ;;  %vm15720_vm6 = vmmov %vm15719_vm12  ;;  %v9670_v41 = vld [vmem:[%s15714_s5 + $0x9c] sm:$0xff]   ;;  %s15734_s27 = smov 32  }
 0x595   : > { %8869 = vmatprep.subr.msk.bf16.mxu1 %vm3041_vm9, %v5523_v16  ;;  %vm15721_vm5 = vmmov %vm15720_vm6 }
 0x596   : > { %v5668_v25 = vpop.permute.xlu0 %5667  ;;  %5605 = vmatpush1.bf16.msra.mxu1 %v5549_v30  ;;  %4547 = vrot.lane.b32.xlu1 %v13102_v43, %s15718_s13 }
 0x597   : > { %v5678_v53 = vsel %vm15720_vm6, %v5668_v25, %v5670_v50  ;;  %v9672_v25 = vld [vmem:[%s15714_s5 + $0xa4] ss:$0 sps:$4 sm:$0x33]  }
 0x598   : > { %4545 = vrot.lane.b32.xlu0 %v13099_v58, %s15718_s13  ;;  %v5674_v8 = vpop.permute.xlu1 %5673  ;;  %v5706_v24 = vsel %vm3041_vm9, %v5678_v53, 0  ;;  %v9673_v53 = vld [vmem:[%s15714_s5 + $0x8] ss:$0 sps:$4 sm:$0x33]  }
 0x599   : > { %8868 = vmatmul.mubr.msk.bf16.gmra.mrb[8].mxu1 %vm3037_vm11, %v9665_v38 }
 0x59a   : > { %v5672_v39 = vpop.permute.xlu0 %5671  ;;  %6798 = vrot.lane.b32.xlu1 %v13102_v43, %s15695_s23  ;;  %5636 = vmatprep.mubr.bf16.mxu1 %v15701_v21 }
 0x59b   : > { %v5679_v44 = vsel %vm15719_vm12, %v5670_v50, %v5672_v39  ;;  %vm15724_vm12 = vcmask 1031168  }
 0x59c   : > { %4549 = vrot.lane.b32.xlu0 %v13112_v55, %s15718_s13  ;;  %8877 = vmatprep.subr.msk.bf16.mxu1 %vm3041_vm9, %v5679_v44  ;;  %v5683_v6 = vpop.permute.xlu1 %5682  ;;  %vm15725_vm6 = vmmov %vm15724_vm12 }
 0x59e   : > { %v5676_v45 = vpop.permute.xlu0 %5675  ;;  %6802 = vrot.lane.b32.xlu1 %v13114_v63, %s15695_s23 }
 0x59f   : > { %v5681_v4 = vsel %vm15721_vm5, %v5674_v8, %v5676_v45 }
 0x5a0   : > { %6800 = vrot.lane.b32.xlu0 %v13112_v55, %s15695_s23  ;;  %v13255_v3 = vpop.permute.xlu1 %5832  ;;  %v5686_v51 = vsel %vm2615_vm15, %v5681_v4, %v5683_v6  ;;  %vm15722_vm15 = vmmov %vm15721_vm5 }
 0x5a1   : > { %8870 = vmatmul.mubr.msk.bf16.vlgmr.msra.gmra.mrb[12].mxu1 %vm3037_vm11, %v9664_v42  ;;  %v5680_v22 = vsel %vm15722_vm15, %v5672_v39, %v5674_v8  ;;  %vm15727_vm5 = vmmov %vm15725_vm6  ;;  %v3961_v39 = vsel %vm3041_vm9, %v13112_v55, 0 }
 0x5a2   : > { %v5831_v61 = vpop.permute.xlu0 %5830  ;;  %5717 = vmatpush1.bf16.msra.mxu1 %v5706_v24  ;;  %4553 = vrot.lane.b32.xlu1 %v13120_v31, %s15718_s13  ;;  %v5712_v60 = vsel %vm3041_vm9, %v5680_v22, 0  ;;  %vm15728_vm15 = vmmov %vm15727_vm5  ;;  %v9674_v22 = vld [vmem:[%s15714_s5 + $0xa8] sm:$0xff]  }
 0x5a3   : > { %8880 = vmatprep.subr.msk.bf16.mxu1 %vm3041_vm9, %v5686_v51  ;;  %5646 = vmatprep.mubr.bf16.mxu1 %v15701_v21  ;;  %v5841_v5 = vsel %vm5840_vm13, %v5831_v61, %v13255_v3 }
 0x5a4   : > { %4551 = vrot.lane.b32.xlu0 %v13114_v63, %s15718_s13  ;;  %v13266_v34 = vpop.permute.xlu1 %5836  ;;  %v5870_v54 = vsel %vm3041_vm9, %v5841_v5, 0 }
 0x5a6   : > { %v13268_v35 = vpop.permute.xlu0 %5834  ;;  %6810 = vrot.lane.b32.xlu1 %v13099_v58, %s15230_s18  ;;  %s15723_s18 = smov 64  }
 0x5a7   : > { %v5842_v62 = vsel %vm5840_vm13, %v13255_v3, %v13268_v35  ;;  %v5843_v19 = vsel %vm5840_vm13, %v13268_v35, %v13266_v34 }
 0x5a8   : > { %6804 = vrot.lane.b32.xlu0 %v13120_v31, %s15695_s23  ;;  %v5846_v59 = vpop.permute.xlu1 %5845  ;;  %s15726_s23 = smov 76   ;;  %v5876_v16 = vsel %vm3041_vm9, %v5843_v19, 0 }
 0x5a9   : > { %8871 = vmatmul.mubr.msk.bf16.gmra.mrb[16].mxu1 %vm3037_vm11, %v9665_v38  ;;  %v9671_v38 = vld [vmem:[%s15714_s5] sm:$0xff]  }
 0x5aa   : > { %v5839_v15 = vpop.permute.xlu0 %5838  ;;  %4706 = vrot.lane.b32.xlu1 %v13102_v43, %s15025_s2  ;;  %5748 = vmatprep.mubr.bf16.mxu1 %v15701_v21 }
 0x5ab   : > { %v5844_v36 = vsel %vm5840_vm13, %v13266_v34, %v5839_v15  ;;  %vm15729_vm13 = vcmask 1014784  }
 0x5ac   : > { %4704 = vrot.lane.b32.xlu0 %v13099_v58, %s15025_s2  ;;  %v3796_v2 = vpop.permute.xlu1 %3795 }
 0x5ae   : > { %v13284_v29 = vpop.permute.xlu0 %3793  ;;  %6958 = vrot.lane.b32.xlu1 %v13102_v43, %s15723_s18 }
 0x5af   : > { %v13294_v20 = vsel %vm15724_vm12, %v13284_v29, %v3796_v2  ;;  %vm5847_vm12 = vcmask 736256  }
 0x5b0   : > { %4708 = vrot.lane.b32.xlu0 %v13112_v55, %s15025_s2  ;;  %v13290_v17 = vpop.permute.xlu1 %5994  ;;  %v3827_v14 = vsel %vm3041_vm9, %v13294_v20, 0  ;;  %v5850_v23 = vsel %vm5847_vm12, %v5844_v36, %v5846_v59 }
 0x5b1   : > { %8878 = vmatmul.mubr.msk.bf16.vlgmr.msra.gmra.mrb[4].mxu1 %vm3037_vm11, %v9666_v12 }
 0x5b2   : > { %v3798_v0 = vpop.permute.xlu0 %3797  ;;  %5768 = vmatpush1.bf16.msra.mxu1 %v5712_v60  ;;  %6962 = vrot.lane.b32.xlu1 %v13114_v63, %s15723_s18 }
 0x5b3   : > { %v3805_v48 = vsel %vm15725_vm6, %v3796_v2, %v3798_v0  ;;  %8888 = vmatprep.subr.msk.bf16.mxu1 %vm3041_vm9, %v5842_v62  ;;  %5758 = vmatprep.mubr.bf16.mxu1 %v15701_v21  ;;  %vm15730_vm6 = vcmask 719872  }
 0x5b4   : > { %6960 = vrot.lane.b32.xlu0 %v13112_v55, %s15723_s18  ;;  %8748 = vmatprep.subr.msk.bf16.mxu0 %vm3041_vm9, %v3805_v48  ;;  %v13311_v10 = vpop.permute.xlu1 %5998 }
 0x5b5   : > { %3839 = vmatpush1.bf16.msra.mxu0 %v3827_v14 }
 0x5b6   : > { %v13319_v11 = vpop.permute.xlu0 %5996  ;;  %4712 = vrot.lane.b32.xlu1 %v13120_v31, %s15025_s2 }
 0x5b7   : > { %v6006_v50 = vsel %vm2665_vm7, %v13319_v11, %v13311_v10  ;;  %v6005_v45 = vsel %vm2665_vm7, %v13290_v17, %v13319_v11 }
 0x5b8   : > { %4710 = vrot.lane.b32.xlu0 %v13114_v63, %s15025_s2  ;;  %8749 = vmatmul.mubr.msk.bf16.vlgmr.msra.gmra.mrb[8].mxu0 %vm3037_vm11, %v9667_v27  ;;  %v3802_v32 = vpop.permute.xlu1 %3801  ;;  %s9942_s2 = smov 74   ;;  %v6033_v51 = vsel %vm3041_vm9, %v6005_v45, 0 }
 0x5b9   : > { %8879 = vmatmul.mubr.msk.bf16.gmra.mrb[20].mxu1 %vm3037_vm11, %v9668_v26  ;;  %3880 = vmatprep.mubr.bf16.mxu0 %v15701_v21 }
 0x5ba   : > { %v3800_v56 = vpop.permute.xlu0 %3799  ;;  %4863 = vrot.lane.b32.xlu1 %v13099_v58, %s15726_s23  ;;  %5799 = vmatprep.mubr.bf16.mxu1 %v15701_v21 }
 0x5bb   : > { %v3806_v46 = vsel %vm15727_vm5, %v3798_v0, %v3800_v56  ;;  %v3807_v57 = vsel %vm15728_vm15, %v3800_v56, %v3802_v32  ;;  %vm15731_vm5 = vmmov %vm15729_vm13 }
 0x5bc   : > { %6964 = vrot.lane.b32.xlu0 %v13120_v31, %s15723_s18  ;;  %8751 = vmatprep.subr.msk.bf16.mxu0 %vm3041_vm9, %v3807_v57  ;;  %v3833_v37 = vsel %vm3041_vm9, %v3806_v46, 0  ;;  %v13337_v18 = vpop.permute.xlu1 %6002  ;;  %vm15733_vm15 = vmmov %vm15731_vm5 }
 0x5bd   : > { %3890 = vmatpush1.bf16.msra.mxu0 %v3833_v37  ;;  %vm15736_vm12 = vmmov %vm15731_vm5 }
 0x5be   : > { %v13344_v47 = vpop.permute.xlu0 %6000  ;;  %8756 = vmatprep.subr.msk.bf16.mxu0 %vm3041_vm9, %v13102_v43  ;;  %4867 = vrot.lane.b32.xlu1 %v13112_v55, %s15726_s23 }
 0x5bf   : > { %v6008_v24 = vsel %vm2665_vm7, %v13344_v47, %v13337_v18  ;;  %v6007_v17 = vsel %vm2665_vm7, %v13311_v10, %v13344_v47  ;;  %vm15735_vm7 = vcmask 916480   ;;  %v9675_v10 = vld [vmem:[%s15714_s5 + $0x18] sm:$0xff]  }
 0x5c0   : > { %4865 = vrot.lane.b32.xlu0 %v13102_v43, %s15726_s23  ;;  %8750 = vmatmul.mubr.msk.bf16.gmra.mrb[12].mxu0 %vm3037_vm11, %v9669_v52  ;;  %v13360_v9 = vpop.permute.xlu1 %6157  ;;  %v6039_v62 = vsel %vm3041_vm9, %v6007_v17, 0 }
 0x5c1   : > { %8881 = vmatmul.mubr.msk.bf16.vlgmr.msra.gmra.mrb[12].mxu1 %vm3037_vm11, %v9666_v12  ;;  %3921 = vmatprep.mubr.bf16.mxu0 %v15701_v21 }
 0x5c2   : > { %v13358_v49 = vpop.permute.xlu0 %6009  ;;  %5881 = vmatpush1.bf16.msra.mxu1 %v5870_v54  ;;  %7113 = vrot.lane.b32.xlu1 %v13112_v55, %s9941_s16 }
 0x5c3   : > { %8891 = vmatprep.subr.msk.bf16.mxu1 %vm3041_vm9, %v5850_v23  ;;  %5809 = vmatprep.mubr.bf16.mxu1 %v15701_v21  ;;  %v6013_v61 = vsel %vm15730_vm6, %v6008_v24, %v13358_v49  ;;  %vm15737_vm6 = vmmov %vm15735_vm7  ;;  %v7734_v49 = vld [vmem:[%s15738_s6 + $0x10] sm:$0xf] }
 0x5c4   : > { %7111 = vrot.lane.b32.xlu0 %v13102_v43, %s9941_s16  ;;  %v13370_v7 = vpop.permute.xlu1 %6161 }
 0x5c6   : > { %v13366_v28 = vpop.permute.xlu0 %6159  ;;  %4869 = vrot.lane.b32.xlu1 %v13114_v63, %s15726_s23 }
 0x5c7   : > { %v6167_v48 = vsel %vm15735_vm7, %v13366_v28, %v13370_v7  ;;  %v6166_v57 = vsel %vm15737_vm6, %v13360_v9, %v13366_v28  ;;  %v9678_v28 = vld [vmem:[%s15714_s5 + $0xb4] sm:$0xff]   ;;  %vm6331_vm7 = vcmask 375808  }
 0x5c8   : > { %7115 = vrot.lane.b32.xlu0 %v13114_v63, %s9941_s16  ;;  %8752 = vmatmul.mubr.msk.bf16.vlgmr.msra.gmra.mrb[16].mxu0 %vm3037_vm11, %v9667_v27  ;;  %v13392_v13 = vpop.permute.xlu1 %6169 }
 0x5c9   : > { %3967 = vmatpush1.bf16.msra.mxu0 %v3955_v1  ;;  %8882 = vmatmul.mubr.msk.bf16.gmra.mrb[24].mxu1 %vm3037_vm11, %v9668_v26  ;;  %v9676_v26 = vld [vmem:[%s15714_s5 + $0xb0] ss:$0 sps:$4 sm:$0x33]  }
 0x5ca   : > { %8759 = vmatprep.subr.msk.bf16.mxu0 %vm3041_vm9, %v13114_v63  ;;  %v13379_v42 = vpop.permute.xlu0 %6163  ;;  %7117 = vrot.lane.b32.xlu1 %v13120_v31, %s9941_s16  ;;  %s15769_s16 = smov 78  }
 0x5cb   : > { %3931 = vmatprep.mubr.bf16.mxu0 %v15701_v21  ;;  %5912 = vmatprep.mubr.bf16.mxu1 %v15701_v21 }
 0x5cc   : > { %4871 = vrot.lane.b32.xlu0 %v13120_v31, %s15726_s23  ;;  %v4071_v30 = vpop.permute.xlu1 %4070  ;;  %s9943_s23 = smov 119  }
 0x5ce   : > { %5024 = vrot.lane.b32.xlu1 %v13102_v43, %s9942_s2  ;;  %v13395_v33 = vpop.permute.xlu0 %4068 }
 0x5cf   : > { %v13466_v35 = vsel %vm15731_vm5, %v13395_v33, %v4071_v30  ;;  %vm15739_vm5 = vmmov %vm15737_vm6  ;;  %vm15740_vm6 = vcmask 359424  }
 0x5d0   : > { %5022 = vrot.lane.b32.xlu0 %v13099_v58, %s9942_s2  ;;  %8753 = vmatmul.mubr.msk.bf16.gmra.mrb[20].mxu0 %vm3037_vm11, %v9669_v52  ;;  %v13428_v6 = vpop.permute.xlu1 %6317  ;;  %v4102_v15 = vsel %vm3041_vm9, %v13466_v35, 0  ;;  %v6173_v52 = vsel %vm2668_vm10, %v13379_v42, %v13392_v13  ;;  %v6168_v1 = vsel %vm15739_vm5, %v13370_v7, %v13379_v42  ;;  %v9679_v42 = vld [vmem:[%s15714_s5 + $0x24] sm:$0xff]   ;;  %vm6646_vm5 = vcmask 867328  }
 0x5d1   : > { %8889 = vmatmul.mubr.msk.bf16.vlgmr.msra.gmra.mrb[4].mxu1 %vm3037_vm11, %v9670_v41  ;;  %3998 = vmatprep.mubr.bf16.mxu0 %v15701_v21  ;;  %v6199_v13 = vsel %vm3041_vm9, %v6168_v1, 0 }
 0x5d2   : > { %5932 = vmatpush1.bf16.msra.mxu1 %v5876_v16  ;;  %7266 = vrot.lane.b32.xlu1 %v13102_v43, %s15682_s14  ;;  %v13416_v8 = vpop.permute.xlu0 %4072 }
 0x5d3   : > { %8899 = vmatprep.subr.msk.bf16.mxu1 %vm3041_vm9, %v6006_v50  ;;  %5922 = vmatprep.mubr.bf16.mxu1 %v15701_v21  ;;  %v4080_v44 = vsel %vm15729_vm13, %v4071_v30, %v13416_v8  ;;  %vm4237_vm13 = vcmask 998400   ;;  %v9680_v30 = vld [vmem:[%s15714_s5 + $0xbc] ss:$0 sps:$4 sm:$0x33]  }
 0x5d4   : > { %5026 = vrot.lane.b32.xlu0 %v13112_v55, %s9942_s2  ;;  %v13445_v3 = vpop.permute.xlu1 %6321 }
 0x5d6   : > { %7270 = vrot.lane.b32.xlu1 %v13114_v63, %s15682_s14  ;;  %v13441_v4 = vpop.permute.xlu0 %6319 }
 0x5d8   : > { %7268 = vrot.lane.b32.xlu0 %v13112_v55, %s15682_s14  ;;  %8757 = vmatmul.mubr.msk.bf16.vlgmr.msra.gmra.mrb[8].mxu0 %vm3037_vm11, %v9671_v38  ;;  %v4077_v59 = vpop.permute.xlu1 %4076 }
 0x5d9   : > { %4018 = vmatpush1.bf16.msra.mxu0 %v3961_v39  ;;  %8890 = vmatmul.mubr.msk.bf16.gmra.mrb[28].mxu1 %vm3037_vm11, %v9672_v25 }
 0x5da   : > { %8767 = vmatprep.subr.msk.bf16.mxu0 %vm3041_vm9, %v4080_v44  ;;  %5030 = vrot.lane.b32.xlu1 %v13120_v31, %s9942_s2  ;;  %v4075_v34 = vpop.permute.xlu0 %4074  ;;  %v9681_v44 = vld [vmem:[%s15714_s5 + $0x2c] ss:$0 sps:$4 sm:$0x33]  }
 0x5db   : > { %4008 = vmatprep.mubr.bf16.mxu0 %v15701_v21  ;;  %5963 = vmatprep.mubr.bf16.mxu1 %v15701_v21  ;;  %v4082_v2 = vsel %vm15733_vm15, %v4075_v34, %v4077_v59  ;;  %v4081_v27 = vsel %vm15736_vm12, %v13416_v8, %v4075_v34  ;;  %vm6325_vm15 = vcmask 900096   ;;  %vm6486_vm12 = vcmask 883712  }
 0x5dc   : > { %5028 = vrot.lane.b32.xlu0 %v13114_v63, %s9942_s2  ;;  %v13492_v60 = vpop.permute.xlu1 %6329  ;;  %v4108_v32 = vsel %vm3041_vm9, %v4081_v27, 0  ;;  %v6327_v16 = vsel %vm6325_vm15, %v13441_v4, %v13445_v3  ;;  %v9684_v27 = vld [vmem:[%s15714_s5 + $0xc8] ss:$0 sps:$4 sm:$0x33]   ;;  %s15772_s2 = smov 122  }
 0x5de   : > { %5181 = vrot.lane.b32.xlu1 %v13099_v58, %s15681_s15  ;;  %v13477_v12 = vpop.permute.xlu0 %6323 }
 0x5df   : > { %v6328_v17 = vsel %vm6325_vm15, %v13445_v3, %v13477_v12 }
 0x5e0   : > { %7272 = vrot.lane.b32.xlu0 %v13120_v31, %s15682_s14  ;;  %8758 = vmatmul.mubr.msk.bf16.gmra.mrb[24].mxu0 %vm3037_vm11, %v9673_v53  ;;  %s15732_s14 = smov 58   ;;  %v4230_v14 = vpop.permute.xlu1 %4229 }
 0x5e1   : > { %8892 = vmatmul.mubr.msk.bf16.vlgmr.msra.gmra.mrb[12].mxu1 %vm3037_vm11, %v9670_v41  ;;  %4049 = vmatprep.mubr.bf16.mxu0 %v15701_v21 }
 0x5e2   : > { %6044 = vmatpush1.bf16.msra.mxu1 %v6033_v51  ;;  %5185 = vrot.lane.b32.xlu1 %v13112_v55, %s15681_s15  ;;  %v13496_v0 = vpop.permute.xlu0 %4227 }
 0x5e3   : > { %8902 = vmatprep.subr.msk.bf16.mxu1 %vm3041_vm9, %v6013_v61  ;;  %5973 = vmatprep.mubr.bf16.mxu1 %v15701_v21  ;;  %v13573_v47 = vsel %vm4237_vm13, %v13496_v0, %v4230_v14  ;;  %v6334_v61 = vsel %vm6331_vm7, %v13477_v12, %v13492_v60  ;;  %v9683_v12 = vld [vmem:[%s15714_s5 + $0x30] sm:$0xff]   ;;  %vm15741_vm7 = vcmask 343040  }
 0x5e4   : > { %5183 = vrot.lane.b32.xlu0 %v13102_v43, %s15681_s15  ;;  %v13532_v46 = vpop.permute.xlu1 %6478  ;;  %v4261_v54 = vsel %vm3041_vm9, %v13573_v47, 0 }
 0x5e6   : > { %7423 = vrot.lane.b32.xlu1 %v13112_v55, %s15732_s14  ;;  %v13521_v11 = vpop.permute.xlu0 %4231 }
 0x5e7   : > { %v4239_v56 = vsel %vm4237_vm13, %v4230_v14, %v13521_v11 }
 0x5e8   : > { %7421 = vrot.lane.b32.xlu0 %v13102_v43, %s15732_s14  ;;  %8760 = vmatmul.mubr.msk.bf16.vlgmr.msra.gmra.mrb[16].mxu0 %vm3037_vm11, %v9671_v38  ;;  %v13551_v18 = vpop.permute.xlu1 %6482 }
 0x5e9   : > { %4114 = vmatpush1.bf16.msra.mxu0 %v4102_v15  ;;  %8893 = vmatmul.mubr.msk.bf16.gmra.mrb[32].mxu1 %vm3037_vm11, %v9672_v25 }
 0x5ea   : > { %8770 = vmatprep.subr.msk.bf16.mxu0 %vm3041_vm9, %v4082_v2  ;;  %5187 = vrot.lane.b32.xlu1 %v13114_v63, %s15681_s15  ;;  %v13547_v37 = vpop.permute.xlu0 %6480 }
 0x5eb   : > { %4059 = vmatprep.mubr.bf16.mxu0 %v15701_v21  ;;  %6075 = vmatprep.mubr.bf16.mxu1 %v15701_v21  ;;  %v6488_v14 = vsel %vm6486_vm12, %v13547_v37, %v13551_v18 }
 0x5ec   : > { %7425 = vrot.lane.b32.xlu0 %v13114_v63, %s15732_s14  ;;  %v4236_v36 = vpop.permute.xlu1 %4235 }
 0x5ee   : > { %7427 = vrot.lane.b32.xlu1 %v13120_v31, %s15732_s14  ;;  %v4234_v5 = vpop.permute.xlu0 %4233  ;;  %s7762_s14 = sld [smem:[#allocation2]] }
 0x5ef   : > { %v4241_v23 = vsel %vm4237_vm13, %v4234_v5, %v4236_v36  ;;  %v4240_v50 = vsel %vm4237_vm13, %v13521_v11, %v4234_v5 }
 0x5f0   : > { %5189 = vrot.lane.b32.xlu0 %v13120_v31, %s15681_s15  ;;  %8761 = vmatmul.mubr.msk.bf16.gmra.mrb[28].mxu0 %vm3037_vm11, %v9673_v53  ;;  %v13597_v41 = vpop.permute.xlu1 %6490  ;;  %v4267_v25 = vsel %vm3041_vm9, %v4240_v50, 0  ;;  %v6326_v53 = vsel %vm6325_vm15, %v13428_v6, %v13441_v4  ;;  %vm4714_vm15 = vcmask 637952  }
 0x5f1   : > { %8900 = vmatmul.mubr.msk.bf16.vlgmr.msra.gmra.mrb[4].mxu1 %vm3037_vm11, %v9674_v22  ;;  %4145 = vmatprep.mubr.bf16.mxu0 %v15701_v21  ;;  %v6354_v51 = vsel %vm3041_vm9, %v6326_v53, 0 }
 0x5f2   : > { %6095 = vmatpush1.bf16.msra.mxu1 %v6039_v62  ;;  %5342 = vrot.lane.b32.xlu1 %v13102_v43, %s15734_s27  ;;  %v13586_v9 = vpop.permute.xlu0 %6484 }
 0x5f3   : > { %8910 = vmatprep.subr.msk.bf16.mxu1 %vm3041_vm9, %v6167_v48  ;;  %6085 = vmatprep.mubr.bf16.mxu1 %v15701_v21  ;;  %v6360_v48 = vsel %vm3041_vm9, %v6328_v17, 0  ;;  %v6494_v5 = vsel %vm15740_vm6, %v13586_v9, %v13597_v41  ;;  %v9690_v17 = vld [vmem:[%s15714_s5 + $0xd8] sm:$0xff]  }
 0x5f4   : > { %5340 = vrot.lane.b32.xlu0 %v13099_v58, %s15734_s27  ;;  %v4389_v7 = vpop.permute.xlu1 %4388 }
 0x5f6   : > { %7577 = vrot.lane.b32.xlu1 %v13102_v43, %s15683_s1  ;;  %v9677_v43 = vld [vmem:[%s15714_s5 + $0x20] ss:$0 sps:$4 sm:$0x33]   ;;  %v13599_v19 = vpop.permute.xlu0 %4386 }
 0x5f7   : > { %v13647_v4 = vsel %vm2675_vm0, %v13599_v19, %v4389_v7 }
 0x5f8   : > { %5344 = vrot.lane.b32.xlu0 %v13112_v55, %s15734_s27  ;;  %8768 = vmatmul.mubr.msk.bf16.vlgmr.msra.gmra.mrb[8].mxu0 %vm3037_vm11, %v9675_v10  ;;  %v13622_v39 = vpop.permute.xlu1 %6638  ;;  %v4420_v59 = vsel %vm3041_vm9, %v13647_v4, 0 }
 0x5f9   : > { %4165 = vmatpush1.bf16.msra.mxu0 %v4108_v32  ;;  %8901 = vmatmul.mubr.msk.bf16.gmra.mrb[36].mxu1 %vm3037_vm11, %v9676_v26 }
 0x5fa   : > { %8778 = vmatprep.subr.msk.bf16.mxu0 %vm3041_vm9, %v4239_v56  ;;  %7581 = vrot.lane.b32.xlu1 %v13114_v63, %s15683_s1  ;;  %v4391_v38 = vpop.permute.xlu0 %4390 }
 0x5fb   : > { %4155 = vmatprep.mubr.bf16.mxu0 %v15701_v21  ;;  %6126 = vmatprep.mubr.bf16.mxu1 %v15701_v21  ;;  %v4398_v8 = vsel %vm2675_vm0, %v4389_v7, %v4391_v38 }
 0x5fc   : > { %7579 = vrot.lane.b32.xlu0 %v13112_v55, %s15683_s1  ;;  %v6193_v55 = vsel %vm3041_vm9, %v6166_v57, 0  ;;  %v13635_v24 = vpop.permute.xlu1 %6642  ;;  %v6487_v57 = vsel %vm6486_vm12, %v13532_v46, %v13547_v37 }
 0x5fe   : > { %5348 = vrot.lane.b32.xlu1 %v13120_v31, %s15734_s27  ;;  %v13633_v45 = vpop.permute.xlu0 %6640 }
 0x600   : > { %5346 = vrot.lane.b32.xlu0 %v13114_v63, %s15734_s27  ;;  %8769 = vmatmul.mubr.msk.bf16.gmra.mrb[32].mxu0 %vm3037_vm11, %v9677_v43  ;;  %v7732_v63 = vld [vmem:[%s15738_s6] sm:$0xff]  ;;  %v4395_v34 = vpop.permute.xlu1 %4394 }
 0x601   : > { %8903 = vmatmul.mubr.msk.bf16.vlgmr.msra.gmra.mrb[12].mxu1 %vm3037_vm11, %v9674_v22  ;;  %4196 = vmatprep.mubr.bf16.mxu0 %v15701_v21  ;;  %v9682_v22 = vld [vmem:[%s15714_s5 + $0xc0] sm:$0xff]  }
 0x602   : > { %6204 = vmatpush1.bf16.msra.mxu1 %v6193_v55  ;;  %7583 = vrot.lane.b32.xlu1 %v13120_v31, %s15683_s1  ;;  %v7733_v31 = vld [vmem:[%s15738_s6 + $0x8] sm:$0xff]  ;;  %v4393_v6 = vpop.permute.xlu0 %4392  ;;  %s15774_s1 = smov 36  }
 0x603   : > { %8913 = vmatprep.subr.msk.bf16.mxu1 %vm3041_vm9, %v6173_v52  ;;  %6136 = vmatprep.mubr.bf16.mxu1 %v15701_v21  ;;  %v4400_v15 = vsel %vm2675_vm0, %v4393_v6, %v4395_v34 }
 0x604   : > { %5355 = vrot.lane.b32.xlu0 %v13099_v58, %s15666_s17  ;;  %v13665_v60 = vpop.permute.xlu1 %6650 }
 0x606   : > { %7737 = vperm.xlu1 %9549, %v7732_v63   ;;  %v13654_v2 = vpop.permute.xlu0 %6644  ;;  %v6514_v63 = vsel %vm3041_vm9, %v6487_v57, 0 }
 0x608   : > { %7742 = vperm.xlu0 %9548, %v7733_v31   ;;  %8771 = vmatmul.mubr.msk.bf16.vlgmr.msra.gmra.mrb[16].mxu0 %vm3037_vm11, %v9675_v10  ;;  %v4548_v3 = vpop.permute.xlu1 %4547  ;;  %v4399_v10 = vsel %vm2675_vm0, %v4391_v38, %v4393_v6  ;;  %v6654_v6 = vsel %vm15741_vm7, %v13654_v2, %v13665_v60  ;;  %vm15746_vm7 = vcmask 490496  }
 0x609   : > { %4273 = vmatpush1.bf16.msra.mxu0 %v4261_v54  ;;  %8904 = vmatmul.mubr.msk.bf16.gmra.mrb[40].mxu1 %vm3037_vm11, %v9676_v26  ;;  %v4426_v11 = vsel %vm3041_vm9, %v4399_v10, 0 }
 0x60a   : > { %8781 = vmatprep.subr.msk.bf16.mxu0 %vm3041_vm9, %v4241_v23  ;;  %4206 = vmatprep.mubr.bf16.mxu0 %v15701_v21  ;;  %v4546_v62 = vpop.permute.xlu0 %4545 }
 0x60b   : > { %6235 = vmatprep.mubr.bf16.mxu1 %v15701_v21  ;;  %v4556_v37 = vsel %vm2696_vm3, %v4546_v62, %v4548_v3  ;;  %v6649_v62 = vsel %vm6646_vm5, %v13635_v24, %v13654_v2  ;;  %v9691_v2 = vld [vmem:[%s15714_s5 + $0x48] sm:$0xff]  }
 0x60c   : > { %7747 = vperm.xlu0 %9548, %v7734_v49   ;;  %v13687_v56 = vpop.permute.xlu1 %6798  ;;  %v4579_v36 = vsel %vm3041_vm9, %v4556_v37, 0  ;;  %v9686_v49 = vld [vmem:[%s15714_s5 + $0xcc] sm:$0xff]   ;;  %v6680_v10 = vsel %vm3041_vm9, %v6649_v62, 0 }
 0x60e   : > { %v4550_v26 = vpop.permute.xlu0 %4549 }
 0x60f   : > { %v4557_v32 = vsel %vm2696_vm3, %v4548_v3, %v4550_v26 }
 0x610   : > { %8772 = vmatmul.mubr.msk.bf16.gmra.mrb[36].mxu0 %vm3037_vm11, %v9677_v43  ;;  %v9685_v43 = vld [vmem:[%s15714_s5 + $0x38] ss:$0 sps:$4 sm:$0x33]   ;;  %v13700_v52 = vpop.permute.xlu1 %6802 }
 0x611   : > { %8911 = vmatmul.mubr.msk.bf16.vlgmr.msra.gmra.mrb[4].mxu1 %vm3037_vm11, %v9678_v28  ;;  %4304 = vmatprep.mubr.bf16.mxu0 %v15701_v21 }
 0x612   : > { %6255 = vmatpush1.bf16.msra.mxu1 %v6199_v13  ;;  %6245 = vmatprep.mubr.bf16.mxu1 %v15701_v21  ;;  %v13698_v55 = vpop.permute.xlu0 %6800 }
 0x613   : > { %8921 = vmatprep.subr.msk.bf16.mxu1 %vm3041_vm9, %v6327_v16  ;;  %v6648_v16 = vsel %vm6646_vm5, %v13633_v45, %v13635_v24 }
 0x614   : > { %v4554_v31 = vpop.permute.xlu1 %4553 }
 0x616   : > { %v4552_v46 = vpop.permute.xlu0 %4551 }
 0x617   : > { %v4559_v54 = vsel %vm2696_vm3, %v4552_v46, %v4554_v31  ;;  %v4558_v7 = vsel %vm2696_vm3, %v4550_v26, %v4552_v46  ;;  %v6807_v31 = vsel %vm2699_vm8, %v13687_v56, %v13698_v55 }
 0x618   : > { %8779 = vmatmul.mubr.msk.bf16.vlgmr.msra.gmra.mrb[8].mxu0 %vm3037_vm11, %v9679_v42  ;;  %v13727_v1 = vpop.permute.xlu1 %6810 }
 0x619   : > { %4324 = vmatpush1.bf16.msra.mxu0 %v4267_v25  ;;  %8912 = vmatmul.mubr.msk.bf16.gmra.mrb[44].mxu1 %vm3037_vm11, %v9680_v30 }
 0x61a   : > { %8789 = vmatprep.subr.msk.bf16.mxu0 %vm3041_vm9, %v4398_v8  ;;  %4314 = vmatprep.mubr.bf16.mxu0 %v15701_v21  ;;  %v13716_v23 = vpop.permute.xlu0 %6804  ;;  %v9689_v8 = vld [vmem:[%s15714_s5 + $0x44] ss:$0 sps:$4 sm:$0x33]  }
 0x61b   : > { %6286 = vmatprep.mubr.bf16.mxu1 %v15701_v21 }
 0x61e   : > { %v4705_v41 = vpop.permute.xlu0 %4704 }
 0x620   : > { %8780 = vmatmul.mubr.msk.bf16.gmra.mrb[40].mxu0 %vm3037_vm11, %v9681_v44 }
 0x621   : > { %8914 = vmatmul.mubr.msk.bf16.vlgmr.msra.gmra.mrb[12].mxu1 %vm3037_vm11, %v9678_v28  ;;  %4355 = vmatprep.mubr.bf16.mxu0 %v15701_v21  ;;  %v6489_v28 = vsel %vm6486_vm12, %v13551_v18, %v13586_v9  ;;  %v4707_v18 = vpop.permute.xlu1 %4706  ;;  %v9687_v9 = vld [vmem:[%s15714_s5 + $0x3c] sm:$0xff]  }
 0x622   : > { %6365 = vmatpush1.bf16.msra.mxu1 %v6354_v51  ;;  %6296 = vmatprep.mubr.bf16.mxu1 %v15701_v21  ;;  %v6520_v13 = vsel %vm3041_vm9, %v6489_v28, 0  ;;  %v4709_v50 = vpop.permute.xlu0 %4708 }
 0x623   : > { %8924 = vmatprep.subr.msk.bf16.mxu1 %vm3041_vm9, %v6334_v61  ;;  %v4716_v38 = vsel %vm4714_vm15, %v4707_v18, %v4709_v50 }
 0x625   : > { %v13749_v25 = vpop.permute.xlu1 %6958 }
 0x626   : > { %v13760_v53 = vpop.permute.xlu0 %6960 }
 0x628   : > { %8782 = vmatmul.mubr.msk.bf16.vlgmr.msra.gmra.mrb[16].mxu0 %vm3037_vm11, %v9679_v42  ;;  %v9688_v42 = vld [vmem:[%s15714_s5 + $0xd4] ss:$0 sps:$4 sm:$0x33]  }
 0x629   : > { %4432 = vmatpush1.bf16.msra.mxu0 %v4420_v59  ;;  %8915 = vmatmul.mubr.msk.bf16.gmra.mrb[48].mxu1 %vm3037_vm11, %v9680_v30  ;;  %v4585_v30 = vsel %vm3041_vm9, %v4558_v7, 0  ;;  %v13762_v51 = vpop.permute.xlu1 %6962 }
 0x62a   : > { %8792 = vmatprep.subr.msk.bf16.mxu0 %vm3041_vm9, %v4400_v15  ;;  %4365 = vmatprep.mubr.bf16.mxu0 %v15701_v21 }
 0x62b   : > { %6396 = vmatprep.mubr.bf16.mxu1 %v15701_v21 }
 0x62d   : > { %v4713_v34 = vpop.permute.xlu1 %4712 }
 0x630   : > { %8783 = vmatmul.mubr.msk.bf16.gmra.mrb[44].mxu0 %vm3037_vm11, %v9681_v44  ;;  %v6647_v44 = vsel %vm6646_vm5, %v13622_v39, %v13633_v45  ;;  %v4715_v39 = vsel %vm4714_vm15, %v4705_v41, %v4707_v18  ;;  %v4711_v45 = vpop.permute.xlu0 %4710  ;;  %v6834_v41 = vsel %vm3041_vm9, %v6807_v31, 0  ;;  %vm15745_vm5 = vcmask 1031168  }
 0x631   : > { %8922 = vmatmul.mubr.msk.bf16.vlgmr.msra.gmra.mrb[4].mxu1 %vm3037_vm11, %v9682_v22  ;;  %4463 = vmatprep.mubr.bf16.mxu0 %v15701_v21  ;;  %v6674_v61 = vsel %vm3041_vm9, %v6647_v44, 0  ;;  %v4738_v59 = vsel %vm3041_vm9, %v4715_v39, 0  ;;  %v4718_v15 = vsel %vm4714_vm15, %v4711_v45, %v4713_v34  ;;  %v4717_v26 = vsel %vm4714_vm15, %v4709_v50, %v4711_v45 }
 0x632   : > { %6416 = vmatpush1.bf16.msra.mxu1 %v6360_v48  ;;  %6406 = vmatprep.mubr.bf16.mxu1 %v15701_v21 }
 0x633   : > { %8932 = vmatprep.subr.msk.bf16.mxu1 %vm3041_vm9, %v6488_v14 }
 0x634   : > { %v13791_v48 = vpop.permute.xlu0 %6964 }
 0x638   : > { %8790 = vmatmul.mubr.msk.bf16.vlgmr.msra.gmra.mrb[8].mxu0 %vm3037_vm11, %v9683_v12  ;;  %v4866_v24 = vpop.permute.xlu0 %4865 }
 0x639   : > { %4483 = vmatpush1.bf16.msra.mxu0 %v4426_v11  ;;  %8923 = vmatmul.mubr.msk.bf16.gmra.mrb[52].mxu1 %vm3037_vm11, %v9684_v27  ;;  %v9692_v11 = vld [vmem:[%s15714_s5 + $0xe0] ss:$0 sps:$4 sm:$0x33]  }
 0x63a   : > { %8800 = vmatprep.subr.msk.bf16.mxu0 %vm3041_vm9, %v4557_v32  ;;  %4473 = vmatprep.mubr.bf16.mxu0 %v15701_v21 }
 0x63b   : > { %6447 = vmatprep.mubr.bf16.mxu1 %v15701_v21 }
 0x640   : > { %8791 = vmatmul.mubr.msk.bf16.gmra.mrb[48].mxu0 %vm3037_vm11, %v9685_v43 }
 0x641   : > { %8925 = vmatmul.mubr.msk.bf16.vlgmr.msra.gmra.mrb[12].mxu1 %vm3037_vm11, %v9682_v22  ;;  %4514 = vmatprep.mubr.bf16.mxu0 %v15701_v21 }
 0x642   : > { %6525 = vmatpush1.bf16.msra.mxu1 %v6514_v63  ;;  %6457 = vmatprep.mubr.bf16.mxu1 %v15701_v21  ;;  %v13813_v63 = vpop.permute.xlu0 %7111 }
 0x643   : > { %8935 = vmatprep.subr.msk.bf16.mxu1 %vm3041_vm9, %v6494_v5  ;;  %v9693_v5 = vld [vmem:[%s15714_s5 + $0x50] ss:$0 sps:$4 sm:$0x33]  }
 0x648   : > { %8793 = vmatmul.mubr.msk.bf16.vlgmr.msra.gmra.mrb[16].mxu0 %vm3037_vm11, %v9683_v12  ;;  %v4864_v12 = vpop.permute.xlu1 %4863 }
 0x649   : > { %4591 = vmatpush1.bf16.msra.mxu0 %v4579_v36  ;;  %8926 = vmatmul.mubr.msk.bf16.gmra.mrb[56].mxu1 %vm3037_vm11, %v9684_v27  ;;  %v6808_v27 = vsel %vm2699_vm8, %v13698_v55, %v13700_v52  ;;  %v4874_v56 = vsel %vm2648_vm14, %v4864_v12, %v4866_v24 }
 0x64a   : > { %8803 = vmatprep.subr.msk.bf16.mxu0 %vm3041_vm9, %v4559_v54  ;;  %4524 = vmatprep.mubr.bf16.mxu0 %v15701_v21  ;;  %v4897_v18 = vsel %vm3041_vm9, %v4874_v56, 0 }
 0x64b   : > { %6556 = vmatprep.mubr.bf16.mxu1 %v15701_v21 }
 0x64c   : > { %v4868_v32 = vpop.permute.xlu1 %4867 }
 0x64d   : > { %v4875_v57 = vsel %vm2648_vm14, %v4866_v24, %v4868_v32 }
 0x650   : > { %8794 = vmatmul.mubr.msk.bf16.gmra.mrb[52].mxu0 %vm3037_vm11, %v9685_v43  ;;  %v4744_v43 = vsel %vm3041_vm9, %v4717_v26, 0  ;;  %v13831_v28 = vpop.permute.xlu1 %7113 }
 0x651   : > { %8933 = vmatmul.mubr.msk.bf16.vlgmr.msra.gmra.mrb[4].mxu1 %vm3037_vm11, %v9686_v49  ;;  %4622 = vmatprep.mubr.bf16.mxu0 %v15701_v21 }
 0x652   : > { %6576 = vmatpush1.bf16.msra.mxu1 %v6520_v13  ;;  %6566 = vmatprep.mubr.bf16.mxu1 %v15701_v21  ;;  %v6814_v13 = vsel %vm2033_vm4, %v13716_v23, %v13727_v1  ;;  %vm7119_vm4 = vcmask 506880  }
 0x653   : > { %8943 = vmatprep.subr.msk.bf16.mxu1 %vm3041_vm9, %v6648_v16 }
 0x654   : > { %v4870_v16 = vpop.permute.xlu1 %4869 }
 0x655   : > { %v4876_v34 = vsel %vm2648_vm14, %v4868_v32, %v4870_v16 }
 0x658   : > { %8801 = vmatmul.mubr.msk.bf16.vlgmr.msra.gmra.mrb[8].mxu0 %vm3037_vm11, %v9687_v9  ;;  %v13851_v7 = vpop.permute.xlu1 %7117 }
 0x659   : > { %4642 = vmatpush1.bf16.msra.mxu0 %v4585_v30  ;;  %8934 = vmatmul.mubr.msk.bf16.gmra.mrb[60].mxu1 %vm3037_vm11, %v9688_v42  ;;  %v6809_v30 = vsel %vm2699_vm8, %v13700_v52, %v13716_v23  ;;  %v9695_v23 = vld [vmem:[%s15714_s5 + $0x54] sm:$0xff]   ;;  %vm5032_vm8 = vcmask 605184  }
 0x65a   : > { %8811 = vmatprep.subr.msk.bf16.mxu0 %vm3041_vm9, %v4716_v38  ;;  %4632 = vmatprep.mubr.bf16.mxu0 %v15701_v21 }
 0x65b   : > { %6607 = vmatprep.mubr.bf16.mxu1 %v15701_v21 }
 0x65c   : > { %v5025_v39 = vpop.permute.xlu1 %5024 }
 0x660   : > { %8802 = vmatmul.mubr.msk.bf16.gmra.mrb[56].mxu0 %vm3037_vm11, %v9689_v8 }
 0x661   : > { %8936 = vmatmul.mubr.msk.bf16.vlgmr.msra.gmra.mrb[12].mxu1 %vm3037_vm11, %v9686_v49  ;;  %4673 = vmatprep.mubr.bf16.mxu0 %v15701_v21  ;;  %v13828_v49 = vpop.permute.xlu0 %7115 }
 0x662   : > { %6685 = vmatpush1.bf16.msra.mxu1 %v6674_v61  ;;  %6617 = vmatprep.mubr.bf16.mxu1 %v15701_v21  ;;  %v6840_v61 = vsel %vm3041_vm9, %v6809_v30, 0 }
 0x663   : > { %8946 = vmatprep.subr.msk.bf16.mxu1 %vm3041_vm9, %v6654_v6  ;;  %v6968_v6 = vsel %vm2682_vm2, %v13760_v53, %v13762_v51 }
 0x665   : > { %v4872_v55 = vpop.permute.xlu0 %4871 }
 0x668   : > { %8804 = vmatmul.mubr.msk.bf16.vlgmr.msra.gmra.mrb[16].mxu0 %vm3037_vm11, %v9687_v9  ;;  %v4877_v9 = vsel %vm2648_vm14, %v4870_v16, %v4872_v55  ;;  %v9698_v55 = vld [vmem:[%s15714_s5 + $0xf0] sm:$0xff]   ;;  %vm15742_vm14 = vcmask 588800  }
 0x669   : > { %4750 = vmatpush1.bf16.msra.mxu0 %v4738_v59  ;;  %8937 = vmatmul.mubr.msk.bf16.gmra.mrb[64].mxu1 %vm3037_vm11, %v9688_v42  ;;  %v9694_v42 = vld [vmem:[%s15714_s5 + $0xe4] sm:$0xff]   ;;  %v5023_v44 = vpop.permute.xlu0 %5022  ;;  %v9696_v59 = vld [vmem:[%s15714_s5 + $0xec] ss:$0 sps:$4 sm:$0x33]   ;;  %vm15743_vm12 = vmmov %vm15742_vm14 }
 0x66a   : > { %8814 = vmatprep.subr.msk.bf16.mxu0 %vm3041_vm9, %v4718_v15  ;;  %4683 = vmatprep.mubr.bf16.mxu0 %v15701_v21  ;;  %vm15744_vm6 = vmmov %vm15743_vm12 }
 0x66b   : > { %6716 = vmatprep.mubr.bf16.mxu1 %v15701_v21 }
 0x66c   : > { %v13781_v22 = vpop.f32.mrb[8].mxu1 }
 0x66d   : > { %v13786_v60 = vpop.f32.mrb[9].mxu1 }
 0x66e   : > { %v5601_v14 = vpop.f32.mrb[10].mxu1 }
 0x66f   : > { %v5602_v3 = vpop.f32.mrb[11].mxu1  ;;  %v4903_v14 = vsel %vm3041_vm9, %v4876_v34, 0  ;;  %v9700_v34 = vld [vmem:[%s15714_s5 + $0xf8] ss:$0 sps:$4 sm:$0x33]  }
 0x670   : > { %8805 = vmatmul.mubr.msk.bf16.gmra.mrb[60].mxu0 %vm3037_vm11, %v9689_v8  ;;  %v13885_v3 = vpop.permute.xlu1 %7266 }
 0x671   : > { %8944 = vmatmul.mubr.msk.bf16.vlgmr.msra.gmra.mrb[4].mxu1 %vm3037_vm11, %v9690_v17  ;;  %4781 = vmatprep.mubr.bf16.mxu0 %v15701_v21 }
 0x672   : > { %6736 = vmatpush1.bf16.msra.mxu1 %v6680_v10  ;;  %6726 = vmatprep.mubr.bf16.mxu1 %v15701_v21  ;;  %v9697_v10 = vld [vmem:[%s15714_s5 + $0x5c] ss:$0 sps:$4 sm:$0x33]  }
 0x673   : > { %8954 = vmatprep.subr.msk.bf16.mxu1 %vm3041_vm9, %v6808_v27 }
 0x678   : > { %8812 = vmatmul.mubr.msk.bf16.vlgmr.msra.gmra.mrb[8].mxu0 %vm3037_vm11, %v9691_v2 }
 0x679   : > { %4801 = vmatpush1.bf16.msra.mxu0 %v4744_v43  ;;  %8945 = vmatmul.mubr.msk.bf16.gmra.mrb[68].mxu1 %vm3037_vm11, %v9692_v11 }
 0x67a   : > { %8822 = vmatprep.subr.msk.bf16.mxu0 %vm3041_vm9, %v4875_v57  ;;  %4791 = vmatprep.mubr.bf16.mxu0 %v15701_v21 }
 0x67b   : > { %6767 = vmatprep.mubr.bf16.mxu1 %v15701_v21 }
 0x67c   : > { %v13821_v46 = vpop.f32.mrb[16].mxu1 }
 0x67d   : > { %v13823_v37 = vpop.f32.mrb[17].mxu1 }
 0x67e   : > { %v5652_v36 = vpop.f32.mrb[18].mxu1 }
 0x67f   : > { %v5653_v54 = vpop.f32.mrb[19].mxu1 }
 0x680   : > { %8813 = vmatmul.mubr.msk.bf16.gmra.mrb[64].mxu0 %vm3037_vm11, %v9693_v5 }
 0x681   : > { %8947 = vmatmul.mubr.msk.bf16.vlgmr.msra.gmra.mrb[12].mxu1 %vm3037_vm11, %v9690_v17  ;;  %4832 = vmatprep.mubr.bf16.mxu0 %v15701_v21  ;;  %v13881_v17 = vpop.permute.xlu0 %5026 }
 0x682   : > { %6845 = vmatpush1.bf16.msra.mxu1 %v6834_v41  ;;  %6777 = vmatprep.mubr.bf16.mxu1 %v15701_v21  ;;  %v5034_v12 = vsel %vm5032_vm8, %v5025_v39, %v13881_v17 }
 0x683   : > { %8957 = vmatprep.subr.msk.bf16.mxu1 %vm3041_vm9, %v6814_v13 }
 0x685   : > { %v13905_v43 = vpop.permute.xlu0 %7268 }
 0x688   : > { %8815 = vmatmul.mubr.msk.bf16.vlgmr.msra.gmra.mrb[16].mxu0 %vm3037_vm11, %v9691_v2  ;;  %v6967_v2 = vsel %vm2682_vm2, %v13749_v25, %v13760_v53 }
 0x689   : > { %4909 = vmatpush1.bf16.msra.mxu0 %v4897_v18  ;;  %8948 = vmatmul.mubr.msk.bf16.gmra.mrb[72].mxu1 %vm3037_vm11, %v9692_v11  ;;  %v13903_v11 = vpop.permute.xlu1 %7270  ;;  %v6989_v57 = vsel %vm3041_vm9, %v6967_v2, 0  ;;  %v5029_v54 = vpop.permute.xlu0 %5028  ;;  %v6969_v18 = vsel %vm2682_vm2, %v13762_v51, %v13791_v48 }
 0x68a   : > { %8825 = vmatprep.subr.msk.bf16.mxu0 %vm3041_vm9, %v4877_v9  ;;  %4842 = vmatprep.mubr.bf16.mxu0 %v15701_v21 }
 0x68b   : > { %6876 = vmatprep.mubr.bf16.mxu1 %v15701_v21 }
 0x68c   : > { %v13849_v1 = vpop.f32.mrb[20].mxu1 }
 0x68d   : > { %v13856_v50 = vpop.f32.mrb[21].mxu1  ;;  %v5031_v31 = vpop.permute.xlu1 %5030 }
 0x68e   : > { %v5764_v38 = vpop.f32.mrb[22].mxu1  ;;  %v5036_v56 = vsel %vm5032_vm8, %v5029_v54, %v5031_v31  ;;  %v13936_v9 = vpop.permute.xlu0 %7272 }
 0x68f   : > { %v5765_v8 = vpop.f32.mrb[23].mxu1 }
 0x690   : > { %8816 = vmatmul.mubr.msk.bf16.gmra.mrb[68].mxu0 %vm3037_vm11, %v9693_v5  ;;  %v5033_v5 = vsel %vm5032_vm8, %v5023_v44, %v5025_v39  ;;  %v6995_v8 = vsel %vm3041_vm9, %v6969_v18, 0  ;;  %v7121_v44 = vsel %vm7119_vm4, %v13831_v28, %v13828_v49 }
 0x691   : > { %8955 = vmatmul.mubr.msk.bf16.vlgmr.msra.gmra.mrb[4].mxu1 %vm3037_vm11, %v9694_v42  ;;  %4940 = vmatprep.mubr.bf16.mxu0 %v15701_v21  ;;  %v5056_v13 = vsel %vm3041_vm9, %v5033_v5, 0  ;;  %v5182_v38 = vpop.permute.xlu1 %5181 }
 0x692   : > { %6896 = vmatpush1.bf16.msra.mxu1 %v6840_v61  ;;  %6886 = vmatprep.mubr.bf16.mxu1 %v15701_v21  ;;  %v5184_v48 = vpop.permute.xlu0 %5183  ;;  %v9699_v61 = vld [vmem:[%s15714_s5 + $0x60] sm:$0xff]  }
 0x693   : > { %8965 = vmatprep.subr.msk.bf16.mxu1 %vm3041_vm9, %v6968_v6  ;;  %v13870_v52 = vpop.f32.mrb[12].mxu0 }
 0x694   : > { %v13875_v45 = vpop.f32.mrb[13].mxu0 }
 0x695   : > { %v3886_v15 = vpop.f32.mrb[14].mxu0 }
 0x696   : > { %v3887_v62 = vpop.f32.mrb[15].mxu0 }
 0x697   : > { %v13961_v62 = vpop.permute.xlu1 %5185 }
 0x698   : > { %8823 = vmatmul.mubr.msk.bf16.vlgmr.msra.gmra.mrb[8].mxu0 %vm3037_vm11, %v9695_v23 }
 0x699   : > { %4960 = vmatpush1.bf16.msra.mxu0 %v4903_v14  ;;  %8956 = vmatmul.mubr.msk.bf16.gmra.mrb[76].mxu1 %vm3037_vm11, %v9696_v59 }
 0x69a   : > { %8833 = vmatprep.subr.msk.bf16.mxu0 %vm3041_vm9, %v5034_v12  ;;  %4950 = vmatprep.mubr.bf16.mxu0 %v15701_v21  ;;  %v5193_v12 = vsel %vm15742_vm14, %v5184_v48, %v13961_v62  ;;  %vm15749_vm14 = vmmov %vm15746_vm7 }
 0x69b   : > { %6927 = vmatprep.mubr.bf16.mxu1 %v15701_v21  ;;  %v13986_v31 = vpop.permute.xlu1 %7423 }
 0x69c   : > { %v13896_v27 = vpop.f32.mrb[24].mxu1 }
 0x69d   : > { %v13898_v24 = vpop.f32.mrb[25].mxu1 }
 0x69e   : > { %v5815_v26 = vpop.f32.mrb[26].mxu1 }
 0x69f   : > { %v5816_v32 = vpop.f32.mrb[27].mxu1  ;;  %v7120_v26 = vsel %vm7119_vm4, %v13813_v63, %v13831_v28 }
 0x6a0   : > { %8824 = vmatmul.mubr.msk.bf16.gmra.mrb[72].mxu0 %vm3037_vm11, %v9697_v10 }
 0x6a1   : > { %8958 = vmatmul.mubr.msk.bf16.vlgmr.msra.gmra.mrb[12].mxu1 %vm3037_vm11, %v9694_v42  ;;  %4991 = vmatprep.mubr.bf16.mxu0 %v15701_v21 }
 0x6a2   : > { %6998 = vmatpush1.bf16.msra.mxu1 %v6989_v57  ;;  %6937 = vmatprep.mubr.bf16.mxu1 %v15701_v21 }
 0x6a3   : > { %8968 = vmatprep.subr.msk.bf16.mxu1 %vm3041_vm9, %v13099_v58  ;;  %v13914_v25 = vpop.f32.mrb[20].mxu0 }
 0x6a4   : > { %v13916_v53 = vpop.f32.mrb[21].mxu0 }
 0x6a5   : > { %v3937_v36 = vpop.f32.mrb[22].mxu0 }
 0x6a6   : > { %v3938_v41 = vpop.f32.mrb[23].mxu0  ;;  %v7145_v36 = vsel %vm3041_vm9, %v7120_v26, 0  ;;  %v9704_v26 = vld [vmem:[%s15714_s5 + $0x104] ss:$0 sps:$4 sm:$0x33]  }
 0x6a7   : > { %v5192_v41 = vsel %vm15743_vm12, %v5182_v38, %v5184_v48 }
 0x6a8   : > { %8826 = vmatmul.mubr.msk.bf16.vlgmr.msra.gmra.mrb[16].mxu0 %vm3037_vm11, %v9695_v23  ;;  %v5035_v23 = vsel %vm5032_vm8, %v13881_v17, %v5029_v54  ;;  %v13968_v17 = vpop.permute.xlu0 %7421  ;;  %vm15747_vm8 = vmmov %vm15744_vm6 }
 0x6a9   : > { %5068 = vmatpush1.bf16.msra.mxu0 %v5056_v13  ;;  %8959 = vmatmul.mubr.msk.bf16.gmra.mrb[80].mxu1 %vm3037_vm11, %v9696_v59 }
 0x6aa   : > { %8836 = vmatprep.subr.msk.bf16.mxu0 %vm3041_vm9, %v5036_v56  ;;  %5001 = vmatprep.mubr.bf16.mxu0 %v15701_v21 }
 0x6ab   : > { %7029 = vmatprep.mubr.bf16.mxu1 %v15701_v21 }
 0x6ac   : > { %v13926_v58 = vpop.f32.mrb[28].mxu1  ;;  %v13983_v5 = vpop.permute.xlu0 %7425 }
 0x6ad   : > { %v13931_v16 = vpop.f32.mrb[29].mxu1 }
 0x6ae   : > { %v5928_v42 = vpop.f32.mrb[30].mxu1 }
 0x6af   : > { %v5929_v30 = vpop.f32.mrb[31].mxu1  ;;  %v5188_v42 = vpop.permute.xlu1 %5187 }
 0x6b0   : > { %8827 = vmatmul.mubr.msk.bf16.gmra.mrb[76].mxu0 %vm3037_vm11, %v9697_v10  ;;  %v5215_v30 = vsel %vm3041_vm9, %v5192_v41, 0 }
 0x6b1   : > { %8966 = vmatmul.mubr.msk.bf16.vlgmr.msra.gmra.mrb[4].mxu1 %vm3037_vm11, %v9698_v55  ;;  %5099 = vmatprep.mubr.bf16.mxu0 %v15701_v21 }
 0x6b2   : > { %7049 = vmatpush1.bf16.msra.mxu1 %v6995_v8  ;;  %7039 = vmatprep.mubr.bf16.mxu1 %v15701_v21  ;;  %v9702_v8 = vld [vmem:[%s15714_s5 + $0xfc] sm:$0xff]  }
 0x6b3   : > { %8976 = vmatprep.subr.msk.bf16.mxu1 %vm3041_vm9, %v7121_v44  ;;  %v4010_v51 = vpop.f32.mrb[24].mxu0  ;;  %v14013_v38 = vpop.permute.xlu1 %7427 }
 0x6b4   : > { %v13951_v6 = vadd.f32 %v4010_v51, %v13870_v52  ;;  %v4012_v39 = vpop.f32.mrb[25].mxu0  ;;  %v5062_v52 = vsel %vm3041_vm9, %v5035_v23, 0 }
 0x6b5   : > { %v13959_v59 = vadd.f32 %v4012_v39, %v13875_v45  ;;  %v4014_v15 = vpop.f32.mrb[26].mxu0  ;;  %v9701_v45 = vld [vmem:[%s15714_s5 + $0x68] ss:$0 sps:$4 sm:$0x33]  }
 0x6b6   : > { %v4015_v14 = vpop.f32.mrb[27].mxu0 }
 0x6b7   : > { %v5343_v23 = vpop.permute.xlu1 %5342 }
 0x6b8   : > { %8834 = vmatmul.mubr.msk.bf16.vlgmr.msra.gmra.mrb[8].mxu0 %vm3037_vm11, %v9699_v61 }
 0x6b9   : > { %5119 = vmatpush1.bf16.msra.mxu0 %v5062_v52  ;;  %8967 = vmatmul.mubr.msk.bf16.gmra.mrb[84].mxu1 %vm3037_vm11, %v9700_v34  ;;  %v9703_v52 = vld [vmem:[%s15714_s5 + $0x6c] sm:$0xff]  }
 0x6ba   : > { %8844 = vmatprep.subr.msk.bf16.mxu0 %vm3041_vm9, %v5193_v12  ;;  %5109 = vmatprep.mubr.bf16.mxu0 %v15701_v21  ;;  %v5194_v12 = vsel %vm15747_vm8, %v13961_v62, %v5188_v42  ;;  %v9705_v62 = vld [vmem:[%s15714_s5 + $0x74] ss:$0 sps:$4 sm:$0x33]   ;;  %vm15753_vm8 = vcmask 1014784  }
 0x6bb   : > { %7080 = vmatprep.mubr.bf16.mxu1 %v15701_v21 }
 0x6bc   : > { %v13976_v10 = vpop.f32.mrb[32].mxu1 }
 0x6bd   : > { %v13978_v2 = vpop.f32.mrb[33].mxu1 }
 0x6be   : > { %v5979_v32 = vpop.f32.mrb[34].mxu1 }
 0x6bf   : > { %v5980_v57 = vpop.f32.mrb[35].mxu1 }
 0x6c0   : > { %8835 = vmatmul.mubr.msk.bf16.gmra.mrb[80].mxu0 %vm3037_vm11, %v9701_v45 }
 0x6c1   : > { %8969 = vmatmul.mubr.msk.bf16.vlgmr.msra.gmra.mrb[12].mxu1 %vm3037_vm11, %v9698_v55  ;;  %5150 = vmatprep.mubr.bf16.mxu0 %v15701_v21  ;;  %v5190_v55 = vpop.permute.xlu0 %5189 }
 0x6c2   : > { %7153 = vmatpush1.bf16.msra.mxu1 %v7145_v36  ;;  %7090 = vmatprep.mubr.bf16.mxu1 %v15701_v21 }
 0x6c3   : > { %8979 = vmatprep.subr.msk.bf16.mxu1 %vm3041_vm9, %v13294_v20  ;;  %v4061_v63 = vpop.f32.mrb[28].mxu0  ;;  %v5195_v20 = vsel %vm15744_vm6, %v5188_v42, %v5190_v55 }
 0x6c4   : > { %v13995_v28 = vadd.f32 %v4061_v63, %v13914_v25  ;;  %v4063_v54 = vpop.f32.mrb[29].mxu0  ;;  %v7122_v25 = vsel %vm7119_vm4, %v13828_v49, %v13851_v7  ;;  %v7276_v7 = vsel %vm15746_vm7, %v13905_v43, %v13903_v11  ;;  %vm15748_vm4 = vcmask 261120   ;;  %v14051_v63 = vpop.permute.xlu1 %7577 }
 0x6c5   : > { %v13999_v13 = vadd.f32 %v4063_v54, %v13916_v53  ;;  %v4065_v56 = vpop.f32.mrb[30].mxu0  ;;  %v7125_v51 = vsel %vm15745_vm5, %v7122_v25, %v13284_v29  ;;  %v5341_v48 = vpop.permute.xlu0 %5340  ;;  %vm15750_vm12 = vmmov %vm15748_vm4  ;;  %vm15752_vm5 = vcmask 785408  }
 0x6c6   : > { %v4066_v18 = vpop.f32.mrb[31].mxu0  ;;  %v7150_v49 = vsel %vm3041_vm9, %v7125_v51, 0  ;;  %v7275_v56 = vsel %vm15749_vm14, %v13885_v3, %v13905_v43  ;;  %v5351_v51 = vsel %vm15750_vm12, %v5341_v48, %v5343_v23  ;;  %vm15751_vm6 = vmmov %vm15748_vm4 }
 0x6c7   : > { %vm15755_vm14 = vmmov %vm15751_vm6 }
 0x6c8   : > { %8837 = vmatmul.mubr.msk.bf16.vlgmr.msra.gmra.mrb[16].mxu0 %vm3037_vm11, %v9699_v61  ;;  %v14069_v18 = vpop.permute.xlu1 %7581 }
 0x6c9   : > { %5227 = vmatpush1.bf16.msra.mxu0 %v5215_v30  ;;  %8970 = vmatmul.mubr.msk.bf16.gmra.mrb[88].mxu1 %vm3037_vm11, %v9700_v34  ;;  %v14031_v34 = vpop.permute.xlu0 %5344 }
 0x6ca   : > { %8847 = vmatprep.subr.msk.bf16.mxu0 %vm3041_vm9, %v5195_v20  ;;  %5160 = vmatprep.mubr.bf16.mxu0 %v15701_v21  ;;  %v5352_v36 = vsel %vm15748_vm4, %v5343_v23, %v14031_v34  ;;  %v7300_v20 = vsel %vm3041_vm9, %v7275_v56, 0  ;;  %vm15754_vm4 = vcmask 474112   ;;  %v9708_v56 = vld [vmem:[%s15714_s5 + $0x110] ss:$0 sps:$4 sm:$0x33]  }
 0x6cb   : > { %7184 = vmatprep.mubr.bf16.mxu1 %v15701_v21  ;;  %vm15756_vm12 = vmmov %vm15754_vm4 }
 0x6cc   : > { %v14011_v53 = vpop.f32.mrb[36].mxu1 }
 0x6cd   : > { %v14018_v44 = vpop.f32.mrb[37].mxu1 }
 0x6ce   : > { %v6091_v61 = vpop.f32.mrb[38].mxu1 }
 0x6cf   : > { %v6092_v39 = vpop.f32.mrb[39].mxu1  ;;  %v5349_v61 = vpop.permute.xlu1 %5348 }
 0x6d0   : > { %8838 = vmatmul.mubr.msk.bf16.gmra.mrb[84].mxu0 %vm3037_vm11, %v9701_v45 }
 0x6d1   : > { %8977 = vmatmul.mubr.msk.bf16.vlgmr.msra.gmra.mrb[4].mxu1 %vm3037_vm11, %v9702_v8  ;;  %5258 = vmatprep.mubr.bf16.mxu0 %v15701_v21 }
 0x6d2   : > { %7204 = vmatpush1.bf16.msra.mxu1 %v7150_v49  ;;  %7194 = vmatprep.mubr.bf16.mxu1 %v15701_v21 }
 0x6d3   : > { %v4157_v29 = vpop.f32.mrb[32].mxu0  ;;  %8987 = vmatprep.subr.msk.bf16.mxu1 %vm3041_vm9, %v7276_v7 }
 0x6d4   : > { %v14034_v15 = vadd.f32 %v4157_v29, %v13951_v6  ;;  %v4159_v14 = vpop.f32.mrb[33].mxu0  ;;  %v5221_v6 = vsel %vm3041_vm9, %v5194_v12, 0  ;;  %v5379_v29 = vsel %vm3041_vm9, %v5351_v51, 0 }
 0x6d5   : > { %v14042_v45 = vadd.f32 %v4159_v14, %v13959_v59  ;;  %v4161_v32 = vpop.f32.mrb[34].mxu0  ;;  %v14054_v59 = vpop.permute.xlu0 %7579 }
 0x6d6   : > { %v4162_v57 = vpop.f32.mrb[35].mxu0 }
 0x6d8   : > { %8845 = vmatmul.mubr.msk.bf16.vlgmr.msra.gmra.mrb[8].mxu0 %vm3037_vm11, %v9703_v52 }
 0x6d9   : > { %5278 = vmatpush1.bf16.msra.mxu0 %v5221_v6  ;;  %8978 = vmatmul.mubr.msk.bf16.gmra.mrb[92].mxu1 %vm3037_vm11, %v9704_v26  ;;  %v5347_v30 = vpop.permute.xlu0 %5346  ;;  %v9707_v6 = vld [vmem:[%s15714_s5 + $0x78] sm:$0xff]  }
 0x6da   : > { %8855 = vmatprep.subr.msk.bf16.mxu0 %vm3041_vm9, %v5352_v36  ;;  %5268 = vmatprep.mubr.bf16.mxu0 %v15701_v21  ;;  %v5354_v14 = vsel %vm15751_vm6, %v5347_v30, %v5349_v61  ;;  %v5353_v36 = vsel %vm15755_vm14, %v14031_v34, %v5347_v30  ;;  %v9709_v34 = vld [vmem:[%s15714_s5 + $0x80] ss:$0 sps:$4 sm:$0x33]   ;;  %v7430_v30 = vsel %vm15756_vm12, %v13968_v17, %v13986_v31  ;;  %vm15757_vm6 = vmmov %vm15754_vm4 }
 0x6db   : > { %7235 = vmatprep.mubr.bf16.mxu1 %v15701_v21  ;;  %v7456_v51 = vsel %vm3041_vm9, %v7430_v30, 0 }
 0x6dc   : > { %v14062_v54 = vpop.f32.mrb[40].mxu1 }
 0x6dd   : > { %v14064_v41 = vpop.f32.mrb[41].mxu1  ;;  %v5356_v49 = vpop.permute.xlu0 %5355 }
 0x6de   : > { %v6142_v55 = vpop.f32.mrb[42].mxu1  ;;  %v5359_v12 = vsel %vm15752_vm5, %v5354_v14, %v5356_v49  ;;  %vm15758_vm5 = vcmask 457728  }
 0x6df   : > { %v6143_v42 = vpop.f32.mrb[43].mxu1 }
 0x6e0   : > { %8846 = vmatmul.mubr.msk.bf16.gmra.mrb[88].mxu0 %vm3037_vm11, %v9705_v62 }
 0x6e1   : > { %8980 = vmatmul.mubr.msk.bf16.vlgmr.msra.gmra.mrb[12].mxu1 %vm3037_vm11, %v9702_v8  ;;  %5309 = vmatprep.mubr.bf16.mxu0 %v15701_v21 }
 0x6e2   : > { %7308 = vmatpush1.bf16.msra.mxu1 %v7300_v20  ;;  %7245 = vmatprep.mubr.bf16.mxu1 %v15701_v21  ;;  %v5385_v20 = vsel %vm3041_vm9, %v5353_v36, 0 }
 0x6e3   : > { %v4208_v25 = vpop.f32.mrb[36].mxu0  ;;  %8990 = vmatprep.subr.msk.bf16.mxu1 %vm3041_vm9, %v13466_v35  ;;  %v7277_v35 = vsel %vm15746_vm7, %v13903_v11, %v13936_v9  ;;  %v7431_v9 = vsel %vm15754_vm4, %v13986_v31, %v13983_v5  ;;  %vm15760_vm7 = vmmov %vm15758_vm5 }
 0x6e4   : > { %v4225_v3 = vadd.f32 %v4208_v25, %v13995_v28  ;;  %v4210_v43 = vpop.f32.mrb[37].mxu0  ;;  %v7280_v23 = vsel %vm15753_vm8, %v7277_v35, %v13395_v33 }
 0x6e5   : > { %v4226_v39 = vadd.f32 %v4210_v43, %v13999_v13  ;;  %v4212_v8 = vpop.f32.mrb[38].mxu0  ;;  %v9706_v13 = vld [vmem:[%s15714_s5 + $0x108] sm:$0xff]   ;;  %v7305_v11 = vsel %vm3041_vm9, %v7280_v23, 0 }
 0x6e6   : > { %v4213_v7 = vpop.f32.mrb[39].mxu0 }
 0x6e8   : > { %8848 = vmatmul.mubr.msk.bf16.vlgmr.msra.gmra.mrb[16].mxu0 %vm3037_vm11, %v9703_v52 }
 0x6e9   : > { %5390 = vmatpush1.bf16.msra.mxu0 %v5379_v29  ;;  %8981 = vmatmul.mubr.msk.bf16.gmra.mrb[96].mxu1 %vm3037_vm11, %v9704_v26  ;;  %v7432_v29 = vsel %vm15757_vm6, %v13983_v5, %v14013_v38  ;;  %v7587_v5 = vsel %vm15758_vm5, %v14054_v59, %v14069_v18 }
 0x6ea   : > { %8858 = vmatprep.subr.msk.bf16.mxu0 %vm3041_vm9, %v5359_v12  ;;  %5319 = vmatprep.mubr.bf16.mxu0 %v15701_v21 }
 0x6eb   : > { %7339 = vmatprep.mubr.bf16.mxu1 %v15701_v21 }
 0x6ec   : > { %v14092_v28 = vpop.f32.mrb[44].mxu1 }
 0x6ed   : > { %v14097_v48 = vpop.f32.mrb[45].mxu1 }
 0x6ee   : > { %v6251_v52 = vpop.f32.mrb[46].mxu1 }
 0x6ef   : > { %v6252_v26 = vpop.f32.mrb[47].mxu1 }
 0x6f0   : > { %8849 = vmatmul.mubr.msk.bf16.gmra.mrb[92].mxu0 %vm3037_vm11, %v9705_v62  ;;  %v9711_v26 = vld [vmem:[%s15714_s5 + $0x11c] ss:$0 sps:$4 sm:$0x33]  }
 0x6f1   : > { %8988 = vmatmul.mubr.msk.bf16.vlgmr.msra.gmra.mrb[4].mxu1 %vm3037_vm11, %v9706_v13  ;;  %5421 = vmatprep.mubr.bf16.mxu0 %v15701_v21 }
 0x6f2   : > { %7359 = vmatpush1.bf16.msra.mxu1 %v7305_v11  ;;  %7349 = vmatprep.mubr.bf16.mxu1 %v15701_v21 }
 0x6f3   : > { %v4316_v32 = vpop.f32.mrb[40].mxu0  ;;  %8998 = vmatprep.subr.msk.bf16.mxu1 %vm3041_vm9, %v7431_v9 }
 0x6f4   : > { %v4382_v33 = vadd.f32 %v4316_v32, %v14034_v15  ;;  %v4318_v57 = vpop.f32.mrb[41].mxu0 }
 0x6f5   : > { %v4383_v62 = vadd.f32 %v4318_v57, %v14042_v45  ;;  %v4320_v55 = vpop.f32.mrb[42].mxu0 }
 0x6f6   : > { %v4321_v42 = vpop.f32.mrb[43].mxu0 }
 0x6f8   : > { %8856 = vmatmul.mubr.msk.bf16.vlgmr.msra.gmra.mrb[8].mxu0 %vm3037_vm11, %v9707_v6 }
 0x6f9   : > { %5441 = vmatpush1.bf16.msra.mxu0 %v5385_v20  ;;  %8989 = vmatmul.mubr.msk.bf16.gmra.mrb[100].mxu1 %vm3037_vm11, %v9708_v56 }
 0x6fa   : > { %5431 = vmatprep.mubr.bf16.mxu0 %v15701_v21  ;;  %7390 = vmatprep.mubr.bf16.mxu1 %v15701_v21 }
 0x6fc   : > { %v14128_v15 = vpop.f32.mrb[48].mxu1 }
 0x6fd   : > { %v14130_v45 = vpop.f32.mrb[49].mxu1 }
 0x6fe   : > { %v6302_v25 = vpop.f32.mrb[50].mxu1 }
 0x6ff   : > { %v6303_v43 = vpop.f32.mrb[51].mxu1  ;;  %v7584_v25 = vpop.permute.xlu1 %7583 }
 0x700   : > { %8857 = vmatmul.mubr.msk.bf16.gmra.mrb[96].mxu0 %vm3037_vm11, %v9709_v34  ;;  %v9712_v43 = vld [vmem:[%s15714_s5 + $0x120] sm:$0xff]  }
 0x701   : > { %8991 = vmatmul.mubr.msk.bf16.vlgmr.msra.gmra.mrb[12].mxu1 %vm3037_vm11, %v9706_v13  ;;  %5472 = vmatprep.mubr.bf16.mxu0 %v15701_v21 }
 0x702   : > { %7464 = vmatpush1.bf16.msra.mxu1 %v7456_v51  ;;  %7400 = vmatprep.mubr.bf16.mxu1 %v15701_v21 }
 0x703   : > { %v4367_v61 = vpop.f32.mrb[44].mxu0  ;;  %9001 = vmatprep.subr.msk.bf16.mxu1 %vm3041_vm9, %v13573_v47  ;;  %v9710_v47 = vld [vmem:[%s15714_s5 + $0x114] sm:$0xff]  }
 0x704   : > { %v4384_v8 = vadd.f32 %v4367_v61, %v4225_v3  ;;  %v4369_v49 = vpop.f32.mrb[45].mxu0 }
 0x705   : > { %v4385_v17 = vadd.f32 %v4369_v49, %v4226_v39  ;;  %v4371_v31 = vpop.f32.mrb[46].mxu0  ;;  %v7436_v39 = vsel %vm4237_vm13, %v7432_v29, %v13496_v0  ;;  %vm15759_vm13 = vmmov %vm15758_vm5  ;;  %v9713_v29 = vld [vmem:[%s15714_s5 + $0x128] ss:$0 sps:$4 sm:$0x33]   ;;  %s15785_s5 = smov 27  }
 0x706   : > { %v4372_v7 = vpop.f32.mrb[47].mxu0  ;;  %v7461_v13 = vsel %vm3041_vm9, %v7436_v39, 0 }
 0x708   : > { %8859 = vmatmul.mubr.msk.bf16.vlgmr.msra.gmra.mrb[16].mxu0 %vm3037_vm11, %v9707_v6 }
 0x709   : > { %8992 = vmatmul.mubr.msk.bf16.gmra.mrb[104].mxu1 %vm3037_vm11, %v9708_v56  ;;  %5482 = vmatprep.mubr.bf16.mxu0 %v15701_v21 }
 0x70a   : > { %7495 = vmatprep.mubr.bf16.mxu1 %v15701_v21 }
 0x70c   : > { %v14149_v14 = vpop.f32.mrb[52].mxu1 }
 0x70d   : > { %v14154_v3 = vpop.f32.mrb[53].mxu1 }
 0x70e   : > { %v6412_v12 = vpop.f32.mrb[54].mxu1 }
 0x70f   : > { %v6413_v35 = vpop.f32.mrb[55].mxu1 }
 0x710   : > { %8860 = vmatmul.mubr.msk.bf16.gmra.mrb[100].mxu0 %vm3037_vm11, %v9709_v34 }
 0x711   : > { %8999 = vmatmul.mubr.msk.bf16.vlgmr.msra.gmra.mrb[4].mxu1 %vm3037_vm11, %v9710_v47 }
 0x712   : > { %7515 = vmatpush1.bf16.msra.mxu1 %v7461_v13  ;;  %7505 = vmatprep.mubr.bf16.mxu1 %v15701_v21 }
 0x713   : > { %v4475_v38 = vpop.f32.mrb[48].mxu0  ;;  %9009 = vmatprep.subr.msk.bf16.mxu1 %vm3041_vm9, %v7587_v5 }
 0x714   : > { %v4541_v23 = vadd.f32 %v4475_v38, %v4382_v33  ;;  %v4477_v0 = vpop.f32.mrb[49].mxu0  ;;  %v7586_v33 = vsel %vm15759_vm13, %v14051_v63, %v14054_v59  ;;  %v7588_v63 = vsel %vm15760_vm7, %v14069_v18, %v7584_v25  ;;  %vm8152_vm7 = vcmask 15360  }
 0x715   : > { %v4542_v52 = vadd.f32 %v4477_v0, %v4383_v62  ;;  %v4479_v11 = vpop.f32.mrb[50].mxu0  ;;  %v7611_v62 = vsel %vm3041_vm9, %v7586_v33, 0  ;;  %v7591_v51 = vsel %vm2675_vm0, %v7588_v63, %v13599_v19  ;;  %vm15770_vm0 = vcmask 1031168  }
 0x716   : > { %v4480_v9 = vpop.f32.mrb[51].mxu0  ;;  %v7616_v49 = vsel %vm3041_vm9, %v7591_v51, 0  ;;  %vm15775_vm8 = vmmov %vm15770_vm0 }
 0x717   : > { %vm15776_vm4 = vmmov %vm15770_vm0 }
 0x718   : > { %vm15777_vm14 = vmmov %vm15770_vm0 }
 0x719   : > { %9000 = vmatmul.mubr.msk.bf16.gmra.mrb[108].mxu1 %vm3037_vm11, %v9711_v26  ;;  %vm15778_vm12 = vmmov %vm15770_vm0 }
 0x71a   : > { %7546 = vmatprep.mubr.bf16.mxu1 %v15701_v21  ;;  %vm15779_vm6 = vmmov %vm15770_vm0 }
 0x71b   : > { %vm15780_vm5 = vmmov %vm15770_vm0 }
 0x71c   : > { %v14171_v32 = vpop.f32.mrb[56].mxu1  ;;  %vm15781_vm13 = vmmov %vm15770_vm0 }
 0x71d   : > { %v14173_v57 = vpop.f32.mrb[57].mxu1 }
 0x71e   : > { %v6463_v6 = vpop.f32.mrb[58].mxu1 }
 0x71f   : > { %v6464_v36 = vpop.f32.mrb[59].mxu1 }
 0x721   : > { %9002 = vmatmul.mubr.msk.bf16.vlgmr.msra.gmra.mrb[12].mxu1 %vm3037_vm11, %v9710_v47 }
 0x722   : > { %7619 = vmatpush1.bf16.msra.mxu1 %v7611_v62  ;;  %7556 = vmatprep.mubr.bf16.mxu1 %v15701_v21 }
 0x723   : > { %v4526_v56 = vpop.f32.mrb[52].mxu0  ;;  %9012 = vmatprep.subr.msk.bf16.mxu1 %vm3041_vm9, %v13647_v4  ;;  %vm15771_vm9 = vmmov %vm15770_vm0 }
 0x724   : > { %v4543_v55 = vadd.f32 %v4526_v56, %v4384_v8  ;;  %v4528_v42 = vpop.f32.mrb[53].mxu0 }
 0x725   : > { %v4544_v20 = vadd.f32 %v4528_v42, %v4385_v17  ;;  %v4530_v34 = vpop.f32.mrb[54].mxu0 }
 0x726   : > { %v4531_v30 = vpop.f32.mrb[55].mxu0 }
 0x729   : > { %9003 = vmatmul.mubr.msk.bf16.gmra.mrb[112].mxu1 %vm3037_vm11, %v9711_v26 }
 0x72a   : > { %7650 = vmatprep.mubr.bf16.mxu1 %v15701_v21 }
 0x72c   : > { %v14187_v59 = vpop.f32.mrb[60].mxu1 }
 0x72d   : > { %v14192_v4 = vpop.f32.mrb[61].mxu1 }
 0x72e   : > { %v6572_v61 = vpop.f32.mrb[62].mxu1 }
 0x72f   : > { %v6573_v8 = vpop.f32.mrb[63].mxu1 }
 0x731   : > { %9010 = vmatmul.mubr.msk.bf16.vlgmr.msra.gmra.mrb[4].mxu1 %vm3037_vm11, %v9712_v43 }
 0x732   : > { %7670 = vmatpush1.bf16.msra.mxu1 %v7616_v49  ;;  %7660 = vmatprep.mubr.bf16.mxu1 %v15701_v21 }
 0x733   : > { %v4634_v18 = vpop.f32.mrb[56].mxu0 }
 0x734   : > { %v4700_v17 = vadd.f32 %v4634_v18, %v4541_v23  ;;  %v4636_v31 = vpop.f32.mrb[57].mxu0 }
 0x735   : > { %v4701_v7 = vadd.f32 %v4636_v31, %v4542_v52  ;;  %v4638_v47 = vpop.f32.mrb[58].mxu0 }
 0x736   : > { %v4639_v39 = vpop.f32.mrb[59].mxu0 }
 0x739   : > { %9011 = vmatmul.mubr.msk.bf16.gmra.mrb[116].mxu1 %vm3037_vm11, %v9713_v29 }
 0x73a   : > { %7701 = vmatprep.mubr.bf16.mxu1 %v15701_v21 }
 0x73c   : > { %v14204_v19 = vpop.f32.mrb[64].mxu1 }
 0x73d   : > { %v14206_v12 = vpop.f32.mrb[65].mxu1 }
 0x73e   : > { %v6623_v35 = vpop.f32.mrb[66].mxu1 }
 0x73f   : > { %v6624_v13 = vpop.f32.mrb[67].mxu1 }
 0x741   : > { %9013 = vmatmul.mubr.msk.bf16.vlgmr.msra.gmra.mrb[12].mxu1 %vm3037_vm11, %v9712_v43 }
 0x742   : > { %7711 = vmatprep.mubr.bf16.mxu1 %v15701_v21 }
 0x743   : > { %v4685_v5 = vpop.f32.mrb[60].mxu0 }
 0x744   : > { %v4702_v38 = vadd.f32 %v4685_v5, %v4543_v55  ;;  %v4687_v23 = vpop.f32.mrb[61].mxu0 }
 0x745   : > { %v4703_v0 = vadd.f32 %v4687_v23, %v4544_v20  ;;  %v4689_v52 = vpop.f32.mrb[62].mxu0 }
 0x746   : > { %v4690_v26 = vpop.f32.mrb[63].mxu0 }
 0x749   : > { %9014 = vmatmul.mubr.msk.bf16.gmra.mrb[120].mxu1 %vm3037_vm11, %v9713_v29 }
 0x74c   : > { %v14211_v11 = vpop.f32.mrb[68].mxu1 }
 0x74d   : > { %v14213_v9 = vpop.f32.mrb[69].mxu1 }
 0x74e   : > { %v6732_v33 = vpop.f32.mrb[70].mxu1 }
 0x74f   : > { %v6733_v6 = vpop.f32.mrb[71].mxu1 }
 0x753   : > { %v4793_v36 = vpop.f32.mrb[64].mxu0 }
 0x754   : > { %v4859_v62 = vadd.f32 %v4793_v36, %v4700_v17  ;;  %v4795_v56 = vpop.f32.mrb[65].mxu0 }
 0x755   : > { %v4860_v42 = vadd.f32 %v4795_v56, %v4701_v7  ;;  %v4797_v34 = vpop.f32.mrb[66].mxu0 }
 0x756   : > { %v4798_v21 = vpop.f32.mrb[67].mxu0 }
 0x75c   : > { %v14215_v30 = vpop.f32.mrb[72].mxu1 }
 0x75d   : > { %v14217_v55 = vpop.f32.mrb[73].mxu1 }
 0x75e   : > { %v6783_v20 = vpop.f32.mrb[74].mxu1 }
 0x75f   : > { %v6784_v25 = vpop.f32.mrb[75].mxu1 }
 0x763   : > { %v4844_v63 = vpop.f32.mrb[68].mxu0 }
 0x764   : > { %v4861_v43 = vadd.f32 %v4844_v63, %v4702_v38  ;;  %v4846_v51 = vpop.f32.mrb[69].mxu0 }
 0x765   : > { %v4862_v61 = vadd.f32 %v4846_v51, %v4703_v0  ;;  %v4848_v8 = vpop.f32.mrb[70].mxu0 }
 0x766   : > { %v4849_v49 = vpop.f32.mrb[71].mxu0 }
 0x76c   : > { %v14219_v18 = vpop.f32.mrb[76].mxu1 }
 0x76d   : > { %v14221_v31 = vpop.f32.mrb[77].mxu1 }
 0x76e   : > { %v6892_v17 = vpop.f32.mrb[78].mxu1 }
 0x76f   : > { %v6893_v7 = vpop.f32.mrb[79].mxu1 }
 0x773   : > { %v4952_v29 = vpop.f32.mrb[72].mxu0 }
 0x774   : > { %v5018_v47 = vadd.f32 %v4952_v29, %v4859_v62  ;;  %v4954_v39 = vpop.f32.mrb[73].mxu0 }
 0x775   : > { %v5019_v35 = vadd.f32 %v4954_v39, %v4860_v42  ;;  %v4956_v13 = vpop.f32.mrb[74].mxu0 }
 0x776   : > { %v4957_v5 = vpop.f32.mrb[75].mxu0 }
 0x77c   : > { %v14223_v23 = vpop.f32.mrb[80].mxu1 }
 0x77d   : > { %v14225_v52 = vpop.f32.mrb[81].mxu1 }
 0x77e   : > { %v6943_v38 = vpop.f32.mrb[82].mxu1 }
 0x77f   : > { %v6944_v0 = vpop.f32.mrb[83].mxu1 }
 0x783   : > { %v5003_v26 = vpop.f32.mrb[76].mxu0 }
 0x784   : > { %v5020_v33 = vadd.f32 %v5003_v26, %v4861_v43  ;;  %v5005_v6 = vpop.f32.mrb[77].mxu0 }
 0x785   : > { %v5021_v36 = vadd.f32 %v5005_v6, %v4862_v61  ;;  %v5007_v56 = vpop.f32.mrb[78].mxu0 }
 0x786   : > { %v5008_v34 = vpop.f32.mrb[79].mxu0 }
 0x78c   : > { %v14227_v21 = vpop.f32.mrb[84].mxu1 }
 0x78d   : > { %v14229_v20 = vpop.f32.mrb[85].mxu1 }
 0x78e   : > { %v7045_v62 = vpop.f32.mrb[86].mxu1 }
 0x78f   : > { %v7046_v42 = vpop.f32.mrb[87].mxu1 }
 0x793   : > { %v5111_v25 = vpop.f32.mrb[80].mxu0 }
 0x794   : > { %v5177_v63 = vadd.f32 %v5111_v25, %v5018_v47  ;;  %v5113_v51 = vpop.f32.mrb[81].mxu0 }
 0x795   : > { %v5178_v8 = vadd.f32 %v5113_v51, %v5019_v35  ;;  %v5115_v49 = vpop.f32.mrb[82].mxu0 }
 0x796   : > { %v5116_v17 = vpop.f32.mrb[83].mxu0 }
 0x79c   : > { %v14231_v7 = vpop.f32.mrb[88].mxu1 }
 0x79d   : > { %v14233_v29 = vpop.f32.mrb[89].mxu1 }
 0x79e   : > { %v7096_v43 = vpop.f32.mrb[90].mxu1 }
 0x79f   : > { %v7097_v61 = vpop.f32.mrb[91].mxu1 }
 0x7a3   : > { %v5162_v39 = vpop.f32.mrb[84].mxu0 }
 0x7a4   : > { %v5179_v13 = vadd.f32 %v5162_v39, %v5020_v33  ;;  %v5164_v5 = vpop.f32.mrb[85].mxu0 }
 0x7a5   : > { %v5180_v38 = vadd.f32 %v5164_v5, %v5021_v36  ;;  %v5166_v0 = vpop.f32.mrb[86].mxu0 }
 0x7a6   : > { %v5167_v26 = vpop.f32.mrb[87].mxu0 }
 0x7ac   : > { %v14235_v6 = vpop.f32.mrb[92].mxu1 }
 0x7ad   : > { %v14237_v56 = vpop.f32.mrb[93].mxu1 }
 0x7ae   : > { %v7200_v47 = vpop.f32.mrb[94].mxu1 }
 0x7af   : > { %v7201_v35 = vpop.f32.mrb[95].mxu1 }
 0x7b3   : > { %v5270_v34 = vpop.f32.mrb[88].mxu0 }
 0x7b4   : > { %v5336_v62 = vadd.f32 %v5270_v34, %v5177_v63  ;;  %v5272_v42 = vpop.f32.mrb[89].mxu0 }
 0x7b5   : > { %v5337_v25 = vadd.f32 %v5272_v42, %v5178_v8  ;;  %v5274_v51 = vpop.f32.mrb[90].mxu0 }
 0x7b6   : > { %v5275_v49 = vpop.f32.mrb[91].mxu0 }
 0x7bc   : > { %v14239_v17 = vpop.f32.mrb[96].mxu1 }
 0x7bd   : > { %v14241_v43 = vpop.f32.mrb[97].mxu1 }
 0x7be   : > { %15761 = vst [vmem:[#allocation134_spill] sm:$0xff] %v14241_v43  ;;  %v7251_v33 = vpop.f32.mrb[98].mxu1 }
 0x7bf   : > { %v7252_v36 = vpop.f32.mrb[99].mxu1 }
 0x7c3   : > { %v5321_v61 = vpop.f32.mrb[92].mxu0 }
 0x7c4   : > { %v5338_v39 = vadd.f32 %v5321_v61, %v5179_v13  ;;  %v5323_v5 = vpop.f32.mrb[93].mxu0 }
 0x7c5   : > { %v5339_v0 = vadd.f32 %v5323_v5, %v5180_v38  ;;  %v5325_v26 = vpop.f32.mrb[94].mxu0 }
 0x7c6   : > { %v5326_v40 = vpop.f32.mrb[95].mxu0 }
 0x7cb   : > { %v14243_v47 = vpop.f32.mrb[8].mxu0 }
 0x7cc   : > { %v14245_v35 = vpop.f32.mrb[9].mxu0  ;;  %v7351_v63 = vpop.f32.mrb[100].mxu1 }
 0x7cd   : > { %15762 = vst [vmem:[#allocation44_spill] sm:$0xff] %v14245_v35  ;;  %v14247_v8 = vpop.f32.mrb[10].mxu0  ;;  %v7353_v34 = vpop.f32.mrb[101].mxu1 }
 0x7ce   : > { %15763 = vst [vmem:[#allocation52_spill] sm:$0xff] %v14247_v8  ;;  %v14249_v42 = vpop.f32.mrb[11].mxu0  ;;  %v7355_v51 = vpop.f32.mrb[102].mxu1 }
 0x7cf   : > { %15764 = vst [vmem:[#allocation84_spill] sm:$0xff] %v14249_v42  ;;  %v7356_v49 = vpop.f32.mrb[103].mxu1 }
 0x7d3   : > { %v5433_v33 = vpop.f32.mrb[96].mxu0 }
 0x7d4   : > { %v5499_v36 = vadd.f32 %v5433_v33, %v5336_v62  ;;  %v5435_v43 = vpop.f32.mrb[97].mxu0 }
 0x7d5   : > { %v5500_v13 = vadd.f32 %v5435_v43, %v5337_v25  ;;  %v5437_v61 = vpop.f32.mrb[98].mxu0 }
 0x7d6   : > { %v5663_v38 = vadd.f32 %v13781_v22, %v5499_v36  ;;  %v5438_v40 = vpop.f32.mrb[99].mxu0 }
 0x7d7   : > { %v5664_v5 = vadd.f32 %v13786_v60, %v5500_v13 }
 0x7d8   : > { %v5826_v26 = vadd.f32 %v13849_v1, %v5663_v38 }
 0x7d9   : > { %v5827_v35 = vadd.f32 %v13856_v50, %v5664_v5 }
 0x7da   : > { %v5990_v8 = vadd.f32 %v13926_v58, %v5826_v26 }
 0x7db   : > { %v5991_v42 = vadd.f32 %v13931_v16, %v5827_v35  ;;  %v14257_v51 = vpop.f32.mrb[16].mxu0 }
 0x7dc   : > { %v6153_v62 = vadd.f32 %v14011_v53, %v5990_v8  ;;  %v14260_v49 = vpop.f32.mrb[17].mxu0  ;;  %v7402_v25 = vpop.f32.mrb[104].mxu1 }
 0x7dd   : > { %v6154_v22 = vadd.f32 %v14018_v44, %v5991_v42  ;;  %v14263_v43 = vpop.f32.mrb[18].mxu0  ;;  %v7404_v60 = vpop.f32.mrb[105].mxu1 }
 0x7de   : > { %v6313_v1 = vadd.f32 %v14092_v28, %v6153_v62  ;;  %v14266_v33 = vpop.f32.mrb[19].mxu0  ;;  %v7406_v50 = vpop.f32.mrb[106].mxu1 }
 0x7df   : > { %v6314_v58 = vadd.f32 %v14097_v48, %v6154_v22  ;;  %v7407_v16 = vpop.f32.mrb[107].mxu1 }
 0x7e0   : > { %v6474_v35 = vadd.f32 %v14149_v14, %v6313_v1 }
 0x7e1   : > { %v6475_v53 = vadd.f32 %v14154_v3, %v6314_v58 }
 0x7e2   : > { %v6634_v8 = vadd.f32 %v14187_v59, %v6474_v35  ;;  %v15765_v35 = vld [vmem:[#allocation134_spill] sm:$0xff] }
 0x7e3   : > { %v6635_v36 = vadd.f32 %v14192_v4, %v6475_v53  ;;  %v5484_v44 = vpop.f32.mrb[100].mxu0 }
 0x7e4   : > { %v6794_v42 = vadd.f32 %v14211_v11, %v6634_v8  ;;  %v5501_v13 = vadd.f32 %v5484_v44, %v5338_v39  ;;  %v5486_v61 = vpop.f32.mrb[101].mxu0 }
 0x7e5   : > { %v6795_v28 = vadd.f32 %v14213_v9, %v6635_v36  ;;  %v5502_v38 = vadd.f32 %v5486_v61, %v5339_v0  ;;  %v5488_v40 = vpop.f32.mrb[102].mxu0 }
 0x7e6   : > { %v6954_v48 = vadd.f32 %v14219_v18, %v6794_v42  ;;  %v5665_v5 = vadd.f32 %v13821_v46, %v5501_v13  ;;  %v5489_v14 = vpop.f32.mrb[103].mxu0  ;;  %v7738_v13 = vpop.permute.xlu1 %7737 }
 0x7e7   : > { %v6955_v3 = vadd.f32 %v14221_v31, %v6795_v28  ;;  %v5666_v59 = vadd.f32 %v13823_v37, %v5502_v38 }
 0x7e8   : > { %v7107_v4 = vadd.f32 %v14227_v21, %v6954_v48  ;;  %v5828_v26 = vadd.f32 %v13896_v27, %v5665_v5 }
 0x7e9   : > { %v7108_v11 = vadd.f32 %v14229_v20, %v6955_v3  ;;  %v5829_v39 = vadd.f32 %v13898_v24, %v5666_v59 }
 0x7ea   : > { %v7262_v9 = vadd.f32 %v14235_v6, %v7107_v4  ;;  %v5992_v0 = vadd.f32 %v13976_v10, %v5828_v26  ;;  %v7743_v26 = vpop.permute.xlu0 %7742 }
 0x7eb   : > { %v7263_v18 = vadd.f32 %v14237_v56, %v7108_v11  ;;  %v5993_v46 = vadd.f32 %v13978_v2, %v5829_v39 }
 0x7ec   : > { %v7417_v62 = vadd.f32 %v7351_v63, %v7262_v9  ;;  %v6155_v31 = vadd.f32 %v14062_v54, %v5992_v0  ;;  %v7507_v37 = vpop.f32.mrb[108].mxu1 }
 0x7ed   : > { %v7418_v22 = vadd.f32 %v7353_v34, %v7263_v18  ;;  %v6156_v21 = vadd.f32 %v14064_v41, %v5993_v46  ;;  %v7509_v27 = vpop.f32.mrb[109].mxu1 }
 0x7ee   : > { %v6315_v20 = vadd.f32 %v14128_v15, %v6155_v31  ;;  %v7573_v1 = vadd.f32 %v7507_v37, %v7417_v62  ;;  %v7511_v24 = vpop.f32.mrb[110].mxu1 }
 0x7ef   : > { %v6316_v6 = vadd.f32 %v14130_v45, %v6156_v21  ;;  %v7574_v50 = vadd.f32 %v7509_v27, %v7418_v22  ;;  %v7512_v10 = vpop.f32.mrb[111].mxu1 }
 0x7f0   : > { %v6476_v56 = vadd.f32 %v14171_v32, %v6315_v20 }
 0x7f1   : > { %v6477_v2 = vadd.f32 %v14173_v57, %v6316_v6 }
 0x7f2   : > { %v6636_v63 = vadd.f32 %v14204_v19, %v6476_v56 }
 0x7f3   : > { %v6637_v54 = vadd.f32 %v14206_v12, %v6477_v2 }
 0x7f4   : > { %v6796_v34 = vadd.f32 %v14215_v30, %v6636_v63 }
 0x7f5   : > { %v6797_v41 = vadd.f32 %v14217_v55, %v6637_v54 }
 0x7f6   : > { %v6956_v15 = vadd.f32 %v14223_v23, %v6796_v34 }
 0x7f7   : > { %v6957_v58 = vadd.f32 %v14225_v52, %v6797_v41 }
 0x7f8   : > { %v7109_v45 = vadd.f32 %v14231_v7, %v6956_v15  ;;  %v15766_v7 = vld [vmem:[#allocation44_spill] sm:$0xff] }
 0x7f9   : > { %v7110_v16 = vadd.f32 %v14233_v29, %v6957_v58 }
 0x7fa   : > { %v7264_v32 = vadd.f32 %v14239_v17, %v7109_v45  ;;  %v15767_v17 = vld [vmem:[#allocation52_spill] sm:$0xff] }
 0x7fb   : > { %v7265_v57 = vadd.f32 %v15765_v35, %v7110_v16 }
 0x7fc   : > { %v7419_v53 = vadd.f32 %v7402_v25, %v7264_v32  ;;  %v7558_v19 = vpop.f32.mrb[112].mxu1 }
 0x7fd   : > { %v7420_v8 = vadd.f32 %v7404_v60, %v7265_v57  ;;  %v7560_v12 = vpop.f32.mrb[113].mxu1  ;;  %v15768_v60 = vld [vmem:[#allocation84_spill] sm:$0xff] }
 0x7fe   : > { %v7575_v36 = vadd.f32 %v7558_v19, %v7419_v53  ;;  %v7562_v30 = vpop.f32.mrb[114].mxu1 }
 0x7ff   : > { %v7576_v44 = vadd.f32 %v7560_v12, %v7420_v8  ;;  %v7563_v55 = vpop.f32.mrb[115].mxu1 }
 0x804   : > { %v7652_v42 = vpop.f32.mrb[4].mxu1 }
 0x805   : > { %v9132_v23 = vadd.f32 %v7652_v42, %v14243_v47  ;;  %v7654_v52 = vpop.f32.mrb[5].mxu1 }
 0x806   : > { %v9133_v61 = vadd.f32 %v7654_v52, %v15766_v7  ;;  %v7656_v29 = vpop.f32.mrb[6].mxu1 }
 0x807   : > { %v14305_v28 = vadd.f32 %v9132_v23, %v7738_v13  ;;  %v9134_v38 = vadd.f32 %v7656_v29, %v15767_v17  ;;  %v7658_v25 = vpop.f32.mrb[7].mxu1 }
 0x808   : > { %v14308_v40 = vadd.f32 %v9133_v61, %v7738_v13  ;;  %v9135_v48 = vadd.f32 %v7658_v25, %v15768_v60 }
 0x809   : > { %7775 = vrot.lane.b32.xlu1 %v14305_v28, %s15708_s21  ;;  %v14323_v11 = vadd.f32 %v9134_v38, %v7743_v26 }
 0x80a   : > { %7777 = vrot.lane.b32.xlu0 %v14308_v40, %s15708_s21  ;;  %v14325_v39 = vadd.f32 %v9135_v48, %v7743_v26 }
 0x80c   : > { %v7662_v47 = vpop.f32.mrb[116].mxu1 }
 0x80d   : > { %v7728_v5 = vadd.f32 %v7662_v47, %v7573_v1  ;;  %v7664_v14 = vpop.f32.mrb[117].mxu1  ;;  %7817 = vrot.lane.b32.xlu1 %v14305_v28, %s15718_s13 }
 0x80e   : > { %v7729_v3 = vadd.f32 %v7664_v14, %v7574_v50  ;;  %7819 = vrot.lane.b32.xlu0 %v14308_v40, %s15718_s13  ;;  %v7666_v59 = vpop.f32.mrb[118].mxu1 }
 0x80f   : > { %v7667_v4 = vpop.f32.mrb[119].mxu1 }
 0x811   : > { %7859 = vrot.lane.b32.xlu1 %v14305_v28, %s15769_s16 }
 0x812   : > { %7861 = vrot.lane.b32.xlu0 %v14308_v40, %s15769_s16 }
 0x814   : > { %v7703_v9 = vpop.f32.mrb[12].mxu1 }
 0x815   : > { %v9136_v0 = vadd.f32 %v7703_v9, %v14257_v51  ;;  %v7705_v18 = vpop.f32.mrb[13].mxu1  ;;  %7783 = vrot.lane.b32.xlu1 %v14323_v11, %s15708_s21 }
 0x816   : > { %v9137_v46 = vadd.f32 %v7705_v18, %v14260_v49  ;;  %v7707_v62 = vpop.f32.mrb[14].mxu1  ;;  %7785 = vrot.lane.b32.xlu0 %v14325_v39, %s15708_s21  ;;  %v7748_v49 = vpop.permute.xlu0 %7747 }
 0x817   : > { %v9138_v31 = vadd.f32 %v7707_v62, %v14263_v43  ;;  %v7709_v37 = vpop.f32.mrb[15].mxu1  ;;  %v14343_v1 = vadd.f32 %v7748_v49, %v7728_v5  ;;  %v14345_v24 = vadd.f32 %v9136_v0, %v7738_v13  ;;  %v14368_v56 = vadd.f32 %v7748_v49, %v7729_v3 }
 0x818   : > { %v9139_v22 = vadd.f32 %v7709_v37, %v14266_v33  ;;  %v7753_v6 = vadd.f32 %v9137_v46, %v7738_v13  ;;  %v14408_v13 = vstv %s7762_s14 }
 0x819   : > { %7825 = vrot.lane.b32.xlu1 %v14323_v11, %s15718_s13  ;;  %v14354_v50 = vadd.f32 %v9138_v31, %v7743_v26 }
 0x81a   : > { %7827 = vrot.lane.b32.xlu0 %v14325_v39, %s15718_s13  ;;  %v7757_v10 = vadd.f32 %v9139_v22, %v7743_v26 }
 0x81c   : > { %v7713_v51 = vpop.f32.mrb[120].mxu1 }
 0x81d   : > { %v7730_v21 = vadd.f32 %v7713_v51, %v7575_v36  ;;  %v7715_v27 = vpop.f32.mrb[121].mxu1  ;;  %7867 = vrot.lane.b32.xlu1 %v14323_v11, %s15769_s16 }
 0x81e   : > { %v7731_v20 = vadd.f32 %v7715_v27, %v7576_v44  ;;  %7869 = vrot.lane.b32.xlu0 %v14325_v39, %s15769_s16  ;;  %v7717_v43 = vpop.f32.mrb[122].mxu1 }
 0x81f   : > { %v7718_v33 = vpop.f32.mrb[123].mxu1  ;;  %v14381_v2 = vadd.f32 %v7748_v49, %v7730_v21 }
 0x820   : > { %v7761_v63 = vadd.f32 %v7748_v49, %v7731_v20 }
 0x821   : > { %7791 = vrot.lane.b32.xlu1 %v14343_v1, %s15708_s21 }
 0x822   : > { %7779 = vrot.lane.b32.xlu0 %v14345_v24, %s15708_s21 }
 0x825   : > { %7781 = vrot.lane.b32.xlu1 %v7753_v6, %s15708_s21 }
 0x826   : > { %7821 = vrot.lane.b32.xlu0 %v14345_v24, %s15718_s13 }
 0x829   : > { %7787 = vrot.lane.b32.xlu1 %v14354_v50, %s15708_s21 }
 0x82a   : > { %7863 = vrot.lane.b32.xlu0 %v14345_v24, %s15769_s16 }
 0x82d   : > { %7829 = vrot.lane.b32.xlu1 %v14354_v50, %s15718_s13 }
 0x82e   : > { %7823 = vrot.lane.b32.xlu0 %v7753_v6, %s15718_s13 }
 0x831   : > { %7789 = vrot.lane.b32.xlu1 %v7757_v10, %s15708_s21 }
 0x832   : > { %7865 = vrot.lane.b32.xlu0 %v7753_v6, %s15769_s16 }
 0x835   : > { %7831 = vrot.lane.b32.xlu1 %v7757_v10, %s15718_s13 }
 0x836   : > { %7871 = vrot.lane.b32.xlu0 %v14354_v50, %s15769_s16 }
 0x839   : > { %7873 = vrot.lane.b32.xlu1 %v7757_v10, %s15769_s16 }
 0x83a   : > { %7793 = vrot.lane.b32.xlu0 %v14368_v56, %s15708_s21 }
 0x83d   : > { %7833 = vrot.lane.b32.xlu1 %v14343_v1, %s15718_s13 }
 0x83e   : > { %7835 = vrot.lane.b32.xlu0 %v14368_v56, %s15718_s13 }
 0x841   : > { %7875 = vrot.lane.b32.xlu1 %v14343_v1, %s15769_s16 }
 0x842   : > { %7877 = vrot.lane.b32.xlu0 %v14368_v56, %s15769_s16 }
 0x845   : > { %7795 = vrot.lane.b32.xlu1 %v14381_v2, %s15708_s21 }
 0x846   : > { %7837 = vrot.lane.b32.xlu0 %v14381_v2, %s15718_s13 }
 0x849   : > { %7797 = vrot.lane.b32.xlu1 %v7761_v63, %s15708_s21  ;;  %s7975_s21 = ssub.f32 1.0, %s7762_s14  ;;  %s15029_s14 = smov 27  }
 0x84a   : > { %7879 = vrot.lane.b32.xlu0 %v14381_v2, %s15769_s16 }
 0x84b   : > { %v14411_v29 = vstv %s7975_s21  ;;  %s15782_s21 = smov 69  }
 0x84d   : > { %7839 = vrot.lane.b32.xlu1 %v7761_v63, %s15718_s13 }
 0x84e   : > { %7881 = vrot.lane.b32.xlu0 %v7761_v63, %s15769_s16  ;;  %s9944_s16 = smov 33  }
 0x87b   : > { %v7776_v54 = vpop.permute.xlu1 %7775 }
 0x87c   : > { %v14392_v34 = vpop.permute.xlu0 %7777 }
 0x87d   : > { %v7799_v58 = vsel %vm15770_vm0, %v7776_v54, %v14392_v34  ;;  %vm8156_vm0 = vcmask 23552  }
 0x87e   : > { %v7929_v35 = vadd.f32 %v7799_v58, %v14305_v28  ;;  %v7902_v30 = vmax.f32 %v14305_v28, %v7799_v58 }
 0x87f   : > { %v7818_v41 = vpop.permute.xlu1 %7817 }
 0x880   : > { %v14394_v15 = vpop.permute.xlu0 %7819 }
 0x881   : > { %v7841_v32 = vsel %vm2696_vm3, %v7818_v41, %v14394_v15 }
 0x882   : > { %v7938_v19 = vadd.f32 %v7929_v35, %v7841_v32 }
 0x883   : > { %v7860_v45 = vpop.permute.xlu1 %7859 }
 0x884   : > { %v14398_v16 = vpop.permute.xlu0 %7861 }
 0x885   : > { %v7884_v57 = vsel %vm4714_vm15, %v7860_v45, %v14398_v16 }
 0x886   : > { %v7911_v12 = vmax.f32 %v7841_v32, %v7884_v57  ;;  %v7947_v36 = vadd.f32 %v7938_v19, %v7884_v57 }
 0x887   : > { %v7784_v53 = vpop.permute.xlu1 %7783 }
 0x888   : > { %v7786_v8 = vpop.permute.xlu0 %7785  ;;  %v7920_v23 = vmax.f32 %v7902_v30, %v7911_v12  ;;  %v7956_v7 = vmul.f32 0.25, %v7947_v36 }
 0x889   : > { %v7802_v44 = vsel %vm15771_vm9, %v7784_v53, %v7786_v8  ;;  %vm8160_vm9 = vcmask 31744  }
 0x88a   : > { %v7932_v61 = vadd.f32 %v7802_v44, %v14323_v11  ;;  %v7966_v28 = vmul.f32 %v14408_v13, %v7920_v23  ;;  %v7977_v48 = vmul.f32 %v14411_v29, %v7956_v7  ;;  %v7905_v47 = vmax.f32 %v14323_v11, %v7802_v44 }
 0x88b   : > { %v7826_v55 = vpop.permute.xlu1 %7825 }
 0x88c   : > { %v7828_v42 = vpop.permute.xlu0 %7827  ;;  %v14417_v9 = vadd.f32 %v7977_v48, %v7966_v28 }
 0x88d   : > { %v7844_v52 = vsel %vm2696_vm3, %v7826_v55, %v7828_v42 }
 0x88e   : > { %v7941_v38 = vadd.f32 %v7932_v61, %v7844_v52  ;;  %v7995_v37 = vmax.f32 %v14417_v9, 0.0 }
 0x88f   : > { %v7868_v17 = vpop.permute.xlu1 %7867 }
 0x890   : > { %v7870_v25 = vpop.permute.xlu0 %7869 }
 0x891   : > { %v7887_v60 = vsel %vm4714_vm15, %v7868_v17, %v7870_v25 }
 0x892   : > { %v7914_v5 = vmax.f32 %v7844_v52, %v7887_v60  ;;  %v7950_v14 = vadd.f32 %v7941_v38, %v7887_v60 }
 0x893   : > { %v7792_v3 = vpop.permute.xlu1 %7791 }
 0x894   : > { %v7923_v59 = vmax.f32 %v7905_v47, %v7914_v5  ;;  %v7959_v4 = vmul.f32 0.25, %v7950_v14  ;;  %v7780_v26 = vpop.permute.xlu0 %7779 }
 0x895   : > { %v7800_v63 = vsel %vm15776_vm4, %v14392_v34, %v7780_v26  ;;  %vm8168_vm4 = vcmask 48128  }
 0x896   : > { %v7969_v0 = vmul.f32 %v14408_v13, %v7923_v59  ;;  %v7980_v18 = vmul.f32 %v14411_v29, %v7959_v4  ;;  %v7930_v57 = vadd.f32 %v7800_v63, %v14308_v40  ;;  %v7903_v23 = vmax.f32 %v14308_v40, %v7800_v63 }
 0x897   : > { %v7782_v46 = vpop.permute.xlu1 %7781 }
 0x898   : > { %v14421_v62 = vadd.f32 %v7980_v18, %v7969_v0  ;;  %v7822_v31 = vpop.permute.xlu0 %7821  ;;  %v14449_v12 = vsel %vm15778_vm12, %v7780_v26, %v7782_v46  ;;  %vm8179_vm12 = vcmask 72704  }
 0x899   : > { %v7842_v45 = vsel %vm2696_vm3, %v14394_v15, %v7822_v31  ;;  %v7931_v7 = vadd.f32 %v14449_v12, %v14345_v24 }
 0x89a   : > { %v7998_v11 = vmax.f32 %v14421_v62, 0.0  ;;  %v7939_v36 = vadd.f32 %v7930_v57, %v7842_v45 }
 0x89b   : > { %v7788_v22 = vpop.permute.xlu1 %7787 }
 0x89c   : > { %v7864_v51 = vpop.permute.xlu0 %7863  ;;  %v9555_v21 = vpack.i.bf16 %v7995_v37, %v7998_v11  ;;  %v7803_v10 = vsel %vm15775_vm8, %v7786_v8, %v7788_v22  ;;  %vm8164_vm8 = vcmask 39936  }
 0x89d   : > { %v7933_v32 = vadd.f32 %v7803_v10, %v14325_v39  ;;  %v7885_v35 = vsel %vm4714_vm15, %v14398_v16, %v7864_v51  ;;  %v7906_v61 = vmax.f32 %v14325_v39, %v7803_v10 }
 0x89e   : > { %9556 = vrot.lane.b32.xlu0 %v9555_v21, %s15772_s2  ;;  %9551 = vrot.lane.b32.xlu1 %v9555_v21, %s15773_s30  ;;  %v7912_v30 = vmax.f32 %v7842_v45, %v7885_v35  ;;  %v7948_v17 = vadd.f32 %v7939_v36, %v7885_v35 }
 0x89f   : > { %v7830_v27 = vpop.permute.xlu1 %7829 }
 0x8a0   : > { %v7824_v49 = vpop.permute.xlu0 %7823  ;;  %v7845_v41 = vsel %vm2696_vm3, %v7828_v42, %v7830_v27  ;;  %v7921_v40 = vmax.f32 %v7903_v23, %v7912_v30  ;;  %v7957_v18 = vmul.f32 0.25, %v7948_v17  ;;  %v7904_v30 = vmax.f32 %v14345_v24, %v14449_v12 }
 0x8a1   : > { %v7942_v19 = vadd.f32 %v7933_v32, %v7845_v41  ;;  %v7843_v28 = vsel %vm2696_vm3, %v7822_v31, %v7824_v49 }
 0x8a2   : > { %9566 = vrot.lane.b32.xlu0 %v9555_v21, %s15774_s1  ;;  %9561 = vrot.lane.b32.xlu1 %v9555_v21, %s9943_s23  ;;  %v7940_v46 = vadd.f32 %v7931_v7, %v7843_v28  ;;  %v7978_v32 = vmul.f32 %v14411_v29, %v7957_v18 }
 0x8a3   : > { %v7790_v20 = vpop.permute.xlu1 %7789 }
 0x8a4   : > { %v7866_v43 = vpop.permute.xlu0 %7865  ;;  %v7804_v15 = vsel %vm15779_vm6, %v7788_v22, %v7790_v20  ;;  %vm15786_vm6 = vcmask 64512  }
 0x8a5   : > { %v7934_v60 = vadd.f32 %v7804_v15, %v14354_v50  ;;  %v7886_v31 = vsel %vm4714_vm15, %v7864_v51, %v7866_v43  ;;  %v7907_v51 = vmax.f32 %v14354_v50, %v7804_v15 }
 0x8a6   : > { %9576 = vrot.lane.b32.xlu0 %v9555_v21, %s15705_s25  ;;  %9571 = vrot.lane.b32.xlu1 %v9555_v21, %s9944_s16  ;;  %v7949_v35 = vadd.f32 %v7940_v46, %v7886_v31 }
 0x8a7   : > { %v7832_v33 = vpop.permute.xlu1 %7831 }
 0x8a8   : > { %v7872_v6 = vpop.permute.xlu0 %7871  ;;  %v7846_v38 = vsel %vm2696_vm3, %v7830_v27, %v7832_v33 }
 0x8a9   : > { %v7888_v53 = vsel %vm4714_vm15, %v7870_v25, %v7872_v6  ;;  %v7943_v4 = vadd.f32 %v7934_v60, %v7846_v38 }
 0x8aa   : > { %9581 = vrot.lane.b32.xlu1 %v9555_v21, %s15029_s14  ;;  %v7915_v55 = vmax.f32 %v7845_v41, %v7888_v53  ;;  %v7951_v42 = vadd.f32 %v7942_v19, %v7888_v53  ;;  %v7967_v41 = vmul.f32 %v14408_v13, %v7921_v40  ;;  %s9948_s14 = smov 102  }
 0x8ab   : > { %v7874_v54 = vpop.permute.xlu1 %7873 }
 0x8ac   : > { %v7794_v58 = vpop.permute.xlu0 %7793  ;;  %v7889_v48 = vsel %vm4714_vm15, %v7872_v6, %v7874_v54  ;;  %v7924_v14 = vmax.f32 %v7906_v61, %v7915_v55  ;;  %v7958_v61 = vmul.f32 0.25, %v7949_v35 }
 0x8ad   : > { %v7805_v8 = vsel %vm15777_vm14, %v7792_v3, %v7794_v58  ;;  %v7960_v3 = vmul.f32 0.25, %v7951_v42  ;;  %v7916_v22 = vmax.f32 %v7846_v38, %v7889_v48  ;;  %v7952_v27 = vadd.f32 %v7943_v4, %v7889_v48 }
 0x8ae   : > { %v7935_v52 = vadd.f32 %v7805_v8, %v14343_v1  ;;  %v7908_v39 = vmax.f32 %v14343_v1, %v7805_v8  ;;  %v7970_v10 = vmul.f32 %v14408_v13, %v7924_v14  ;;  %vm8172_vm14 = vcmask 56320  }
 0x8af   : > { %v7834_v34 = vpop.permute.xlu1 %7833  ;;  %v7981_v63 = vmul.f32 %v14411_v29, %v7960_v3  ;;  %v7925_v19 = vmax.f32 %v7907_v51, %v7916_v22  ;;  %v7961_v50 = vmul.f32 0.25, %v7952_v27  ;;  %v9718_v51 = vld [vmem:[%s14766_s7 + $0x50] sm:$0xff]  }
 0x8b0   : > { %v7836_v44 = vpop.permute.xlu0 %7835 }
 0x8b1   : > { %v7847_v16 = vsel %vm2696_vm3, %v7834_v34, %v7836_v44  ;;  %v7982_v48 = vmul.f32 %v14411_v29, %v7961_v50 }
 0x8b2   : > { %v7944_v47 = vadd.f32 %v7935_v52, %v7847_v16  ;;  %v7987_v52 = vadd.f32 %v7978_v32, %v7967_v41  ;;  %v9717_v41 = vld [vmem:[%s14766_s7 + $0x8] sm:$0xff]   ;;  %v9721_v32 = vld [vmem:[%s14766_s7 + $0x18] sm:$0xff]  }
 0x8b3   : > { %v7876_v25 = vpop.permute.xlu1 %7875 }
 0x8b4   : > { %v7878_v5 = vpop.permute.xlu0 %7877 }
 0x8b5   : > { %v7890_v59 = vsel %vm4714_vm15, %v7876_v25, %v7878_v5  ;;  %v7971_v25 = vmul.f32 %v14408_v13, %v7925_v19 }
 0x8b6   : > { %v7917_v26 = vmax.f32 %v7847_v16, %v7890_v59  ;;  %v7953_v0 = vadd.f32 %v7944_v47, %v7890_v59 }
 0x8b7   : > { %v7796_v21 = vpop.permute.xlu1 %7795 }
 0x8b8   : > { %v7926_v49 = vmax.f32 %v7908_v39, %v7917_v26  ;;  %v7962_v20 = vmul.f32 0.25, %v7953_v0  ;;  %v7806_v33 = vsel %vm15780_vm5, %v7794_v58, %v7796_v21  ;;  %v7838_v6 = vpop.permute.xlu0 %7837  ;;  %v7913_v58 = vmax.f32 %v7843_v28, %v7886_v31  ;;  %vm15787_vm5 = vmmov %vm15786_vm6 }
 0x8b9   : > { %v7936_v1 = vadd.f32 %v7806_v33, %v14368_v56  ;;  %v7848_v54 = vsel %vm2696_vm3, %v7836_v44, %v7838_v6  ;;  %v7990_v44 = vadd.f32 %v7981_v63, %v7970_v10  ;;  %v7909_v42 = vmax.f32 %v14368_v56, %v7806_v33  ;;  %v9714_v63 = vld [vmem:[%s14766_s7 + $0x40] sm:$0xff]  }
 0x8ba   : > { %v7972_v43 = vmul.f32 %v14408_v13, %v7926_v49  ;;  %v7983_v45 = vmul.f32 %v14411_v29, %v7962_v20  ;;  %v7922_v7 = vmax.f32 %v7904_v30, %v7913_v58  ;;  %v7996_v26 = vmax.f32 %v7987_v52, 0.0  ;;  %9052 = vmatprep.subr.bf16.mxu0 %v9714_v63 }
 0x8bb   : > { %v7945_v57 = vadd.f32 %v7936_v1, %v7848_v54  ;;  %v7798_v53 = vpop.permute.xlu1 %7797  ;;  %v7999_v56 = vmax.f32 %v7990_v44, 0.0  ;;  %v7979_v0 = vmul.f32 %v14411_v29, %v7958_v61  ;;  %v7991_v31 = vadd.f32 %v7982_v48, %v7971_v25  ;;  %v9715_v1 = vld [vmem:[%s14766_s7] sm:$0xff]  }
 0x8bc   : > { %v7992_v8 = vadd.f32 %v7983_v45, %v7972_v43  ;;  %v7807_v34 = vsel %vm15781_vm13, %v7796_v21, %v7798_v53  ;;  %v7880_v36 = vpop.permute.xlu0 %7879  ;;  %v7968_v4 = vmul.f32 %v14408_v13, %v7922_v7  ;;  %9053 = vmatpush3.bf16.msra.mxu0 %v9715_v1  ;;  %v9719_v43 = vld [vmem:[%s14766_s7 + $0x10] sm:$0xff]   ;;  %v9720_v45 = vld [vmem:[%s14766_s7 + $0x58] sm:$0xff]   ;;  %vm8186_vm13 = vcmask 89088  }
 0x8bd   : > { %v7891_v15 = vsel %vm4714_vm15, %v7878_v5, %v7880_v36  ;;  %v7937_v17 = vadd.f32 %v7807_v34, %v14381_v2  ;;  %v7910_v40 = vmax.f32 %v14381_v2, %v7807_v34  ;;  %v9590_v21 = vpack.i.bf16 %v7996_v26, %v7999_v56 }
 0x8be   : > { %v14479_v55 = vmax.f32 %v7992_v8, 0.0  ;;  %v7918_v16 = vmax.f32 %v7848_v54, %v7891_v15  ;;  %v7954_v23 = vadd.f32 %v7945_v57, %v7891_v15  ;;  %v7988_v49 = vadd.f32 %v7979_v0, %v7968_v4  ;;  %v9716_v54 = vld [vmem:[%s14766_s7 + $0x48] sm:$0xff]  }
 0x8bf   : > { %v7840_v38 = vpop.permute.xlu1 %7839  ;;  %v8000_v33 = vmax.f32 %v7991_v31, 0.0  ;;  %9054 = vmatprep.subr.bf16.mxu0 %v9716_v54 }
 0x8c0   : > { %v7927_v28 = vmax.f32 %v7909_v42, %v7918_v16  ;;  %v7963_v24 = vmul.f32 0.25, %v7954_v23  ;;  %v7849_v12 = vsel %vm2696_vm3, %v7838_v6, %v7840_v38  ;;  %v7882_v60 = vpop.permute.xlu0 %7881  ;;  %8020 = vrot.lane.b32.xlu1 %v14479_v55, %s15772_s2  ;;  %8011 = vrot.lane.b32.xlu0 %v14479_v55, %s15773_s30  ;;  %v7997_v6 = vmax.f32 %v7988_v49, 0.0  ;;  %s15783_s2 = smov 63   ;;  %s9946_s30 = smov 66  }
 0x8c1   : > { %v7946_v47 = vadd.f32 %v7937_v17, %v7849_v12  ;;  %v7892_v5 = vsel %vm4714_vm15, %v7880_v36, %v7882_v60  ;;  %9055 = vmatpush3.bf16.msra.mxu0 %v9717_v41  ;;  %vm8148_vm15 = vcmask 7168  }
 0x8c2   : > { %v7973_v14 = vmul.f32 %v14408_v13, %v7927_v28  ;;  %v7984_v3 = vmul.f32 %v14411_v29, %v7963_v24  ;;  %v7919_v59 = vmax.f32 %v7849_v12, %v7892_v5  ;;  %v9610_v10 = vpack.i.bf16 %v7997_v6, %v8000_v33  ;;  %9056 = vmatprep.subr.bf16.mxu0 %v9718_v51 }
 0x8c3   : > { %v7955_v39 = vadd.f32 %v7946_v47, %v7892_v5 }
 0x8c4   : > { %v7993_v18 = vadd.f32 %v7984_v3, %v7973_v14  ;;  %v7928_v46 = vmax.f32 %v7910_v40, %v7919_v59  ;;  %8038 = vrot.lane.b32.xlu1 %v14479_v55, %s15774_s1  ;;  %8029 = vrot.lane.b32.xlu0 %v14479_v55, %s9943_s23  ;;  %s9947_s1 = smov 105   ;;  %s15784_s23 = smov 99  }
 0x8c5   : > { %v7964_v2 = vmul.f32 0.25, %v7955_v39  ;;  %9057 = vmatpush3.bf16.msra.mxu0 %v9719_v43 }
 0x8c6   : > { %v7974_v22 = vmul.f32 %v14408_v13, %v7928_v46  ;;  %v8002_v13 = vmax.f32 %v7993_v18, 0.0  ;;  %9058 = vmatprep.subr.bf16.mxu0 %v9720_v45 }
 0x8c7   : > { %v7985_v27 = vmul.f32 %v14411_v29, %v7964_v2 }
 0x8c8   : > { %9591 = vrot.lane.b32.xlu1 %v9590_v21, %s15782_s21  ;;  %9586 = vrot.lane.b32.xlu0 %v9590_v21, %s15681_s15 }
 0x8c9   : > { %v7994_v20 = vadd.f32 %v7985_v27, %v7974_v22  ;;  %9059 = vmatpush3.bf16.msra.mxu0 %v9721_v32 }
 0x8cb   : > { %v8003_v29 = vmax.f32 %v7994_v20, 0.0 }
 0x8cc   : > { %9601 = vrot.lane.b32.xlu1 %v9590_v21, %s15783_s2  ;;  %9596 = vrot.lane.b32.xlu0 %v9590_v21, %s9946_s30 }
 0x8d0   : > { %9611 = vrot.lane.b32.xlu1 %v9610_v10, %s9947_s1  ;;  %9606 = vrot.lane.b32.xlu0 %v9610_v10, %s15710_s3 }
 0x8d4   : > { %9621 = vrot.lane.b32.xlu1 %v9610_v10, %s15784_s23  ;;  %9616 = vrot.lane.b32.xlu0 %v9610_v10, %s9948_s14 }
 0x8d8   : > { %8056 = vrot.lane.b32.xlu1 %v14479_v55, %s15705_s25  ;;  %8047 = vrot.lane.b32.xlu0 %v14479_v55, %s9944_s16  ;;  %s376_s25 = sand.u32 1, %s9838_s20  }
 0x8dc   : > { %8065 = vrot.lane.b32.xlu0 %v14479_v55, %s15785_s5  ;;  %8077 = vrot.lane.b32.xlu1 %v8002_v13, %s15681_s15 }
 0x8e0   : > { %8086 = vrot.lane.b32.xlu0 %v8002_v13, %s15782_s21  ;;  %8095 = vrot.lane.b32.xlu1 %v8002_v13, %s9946_s30 }
 0x8e4   : > { %8104 = vrot.lane.b32.xlu0 %v8002_v13, %s15783_s2  ;;  %8116 = vrot.lane.b32.xlu1 %v8003_v29, %s15710_s3 }
 0x8e8   : > { %8125 = vrot.lane.b32.xlu0 %v8003_v29, %s9947_s1  ;;  %8134 = vrot.lane.b32.xlu1 %v8003_v29, %s9948_s14 }
 0x8ec   : > { %8143 = vrot.lane.b32.xlu0 %v8003_v29, %s15784_s23 }
 0x910   : > { %v9552_v58 = vpop.permute.xlu1 %9551  ;;  %v9557_v35 = vpop.permute.xlu0 %9556 }
 0x911   : > { %v9554_v8 = vunpack.i.h.bf16 %v9552_v58  ;;  %v9553_v34 = vunpack.i.l.bf16 %v9552_v58  ;;  %v9559_v44 = vunpack.i.h.bf16 %v9557_v35  ;;  %v9558_v50 = vunpack.i.l.bf16 %v9557_v35 }
 0x913   : > { %v8149_v16 = vsel %vm8148_vm15, %v7995_v37, %v9554_v8  ;;  %v8150_v23 = vsel %vm8148_vm15, %v7998_v11, %v9553_v34  ;;  %v9723_v34 = vld [vmem:[%s14766_s7 + $0x20] sm:$0xff]  }
 0x914   : > { %v9562_v57 = vpop.permute.xlu1 %9561  ;;  %v9567_v53 = vpop.permute.xlu0 %9566  ;;  %v8153_v38 = vsel %vm8152_vm7, %v8149_v16, %v9559_v44  ;;  %v8154_v25 = vsel %vm8152_vm7, %v8150_v23, %v9558_v50 }
 0x915   : > { %v9564_v15 = vunpack.i.h.bf16 %v9562_v57  ;;  %v9563_v42 = vunpack.i.l.bf16 %v9562_v57  ;;  %v9569_v61 = vunpack.i.h.bf16 %v9567_v53  ;;  %v9568_v17 = vunpack.i.l.bf16 %v9567_v53 }
 0x917   : > { %v8157_v9 = vsel %vm8156_vm0, %v8153_v38, %v9564_v15  ;;  %v8158_v37 = vsel %vm8156_vm0, %v8154_v25, %v9563_v42  ;;  %v9725_v38 = vld [vmem:[%s14766_s7 + $0x28] sm:$0xff]  }
 0x918   : > { %v9572_v19 = vpop.permute.xlu1 %9571  ;;  %v9577_v36 = vpop.permute.xlu0 %9576  ;;  %v8161_v56 = vsel %vm8160_vm9, %v8157_v9, %v9569_v61  ;;  %v8162_v48 = vsel %vm8160_vm9, %v8158_v37, %v9568_v17  ;;  %v9724_v17 = vld [vmem:[%s14766_s7 + $0x68] sm:$0xff]  }
 0x919   : > { %v9574_v28 = vunpack.i.h.bf16 %v9572_v19  ;;  %v9573_v24 = vunpack.i.l.bf16 %v9572_v19  ;;  %v9579_v11 = vunpack.i.h.bf16 %v9577_v36  ;;  %v9578_v60 = vunpack.i.l.bf16 %v9577_v36 }
 0x91b   : > { %v8165_v40 = vsel %vm8164_vm8, %v8161_v56, %v9574_v28  ;;  %v8166_v14 = vsel %vm8164_vm8, %v8162_v48, %v9573_v24 }
 0x91c   : > { %v9582_v30 = vpop.permute.xlu1 %9581  ;;  %v8169_v26 = vsel %vm8168_vm4, %v8165_v40, %v9579_v11  ;;  %v8170_v0 = vsel %vm8168_vm4, %v8166_v14, %v9578_v60  ;;  %v9726_v40 = vld [vmem:[%s14766_s7 + $0x70] sm:$0xff]  }
 0x91d   : > { %v9584_v47 = vunpack.i.h.bf16 %v9582_v30  ;;  %v9583_v5 = vunpack.i.l.bf16 %v9582_v30  ;;  %v9727_v14 = vld [vmem:[%s14766_s7 + $0x30] sm:$0xff]  }
 0x91f   : > { %v8173_v2 = vsel %vm8172_vm14, %v8169_v26, %v9584_v47  ;;  %v8174_v31 = vsel %vm8172_vm14, %v8170_v0, %v9583_v5 }
 0x932   : > { %v8012_v52 = vpop.permute.xlu0 %8011  ;;  %v8021_v7 = vpop.permute.xlu1 %8020 }
 0x933   : > { %v8151_v54 = vsel %vm8148_vm15, %v14479_v55, %v8012_v52  ;;  %v9722_v55 = vld [vmem:[%s14766_s7 + $0x60] sm:$0xff]   ;;  %vm15790_vm15 = vcmask 105472  }
 0x934   : > { %v8155_v53 = vsel %vm8152_vm7, %v8151_v54, %v8021_v7  ;;  %9060 = vmatprep.subr.bf16.mxu0 %v9722_v55  ;;  %vm15791_vm7 = vmmov %vm15790_vm15 }
 0x935   : > { %9061 = vmatpush3.bf16.msra.mxu0 %v9723_v34 }
 0x936   : > { %v8030_v62 = vpop.permute.xlu0 %8029  ;;  %v14552_v12 = vpop.permute.xlu1 %8038  ;;  %9062 = vmatprep.subr.bf16.mxu0 %v9724_v17 }
 0x937   : > { %v8159_v36 = vsel %vm8156_vm0, %v8155_v53, %v8030_v62  ;;  %vm15794_vm0 = vcmask 121856  }
 0x938   : > { %v8163_v25 = vsel %vm8160_vm9, %v8159_v36, %v14552_v12  ;;  %vm15796_vm9 = vcmask 64512  }
 0x939   : > { %9063 = vmatpush3.bf16.msra.mxu0 %v9725_v38 }
 0x93a   : > { %v9587_v3 = vpop.permute.xlu0 %9586  ;;  %v9592_v59 = vpop.permute.xlu1 %9591  ;;  %9064 = vmatprep.subr.bf16.mxu0 %v9726_v40 }
 0x93b   : > { %v9589_v4 = vunpack.i.h.bf16 %v9587_v3  ;;  %v9588_v39 = vunpack.i.l.bf16 %v9587_v3  ;;  %v9594_v18 = vunpack.i.h.bf16 %v9592_v59  ;;  %v9593_v46 = vunpack.i.l.bf16 %v9592_v59 }
 0x93d   : > { %v8176_v22 = vsel %vm15786_vm6, %v8173_v2, %v9589_v4  ;;  %v8177_v21 = vsel %vm15787_vm5, %v8174_v31, %v9588_v39  ;;  %vm15788_vm6 = vcmask 97280   ;;  %9065 = vmatpush3.bf16.msra.mxu0 %v9727_v14 }
 0x93e   : > { %v9597_v27 = vpop.permute.xlu0 %9596  ;;  %v9602_v49 = vpop.permute.xlu1 %9601  ;;  %v8180_v13 = vsel %vm8179_vm12, %v8176_v22, %v9594_v18  ;;  %v8181_v29 = vsel %vm8179_vm12, %v8177_v21, %v9593_v46  ;;  %vm15789_vm5 = vmmov %vm15788_vm6 }
 0x93f   : > { %v9599_v20 = vunpack.i.h.bf16 %v9597_v27  ;;  %v9598_v33 = vunpack.i.l.bf16 %v9597_v27  ;;  %v9604_v6 = vunpack.i.h.bf16 %v9602_v49  ;;  %v9603_v10 = vunpack.i.l.bf16 %v9602_v49 }
 0x941   : > { %v8183_v63 = vsel %vm3037_vm11, %v8180_v13, %v9599_v20  ;;  %v8184_v1 = vsel %vm3037_vm11, %v8181_v29, %v9598_v33 }
 0x942   : > { %v9607_v41 = vpop.permute.xlu0 %9606  ;;  %v9612_v51 = vpop.permute.xlu1 %9611  ;;  %v8187_v35 = vsel %vm8186_vm13, %v8183_v63, %v9604_v6  ;;  %v8188_v57 = vsel %vm8186_vm13, %v8184_v1, %v9603_v10  ;;  %v9728_v6 = vld [vmem:[%s14766_s7 + $0x78] sm:$0xff]  }
 0x943   : > { %v9609_v43 = vunpack.i.h.bf16 %v9607_v41  ;;  %v9608_v45 = vunpack.i.l.bf16 %v9607_v41  ;;  %v9614_v32 = vunpack.i.h.bf16 %v9612_v51  ;;  %v9613_v58 = vunpack.i.l.bf16 %v9612_v51  ;;  %v9729_v10 = vld [vmem:[%s14766_s7 + $0x38] sm:$0xff]   ;;  %9066 = vmatprep.subr.bf16.mxu0 %v9728_v6 }
 0x944   : > { %9067 = vmatpush3.bf16.msra.mxu0 %v9729_v10 }
 0x945   : > { %v8190_v19 = vsel %vm15788_vm6, %v8187_v35, %v9609_v43  ;;  %v8191_v8 = vsel %vm15789_vm5, %v8188_v57, %v9608_v45  ;;  %vm15792_vm6 = vcmask 113664   ;;  %v15797_v45 = vmov 0.0  }
 0x946   : > { %v9617_v30 = vpop.permute.xlu0 %9616  ;;  %v9622_v44 = vpop.permute.xlu1 %9621  ;;  %v8193_v23 = vsel %vm15790_vm15, %v8190_v19, %v9614_v32  ;;  %v8194_v52 = vsel %vm15791_vm7, %v8191_v8, %v9613_v58  ;;  %vm15793_vm5 = vmmov %vm15792_vm6  ;;  %9108 = vmatprep.subr.bf16.mxu0 %v15797_v45 }
 0x947   : > { %v9619_v50 = vunpack.i.h.bf16 %v9617_v30  ;;  %v9618_v15 = vunpack.i.l.bf16 %v9617_v30  ;;  %v9624_v42 = vunpack.i.h.bf16 %v9622_v44  ;;  %v9623_v16 = vunpack.i.l.bf16 %v9622_v44  ;;  %vm15795_vm15 = vmmov %vm15794_vm0 }
 0x949   : > { %v8196_v7 = vsel %vm15792_vm6, %v8193_v23, %v9619_v50  ;;  %v8197_v61 = vsel %vm15793_vm5, %v8194_v52, %v9618_v15 }
 0x94a   : > { %v8048_v28 = vpop.permute.xlu0 %8047  ;;  %v8057_v24 = vpop.permute.xlu1 %8056  ;;  %v14595_v9 = vsel %vm15794_vm0, %v8196_v7, %v9624_v42  ;;  %v14598_v37 = vsel %vm15795_vm15, %v8197_v61, %v9623_v16  ;;  %vm15808_vm15 = vcmask 916480  }
 0x94b   : > { %v8167_v62 = vsel %vm8164_vm8, %v8163_v25, %v8048_v28  ;;  %v8207_v11 = vrot.slane %v14595_v9, 2  ;;  %v8236_v60 = vrot.slane %v14598_v37, 2  ;;  %v8203_v56 = vrot.slane %v14595_v9, 1 }
 0x94c   : > { %v8232_v48 = vrot.slane %v14598_v37, 1  ;;  %v8215_v47 = vrot.slane %v14595_v9, 4  ;;  %v8244_v5 = vrot.slane %v14598_v37, 4  ;;  %v8171_v3 = vsel %vm8168_vm4, %v8167_v62, %v8057_v24  ;;  %vm15800_vm4 = vmmov %vm15793_vm5 }
 0x94d   : > { %v9630_v12 = vpack.i.bf16 %v8207_v11, %v8236_v60  ;;  %v8211_v26 = vrot.slane %v14595_v9, 3  ;;  %v8240_v0 = vrot.slane %v14598_v37, 3  ;;  %v8223_v2 = vrot.slane %v14595_v9, 6 }
 0x94e   : > { %v8066_v59 = vpop.permute.xlu0 %8065  ;;  %v8078_v4 = vpop.permute.xlu1 %8077  ;;  %v9625_v39 = vpack.i.bf16 %v8203_v56, %v8232_v48  ;;  %v9640_v46 = vpack.i.bf16 %v8215_v47, %v8244_v5  ;;  %v8252_v31 = vrot.slane %v14598_v37, 6  ;;  %v8219_v20 = vrot.slane %v14595_v9, 5 }
 0x94f   : > { %v8175_v18 = vsel %vm8172_vm14, %v8171_v3, %v8066_v59  ;;  %9631 = vrot.lane.b32.xlu0 %v9630_v12, %s15734_s27  ;;  %v9635_v49 = vpack.i.bf16 %v8211_v26, %v8240_v0  ;;  %v8248_v33 = vrot.slane %v14598_v37, 5  ;;  %v8227_v51 = vrot.slane %v14595_v9, 7  ;;  %vm15801_vm14 = vmmov %vm15794_vm0 }
 0x950   : > { %9626 = vrot.lane.b32.xlu1 %v9625_v39, %s15144_s26  ;;  %v8178_v22 = vsel %vm15796_vm9, %v8175_v18, %v8078_v4  ;;  %v9650_v29 = vpack.i.bf16 %v8223_v2, %v8252_v31  ;;  %v8256_v43 = vrot.slane %v14598_v37, 7  ;;  %vm15798_vm8 = vcmask 97280   ;;  %vm15809_vm9 = vmmov %vm15808_vm15 }
 0x951   : > { %v9645_v41 = vpack.i.bf16 %v8219_v20, %v8248_v33  ;;  %vm15806_vm5 = vcmask 785408   ;;  %v9732_v33 = vld [vmem:[%s14766_s7 + $0x90] sm:$0xff]  }
 0x952   : > { %v8087_v21 = vpop.permute.xlu0 %8086  ;;  %v8096_v27 = vpop.permute.xlu1 %8095  ;;  %v9655_v57 = vpack.i.bf16 %v8227_v51, %v8256_v43  ;;  %vm15807_vm0 = vmmov %vm15806_vm5  ;;  %v9735_v51 = vld [vmem:[%s14768_s9 + $0x8] sm:$0xff]   ;;  %v9736_v43 = vld [vmem:[%s14768_s9 + $0x10] sm:$0xff]  }
 0x953   : > { %v8182_v13 = vsel %vm8179_vm12, %v8178_v22, %v8087_v21  ;;  %9641 = vrot.lane.b32.xlu0 %v9640_v46, %s15723_s18  ;;  %vm15802_vm12 = vcmask 130048  }
 0x954   : > { %9636 = vrot.lane.b32.xlu1 %v9635_v49, %s15709_s4  ;;  %v8185_v63 = vsel %vm3037_vm11, %v8182_v13, %v8096_v27  ;;  %vm15799_vm11 = vmmov %vm15791_vm7  ;;  %vm15804_vm7 = vcmask 261120   ;;  %v9730_v27 = vld [vmem:[%s14766_s7 + $0x80] sm:$0xff]   ;;  %v9731_v49 = vld [vmem:[%s14766_s7 + $0x88] sm:$0xff]  }
 0x955   : > { %vm15805_vm6 = vmmov %vm15804_vm7 }
 0x956   : > { %v8105_v1 = vpop.permute.xlu0 %8104  ;;  %v8117_v54 = vpop.permute.xlu1 %8116 }
 0x957   : > { %v8189_v32 = vsel %vm8186_vm13, %v8185_v63, %v8105_v1  ;;  %9651 = vrot.lane.b32.xlu0 %v9650_v29, %s15666_s17  ;;  %vm15803_vm13 = vmmov %vm15802_vm12  ;;  %v9733_v29 = vld [vmem:[%s14766_s7 + $0x98] sm:$0xff]  }
 0x958   : > { %9646 = vrot.lane.b32.xlu1 %v9645_v41, %s15718_s13  ;;  %v8192_v58 = vsel %vm15798_vm8, %v8189_v32, %v8117_v54  ;;  %vm15811_vm8 = vmmov %vm15805_vm6  ;;  %v9734_v41 = vld [vmem:[%s14768_s9] sm:$0xff]   ;;  %v9737_v32 = vld [vmem:[%s14768_s9 + $0x18] ss:$0 sps:$4 sm:$0x11]  }
 0x95a   : > { %v8126_v35 = vpop.permute.xlu0 %8125  ;;  %v8135_v19 = vpop.permute.xlu1 %8134 }
 0x95b   : > { %v8195_v53 = vsel %vm15799_vm11, %v8192_v58, %v8126_v35 }
 0x95c   : > { %9656 = vrot.lane.b32.xlu1 %v9655_v57, %s15654_s12  ;;  %v8198_v8 = vsel %vm15800_vm4, %v8195_v53, %v8135_v19  ;;  %s377_s12 = scalar_lea.vmem [#allocation3], %s376_s25 }
 0x95d   : > { %s8644_s17 = sshll.u32 %s377_s12, 4  ;;  %s14718_s17 = int_to_ptr.vmem [resolvable:$true] %s8644_s17 }
 0x95e   : > { %v8144_v55 = vpop.permute.xlu0 %8143  ;;  %s9784_s16 = scalar_lea.vmem %s14718_s17, 16 }
 0x95f   : > { %v8201_v34 = vsel %vm15801_vm14, %v8198_v8, %v8144_v55  ;;  %v8333_v55 = vld [vmem:[%s14767_s8] sm:$0x1]  ;;  %p9785_p11 = scmp.ne.s32.totalorder %s14718_s17, %s9784_s16 }
 0x960   : > { %v8275_v36 = vrot.slane %v8201_v34, 1  ;;  %v8279_v30 = vrot.slane %v8201_v34, 2  ;;  %v8283_v44 = vrot.slane %v8201_v34, 3 }
 0x961   : > { %p9786_p12 = pnand %p9785_p11, %p10051_p5 }
 0x962   : > { %8276 = vrot.lane.b32.xlu0 %v8275_v36, %s15144_s26  ;;  %8280 = vrot.lane.b32.xlu1 %v8279_v30, %s15734_s27  ;;  %s9041_s26 = sshll.u32 %s10034_s0, 4  ;;  %s8632_s27 = scalar_lea.sflag [#allocation4], %s376_s25 }
 0x963   : > { %s14716_s18 = scalar_lea.hbm %s14770_s11, %s9041_s26  ;;  %p9787_p13 = pneg %p9786_p12 }
 0x964   : > { %s9949_s0 = smov [#allocation3]  }
 0x965   : > { %s9788_s5 = sshll.u32 %s9949_s0, 4  ;;  %s9789_s5 = int_to_ptr.vmem [resolvable:$false] %s9788_s5 }
 0x966   : > { %8284 = vrot.lane.b32.xlu0 %v8283_v44, %s15709_s4  ;;  %s9790_s15 = scalar_lea.vmem %s9789_s5, 32  ;;  %p9791_p0 = scmp.lt.s32.totalorder %s14718_s17, %s9789_s5 }
 0x967   : > { %p9792_p1 = scmp.lt.s32.totalorder %s9790_s15, %s9784_s16 }
 0x969   : > { %p9793_p2 = por %p9792_p1, %p9791_p0 }
 0x96b   : > { %p9794_p3 = pnand %p9793_p2, %p9787_p13 }
 0x9c1   : > { %v9632_v50 = vpop.permute.xlu0 %9631 }
 0x9c2   : > { %v9627_v15 = vpop.permute.xlu1 %9626  ;;  %v9634_v23 = vunpack.i.h.bf16 %v9632_v50  ;;  %v9633_v52 = vunpack.i.l.bf16 %v9632_v50 }
 0x9c3   : > { %v9629_v42 = vunpack.i.h.bf16 %v9627_v15  ;;  %v9628_v16 = vunpack.i.l.bf16 %v9627_v15 }
 0x9c5   : > { %v8260_v7 = vsel %vm15802_vm12, %v14595_v9, %v9629_v42  ;;  %v8267_v61 = vsel %vm15803_vm13, %v14598_v37, %v9628_v16  ;;  %v9642_v17 = vpop.permute.xlu0 %9641  ;;  %v8546_v16 = vld [vmem:[%s14769_s10] sm:$0x1] }
 0x9c6   : > { %v9637_v38 = vpop.permute.xlu1 %9636  ;;  %v9644_v24 = vunpack.i.h.bf16 %v9642_v17  ;;  %v9643_v62 = vunpack.i.l.bf16 %v9642_v17  ;;  %v8261_v11 = vsel %vm15804_vm7, %v8260_v7, %v9634_v23  ;;  %v8268_v60 = vsel %vm15805_vm6, %v8267_v61, %v9633_v52 }
 0x9c7   : > { %v9639_v25 = vunpack.i.h.bf16 %v9637_v38  ;;  %v9638_v28 = vunpack.i.l.bf16 %v9637_v38 }
 0x9c9   : > { %v8262_v56 = vsel %vm2668_vm10, %v8261_v11, %v9639_v25  ;;  %v8269_v48 = vsel %vm2668_vm10, %v8268_v60, %v9638_v28  ;;  %v9652_v12 = vpop.permute.xlu0 %9651 }
 0x9ca   : > { %v9647_v47 = vpop.permute.xlu1 %9646  ;;  %v9654_v40 = vunpack.i.h.bf16 %v9652_v12  ;;  %v9653_v37 = vunpack.i.l.bf16 %v9652_v12  ;;  %v8263_v14 = vsel %vm2682_vm2, %v8262_v56, %v9644_v24  ;;  %v8270_v3 = vsel %vm2682_vm2, %v8269_v48, %v9643_v62 }
 0x9cb   : > { %v9649_v9 = vunpack.i.h.bf16 %v9647_v47  ;;  %v9648_v5 = vunpack.i.l.bf16 %v9647_v47 }
 0x9cd   : > { %v8264_v59 = vsel %vm2696_vm3, %v8263_v14, %v9649_v9  ;;  %v8271_v4 = vsel %vm2696_vm3, %v8270_v3, %v9648_v5  ;;  %vm15810_vm3 = vmmov %vm15802_vm12 }
 0x9ce   : > { %v9657_v39 = vpop.permute.xlu1 %9656  ;;  %v8265_v18 = vsel %vm15806_vm5, %v8264_v59, %v9654_v40  ;;  %v8272_v46 = vsel %vm15807_vm0, %v8271_v4, %v9653_v37 }
 0x9cf   : > { %v9659_v26 = vunpack.i.h.bf16 %v9657_v39  ;;  %v9658_v0 = vunpack.i.l.bf16 %v9657_v39 }
 0x9d1   : > { %v8266_v2 = vsel %vm15808_vm15, %v8265_v18, %v9659_v26  ;;  %v8273_v31 = vsel %vm15809_vm9, %v8272_v46, %v9658_v0 }
 0x9d2   : > { %v8290_v22 = vpack.c.bf16 %v8266_v2, %v8266_v2  ;;  %v8291_v21 = vpack.c.bf16 %v8273_v31, %v8273_v31 }
 0x9d4   : > { %8489 = vmatprep.mubr.bf16.mxu0 %v8291_v21  ;;  %v8277_v20 = vpop.permute.xlu0 %8276  ;;  %v8281_v10 = vpop.permute.xlu1 %8280 }
 0x9d5   : > { %8490 = vmatmul.mubr.bf16.vlgmr.msra.gmra.mrb[104].mxu0 %v8290_v22  ;;  %v8287_v6 = vsel %vm15810_vm3, %v8201_v34, %v8277_v20 }
 0x9d6   : > { %9109 = vmatpush3.bf16.msra.mxu0 %v9730_v27  ;;  %9116 = vmatprep.mubr.msk.bf16.mxu0 %vm9931_vm1, %v15797_v45  ;;  %v8288_v63 = vsel %vm15811_vm8, %v8287_v6, %v8281_v10 }
 0x9d7   : > { %9110 = vmatprep.subr.bf16.mxu0 %v15797_v45 }
 0x9d8   : > { %v8285_v13 = vpop.permute.xlu0 %8284 }
 0x9d9   : > { %v8289_v1 = vsel %vm2668_vm10, %v8288_v63, %v8285_v13  ;;  %vm8568_vm10 = vcmask 408576  }
 0x9da   : > { %9111 = vmatpush3.bf16.msra.mxu0 %v9731_v49  ;;  %v8292_v54 = vpack.c.bf16 %v8289_v1, %v8289_v1 }
 0x9db   : > { %9112 = vmatprep.subr.bf16.mxu0 %v15797_v45 }
 0x9de   : > { %9113 = vmatpush3.bf16.msra.mxu0 %v9732_v33 }
 0x9df   : > { %9114 = vmatprep.subr.bf16.mxu0 %v15797_v45 }
 0x9e2   : > { %9115 = vmatpush3.bf16.msra.mxu0 %v9733_v29 }
 0x9e3   : > { %9120 = vmatprep.subr.bf16.mxu0 %v15797_v45 }
 0x9e5   : > { %9117 = vmatmul.mubr.msk.bf16.vlgmr.msra.gmra.mrb[108].mxu0 %vm2682_vm2, %v8292_v54  ;;  %vm8572_vm2 = vcmask 1040384  }
 0x9e6   : > { %9128 = vmatprep.mubr.msk.bf16.mxu0 %vm9931_vm1, %v15797_v45  ;;  %9121 = vmatpush3.bf16.msra.mxu0 %v9734_v41  ;;  %v8574_v58 = vsel %vm8572_vm2, %v9737_v32, 0  ;;  %vm8616_vm1 = vcmask 73728  }
 0x9e7   : > { %9122 = vmatprep.subr.bf16.mxu0 %v15797_v45 }
 0x9ea   : > { %9123 = vmatpush3.bf16.msra.mxu0 %v9735_v51 }
 0x9eb   : > { %9124 = vmatprep.subr.bf16.mxu0 %v15797_v45 }
 0x9ee   : > { %9125 = vmatpush3.bf16.msra.mxu0 %v9736_v43 }
 0x9ef   : > { %9126 = vmatprep.subr.bf16.mxu0 %v15797_v45 }
 0x9f2   : > { %9127 = vmatpush3.bf16.msra.mxu0 %v8574_v58 }
 0xaa8   : > { %v9068_v35 = vpop.f32.mrb[104].mxu0 }
 0xaa9   : > { %v9069_v57 = vpop.f32.mrb[105].mxu0 }
 0xaaa   : > { %v9070_v53 = vadd.f32 %v9069_v57, %v9068_v35  ;;  %v9071_v19 = vpop.f32.mrb[106].mxu0 }
 0xaab   : > { %v9072_v8 = vpop.f32.mrb[107].mxu0 }
 0xaac   : > { %v8492_v34 = vadd.f32 %v9070_v53, %v8333_v55 }
 0xab8   : > { %v8531_v36 = vpop.f32.mrb[108].mxu0 }
 0xab9   : > { %v8532_v30 = vadd.f32 %v8531_v36, %v8492_v34  ;;  %v9118_v44 = vpop.f32.mrb[109].mxu0 }
 0xaba   : > { %v8534_v50 = vpop.f32.mrb[110].mxu0 }
 0xabb   : > { %v8537_v15 = vmax.f32 %v8532_v30, 0.0  ;;  %v9119_v42 = vpop.f32.mrb[111].mxu0 }
 0xabd   : > { %v8538_v45 = vpack.c.bf16 %v8537_v15, %v8537_v15 }
 0xabf   : > { %9129 = vmatmul.mubr.msk.bf16.vlgmr.msra.gmra.mrb[112].mxu0 %vm8568_vm10, %v8538_v45 }
 0xb92   : > { %v8610_v23 = vpop.f32.mrb[112].mxu0 }
 0xb93   : > { %v8611_v52 = vadd.f32 %v8610_v23, %v8546_v16  ;;  %v9130_v7 = vpop.f32.mrb[113].mxu0 }
 0xb94   : > { %v8613_v61 = vpop.f32.mrb[114].mxu0 }
 0xb95   : > { %v9131_v17 = vpop.f32.mrb[115].mxu0  ;;  %v8617_v38 = vsel %vm8616_vm1, %v8611_v52, -inf }
 0xb96   : > { %8618 = vmax.xlane.f32.xlu1 %v8617_v38 }
 0xc23   : > { %v8619_v25 = vpop.xlane.xlu1 %8618 }
 0xc24   : > { %v8620_v28 = vsub.f32 %v8611_v52, %v8619_v25 }
 0xc26   : > { %v8621_v24 = vmul.f32 1.442695, %v8620_v28 }
 0xc28   : > { %9778 = vpow2.f32 %v8621_v24 }
 0xc32   : > { %v9779_v62 = vpop.eup %9778 }
 0xc33   : > { %v8623_v11 = vsel %vm8616_vm1, %v9779_v62, 0.0 }
 0xc34   : > { %8624 = vadd.xlane.f32.xlu0 %v8623_v11 }
 0xcc1   : > { %v8625_v60 = vpop.xlane.xlu0 %8624 }
 0xcc2   : > { %9780 = vlog2.f32 %v8625_v60 }
 0xccc   : > { %v9781_v56 = vpop.eup %9780 }
 0xccd   : > { %v8627_v48 = vmul.f32 0.6931472, %v9781_v56 }
 0xccf   : > { %v8628_v12 = vadd.f32 %v8627_v48, %v8619_v25 }
 0xcd1   : > { %v8629_v47 = vsub.f32 %v8611_v52, %v8628_v12 }
 0xcd3   : > { %8630 = vst.msk [vmem:[%s377_s12] sm:$0x1] %vm8616_vm1, %v8629_v47 }
 0xcd4   : > { %9797 = shalt.err (!%p9794_p3)
}
 0xcd5   : > { %s9798_s21 = scalar_lea.hbm %s14716_s18, 16  ;;  %s9802_s24 = scalar_lea.hbm %s14770_s11, 32 }
 0xcd6   : > { %p9799_p4 = scmp.ne.s32.totalorder %s14716_s18, %s9798_s21  ;;  %p9803_p9 = scmp.lt.u32.totalorder %s14716_s18, %s14770_s11 }
 0xcd7   : > { %p9804_p10 = scmp.lt.u32.totalorder %s9802_s24, %s9798_s21  ;;  %p9806_p12 = scmp.lt.u32.totalorder %s9798_s21, %s14716_s18 }
 0xcd8   : > { %p9800_p7 = pnand %p9799_p4, %p10051_p5 }
 0xcd9   : > { %p9805_p11 = por %p9804_p10, %p9803_p9 }
 0xcda   : > { %p9801_p8 = pneg %p9800_p7 }
 0xcdb   : > { %p9807_p13 = por %p9806_p12, %p9805_p11 }
 0xcdd   : > { %p9808_p0 = pnand %p9807_p13, %p9801_p8 }
 0xcdf   : > { %9811 = shalt.err (!%p9808_p0)
}
 0xce0   : > { %9361 = dma.vmem_to_hbm [thread:$0]  (%p10051_p5), %s14718_s17, 16, %s14716_s18, %s8632_s27  }
 0xce1 PF: > { %p9367_p1 = scmp.ge.s32.totalorder %s9846_s22, 2  ;;  %s8656_s30 = sand.u32 1, %s9834_s19  }
 0xce2   : > { %s8657_s1 = scalar_lea.sflag [#allocation4], %s8656_s30 }
 0xce3   : > { %p9364_p2 = pnand %p9367_p1, %p10055_p6 }
 0xce5   : > { %9829 = dma.done.wait (!%p9364_p2), %s8657_s1, 16  }
 0xce6   : > { %9831 = vsyncadd (!%p9364_p2), %s8657_s1, 4294967280  ;;  %s15813_s22 = sld [smem:[#allocation7_spill]]  ;;  %s15814_s23 = sld [smem:[#allocation6_spill]] }
 0xce7   : > { %s15815_s21 = sld [smem:[#allocation8_spill]]  ;;  %s15816_s19 = smov %s9838_s20 }
 0xcec   : > { %p22_p3 = scmp.ge.s32.totalorder %s15813_s22, 4   ;;  %s15817_s20 = smov %s15814_s23 }
 0xcee   :  { %24 = sbr.rel (!%p22_p3) target bundleno = 11 (0xb), region = 126 }
 0xcf5   :  { %8661 = vsyncpa [#allocation4], 1 }
 0xcf6   :  { %8663 = vsyncpa [#allocation4 + $0x1], 1 }

</bundles_post_ra>
